<compile_context>
chip_gen: v5e
topology: v5e:2x2
jax: 0.10.0
libtpu: 0.0.40
codegen_flags: <defaults>
</compile_context>

<pallas_src>
import math
from functools import partial

import jax
import jax.numpy as jnp
from jax.experimental import pallas as pl
from jax.experimental.pallas import tpu as pltpu

LN_EPS = 1e-5                       # torch.nn.LayerNorm default
VMEM_LIMIT = 48 * 1024 * 1024       # fits v7x's 64 MiB physical VMEM with headroom
DEFAULT_ROW_TILE = 1024             # per-step overhead dominates below ~512 rows


# ----------------------------- helpers ------------------------------------- #

def _gelu(x):
    # exact (erf) GELU, matching torch.nn.GELU() default
    # (on v5e a tanh-approx GELU is cheaper if the EUP slot saturates; opt-in only)
    return 0.5 * x * (1.0 + jax.lax.erf(x * (1.0 / math.sqrt(2.0))))


def _softshrink(x, lam):
    return jnp.where(x > lam, x - lam, jnp.where(x < -lam, x + lam, jnp.zeros_like(x)))


def _block_diag(w):
    # w: (nb, bs_in, bs_out) -> dense (nb*bs_in, nb*bs_out) block-diagonal
    nb, bi, bo = w.shape
    eye = jnp.eye(nb, dtype=w.dtype)
    d = eye[:, None, :, None] * w[:, :, None, :]
    return d.reshape(nb * bi, nb * bo)


def _interleave_complex_matrix(wr, wi):
    """Real (2Ci,2Co) matrix M s.t. for re/im-interleaved row vectors x_il,
    x_il @ M == interleave(x_complex @ (wr + i*wi))."""
    ci, co = wr.shape
    m = jnp.zeros((ci, 2, co, 2), dtype=wr.dtype)
    m = m.at[:, 0, :, 0].set(wr)     # re -> re
    m = m.at[:, 0, :, 1].set(wi)     # re -> im
    m = m.at[:, 1, :, 0].set(-wi)    # im -> re
    m = m.at[:, 1, :, 1].set(wr)     # im -> im
    return m.reshape(2 * ci, 2 * co)


def _interleave_vec(vr, vi):
    return jnp.stack([vr, vi], axis=-1).reshape(vr.shape[0] * 2)


def _row_tile(n, target):
    """Tile size near `target` (multiple of 16 for packed dtypes); never collapses
    to a tiny tile.  Grids use pl.cdiv, so non-divisible n just yields a masked
    tail block handled by Pallas."""
    if n <= target:
        return n
    return max(16, (target // 16) * 16)


def scale_shift_mlp_xla(mod, w1, b1, w2, b2, out_features):
    """ScaleShiftMlp (Linear -> GELU -> Linear) in plain XLA — tiny (B x mod_dim)
    matmuls; kernel-launch overhead would dominate any Pallas version."""
    h = jax.nn.gelu(mod @ w1 + b1, approximate=False)
    o = h @ w2 + b2
    return 1.0 + o[:, :out_features], o[:, out_features:]


# ----------------------------- Pallas kernels ------------------------------ #

def _layernorm_kernel(x_ref, gb_ref, o_ref):
    x = x_ref[0]                                   # (TS, C) f32
    gb = gb_ref[...]                               # (2, C): [gamma; beta]
    mu = jnp.mean(x, axis=-1, keepdims=True)
    xc = x - mu
    var = jnp.mean(xc * xc, axis=-1, keepdims=True)
    o_ref[0] = xc * jax.lax.rsqrt(var + LN_EPS) * gb[0:1, :] + gb[1:2, :]


def layernorm(x, gb_pack, row_tile):
    B, S, C = x.shape
    ts = _row_tile(S, row_tile)
    return pl.pallas_call(
        _layernorm_kernel,
        out_shape=jax.ShapeDtypeStruct((B, S, C), jnp.float32),
        grid=(B, pl.cdiv(S, ts)),
        in_specs=[
            pl.BlockSpec((1, ts, C), lambda b, t: (b, t, 0)),
            pl.BlockSpec((2, C), lambda b, t: (0, 0)),
        ],
        out_specs=pl.BlockSpec((1, ts, C), lambda b, t: (b, t, 0)),
        compiler_params=pltpu.CompilerParams(
            dimension_semantics=("parallel", "parallel"),
            vmem_limit_bytes=VMEM_LIMIT),
    )(x, gb_pack)


def _spectral_kernel(x_ref, mod_ref, m1_ref, m2_ref, b2_ref, o_ref, *,
                     lam, ts, wh, lo, hi, kept, apply_mask):
    # x_ref: (1, TS, 2C) bf16, re/im interleaved per channel.
    x = x_ref[0]                                   # (TS, 2C) bf16
    mod = mod_ref[0]                               # (2, 2C): [scale; eff_bias]
    # combined complex matmul #1 (K = 2C) with folded bias+shift:
    #   o1 = (x @ W1 + b1) * scale + shift  ==  (x @ W1) * scale + b_eff
    o1 = jnp.dot(x, m1_ref[...], preferred_element_type=jnp.float32)
    o1 = o1 * mod[0:1, :] + mod[1:2, :]
    o1 = jnp.maximum(o1, 0.0)                      # ReLU
    # combined complex matmul #2, (TS,2C) @ (2C,2C)
    o2 = (jnp.dot(o1.astype(jnp.bfloat16), m2_ref[...],
                  preferred_element_type=jnp.float32) + b2_ref[...])
    o2 = _softshrink(o2, lam)
    if apply_mask:  # hard-thresholding band; skipped when the kept band covers all
        s0 = pl.program_id(1) * ts
        idx = s0 + jax.lax.broadcasted_iota(jnp.int32, (ts, 1), 0)
        h = idx // wh
        w = idx % wh
        keep = (h >= lo) & (h < hi) & (w < kept)
        o2 = jnp.where(keep, o2, 0.0)
    o_ref[0] = o2.astype(o_ref.dtype)              # one interleaved (TS,2C) bf16 store


def spectral_core(x_il, f_mod, m1, m2, b2_il, lam, Wh, lo, hi, kept, apply_mask,
                  row_tile):
    B, S, C2 = x_il.shape
    ts = _row_tile(S, row_tile)
    kern = partial(_spectral_kernel, lam=lam, ts=ts, wh=Wh,
                   lo=lo, hi=hi, kept=kept, apply_mask=apply_mask)
    full2 = lambda b, t: (0, 0)
    per_bt = lambda b, t: (b, t, 0)
    per_b = lambda b, t: (b, 0, 0)
    return pl.pallas_call(
        kern,
        out_shape=jax.ShapeDtypeStruct((B, S, C2), jnp.bfloat16),
        grid=(B, pl.cdiv(S, ts)),
        in_specs=[
            pl.BlockSpec((1, ts, C2), per_bt),     # interleaved spectral input (bf16)
            pl.BlockSpec((1, 2, C2), per_b),       # [scale; eff_bias] per batch (f32)
            pl.BlockSpec((C2, C2), full2),         # interleaved-complex W1 (bf16)
            pl.BlockSpec((C2, C2), full2),         # interleaved-complex W2 (bf16)
            pl.BlockSpec((1, C2), full2),          # interleaved b2 (f32)
        ],
        out_specs=pl.BlockSpec((1, ts, C2), per_bt),
        compiler_params=pltpu.CompilerParams(
            dimension_semantics=("parallel", "parallel"),
            vmem_limit_bytes=VMEM_LIMIT),
    )(x_il, f_mod, m1, m2, b2_il)


def _fused_mlp_kernel(x_ref, xf_ref, vec_ref, mod_ref, w1_ref, w2_ref, o_ref):
    x = x_ref[0]                                   # (TS, C) f32 block input (residual)
    xf = xf_ref[0].astype(jnp.float32)             # (TS, C) irfft2 output (bf16 in HBM)
    v = vec_ref[...]                               # (5, C): g1, b1, g2, b2, fc2_bias
    g1, b1 = v[0:1, :], v[1:2, :]
    g2, b2 = v[2:3, :], v[3:4, :]
    fb2 = v[4:5, :]
    mod = mod_ref[0]                               # (2, L): [mlp scale; eff bias]
    # recompute norm1(x) (the filter's internal "+bias") instead of re-reading it
    mu = jnp.mean(x, axis=-1, keepdims=True)
    xc = x - mu
    var = jnp.mean(xc * xc, axis=-1, keepdims=True)
    xn1 = xc * jax.lax.rsqrt(var + LN_EPS) * g1 + b1
    # filter output (+ bias) and double-skip residual, fused
    x1 = xf + xn1 + x
    # norm2
    mu2 = jnp.mean(x1, axis=-1, keepdims=True)
    xc2 = x1 - mu2
    var2 = jnp.mean(xc2 * xc2, axis=-1, keepdims=True)
    xn2 = xc2 * jax.lax.rsqrt(var2 + LN_EPS) * g2 + b2
    # modulated MLP: fc1 -> scale/eff-bias -> GELU -> fc2 (bf16 MXU, f32 accum)
    h = jnp.dot(xn2.astype(jnp.bfloat16), w1_ref[...],
                preferred_element_type=jnp.float32)
    h = h * mod[0:1, :] + mod[1:2, :]
    h = _gelu(h)
    y = jnp.dot(h.astype(jnp.bfloat16), w2_ref[...],
                preferred_element_type=jnp.float32) + fb2
    o_ref[0] = y + x1                              # final residual add, fused


def fused_mlp_core(x_flat, x_ifft_bf16, vec_pack, m_mod, w1, w2, row_tile):
    B, S, C = x_flat.shape
    L = w1.shape[1]
    ts = _row_tile(S, row_tile)
    full2 = lambda b, t: (0, 0)
    per_bt = lambda b, t: (b, t, 0)
    per_b = lambda b, t: (b, 0, 0)
    return pl.pallas_call(
        _fused_mlp_kernel,
        out_shape=jax.ShapeDtypeStruct((B, S, C), jnp.float32),
        grid=(B, pl.cdiv(S, ts)),
        in_specs=[
            pl.BlockSpec((1, ts, C), per_bt),      # x (residual, f32)
            pl.BlockSpec((1, ts, C), per_bt),      # irfft output (bf16)
            pl.BlockSpec((5, C), full2),           # [g1,b1,g2,b2,fc2_bias] const
            pl.BlockSpec((1, 2, L), per_b),        # [mlp scale; eff bias] per batch
            pl.BlockSpec((C, L), full2),           # fc1 weight (bf16)
            pl.BlockSpec((L, C), full2),           # fc2 weight (bf16)
        ],
        out_specs=pl.BlockSpec((1, ts, C), per_bt),
        compiler_params=pltpu.CompilerParams(
            dimension_semantics=("parallel", "parallel"),
            vmem_limit_bytes=VMEM_LIMIT),
    )(x_flat, x_ifft_bf16, vec_pack, m_mod, w1, w2)


# ----------------------------- Block forward -------------------------------- #

def block_forward(x, mod_embed, params, *, sparsity_threshold=0.01,
                  hard_thresholding_fraction=1.0, row_tile=DEFAULT_ROW_TILE):
    """ModAFNO Block forward (double_skip=True, modulate_filter=True,
    modulate_mlp=True, scale_shift_mode='real')."""
    B, H, W, C = x.shape
    dtype = x.dtype
    Wh = W // 2 + 1
    S = H * Wh
    HW = H * W

    x_flat = x.reshape(B, HW, C).astype(jnp.float32)

    ln1_pack = jnp.stack([params["norm1_g"], params["norm1_b"]], axis=0)      # (2, C)
    vec_pack = jnp.stack([params["norm1_g"], params["norm1_b"],
                          params["norm2_g"], params["norm2_b"],
                          params["mlp_b2"]], axis=0)                          # (5, C)

    # ---- norm1 (Pallas, row-tiled); must be materialized as FFT input ----
    xn1 = layernorm(x_flat, ln1_pack, row_tile)

    # ---- FFT in XLA (no Pallas FFT primitive) ----
    xf_c = jnp.fft.rfft2(xn1.reshape(B, H, W, C), axes=(1, 2), norm="ortho")
    # interleaved re/im per channel (the complex64 element layout), bf16 stream
    x_il = jnp.stack([jnp.real(xf_c), jnp.imag(xf_c)], axis=-1)
    x_il = x_il.reshape(B, S, 2 * C).astype(jnp.bfloat16)

    # ---- filter scale/shift MLP (tiny -> plain XLA), 'real' mode ----
    f_scale, f_shift = scale_shift_mlp_xla(
        mod_embed, params["f_ss_w1"], params["f_ss_b1"],
        params["f_ss_w2"], params["f_ss_b2"], C)
    # same scale/shift on re & im halves -> duplicate into interleaved layout,
    # and fold the filter bias + shift into one per-batch effective bias.
    f_scale_il = jnp.repeat(f_scale, 2, axis=-1)                              # (B, 2C)
    f_shift_il = jnp.repeat(f_shift, 2, axis=-1)
    f_beff = params["b1_il"][None, :] * f_scale_il + f_shift_il
    f_mod = jnp.stack([f_scale_il, f_beff], axis=1).astype(jnp.float32)       # (B, 2, 2C)

    # hard-thresholding band (spec: min(H, W)//2 + 1); mask handled in-kernel and
    # skipped entirely when the kept band covers the whole (H, Wh) plane.
    total_modes = min(H, W) // 2 + 1
    kept_modes = int(total_modes * hard_thresholding_fraction)
    lo = total_modes - kept_modes
    hi = total_modes + kept_modes
    apply_mask = (lo > 0) or (hi < H) or (kept_modes < Wh)

    o2 = spectral_core(x_il, f_mod, params["m1_il"], params["m2_il"],
                       params["b2_il"], sparsity_threshold,
                       Wh, lo, hi, kept_modes, apply_mask, row_tile)  # (B,S,2C) bf16

    o2 = o2.astype(jnp.float32).reshape(B, H, Wh, C, 2)
    of = jax.lax.complex(o2[..., 0], o2[..., 1])
    x_ifft = jnp.fft.irfft2(of, s=(H, W), axes=(1, 2), norm="ortho")
    x_ifft = x_ifft.reshape(B, HW, C).astype(jnp.bfloat16)   # bf16 stream into fused kernel

    # ---- MLP scale/shift (tiny -> plain XLA), fc1 bias + shift folded ----
    L = params["mlp_w1"].shape[1]
    m_scale, m_shift = scale_shift_mlp_xla(
        mod_embed, params["m_ss_w1"], params["m_ss_b1"],
        params["m_ss_w2"], params["m_ss_b2"], L)
    m_beff = params["mlp_b1"][None, :] * m_scale + m_shift
    m_mod = jnp.stack([m_scale, m_beff], axis=1).astype(jnp.float32)          # (B, 2, L)

    # ---- fused: +bias, double-skip, norm2, modulated MLP, final residual ----
    out = fused_mlp_core(x_flat, x_ifft, vec_pack, m_mod,
                         params["mlp_w1"], params["mlp_w2"], row_tile)

    return out.reshape(B, H, W, C).astype(dtype)


# ----------------------------- parameters ----------------------------------- #

def init_params(key, embed_dim, mod_dim, num_blocks, mlp_ratio):
    C = embed_dim
    nb = num_blocks
    bs = C // nb
    L = int(C * mlp_ratio)
    afno_scale = 0.02

    # TODO(synk): dense block-diagonal spectral weights are only sensible for
    # C <= ~128; at production AFNO widths use a per-block (nb, bs, bs) batched
    # contraction instead of densifying.
    assert C <= 128, "dense block-diagonal spectral path guarded to C <= 128"

    keys = jax.random.split(key, 20)
    k = iter(keys)

    def rnd(shape, scale=0.02):
        return (scale * jax.random.normal(next(k), shape)).astype(jnp.float32)

    p = {}
    # LayerNorms
    p["norm1_g"] = 1.0 + rnd((C,))
    p["norm1_b"] = rnd((C,))
    p["norm2_g"] = 1.0 + rnd((C,))
    p["norm2_b"] = rnd((C,))

    # AFNO spectral weights (hidden_size_factor = 1): w1/w2 (2, nb, bs, bs), b (2, nb, bs)
    w1 = afno_scale * jax.random.normal(next(k), (2, nb, bs, bs))
    b1 = afno_scale * jax.random.normal(next(k), (2, nb, bs))
    w2 = afno_scale * jax.random.normal(next(k), (2, nb, bs, bs))
    b2 = afno_scale * jax.random.normal(next(k), (2, nb, bs))

    w1r, w1i = _block_diag(w1[0]), _block_diag(w1[1])
    w2r, w2i = _block_diag(w2[0]), _block_diag(w2[1])
    # interleaved-complex matmul weights: x_il @ M == interleave(x @ (wr + i*wi))
    p["m1_il"] = _interleave_complex_matrix(w1r, w1i).astype(jnp.bfloat16)   # (2C, 2C)
    p["m2_il"] = _interleave_complex_matrix(w2r, w2i).astype(jnp.bfloat16)   # (2C, 2C)
    p["b1_il"] = _interleave_vec(b1[0].reshape(C), b1[1].reshape(C)).astype(jnp.float32)
    p["b2_il"] = _interleave_vec(b2[0].reshape(C), b2[1].reshape(C)) \
        .reshape(1, 2 * C).astype(jnp.float32)

    # Filter ScaleShiftMlp: mod_dim -> 2C -> 2C   (out_features = C, real mode)
    p["f_ss_w1"] = rnd((mod_dim, 2 * C), 0.1)
    p["f_ss_b1"] = rnd((2 * C,), 0.02)
    p["f_ss_w2"] = rnd((2 * C, 2 * C), 0.1)
    p["f_ss_b2"] = rnd((2 * C,), 0.02)

    # MLP ScaleShiftMlp: mod_dim -> 2L -> 2L      (out_features = L)
    p["m_ss_w1"] = rnd((mod_dim, 2 * L), 0.1)
    p["m_ss_b1"] = rnd((2 * L,), 0.02)
    p["m_ss_w2"] = rnd((2 * L, 2 * L), 0.1)
    p["m_ss_b2"] = rnd((2 * L,), 0.02)

    # ModAFNOMlp: fc1 (C -> L), fc2 (L -> C); weights stored bf16 for the MXU
    p["mlp_w1"] = rnd((C, L), 0.1).astype(jnp.bfloat16)
    p["mlp_b1"] = rnd((L,), 0.02)
    p["mlp_w2"] = rnd((L, C), 0.1).astype(jnp.bfloat16)
    p["mlp_b2"] = rnd((C,), 0.02)
    return p


# ----------------------------- main ----------------------------------------- #

if __name__ == "__main__":
    B, H, W = 2, 16, 16
    embed_dim = 32
    mod_dim = 16
    num_blocks = 8
    mlp_ratio = 4.0

    key = jax.random.PRNGKey(0)
    kx, km, kp = jax.random.split(key, 3)
    x = jax.random.normal(kx, (B, H, W, embed_dim), dtype=jnp.float32)
    mod_embed = jax.random.normal(km, (B, mod_dim), dtype=jnp.float32)
    params = init_params(kp, embed_dim, mod_dim, num_blocks, mlp_ratio)

    fwd = jax.jit(partial(block_forward, sparsity_threshold=0.01,
                          hard_thresholding_fraction=1.0,
                          row_tile=DEFAULT_ROW_TILE))
    out = fwd(x, mod_embed, params)
    out = jax.block_until_ready(out)
    assert out.shape == (B, H, W, embed_dim) and bool(jnp.all(jnp.isfinite(out)))
    print("KERNEL_OK")
</pallas_src>

<mosaic_0001>
module attributes {stable_mosaic.version = 11 : i64} {
  func.func @_layernorm_kernel(%arg0: i32, %arg1: i32, %arg2: memref<1x256x32xf32, #tpu.memory_space<vmem>>, %arg3: memref<2x32xf32, #tpu.memory_space<vmem>>, %arg4: memref<1x256x32xf32, #tpu.memory_space<vmem>>) attributes {dimension_semantics = [#tpu.dimension_semantics<parallel>, #tpu.dimension_semantics<parallel>], iteration_bounds = array<i64: 2, 1>, scalar_prefetch = 0 : i64, scratch_operands = 0 : i64, tpu.core_type = #tpu.core_type<tc>, window_params = [{transform_indices = @transform_0, window_bounds = array<i64: 1, 256, 32>}, {pipeline_mode = #tpu.pipeline_mode<synchronous>, transform_indices = @transform_1, window_bounds = array<i64: 2, 32>}, {transform_indices = @transform_2, window_bounds = array<i64: 1, 256, 32>}]} {
    %c0 = arith.constant 0 : index
    %c0_0 = arith.constant 0 : index
    %c0_1 = arith.constant 0 : index
    %0 = vector.load %arg2[%c0, %c0_0, %c0_1] : memref<1x256x32xf32, #tpu.memory_space<vmem>>, vector<1x256x32xf32>
    %1 = vector.shape_cast %0 : vector<1x256x32xf32> to vector<256x32xf32>
    %c0_2 = arith.constant 0 : index
    %c0_3 = arith.constant 0 : index
    %2 = vector.load %arg3[%c0_2, %c0_3] : memref<2x32xf32, #tpu.memory_space<vmem>>, vector<2x32xf32>
    %cst = arith.constant dense<0.000000e+00> : vector<256xf32>
    %3 = vector.multi_reduction <add>, %1, %cst [1] : vector<256x32xf32> to vector<256xf32>
    %4 = vector.shape_cast %3 : vector<256xf32> to vector<256x1xf32>
    %cst_4 = arith.constant 3.200000e+01 : f32
    %5 = vector.broadcast %cst_4 : f32 to vector<256x1xf32>
    %6 = arith.divf %4, %5 : vector<256x1xf32>
    %7 = vector.broadcast %6 : vector<256x1xf32> to vector<256x32xf32>
    %8 = arith.subf %1, %7 : vector<256x32xf32>
    %9 = arith.mulf %8, %8 : vector<256x32xf32>
    %cst_5 = arith.constant dense<0.000000e+00> : vector<256xf32>
    %10 = vector.multi_reduction <add>, %9, %cst_5 [1] : vector<256x32xf32> to vector<256xf32>
    %11 = vector.shape_cast %10 : vector<256xf32> to vector<256x1xf32>
    %cst_6 = arith.constant 3.200000e+01 : f32
    %12 = vector.broadcast %cst_6 : f32 to vector<256x1xf32>
    %13 = arith.divf %11, %12 : vector<256x1xf32>
    %cst_7 = arith.constant 9.99999974E-6 : f32
    %14 = vector.broadcast %cst_7 : f32 to vector<256x1xf32>
    %15 = arith.addf %13, %14 : vector<256x1xf32>
    %16 = math.rsqrt %15 : vector<256x1xf32>
    %17 = vector.broadcast %16 : vector<256x1xf32> to vector<256x32xf32>
    %18 = arith.mulf %8, %17 : vector<256x32xf32>
    %19 = vector.extract_strided_slice %2 {offsets = [0, 0], sizes = [1, 32], strides = [1, 1]} : vector<2x32xf32> to vector<1x32xf32>
    %20 = vector.broadcast %19 : vector<1x32xf32> to vector<256x32xf32>
    %21 = arith.mulf %18, %20 : vector<256x32xf32>
    %22 = vector.extract_strided_slice %2 {offsets = [1, 0], sizes = [1, 32], strides = [1, 1]} : vector<2x32xf32> to vector<1x32xf32>
    %23 = vector.broadcast %22 : vector<1x32xf32> to vector<256x32xf32>
    %24 = arith.addf %21, %23 : vector<256x32xf32>
    %c0_8 = arith.constant 0 : index
    %c0_9 = arith.constant 0 : index
    %c0_10 = arith.constant 0 : index
    %25 = vector.load %arg4[%c0_8, %c0_9, %c0_10] : memref<1x256x32xf32, #tpu.memory_space<vmem>>, vector<1x256x32xf32>
    %26 = vector.shape_cast %25 : vector<1x256x32xf32> to vector<256x32xf32>
    %27 = vector.shape_cast %24 : vector<256x32xf32> to vector<1x256x32xf32>
    tpu.vector_store %arg4[%c0_8, %c0_9, %c0_10], %27 {strides = array<i32>} : memref<1x256x32xf32, #tpu.memory_space<vmem>>, vector<1x256x32xf32>,
    return
  }
  func.func @transform_0(%arg0: i32, %arg1: i32) -> (i32, i32, i32) {
    %c0_i32 = arith.constant 0 : i32
    %c0_i32_0 = arith.constant 0 : i32
    return %arg0, %arg1, %c0_i32 : i32, i32, i32
  }
  func.func @transform_1(%arg0: i32, %arg1: i32) -> (i32, i32) {
    %c0_i32 = arith.constant 0 : i32
    %c0_i32_0 = arith.constant 0 : i32
    %c0_i32_1 = arith.constant 0 : i32
    return %c0_i32, %c0_i32_0 : i32, i32
  }
  func.func @transform_2(%arg0: i32, %arg1: i32) -> (i32, i32, i32) {
    %c0_i32 = arith.constant 0 : i32
    %c0_i32_0 = arith.constant 0 : i32
    return %arg0, %arg1, %c0_i32 : i32, i32, i32
  }
}

module attributes {stable_mosaic.version = 11 : i64} {
  func.func @_spectral_kernel(%arg0: i32, %arg1: i32, %arg2: memref<1x144x64xbf16, #tpu.memory_space<vmem>>, %arg3: memref<1x2x64xf32, #tpu.memory_space<vmem>>, %arg4: memref<64x64xbf16, #tpu.memory_space<vmem>>, %arg5: memref<64x64xbf16, #tpu.memory_space<vmem>>, %arg6: memref<1x64xf32, #tpu.memory_space<vmem>>, %arg7: memref<1x144x64xbf16, #tpu.memory_space<vmem>>) attributes {dimension_semantics = [#tpu.dimension_semantics<parallel>, #tpu.dimension_semantics<parallel>], iteration_bounds = array<i64: 2, 1>, scalar_prefetch = 0 : i64, scratch_operands = 0 : i64, tpu.core_type = #tpu.core_type<tc>, window_params = [{transform_indices = @transform_0, window_bounds = array<i64: 1, 144, 64>}, {transform_indices = @transform_1, window_bounds = array<i64: 1, 2, 64>}, {pipeline_mode = #tpu.pipeline_mode<synchronous>, transform_indices = @transform_2, window_bounds = array<i64: 64, 64>}, {pipeline_mode = #tpu.pipeline_mode<synchronous>, transform_indices = @transform_3, window_bounds = array<i64: 64, 64>}, {pipeline_mode = #tpu.pipeline_mode<synchronous>, transform_indices = @transform_4, window_bounds = array<i64: 1, 64>}, {transform_indices = @transform_5, window_bounds = array<i64: 1, 144, 64>}]} {
    %c0 = arith.constant 0 : index
    %c0_0 = arith.constant 0 : index
    %c0_1 = arith.constant 0 : index
    %0 = vector.load %arg2[%c0, %c0_0, %c0_1] : memref<1x144x64xbf16, #tpu.memory_space<vmem>>, vector<1x144x64xbf16>
    %1 = vector.shape_cast %0 : vector<1x144x64xbf16> to vector<144x64xbf16>
    %c0_2 = arith.constant 0 : index
    %c0_3 = arith.constant 0 : index
    %c0_4 = arith.constant 0 : index
    %2 = vector.load %arg3[%c0_2, %c0_3, %c0_4] : memref<1x2x64xf32, #tpu.memory_space<vmem>>, vector<1x2x64xf32>
    %3 = vector.shape_cast %2 : vector<1x2x64xf32> to vector<2x64xf32>
    %c0_5 = arith.constant 0 : index
    %c0_6 = arith.constant 0 : index
    %4 = vector.load %arg4[%c0_5, %c0_6] : memref<64x64xbf16, #tpu.memory_space<vmem>>, vector<64x64xbf16>
    %cst = arith.constant dense<0.000000e+00> : vector<144x64xf32>
    %5 = tpu.matmul %1, %4, %cst {dimension_numbers = #tpu.dot_dimension_numbers<[1], [0], [0], [1], [0, 0, 1, 1], [], []>} : vector<144x64xbf16>, vector<64x64xbf16>, vector<144x64xf32> -> vector<144x64xf32>
    %6 = vector.extract_strided_slice %3 {offsets = [0, 0], sizes = [1, 64], strides = [1, 1]} : vector<2x64xf32> to vector<1x64xf32>
    %7 = vector.broadcast %6 : vector<1x64xf32> to vector<144x64xf32>
    %8 = arith.mulf %5, %7 : vector<144x64xf32>
    %9 = vector.extract_strided_slice %3 {offsets = [1, 0], sizes = [1, 64], strides = [1, 1]} : vector<2x64xf32> to vector<1x64xf32>
    %10 = vector.broadcast %9 : vector<1x64xf32> to vector<144x64xf32>
    %11 = arith.addf %8, %10 : vector<144x64xf32>
    %cst_7 = arith.constant 0.000000e+00 : f32
    %12 = vector.broadcast %cst_7 : f32 to vector<144x64xf32>
    %13 = arith.maximumf %11, %12 : vector<144x64xf32>
    %14 = arith.truncf %13 : vector<144x64xf32> to vector<144x64xbf16>
    %c0_8 = arith.constant 0 : index
    %c0_9 = arith.constant 0 : index
    %15 = vector.load %arg5[%c0_8, %c0_9] : memref<64x64xbf16, #tpu.memory_space<vmem>>, vector<64x64xbf16>
    %cst_10 = arith.constant dense<0.000000e+00> : vector<144x64xf32>
    %16 = tpu.matmul %14, %15, %cst_10 {dimension_numbers = #tpu.dot_dimension_numbers<[1], [0], [0], [1], [0, 0, 1, 1], [], []>} : vector<144x64xbf16>, vector<64x64xbf16>, vector<144x64xf32> -> vector<144x64xf32>
    %c0_11 = arith.constant 0 : index
    %c0_12 = arith.constant 0 : index
    %17 = vector.load %arg6[%c0_11, %c0_12] : memref<1x64xf32, #tpu.memory_space<vmem>>, vector<1x64xf32>
    %18 = vector.broadcast %17 : vector<1x64xf32> to vector<144x64xf32>
    %19 = arith.addf %16, %18 : vector<144x64xf32>
    %cst_13 = arith.constant 0.00999999977 : f32
    %20 = vector.broadcast %cst_13 : f32 to vector<144x64xf32>
    %21 = arith.cmpf ogt, %19, %20 : vector<144x64xf32>
    %cst_14 = arith.constant 0.00999999977 : f32
    %22 = vector.broadcast %cst_14 : f32 to vector<144x64xf32>
    %23 = arith.subf %19, %22 : vector<144x64xf32>
    %cst_15 = arith.constant -0.00999999977 : f32
    %24 = vector.broadcast %cst_15 : f32 to vector<144x64xf32>
    %25 = arith.cmpf olt, %19, %24 : vector<144x64xf32>
    %cst_16 = arith.constant 0.00999999977 : f32
    %26 = vector.broadcast %cst_16 : f32 to vector<144x64xf32>
    %27 = arith.addf %19, %26 : vector<144x64xf32>
    %cst_17 = arith.constant 0.000000e+00 : f32
    %28 = vector.broadcast %cst_17 : f32 to vector<144x64xf32>
    %29 = arith.select %25, %27, %28 : vector<144x64xi1>, vector<144x64xf32>
    %30 = arith.select %21, %23, %29 : vector<144x64xi1>, vector<144x64xf32>
    %31 = arith.truncf %30 : vector<144x64xf32> to vector<144x64xbf16>
    %c0_18 = arith.constant 0 : index
    %c0_19 = arith.constant 0 : index
    %c0_20 = arith.constant 0 : index
    %32 = vector.load %arg7[%c0_18, %c0_19, %c0_20] : memref<1x144x64xbf16, #tpu.memory_space<vmem>>, vector<1x144x64xbf16>
    %33 = vector.shape_cast %32 : vector<1x144x64xbf16> to vector<144x64xbf16>
    %34 = vector.shape_cast %31 : vector<144x64xbf16> to vector<1x144x64xbf16>
    tpu.vector_store %arg7[%c0_18, %c0_19, %c0_20], %34 {strides = array<i32>} : memref<1x144x64xbf16, #tpu.memory_space<vmem>>, vector<1x144x64xbf16>,
    return
  }
  func.func @transform_0(%arg0: i32, %arg1: i32) -> (i32, i32, i32) {
    %c0_i32 = arith.constant 0 : i32
    %c0_i32_0 = arith.constant 0 : i32
    return %arg0, %arg1, %c0_i32 : i32, i32, i32
  }
  func.func @transform_1(%arg0: i32, %arg1: i32) -> (i32, i32, i32) {
    %c0_i32 = arith.constant 0 : i32
    %c0_i32_0 = arith.constant 0 : i32
    %c0_i32_1 = arith.constant 0 : i32
    return %arg0, %c0_i32, %c0_i32_0 : i32, i32, i32
  }
  func.func @transform_2(%arg0: i32, %arg1: i32) -> (i32, i32) {
    %c0_i32 = arith.constant 0 : i32
    %c0_i32_0 = arith.constant 0 : i32
    %c0_i32_1 = arith.constant 0 : i32
    return %c0_i32, %c0_i32_0 : i32, i32
  }
  func.func @transform_3(%arg0: i32, %arg1: i32) -> (i32, i32) {
    %c0_i32 = arith.constant 0 : i32
    %c0_i32_0 = arith.constant 0 : i32
    %c0_i32_1 = arith.constant 0 : i32
    return %c0_i32, %c0_i32_0 : i32, i32
  }
  func.func @transform_4(%arg0: i32, %arg1: i32) -> (i32, i32) {
    %c0_i32 = arith.constant 0 : i32
    %c0_i32_0 = arith.constant 0 : i32
    %c0_i32_1 = arith.constant 0 : i32
    return %c0_i32, %c0_i32_0 : i32, i32
  }
  func.func @transform_5(%arg0: i32, %arg1: i32) -> (i32, i32, i32) {
    %c0_i32 = arith.constant 0 : i32
    %c0_i32_0 = arith.constant 0 : i32
    return %arg0, %arg1, %c0_i32 : i32, i32, i32
  }
}

module attributes {stable_mosaic.version = 11 : i64} {
  func.func @_fused_mlp_kernel(%arg0: i32, %arg1: i32, %arg2: memref<1x256x32xf32, #tpu.memory_space<vmem>>, %arg3: memref<1x256x32xbf16, #tpu.memory_space<vmem>>, %arg4: memref<5x32xf32, #tpu.memory_space<vmem>>, %arg5: memref<1x2x128xf32, #tpu.memory_space<vmem>>, %arg6: memref<32x128xbf16, #tpu.memory_space<vmem>>, %arg7: memref<128x32xbf16, #tpu.memory_space<vmem>>, %arg8: memref<1x256x32xf32, #tpu.memory_space<vmem>>) attributes {dimension_semantics = [#tpu.dimension_semantics<parallel>, #tpu.dimension_semantics<parallel>], iteration_bounds = array<i64: 2, 1>, scalar_prefetch = 0 : i64, scratch_operands = 0 : i64, tpu.core_type = #tpu.core_type<tc>, window_params = [{transform_indices = @transform_0, window_bounds = array<i64: 1, 256, 32>}, {transform_indices = @transform_1, window_bounds = array<i64: 1, 256, 32>}, {pipeline_mode = #tpu.pipeline_mode<synchronous>, transform_indices = @transform_2, window_bounds = array<i64: 5, 32>}, {transform_indices = @transform_3, window_bounds = array<i64: 1, 2, 128>}, {pipeline_mode = #tpu.pipeline_mode<synchronous>, transform_indices = @transform_4, window_bounds = array<i64: 32, 128>}, {pipeline_mode = #tpu.pipeline_mode<synchronous>, transform_indices = @transform_5, window_bounds = array<i64: 128, 32>}, {transform_indices = @transform_6, window_bounds = array<i64: 1, 256, 32>}]} {
    %c0 = arith.constant 0 : index
    %c0_0 = arith.constant 0 : index
    %c0_1 = arith.constant 0 : index
    %0 = vector.load %arg2[%c0, %c0_0, %c0_1] : memref<1x256x32xf32, #tpu.memory_space<vmem>>, vector<1x256x32xf32>
    %1 = vector.shape_cast %0 : vector<1x256x32xf32> to vector<256x32xf32>
    %c0_2 = arith.constant 0 : index
    %c0_3 = arith.constant 0 : index
    %c0_4 = arith.constant 0 : index
    %2 = vector.load %arg3[%c0_2, %c0_3, %c0_4] : memref<1x256x32xbf16, #tpu.memory_space<vmem>>, vector<1x256x32xbf16>
    %3 = vector.shape_cast %2 : vector<1x256x32xbf16> to vector<256x32xbf16>
    %4 = arith.extf %3 : vector<256x32xbf16> to vector<256x32xf32>
    %c0_5 = arith.constant 0 : index
    %c0_6 = arith.constant 0 : index
    %5 = vector.load %arg4[%c0_5, %c0_6] : memref<5x32xf32, #tpu.memory_space<vmem>>, vector<5x32xf32>
    %6 = vector.extract_strided_slice %5 {offsets = [0, 0], sizes = [1, 32], strides = [1, 1]} : vector<5x32xf32> to vector<1x32xf32>
    %7 = vector.extract_strided_slice %5 {offsets = [1, 0], sizes = [1, 32], strides = [1, 1]} : vector<5x32xf32> to vector<1x32xf32>
    %8 = vector.extract_strided_slice %5 {offsets = [2, 0], sizes = [1, 32], strides = [1, 1]} : vector<5x32xf32> to vector<1x32xf32>
    %9 = vector.extract_strided_slice %5 {offsets = [3, 0], sizes = [1, 32], strides = [1, 1]} : vector<5x32xf32> to vector<1x32xf32>
    %10 = vector.extract_strided_slice %5 {offsets = [4, 0], sizes = [1, 32], strides = [1, 1]} : vector<5x32xf32> to vector<1x32xf32>
    %c0_7 = arith.constant 0 : index
    %c0_8 = arith.constant 0 : index
    %c0_9 = arith.constant 0 : index
    %11 = vector.load %arg5[%c0_7, %c0_8, %c0_9] : memref<1x2x128xf32, #tpu.memory_space<vmem>>, vector<1x2x128xf32>
    %12 = vector.shape_cast %11 : vector<1x2x128xf32> to vector<2x128xf32>
    %cst = arith.constant dense<0.000000e+00> : vector<256xf32>
    %13 = vector.multi_reduction <add>, %1, %cst [1] : vector<256x32xf32> to vector<256xf32>
    %14 = vector.shape_cast %13 : vector<256xf32> to vector<256x1xf32>
    %cst_10 = arith.constant 3.200000e+01 : f32
    %15 = vector.broadcast %cst_10 : f32 to vector<256x1xf32>
    %16 = arith.divf %14, %15 : vector<256x1xf32>
    %17 = vector.broadcast %16 : vector<256x1xf32> to vector<256x32xf32>
    %18 = arith.subf %1, %17 : vector<256x32xf32>
    %19 = arith.mulf %18, %18 : vector<256x32xf32>
    %cst_11 = arith.constant dense<0.000000e+00> : vector<256xf32>
    %20 = vector.multi_reduction <add>, %19, %cst_11 [1] : vector<256x32xf32> to vector<256xf32>
    %21 = vector.shape_cast %20 : vector<256xf32> to vector<256x1xf32>
    %cst_12 = arith.constant 3.200000e+01 : f32
    %22 = vector.broadcast %cst_12 : f32 to vector<256x1xf32>
    %23 = arith.divf %21, %22 : vector<256x1xf32>
    %cst_13 = arith.constant 9.99999974E-6 : f32
    %24 = vector.broadcast %cst_13 : f32 to vector<256x1xf32>
    %25 = arith.addf %23, %24 : vector<256x1xf32>
    %26 = math.rsqrt %25 : vector<256x1xf32>
    %27 = vector.broadcast %26 : vector<256x1xf32> to vector<256x32xf32>
    %28 = arith.mulf %18, %27 : vector<256x32xf32>
    %29 = vector.broadcast %6 : vector<1x32xf32> to vector<256x32xf32>
    %30 = arith.mulf %28, %29 : vector<256x32xf32>
    %31 = vector.broadcast %7 : vector<1x32xf32> to vector<256x32xf32>
    %32 = arith.addf %30, %31 : vector<256x32xf32>
    %33 = arith.addf %4, %32 : vector<256x32xf32>
    %34 = arith.addf %33, %1 : vector<256x32xf32>
    %cst_14 = arith.constant dense<0.000000e+00> : vector<256xf32>
    %35 = vector.multi_reduction <add>, %34, %cst_14 [1] : vector<256x32xf32> to vector<256xf32>
    %36 = vector.shape_cast %35 : vector<256xf32> to vector<256x1xf32>
    %cst_15 = arith.constant 3.200000e+01 : f32
    %37 = vector.broadcast %cst_15 : f32 to vector<256x1xf32>
    %38 = arith.divf %36, %37 : vector<256x1xf32>
    %39 = vector.broadcast %38 : vector<256x1xf32> to vector<256x32xf32>
    %40 = arith.subf %34, %39 : vector<256x32xf32>
    %41 = arith.mulf %40, %40 : vector<256x32xf32>
    %cst_16 = arith.constant dense<0.000000e+00> : vector<256xf32>
    %42 = vector.multi_reduction <add>, %41, %cst_16 [1] : vector<256x32xf32> to vector<256xf32>
    %43 = vector.shape_cast %42 : vector<256xf32> to vector<256x1xf32>
    %cst_17 = arith.constant 3.200000e+01 : f32
    %44 = vector.broadcast %cst_17 : f32 to vector<256x1xf32>
    %45 = arith.divf %43, %44 : vector<256x1xf32>
    %cst_18 = arith.constant 9.99999974E-6 : f32
    %46 = vector.broadcast %cst_18 : f32 to vector<256x1xf32>
    %47 = arith.addf %45, %46 : vector<256x1xf32>
    %48 = math.rsqrt %47 : vector<256x1xf32>
    %49 = vector.broadcast %48 : vector<256x1xf32> to vector<256x32xf32>
    %50 = arith.mulf %40, %49 : vector<256x32xf32>
    %51 = vector.broadcast %8 : vector<1x32xf32> to vector<256x32xf32>
    %52 = arith.mulf %50, %51 : vector<256x32xf32>
    %53 = vector.broadcast %9 : vector<1x32xf32> to vector<256x32xf32>
    %54 = arith.addf %52, %53 : vector<256x32xf32>
    %55 = arith.truncf %54 : vector<256x32xf32> to vector<256x32xbf16>
    %c0_19 = arith.constant 0 : index
    %c0_20 = arith.constant 0 : index
    %56 = vector.load %arg6[%c0_19, %c0_20] : memref<32x128xbf16, #tpu.memory_space<vmem>>, vector<32x128xbf16>
    %cst_21 = arith.constant dense<0.000000e+00> : vector<256x128xf32>
    %57 = tpu.matmul %55, %56, %cst_21 {dimension_numbers = #tpu.dot_dimension_numbers<[1], [0], [0], [1], [0, 0, 1, 1], [], []>} : vector<256x32xbf16>, vector<32x128xbf16>, vector<256x128xf32> -> vector<256x128xf32>
    %58 = vector.extract_strided_slice %12 {offsets = [0, 0], sizes = [1, 128], strides = [1, 1]} : vector<2x128xf32> to vector<1x128xf32>
    %59 = vector.broadcast %58 : vector<1x128xf32> to vector<256x128xf32>
    %60 = arith.mulf %57, %59 : vector<256x128xf32>
    %61 = vector.extract_strided_slice %12 {offsets = [1, 0], sizes = [1, 128], strides = [1, 1]} : vector<2x128xf32> to vector<1x128xf32>
    %62 = vector.broadcast %61 : vector<1x128xf32> to vector<256x128xf32>
    %63 = arith.addf %60, %62 : vector<256x128xf32>
    %cst_22 = arith.constant 5.000000e-01 : f32
    %64 = vector.broadcast %cst_22 : f32 to vector<256x128xf32>
    %65 = arith.mulf %64, %63 : vector<256x128xf32>
    %cst_23 = arith.constant 0.707106769 : f32
    %66 = vector.broadcast %cst_23 : f32 to vector<256x128xf32>
    %67 = arith.mulf %63, %66 : vector<256x128xf32>
    %68 = math.erf %67 : vector<256x128xf32>
    %cst_24 = arith.constant 1.000000e+00 : f32
    %69 = vector.broadcast %cst_24 : f32 to vector<256x128xf32>
    %70 = arith.addf %69, %68 : vector<256x128xf32>
    %71 = arith.mulf %65, %70 : vector<256x128xf32>
    %72 = arith.truncf %71 : vector<256x128xf32> to vector<256x128xbf16>
    %c0_25 = arith.constant 0 : index
    %c0_26 = arith.constant 0 : index
    %73 = vector.load %arg7[%c0_25, %c0_26] : memref<128x32xbf16, #tpu.memory_space<vmem>>, vector<128x32xbf16>
    %cst_27 = arith.constant dense<0.000000e+00> : vector<256x32xf32>
    %74 = tpu.matmul %72, %73, %cst_27 {dimension_numbers = #tpu.dot_dimension_numbers<[1], [0], [0], [1], [0, 0, 1, 1], [], []>} : vector<256x128xbf16>, vector<128x32xbf16>, vector<256x32xf32> -> vector<256x32xf32>
    %75 = vector.broadcast %10 : vector<1x32xf32> to vector<256x32xf32>
    %76 = arith.addf %74, %75 : vector<256x32xf32>
    %77 = arith.addf %76, %34 : vector<256x32xf32>
    %c0_28 = arith.constant 0 : index
    %c0_29 = arith.constant 0 : index
    %c0_30 = arith.constant 0 : index
    %78 = vector.load %arg8[%c0_28, %c0_29, %c0_30] : memref<1x256x32xf32, #tpu.memory_space<vmem>>, vector<1x256x32xf32>
    %79 = vector.shape_cast %78 : vector<1x256x32xf32> to vector<256x32xf32>
    %80 = vector.shape_cast %77 : vector<256x32xf32> to vector<1x256x32xf32>
    tpu.vector_store %arg8[%c0_28, %c0_29, %c0_30], %80 {strides = array<i32>} : memref<1x256x32xf32, #tpu.memory_space<vmem>>, vector<1x256x32xf32>,
    return
  }
  func.func @transform_0(%arg0: i32, %arg1: i32) -> (i32, i32, i32) {
    %c0_i32 = arith.constant 0 : i32
    %c0_i32_0 = arith.constant 0 : i32
    return %arg0, %arg1, %c0_i32 : i32, i32, i32
  }
  func.func @transform_1(%arg0: i32, %arg1: i32) -> (i32, i32, i32) {
    %c0_i32 = arith.constant 0 : i32
    %c0_i32_0 = arith.constant 0 : i32
    return %arg0, %arg1, %c0_i32 : i32, i32, i32
  }
  func.func @transform_2(%arg0: i32, %arg1: i32) -> (i32, i32) {
    %c0_i32 = arith.constant 0 : i32
    %c0_i32_0 = arith.constant 0 : i32
    %c0_i32_1 = arith.constant 0 : i32
    return %c0_i32, %c0_i32_0 : i32, i32
  }
  func.func @transform_3(%arg0: i32, %arg1: i32) -> (i32, i32, i32) {
    %c0_i32 = arith.constant 0 : i32
    %c0_i32_0 = arith.constant 0 : i32
    %c0_i32_1 = arith.constant 0 : i32
    return %arg0, %c0_i32, %c0_i32_0 : i32, i32, i32
  }
  func.func @transform_4(%arg0: i32, %arg1: i32) -> (i32, i32) {
    %c0_i32 = arith.constant 0 : i32
    %c0_i32_0 = arith.constant 0 : i32
    %c0_i32_1 = arith.constant 0 : i32
    return %c0_i32, %c0_i32_0 : i32, i32
  }
  func.func @transform_5(%arg0: i32, %arg1: i32) -> (i32, i32) {
    %c0_i32 = arith.constant 0 : i32
    %c0_i32_0 = arith.constant 0 : i32
    %c0_i32_1 = arith.constant 0 : i32
    return %c0_i32, %c0_i32_0 : i32, i32
  }
  func.func @transform_6(%arg0: i32, %arg1: i32) -> (i32, i32, i32) {
    %c0_i32 = arith.constant 0 : i32
    %c0_i32_0 = arith.constant 0 : i32
    return %arg0, %arg1, %c0_i32 : i32, i32, i32
  }
}

</mosaic_0001>

<bundles_post_ra>
// kernel: block_forward.3
= control target key start
LH: loop header
LB: loop body
LE: loop exit
PB: predicated region body
PF: predicated region fallthrough
CT: control target
= control target key end

     0   :  { %s1257_s9 = smov 0   ;;  %s1259_s10 = smov 0   ;;  %s2347_s0 = inlined_call_operand.vmem [shape: f32[2,256,32], index: 0, kind: input, shape index: {}]   ;;  %s2348_s1 = inlined_call_operand.vmem [shape: f32[2,32], index: 1, kind: input, shape index: {}]   ;;  %s2349_s2 = inlined_call_operand.vmem [shape: f32[2,256,32], index: 2, kind: output, shape index: {}]  }
   0x1   :  { %s1261_s11 = smov 0  }
   0x2 LB: > { %s24_s12 = sadd.s32 1, %s1235_s10  ;;  %p1117_p0 = scmp.ge.s32.totalorder %s1239_s11, 1  ;;  %s1239_s11 = sphi %s1261_s11, %s12_s11   ;;  %s1235_s10 = sphi %s1259_s10, %s2371_s10   ;;  %s1231_s9 = sphi %s1257_s9, %s2370_s9  }
   0x3   : > { %p26_p1 = scmp.ge.s32.totalorder %s24_s12, 2  ;;  %p133_p2 = scmp.lt.s32.totalorder %s1239_s11, 3 }
   0x5   : > { %s2373_s12 = smov (%p26_p1, %s24_s12), 0  ;;  %p134_p3 = pnand %p1117_p0, %p133_p2 }
   0x6   : > { %p164_p4 = scmp.lt.s32.totalorder (!%p134_p3), %s1231_s9, 1 }
   0x7   : > { %137 = sbr.rel (%p134_p3) target bundleno = 389 (0x185), region = 28 }
   0xc   : > { %s2375_s9 = smov (!%p164_p4, %s1231_s9), 1  ;;  %vm216_vm0 = vcmask 261120  }
   0xd   : > { %s1124_s13 = sshll.u32 %s2375_s9, 8 }
   0xe   : > { %s1283_s16 = scalar_lea.vmem %s2347_s0, %s1124_s13  ;;  %s1734_s21 = scalar_lea.vmem %s2349_s2, %s1124_s13 }
   0xf   : > { %v1286_v0 = vld [vmem:[%s1283_s16 + $0x20] sm:$0xff]  ;;  %v1289_v1 = vld [vmem:[%s1283_s16 + $0x10] sm:$0xff]  ;;  %v1301_v6 = vld [vmem:[%s1283_s16 + $0x28] sm:$0xff] }
  0x10   : > { %v1292_v2 = vld [vmem:[%s1283_s16] sm:$0xff]  ;;  %v229_v3 = vsel %vm216_vm0, %v1286_v0, 0.0  ;;  %v223_v4 = vsel %vm216_vm0, %v1289_v1, 0.0  ;;  %v1304_v7 = vld [vmem:[%s1283_s16 + $0x18] sm:$0xff]  ;;  %v1307_v8 = vld [vmem:[%s1283_s16 + $0x8] sm:$0xff]  ;;  %v232_v9 = vsel %vm216_vm0, %v1301_v6, 0.0 }
  0x11   : > { %v217_v5 = vsel %vm216_vm0, %v1292_v2, 0.0  ;;  %230 = vadd.xlane.f32.xlu2 %v229_v3  ;;  %224 = vadd.xlane.f32.xlu1 %v223_v4  ;;  %v226_v10 = vsel %vm216_vm0, %v1304_v7, 0.0  ;;  %v220_v11 = vsel %vm216_vm0, %v1307_v8, 0.0  ;;  %v1316_v12 = vld [vmem:[%s1283_s16 + $0x40] sm:$0xff]  ;;  %v1319_v13 = vld [vmem:[%s1283_s16 + $0x38] sm:$0xff]  ;;  %v1322_v14 = vld [vmem:[%s1283_s16 + $0x30] sm:$0xff] }
  0x12   : > { %218 = vadd.xlane.f32.xlu0 %v217_v5  ;;  %v241_v15 = vsel %vm216_vm0, %v1316_v12, 0.0  ;;  %v238_v16 = vsel %vm216_vm0, %v1319_v13, 0.0  ;;  %v235_v17 = vsel %vm216_vm0, %v1322_v14, 0.0  ;;  %v1331_v18 = vld [vmem:[%s1283_s16 + $0x58] sm:$0xff]  ;;  %v1334_v19 = vld [vmem:[%s1283_s16 + $0x50] sm:$0xff]  ;;  %v1337_v20 = vld [vmem:[%s1283_s16 + $0x48] sm:$0xff] }
  0x13   : > { %v250_v21 = vsel %vm216_vm0, %v1331_v18, 0.0  ;;  %v247_v22 = vsel %vm216_vm0, %v1334_v19, 0.0  ;;  %v244_v23 = vsel %vm216_vm0, %v1337_v20, 0.0  ;;  %v1346_v24 = vld [vmem:[%s1283_s16 + $0x70] sm:$0xff]  ;;  %v1349_v25 = vld [vmem:[%s1283_s16 + $0x68] sm:$0xff]  ;;  %v1352_v26 = vld [vmem:[%s1283_s16 + $0x60] sm:$0xff] }
  0x14   : > { %v259_v27 = vsel %vm216_vm0, %v1346_v24, 0.0  ;;  %v256_v28 = vsel %vm216_vm0, %v1349_v25, 0.0  ;;  %v253_v29 = vsel %vm216_vm0, %v1352_v26, 0.0  ;;  %v1361_v30 = vld [vmem:[%s1283_s16 + $0x88] sm:$0xff]  ;;  %v1364_v31 = vld [vmem:[%s1283_s16 + $0x80] sm:$0xff]  ;;  %v1367_v32 = vld [vmem:[%s1283_s16 + $0x78] sm:$0xff] }
  0x15   : > { %v268_v33 = vsel %vm216_vm0, %v1361_v30, 0.0  ;;  %v265_v34 = vsel %vm216_vm0, %v1364_v31, 0.0  ;;  %v262_v35 = vsel %vm216_vm0, %v1367_v32, 0.0  ;;  %v1376_v36 = vld [vmem:[%s1283_s16 + $0xa0] sm:$0xff]  ;;  %v1379_v37 = vld [vmem:[%s1283_s16 + $0x98] sm:$0xff]  ;;  %v1382_v38 = vld [vmem:[%s1283_s16 + $0x90] sm:$0xff] }
  0x16   : > { %v277_v39 = vsel %vm216_vm0, %v1376_v36, 0.0  ;;  %v274_v40 = vsel %vm216_vm0, %v1379_v37, 0.0  ;;  %v271_v41 = vsel %vm216_vm0, %v1382_v38, 0.0  ;;  %v1391_v42 = vld [vmem:[%s1283_s16 + $0xb8] sm:$0xff]  ;;  %v1394_v43 = vld [vmem:[%s1283_s16 + $0xb0] sm:$0xff]  ;;  %v1397_v44 = vld [vmem:[%s1283_s16 + $0xa8] sm:$0xff] }
  0x17   : > { %v286_v45 = vsel %vm216_vm0, %v1391_v42, 0.0  ;;  %v283_v46 = vsel %vm216_vm0, %v1394_v43, 0.0  ;;  %v280_v47 = vsel %vm216_vm0, %v1397_v44, 0.0  ;;  %v1406_v48 = vld [vmem:[%s1283_s16 + $0xd0] sm:$0xff]  ;;  %v1409_v49 = vld [vmem:[%s1283_s16 + $0xc8] sm:$0xff]  ;;  %v1412_v50 = vld [vmem:[%s1283_s16 + $0xc0] sm:$0xff] }
  0x18   : > { %v295_v51 = vsel %vm216_vm0, %v1406_v48, 0.0  ;;  %v292_v52 = vsel %vm216_vm0, %v1409_v49, 0.0  ;;  %v289_v53 = vsel %vm216_vm0, %v1412_v50, 0.0  ;;  %v1421_v54 = vld [vmem:[%s1283_s16 + $0xe8] sm:$0xff]  ;;  %v1424_v55 = vld [vmem:[%s1283_s16 + $0xe0] sm:$0xff]  ;;  %v1427_v56 = vld [vmem:[%s1283_s16 + $0xd8] sm:$0xff] }
  0x19   : > { %233 = vadd.xlane.f32.xlu2 %v232_v9  ;;  %227 = vadd.xlane.f32.xlu1 %v226_v10  ;;  %v304_v57 = vsel %vm216_vm0, %v1421_v54, 0.0  ;;  %v301_v58 = vsel %vm216_vm0, %v1424_v55, 0.0  ;;  %v298_v59 = vsel %vm216_vm0, %v1427_v56, 0.0  ;;  %v1436_v60 = vld [vmem:[%s1283_s16 + $0xf8] sm:$0xff]  ;;  %v1439_v61 = vld [vmem:[%s1283_s16 + $0xf0] sm:$0xff]  ;;  %v1241_v3 = vmov 32.0  }
  0x1a   : > { %221 = vadd.xlane.f32.xlu0 %v220_v11  ;;  %v310_v62 = vsel %vm216_vm0, %v1436_v60, 0.0  ;;  %v307_v63 = vsel %vm216_vm0, %v1439_v61, 0.0  ;;  %1151 = vrcp.f32 %v1241_v3 }
  0x20   : > { %v1152_v4 = vpop.eup %1151 }
  0x21   : > { %242 = vadd.xlane.f32.xlu2 %v241_v15  ;;  %239 = vadd.xlane.f32.xlu1 %v238_v16  ;;  %v314_v5 = vmul.f32 32.0, %v1152_v4  ;;  %vm318_vm1 = vweird.f32 %v1152_v4 }
  0x22   : > { %236 = vadd.xlane.f32.xlu0 %v235_v17 }
  0x23   : > { %v315_v9 = vsub.f32 1.0, %v314_v5 }
  0x25   : > { %v316_v10 = vmul.f32 %v1152_v4, %v315_v9 }
  0x27   : > { %v317_v11 = vadd.f32 %v1152_v4, %v316_v10 }
  0x29   : > { %251 = vadd.xlane.f32.xlu2 %v250_v21  ;;  %248 = vadd.xlane.f32.xlu1 %v247_v22  ;;  %v1445_v15 = vsel %vm318_vm1, %v1152_v4, %v317_v11 }
  0x2a   : > { %245 = vadd.xlane.f32.xlu0 %v244_v23 }
  0x31   : > { %260 = vadd.xlane.f32.xlu2 %v259_v27  ;;  %257 = vadd.xlane.f32.xlu1 %v256_v28 }
  0x32   : > { %254 = vadd.xlane.f32.xlu0 %v253_v29 }
  0x39   : > { %269 = vadd.xlane.f32.xlu2 %v268_v33  ;;  %266 = vadd.xlane.f32.xlu1 %v265_v34 }
  0x3a   : > { %263 = vadd.xlane.f32.xlu0 %v262_v35 }
  0x41   : > { %278 = vadd.xlane.f32.xlu2 %v277_v39  ;;  %275 = vadd.xlane.f32.xlu1 %v274_v40 }
  0x42   : > { %272 = vadd.xlane.f32.xlu0 %v271_v41 }
  0x49   : > { %287 = vadd.xlane.f32.xlu2 %v286_v45  ;;  %284 = vadd.xlane.f32.xlu1 %v283_v46 }
  0x4a   : > { %281 = vadd.xlane.f32.xlu0 %v280_v47 }
  0x51   : > { %296 = vadd.xlane.f32.xlu2 %v295_v51  ;;  %293 = vadd.xlane.f32.xlu1 %v292_v52 }
  0x52   : > { %290 = vadd.xlane.f32.xlu0 %v289_v53 }
  0x59   : > { %305 = vadd.xlane.f32.xlu2 %v304_v57  ;;  %302 = vadd.xlane.f32.xlu1 %v301_v58 }
  0x5a   : > { %299 = vadd.xlane.f32.xlu0 %v298_v59 }
  0x61   : > { %311 = vadd.xlane.f32.xlu1 %v310_v62 }
  0x62   : > { %308 = vadd.xlane.f32.xlu0 %v307_v63 }
  0x84   : > { %v231_v16 = vpop.xlane.xlu2 %230  ;;  %v225_v17 = vpop.xlane.xlu1 %224 }
  0x85   : > { %v322_v21 = vmul.f32 %v1445_v15, %v225_v17  ;;  %v219_v22 = vpop.xlane.xlu0 %218  ;;  %v324_v45 = vmul.f32 %v1445_v15, %v231_v16 }
  0x86   : > { %v320_v23 = vmul.f32 %v1445_v15, %v219_v22 }
  0x87   : > { %v1450_v27 = vsub.f32 %v1289_v1, %v322_v21  ;;  %v1479_v58 = vsub.f32 %v1286_v0, %v324_v45 }
  0x88   : > { %v1453_v28 = vsub.f32 %v1292_v2, %v320_v23 }
  0x89   : > { %v386_v29 = vmul.f32 %v1450_v27, %v1450_v27  ;;  %v388_v9 = vmul.f32 %v1479_v58, %v1479_v58 }
  0x8a   : > { %v384_v33 = vmul.f32 %v1453_v28, %v1453_v28 }
  0x8b   : > { %v422_v34 = vsel %vm216_vm0, %v386_v29, 0.0  ;;  %v428_v21 = vsel %vm216_vm0, %v388_v9, 0.0 }
  0x8c   : > { %v234_v35 = vpop.xlane.xlu2 %233  ;;  %423 = vadd.xlane.f32.xlu1 %v422_v34  ;;  %v228_v39 = vpop.xlane.xlu1 %227  ;;  %v416_v40 = vsel %vm216_vm0, %v384_v33, 0.0 }
  0x8d   : > { %v325_v41 = vmul.f32 %v1445_v15, %v234_v35  ;;  %v323_v1 = vmul.f32 %v1445_v15, %v228_v39  ;;  %417 = vadd.xlane.f32.xlu2 %v416_v40  ;;  %v222_v2 = vpop.xlane.xlu0 %221 }
  0x8e   : > { %v321_v46 = vmul.f32 %v1445_v15, %v222_v2 }
  0x8f   : > { %v1466_v47 = vsub.f32 %v1301_v6, %v325_v41  ;;  %v1469_v51 = vsub.f32 %v1304_v7, %v323_v1 }
  0x90   : > { %v1472_v52 = vsub.f32 %v1307_v8, %v321_v46 }
  0x91   : > { %v389_v53 = vmul.f32 %v1466_v47, %v1466_v47  ;;  %v387_v57 = vmul.f32 %v1469_v51, %v1469_v51 }
  0x92   : > { %v385_v59 = vmul.f32 %v1472_v52, %v1472_v52 }
  0x93   : > { %v431_v6 = vsel %vm216_vm0, %v389_v53, 0.0  ;;  %v425_v7 = vsel %vm216_vm0, %v387_v57, 0.0 }
  0x94   : > { %v243_v62 = vpop.xlane.xlu2 %242  ;;  %432 = vadd.xlane.f32.xlu1 %v431_v6  ;;  %v419_v8 = vsel %vm216_vm0, %v385_v59, 0.0  ;;  %v240_v63 = vpop.xlane.xlu1 %239 }
  0x95   : > { %v328_v3 = vmul.f32 %v1445_v15, %v243_v62  ;;  %426 = vadd.xlane.f32.xlu2 %v425_v7  ;;  %420 = vadd.xlane.f32.xlu0 %v419_v8  ;;  %v237_v4 = vpop.xlane.xlu0 %236  ;;  %v327_v5 = vmul.f32 %v1445_v15, %v240_v63 }
  0x96   : > { %v326_v0 = vmul.f32 %v1445_v15, %v237_v4 }
  0x97   : > { %v1492_v10 = vsub.f32 %v1316_v12, %v328_v3  ;;  %v1500_v17 = vsub.f32 %v1319_v13, %v327_v5 }
  0x98   : > { %v1495_v11 = vsub.f32 %v1322_v14, %v326_v0 }
  0x99   : > { %v392_v16 = vmul.f32 %v1492_v10, %v1492_v10  ;;  %v391_v39 = vmul.f32 %v1500_v17, %v1500_v17 }
  0x9a   : > { %v390_v22 = vmul.f32 %v1495_v11, %v1495_v11 }
  0x9b   : > { %v440_v23 = vsel %vm216_vm0, %v392_v16, 0.0  ;;  %v437_v45 = vsel %vm216_vm0, %v391_v39, 0.0 }
  0x9c   : > { %v252_v29 = vpop.xlane.xlu2 %251  ;;  %441 = vadd.xlane.f32.xlu1 %v440_v23  ;;  %v434_v12 = vsel %vm216_vm0, %v390_v22, 0.0  ;;  %v249_v33 = vpop.xlane.xlu1 %248 }
  0x9d   : > { %v331_v14 = vmul.f32 %v1445_v15, %v252_v29  ;;  %429 = vadd.xlane.f32.xlu0 %v428_v21  ;;  %435 = vadd.xlane.f32.xlu2 %v434_v12  ;;  %v246_v34 = vpop.xlane.xlu0 %245  ;;  %v330_v35 = vmul.f32 %v1445_v15, %v249_v33 }
  0x9e   : > { %v329_v13 = vmul.f32 %v1445_v15, %v246_v34 }
  0x9f   : > { %v1513_v40 = vsub.f32 %v1331_v18, %v331_v14  ;;  %v1521_v2 = vsub.f32 %v1334_v19, %v330_v35 }
  0xa0   : > { %v1516_v41 = vsub.f32 %v1337_v20, %v329_v13 }
  0xa1   : > { %v395_v1 = vmul.f32 %v1513_v40, %v1513_v40  ;;  %v394_v62 = vmul.f32 %v1521_v2, %v1521_v2 }
  0xa2   : > { %v393_v46 = vmul.f32 %v1516_v41, %v1516_v41 }
  0xa3   : > { %v449_v53 = vsel %vm216_vm0, %v395_v1, 0.0  ;;  %v446_v0 = vsel %vm216_vm0, %v394_v62, 0.0 }
  0xa4   : > { %v261_v57 = vpop.xlane.xlu2 %260  ;;  %450 = vadd.xlane.f32.xlu1 %v449_v53  ;;  %v443_v18 = vsel %vm216_vm0, %v393_v46, 0.0  ;;  %v258_v59 = vpop.xlane.xlu1 %257 }
  0xa5   : > { %v334_v20 = vmul.f32 %v1445_v15, %v261_v57  ;;  %438 = vadd.xlane.f32.xlu0 %v437_v45  ;;  %444 = vadd.xlane.f32.xlu2 %v443_v18  ;;  %v255_v6 = vpop.xlane.xlu0 %254  ;;  %v333_v7 = vmul.f32 %v1445_v15, %v258_v59 }
  0xa6   : > { %v332_v19 = vmul.f32 %v1445_v15, %v255_v6 }
  0xa7   : > { %v1534_v8 = vsub.f32 %v1346_v24, %v334_v20  ;;  %v1542_v4 = vsub.f32 %v1349_v25, %v333_v7 }
  0xa8   : > { %v1537_v63 = vsub.f32 %v1352_v26, %v332_v19 }
  0xa9   : > { %v398_v3 = vmul.f32 %v1534_v8, %v1534_v8  ;;  %v397_v29 = vmul.f32 %v1542_v4, %v1542_v4 }
  0xaa   : > { %v396_v5 = vmul.f32 %v1537_v63, %v1537_v63 }
  0xab   : > { %v458_v9 = vsel %vm216_vm0, %v398_v3, 0.0  ;;  %v455_v13 = vsel %vm216_vm0, %v397_v29, 0.0 }
  0xac   : > { %v270_v16 = vpop.xlane.xlu2 %269  ;;  %459 = vadd.xlane.f32.xlu1 %v458_v9  ;;  %v452_v24 = vsel %vm216_vm0, %v396_v5, 0.0  ;;  %v267_v21 = vpop.xlane.xlu1 %266 }
  0xad   : > { %v337_v26 = vmul.f32 %v1445_v15, %v270_v16  ;;  %447 = vadd.xlane.f32.xlu0 %v446_v0  ;;  %453 = vadd.xlane.f32.xlu2 %v452_v24  ;;  %v264_v22 = vpop.xlane.xlu0 %263  ;;  %v336_v23 = vmul.f32 %v1445_v15, %v267_v21 }
  0xae   : > { %v335_v25 = vmul.f32 %v1445_v15, %v264_v22 }
  0xaf   : > { %v1555_v12 = vsub.f32 %v1361_v30, %v337_v26  ;;  %v1563_v34 = vsub.f32 %v1364_v31, %v336_v23 }
  0xb0   : > { %v1558_v33 = vsub.f32 %v1367_v32, %v335_v25 }
  0xb1   : > { %v401_v14 = vmul.f32 %v1555_v12, %v1555_v12  ;;  %v400_v57 = vmul.f32 %v1563_v34, %v1563_v34 }
  0xb2   : > { %v399_v35 = vmul.f32 %v1558_v33, %v1558_v33 }
  0xb3   : > { %v467_v39 = vsel %vm216_vm0, %v401_v14, 0.0  ;;  %v464_v19 = vsel %vm216_vm0, %v400_v57, 0.0 }
  0xb4   : > { %v279_v1 = vpop.xlane.xlu2 %278  ;;  %468 = vadd.xlane.f32.xlu1 %v467_v39  ;;  %v461_v30 = vsel %vm216_vm0, %v399_v35, 0.0  ;;  %v276_v45 = vpop.xlane.xlu1 %275 }
  0xb5   : > { %v340_v32 = vmul.f32 %v1445_v15, %v279_v1  ;;  %456 = vadd.xlane.f32.xlu0 %v455_v13  ;;  %462 = vadd.xlane.f32.xlu2 %v461_v30  ;;  %v273_v46 = vpop.xlane.xlu0 %272  ;;  %v339_v53 = vmul.f32 %v1445_v15, %v276_v45 }
  0xb6   : > { %v338_v31 = vmul.f32 %v1445_v15, %v273_v46 }
  0xb7   : > { %v1576_v18 = vsub.f32 %v1376_v36, %v340_v32  ;;  %v1584_v6 = vsub.f32 %v1379_v37, %v339_v53 }
  0xb8   : > { %v1579_v59 = vsub.f32 %v1382_v38, %v338_v31 }
  0xb9   : > { %v404_v20 = vmul.f32 %v1576_v18, %v1576_v18  ;;  %v403_v16 = vmul.f32 %v1584_v6, %v1584_v6 }
  0xba   : > { %v402_v7 = vmul.f32 %v1579_v59, %v1579_v59 }
  0xbb   : > { %v476_v62 = vsel %vm216_vm0, %v404_v20, 0.0  ;;  %v473_v25 = vsel %vm216_vm0, %v403_v16, 0.0 }
  0xbc   : > { %v288_v3 = vpop.xlane.xlu2 %287  ;;  %477 = vadd.xlane.f32.xlu1 %v476_v62  ;;  %v470_v36 = vsel %vm216_vm0, %v402_v7, 0.0  ;;  %v285_v0 = vpop.xlane.xlu1 %284 }
  0xbd   : > { %v343_v38 = vmul.f32 %v1445_v15, %v288_v3  ;;  %465 = vadd.xlane.f32.xlu0 %v464_v19  ;;  %471 = vadd.xlane.f32.xlu2 %v470_v36  ;;  %v282_v5 = vpop.xlane.xlu0 %281  ;;  %v342_v9 = vmul.f32 %v1445_v15, %v285_v0 }
  0xbe   : > { %v341_v37 = vmul.f32 %v1445_v15, %v282_v5 }
  0xbf   : > { %v1597_v24 = vsub.f32 %v1391_v42, %v343_v38  ;;  %v1605_v22 = vsub.f32 %v1394_v43, %v342_v9 }
  0xc0   : > { %v1600_v21 = vsub.f32 %v1397_v44, %v341_v37 }
  0xc1   : > { %v407_v26 = vmul.f32 %v1597_v24, %v1597_v24  ;;  %v406_v1 = vmul.f32 %v1605_v22, %v1605_v22 }
  0xc2   : > { %v405_v23 = vmul.f32 %v1600_v21, %v1600_v21 }
  0xc3   : > { %v485_v29 = vsel %vm216_vm0, %v407_v26, 0.0  ;;  %v482_v31 = vsel %vm216_vm0, %v406_v1, 0.0 }
  0xc4   : > { %v297_v14 = vpop.xlane.xlu2 %296  ;;  %486 = vadd.xlane.f32.xlu1 %v485_v29  ;;  %v479_v42 = vsel %vm216_vm0, %v405_v23, 0.0  ;;  %v294_v13 = vpop.xlane.xlu1 %293 }
  0xc5   : > { %v346_v44 = vmul.f32 %v1445_v15, %v297_v14  ;;  %474 = vadd.xlane.f32.xlu0 %v473_v25  ;;  %480 = vadd.xlane.f32.xlu2 %v479_v42  ;;  %v291_v35 = vpop.xlane.xlu0 %290  ;;  %v345_v39 = vmul.f32 %v1445_v15, %v294_v13 }
  0xc6   : > { %v344_v43 = vmul.f32 %v1445_v15, %v291_v35 }
  0xc7   : > { %v1618_v30 = vsub.f32 %v1406_v48, %v346_v44  ;;  %v1626_v46 = vsub.f32 %v1409_v49, %v345_v39 }
  0xc8   : > { %v1621_v45 = vsub.f32 %v1412_v50, %v344_v43 }
  0xc9   : > { %v410_v32 = vmul.f32 %v1618_v30, %v1618_v30  ;;  %v409_v3 = vmul.f32 %v1626_v46, %v1626_v46 }
  0xca   : > { %v408_v53 = vmul.f32 %v1621_v45, %v1621_v45 }
  0xcb   : > { %v494_v57 = vsel %vm216_vm0, %v410_v32, 0.0  ;;  %v491_v37 = vsel %vm216_vm0, %v409_v3, 0.0 }
  0xcc   : > { %v306_v20 = vpop.xlane.xlu2 %305  ;;  %495 = vadd.xlane.f32.xlu1 %v494_v57  ;;  %v488_v48 = vsel %vm216_vm0, %v408_v53, 0.0  ;;  %v303_v19 = vpop.xlane.xlu1 %302 }
  0xcd   : > { %v349_v50 = vmul.f32 %v1445_v15, %v306_v20  ;;  %483 = vadd.xlane.f32.xlu0 %v482_v31  ;;  %489 = vadd.xlane.f32.xlu2 %v488_v48  ;;  %v300_v7 = vpop.xlane.xlu0 %299  ;;  %v348_v62 = vmul.f32 %v1445_v15, %v303_v19 }
  0xce   : > { %v347_v49 = vmul.f32 %v1445_v15, %v300_v7 }
  0xcf   : > { %v1639_v36 = vsub.f32 %v1421_v54, %v349_v50  ;;  %v1647_v5 = vsub.f32 %v1424_v55, %v348_v62 }
  0xd0   : > { %v1642_v0 = vsub.f32 %v1427_v56, %v347_v49 }
  0xd1   : > { %v413_v38 = vmul.f32 %v1639_v36, %v1639_v36  ;;  %v412_v55 = vmul.f32 %v1647_v5, %v1647_v5 }
  0xd2   : > { %v411_v9 = vmul.f32 %v1642_v0, %v1642_v0 }
  0xd3   : > { %v503_v16 = vsel %vm216_vm0, %v413_v38, 0.0  ;;  %v500_v42 = vsel %vm216_vm0, %v412_v55, 0.0 }
  0xd4   : > { %504 = vadd.xlane.f32.xlu1 %v503_v16  ;;  %v497_v54 = vsel %vm216_vm0, %v411_v9, 0.0  ;;  %v312_v26 = vpop.xlane.xlu1 %311  ;;  %v215_v9 = vld [vmem:[%s2348_s1] sm:$0x3] }
  0xd5   : > { %492 = vadd.xlane.f32.xlu0 %v491_v37  ;;  %498 = vadd.xlane.f32.xlu2 %v497_v54  ;;  %v309_v56 = vpop.xlane.xlu0 %308  ;;  %v351_v23 = vmul.f32 %v1445_v15, %v312_v26  ;;  %v1690_v55 = vperm.slane %v215_v9, 1 }
  0xd6   : > { %v350_v25 = vmul.f32 %v1445_v15, %v309_v56  ;;  %v1688_v56 = vperm.slane %v215_v9, 0 }
  0xd7   : > { %v1662_v14 = vsub.f32 %v1436_v60, %v351_v23 }
  0xd8   : > { %v1659_v29 = vsub.f32 %v1439_v61, %v350_v25 }
  0xd9   : > { %v415_v35 = vmul.f32 %v1662_v14, %v1662_v14 }
  0xda   : > { %v414_v13 = vmul.f32 %v1659_v29, %v1659_v29 }
  0xdb   : > { %v509_v43 = vsel %vm216_vm0, %v415_v35, 0.0 }
  0xdc   : > { %v506_v44 = vsel %vm216_vm0, %v414_v13, 0.0 }
  0xdd   : > { %501 = vadd.xlane.f32.xlu0 %v500_v42  ;;  %507 = vadd.xlane.f32.xlu2 %v506_v44 }
  0xe5   : > { %510 = vadd.xlane.f32.xlu0 %v509_v43 }
  0xff   : > { %v424_v61 = vpop.xlane.xlu1 %423 }
 0x100   : > { %v514_v39 = vmul.f32 %v424_v61, %v1445_v15  ;;  %v418_v60 = vpop.xlane.xlu2 %417 }
 0x101   : > { %v512_v1 = vmul.f32 %v418_v60, %v1445_v15 }
 0x102   : > { %v546_v32 = vadd.f32 1e-05, %v514_v39 }
 0x103   : > { %v544_v31 = vadd.f32 1e-05, %v512_v1 }
 0x104   : > { %1153 = vrsqrt.f32 %v546_v32  ;;  %vm602_vm2 = vweird.f32 %v546_v32 }
 0x105   : > { %1155 = vrsqrt.f32 %v544_v31  ;;  %vm582_vm4 = vweird.f32 %v544_v31 }
 0x107   : > { %v433_v53 = vpop.xlane.xlu1 %432 }
 0x108   : > { %v517_v57 = vmul.f32 %v433_v53, %v1445_v15  ;;  %v427_v20 = vpop.xlane.xlu2 %426  ;;  %v421_v48 = vpop.xlane.xlu0 %420 }
 0x109   : > { %v515_v19 = vmul.f32 %v427_v20, %v1445_v15  ;;  %v513_v50 = vmul.f32 %v421_v48, %v1445_v15 }
 0x10a   : > { %v1154_v7 = vpop.eup %1153  ;;  %v1676_v49 = vadd.f32 1e-05, %v517_v57 }
 0x10b   : > { %v1156_v62 = vpop.eup %1155  ;;  %v597_v3 = vmul.f32 %v1154_v7, %v546_v32  ;;  %v1678_v38 = vadd.f32 1e-05, %v515_v19  ;;  %v1680_v37 = vadd.f32 1e-05, %v513_v50  ;;  %vm603_vm3 = vweird.f32 %v1154_v7 }
 0x10c   : > { %v577_v16 = vmul.f32 %v1156_v62, %v544_v31  ;;  %1157 = vrsqrt.f32 %v1676_v49  ;;  %vm583_vm5 = vweird.f32 %v1156_v62  ;;  %vm632_vm6 = vweird.f32 %v1676_v49  ;;  %vm604_vm8 = vmor %vm602_vm2, %vm603_vm3 }
 0x10d   : > { %v598_v54 = vmul.f32 %v1154_v7, %v597_v3  ;;  %1159 = vrsqrt.f32 %v1678_v38  ;;  %vm612_vm7 = vweird.f32 %v1678_v38  ;;  %vm584_vm9 = vmor %vm582_vm4, %vm583_vm5  ;;  %vm592_vm10 = vweird.f32 %v1680_v37 }
 0x10e   : > { %v578_v26 = vmul.f32 %v1156_v62, %v577_v16  ;;  %1161 = vrsqrt.f32 %v1680_v37 }
 0x10f   : > { %v599_v25 = vmul.f32 0.5, %v598_v54  ;;  %v442_v23 = vpop.xlane.xlu1 %441 }
 0x110   : > { %v579_v42 = vmul.f32 0.5, %v578_v26  ;;  %v520_v13 = vmul.f32 %v442_v23, %v1445_v15  ;;  %v436_v44 = vpop.xlane.xlu2 %435  ;;  %v430_v35 = vpop.xlane.xlu0 %429 }
 0x111   : > { %v600_v43 = vsub.f32 1.5, %v599_v25  ;;  %v518_v61 = vmul.f32 %v436_v44, %v1445_v15  ;;  %v516_v9 = vmul.f32 %v430_v35, %v1445_v15 }
 0x112   : > { %v1694_v39 = vpop.eup %1157  ;;  %v580_v60 = vsub.f32 1.5, %v579_v42  ;;  %v1697_v1 = vadd.f32 1e-05, %v520_v13 }
 0x113   : > { %v1699_v53 = vpop.eup %1159  ;;  %v601_v57 = vmul.f32 %v1154_v7, %v600_v43  ;;  %v627_v20 = vmul.f32 %v1694_v39, %v1676_v49  ;;  %v1704_v48 = vadd.f32 1e-05, %v518_v61  ;;  %vm633_vm11 = vweird.f32 %v1694_v39 }
 0x114   : > { %v1706_v19 = vpop.eup %1161  ;;  %v581_v50 = vmul.f32 %v1156_v62, %v580_v60  ;;  %v607_v3 = vmul.f32 %v1699_v53, %v1678_v38  ;;  %1163 = vrsqrt.f32 %v1697_v1  ;;  %vm613_vm12 = vweird.f32 %v1699_v53  ;;  %vm1745_vm13 = vmor %vm632_vm6, %vm633_vm11 }
 0x115   : > { %v605_v16 = vsel %vm604_vm8, %v1154_v7, %v601_v57  ;;  %v628_v54 = vmul.f32 %v1694_v39, %v627_v20  ;;  %v587_v26 = vmul.f32 %v1706_v19, %v1680_v37  ;;  %1165 = vrsqrt.f32 %v1704_v48  ;;  %vm614_vm2 = vmor %vm612_vm7, %vm613_vm12 }
 0x116   : > { %v898_v32 = vmul.f32 %v605_v16, %v1450_v27  ;;  %v585_v25 = vsel %vm584_vm9, %v1156_v62, %v581_v50  ;;  %v608_v23 = vmul.f32 %v1699_v53, %v607_v3  ;;  %v1727_v43 = vadd.f32 1e-05, %v516_v9 }
 0x117   : > { %v896_v7 = vmul.f32 %v585_v25, %v1453_v28  ;;  %v629_v42 = vmul.f32 0.5, %v628_v54  ;;  %v588_v31 = vmul.f32 %v1706_v19, %v587_v26  ;;  %v451_v13 = vpop.xlane.xlu1 %450  ;;  %vm593_vm14 = vweird.f32 %v1706_v19 }
 0x118   : > { %v931_v44 = vmul.f32 %v1688_v56, %v898_v32  ;;  %v609_v35 = vmul.f32 0.5, %v608_v23  ;;  %v445_v27 = vpop.xlane.xlu2 %444  ;;  %v439_v62 = vpop.xlane.xlu0 %438  ;;  %v523_v57 = vmul.f32 %v451_v13, %v1445_v15  ;;  %1167 = vrsqrt.f32 %v1727_v43  ;;  %vm594_vm3 = vmor %vm592_vm10, %vm593_vm14 }
 0x119   : > { %v929_v28 = vmul.f32 %v1688_v56, %v896_v7  ;;  %v630_v61 = vsub.f32 1.5, %v629_v42  ;;  %v589_v60 = vmul.f32 0.5, %v588_v31  ;;  %vm662_vm15 = vweird.f32 %v1697_v1 }
 0x11a   : > { %v1738_v20 = vpop.eup %1163  ;;  %v964_v50 = vadd.f32 %v1690_v55, %v931_v44  ;;  %v610_v9 = vsub.f32 1.5, %v609_v35  ;;  %v1760_v25 = vadd.f32 1e-05, %v523_v57  ;;  %v521_v13 = vmul.f32 %v445_v27, %v1445_v15 }
 0x11b   : > { %v962_v16 = vadd.f32 %v1690_v55, %v929_v28  ;;  %v631_v54 = vmul.f32 %v1694_v39, %v630_v61  ;;  %v590_v26 = vsub.f32 1.5, %v589_v60  ;;  %v657_v32 = vmul.f32 %v1738_v20, %v1697_v1  ;;  %v1762_v23 = vpop.eup %1165 }
 0x11c   : > { %996 = vst.msk [vmem:[%s1734_s21 + $0x10] sm:$0xff] %vm216_vm0, %v964_v50  ;;  %v611_v49 = vmul.f32 %v1699_v53, %v610_v9  ;;  %vm663_vm1 = vweird.f32 %v1738_v20  ;;  %v519_v38 = vmul.f32 %v439_v62, %v1445_v15  ;;  %1169 = vrsqrt.f32 %v1760_v25 }
 0x11d   : > { %994 = vst.msk [vmem:[%s1734_s21] sm:$0xff] %vm216_vm0, %v962_v16  ;;  %v635_v7 = vsel %vm1745_vm13, %v1694_v39, %v631_v54  ;;  %v591_v42 = vmul.f32 %v1706_v19, %v590_v26  ;;  %v658_v31 = vmul.f32 %v1738_v20, %v657_v32  ;;  %v637_v39 = vmul.f32 %v1762_v23, %v1704_v48  ;;  %vm1803_vm5 = vmor %vm662_vm15, %vm663_vm1 }
 0x11e   : > { %v901_v44 = vmul.f32 %v635_v7, %v1466_v47  ;;  %v615_v35 = vsel %vm614_vm2, %v1699_v53, %v611_v49  ;;  %v1788_v27 = vpop.eup %1167  ;;  %vm642_vm4 = vweird.f32 %v1704_v48  ;;  %v1807_v26 = vadd.f32 1e-05, %v521_v13 }
 0x11f   : > { %v899_v28 = vmul.f32 %v615_v35, %v1469_v51  ;;  %v595_v61 = vsel %vm594_vm3, %v1706_v19, %v591_v42  ;;  %v659_v60 = vmul.f32 0.5, %v658_v31  ;;  %v460_v47 = vpop.xlane.xlu1 %459  ;;  %v638_v57 = vmul.f32 %v1762_v23, %v637_v39 }
 0x120   : > { %v934_v53 = vmul.f32 %v1688_v56, %v901_v44  ;;  %v897_v37 = vmul.f32 %v595_v61, %v1472_v52  ;;  %v454_v50 = vpop.xlane.xlu2 %453  ;;  %v448_v3 = vpop.xlane.xlu0 %447  ;;  %v617_v19 = vmul.f32 %v1788_v27, %v1727_v43  ;;  %v1812_v42 = vadd.f32 1e-05, %v519_v38 }
 0x121   : > { %v932_v62 = vmul.f32 %v1688_v56, %v899_v28  ;;  %v660_v51 = vsub.f32 1.5, %v659_v60  ;;  %v639_v54 = vmul.f32 0.5, %v638_v57  ;;  %vm643_vm6 = vweird.f32 %v1762_v23 }
 0x122   : > { %v967_v9 = vadd.f32 %v1690_v55, %v934_v53  ;;  %v930_v16 = vmul.f32 %v1688_v56, %v897_v37  ;;  %v618_v7 = vmul.f32 %v1788_v27, %v617_v19  ;;  %1171 = vrsqrt.f32 %v1807_v26  ;;  %v1819_v13 = vpop.eup %1169  ;;  %vm644_vm9 = vmor %vm642_vm4, %vm643_vm6 }
 0x123   : > { %v965_v32 = vadd.f32 %v1690_v55, %v932_v62  ;;  %v661_v49 = vmul.f32 %v1738_v20, %v660_v51  ;;  %v640_v31 = vsub.f32 1.5, %v639_v54  ;;  %vm622_vm7 = vweird.f32 %v1727_v43 }
 0x124   : > { %999 = vst.msk [vmem:[%s1734_s21 + $0x28] sm:$0xff] %vm216_vm0, %v967_v9  ;;  %v963_v1 = vadd.f32 %v1690_v55, %v930_v16  ;;  %v619_v35 = vmul.f32 0.5, %v618_v7  ;;  %1173 = vrsqrt.f32 %v1812_v42  ;;  %vm623_vm8 = vweird.f32 %v1788_v27 }
 0x125   : > { %997 = vst.msk [vmem:[%s1734_s21 + $0x18] sm:$0xff] %vm216_vm0, %v965_v32  ;;  %v665_v44 = vsel %vm1803_vm5, %v1738_v20, %v661_v49  ;;  %v641_v38 = vmul.f32 %v1762_v23, %v640_v31  ;;  %v687_v28 = vmul.f32 %v1819_v13, %v1760_v25  ;;  %v526_v61 = vmul.f32 %v460_v47, %v1445_v15  ;;  %vm624_vm11 = vmor %vm622_vm7, %vm623_vm8 }
 0x126   : > { %995 = vst.msk [vmem:[%s1734_s21 + $0x8] sm:$0xff] %vm216_vm0, %v963_v1  ;;  %v904_v39 = vmul.f32 %v665_v44, %v1492_v10  ;;  %v620_v20 = vsub.f32 1.5, %v619_v35  ;;  %v524_v60 = vmul.f32 %v454_v50, %v1445_v15  ;;  %v522_v53 = vmul.f32 %v448_v3, %v1445_v15 }
 0x127   : > { %v469_v37 = vpop.xlane.xlu1 %468  ;;  %v645_v57 = vsel %vm644_vm9, %v1762_v23, %v641_v38  ;;  %v688_v62 = vmul.f32 %v1819_v13, %v687_v28  ;;  %vm692_vm10 = vweird.f32 %v1760_v25  ;;  %v1847_v50 = vadd.f32 1e-05, %v526_v61 }
 0x128   : > { %v937_v10 = vmul.f32 %v1688_v56, %v904_v39  ;;  %v529_v51 = vmul.f32 %v469_v37, %v1445_v15  ;;  %v463_v19 = vpop.xlane.xlu2 %462  ;;  %v457_v9 = vpop.xlane.xlu0 %456  ;;  %v902_v48 = vmul.f32 %v645_v57, %v1495_v11  ;;  %v621_v47 = vmul.f32 %v1788_v27, %v620_v20 }
 0x129   : > { %v1849_v3 = vpop.eup %1171  ;;  %v689_v23 = vmul.f32 0.5, %v688_v62  ;;  %vm693_vm12 = vweird.f32 %v1819_v13  ;;  %v1857_v52 = vadd.f32 1e-05, %v524_v60  ;;  %v1865_v7 = vadd.f32 1e-05, %v522_v53 }
 0x12a   : > { %v970_v16 = vadd.f32 %v1690_v55, %v937_v10  ;;  %v1859_v11 = vpop.eup %1173  ;;  %v935_v54 = vmul.f32 %v1688_v56, %v902_v48  ;;  %v625_v32 = vsel %vm624_vm11, %v1788_v27, %v621_v47  ;;  %v667_v49 = vmul.f32 %v1849_v3, %v1807_v26  ;;  %vm1877_vm13 = vmor %vm692_vm10, %vm693_vm12 }
 0x12b   : > { %v900_v43 = vmul.f32 %v625_v32, %v1479_v58  ;;  %v690_v1 = vsub.f32 1.5, %v689_v23  ;;  %v647_v31 = vmul.f32 %v1859_v11, %v1812_v42  ;;  %v1872_v44 = vadd.f32 1e-05, %v529_v51 }
 0x12c   : > { %1002 = vst.msk [vmem:[%s1734_s21 + $0x40] sm:$0xff] %vm216_vm0, %v970_v16  ;;  %v968_v35 = vadd.f32 %v1690_v55, %v935_v54  ;;  %v668_v39 = vmul.f32 %v1849_v3, %v667_v49  ;;  %vm672_vm14 = vweird.f32 %v1807_v26  ;;  %1175 = vrsqrt.f32 %v1847_v50 }
 0x12d   : > { %v933_v58 = vmul.f32 %v1688_v56, %v900_v43  ;;  %v691_v38 = vmul.f32 %v1819_v13, %v690_v1  ;;  %v648_v28 = vmul.f32 %v1859_v11, %v647_v31  ;;  %1177 = vrsqrt.f32 %v1857_v52 }
 0x12e   : > { %1000 = vst.msk [vmem:[%s1734_s21 + $0x30] sm:$0xff] %vm216_vm0, %v968_v35  ;;  %v669_v25 = vmul.f32 0.5, %v668_v39  ;;  %vm673_vm15 = vweird.f32 %v1849_v3  ;;  %vm652_vm1 = vweird.f32 %v1812_v42  ;;  %1179 = vrsqrt.f32 %v1865_v7 }
 0x12f   : > { %v966_v20 = vadd.f32 %v1690_v55, %v933_v58  ;;  %v695_v61 = vsel %vm1877_vm13, %v1819_v13, %v691_v38  ;;  %v649_v60 = vmul.f32 0.5, %v648_v28  ;;  %1181 = vrsqrt.f32 %v1872_v44  ;;  %v478_v53 = vpop.xlane.xlu1 %477  ;;  %vm674_vm6 = vmor %vm672_vm14, %vm673_vm15 }
 0x130   : > { %v472_v37 = vpop.xlane.xlu2 %471  ;;  %v907_v10 = vmul.f32 %v695_v61, %v1513_v40  ;;  %v670_v57 = vsub.f32 1.5, %v669_v25  ;;  %vm653_vm2 = vweird.f32 %v1859_v11  ;;  %v527_v62 = vmul.f32 %v463_v19, %v1445_v15  ;;  %v466_v51 = vpop.xlane.xlu0 %465 }
 0x131   : > { %998 = vst.msk [vmem:[%s1734_s21 + $0x20] sm:$0xff] %vm216_vm0, %v966_v20  ;;  %v650_v48 = vsub.f32 1.5, %v649_v60  ;;  %vm722_vm3 = vweird.f32 %v1847_v50  ;;  %vm702_vm4 = vweird.f32 %v1857_v52  ;;  %v525_v13 = vmul.f32 %v457_v9, %v1445_v15  ;;  %vm654_vm7 = vmor %vm652_vm1, %vm653_vm2 }
 0x132   : > { %v1906_v47 = vpop.eup %1175  ;;  %v940_v16 = vmul.f32 %v1688_v56, %v907_v10  ;;  %v671_v40 = vmul.f32 %v1849_v3, %v670_v57  ;;  %vm752_vm5 = vweird.f32 %v1872_v44  ;;  %v532_v19 = vmul.f32 %v478_v53, %v1445_v15 }
 0x133   : > { %v530_v23 = vmul.f32 %v472_v37, %v1445_v15  ;;  %v1913_v54 = vpop.eup %1177  ;;  %v651_v9 = vmul.f32 %v1859_v11, %v650_v48  ;;  %v717_v32 = vmul.f32 %v1906_v47, %v1847_v50  ;;  %v1922_v49 = vadd.f32 1e-05, %v527_v62 }
 0x134   : > { %v528_v43 = vmul.f32 %v466_v51, %v1445_v15  ;;  %v1925_v1 = vpop.eup %1179  ;;  %v973_v31 = vadd.f32 %v1690_v55, %v940_v16  ;;  %v675_v35 = vsel %vm674_vm6, %v1849_v3, %v671_v40  ;;  %vm723_vm8 = vweird.f32 %v1906_v47 }
 0x135   : > { %v697_v26 = vmul.f32 %v1913_v54, %v1857_v52  ;;  %v1182_v27 = vpop.eup %1181  ;;  %v905_v39 = vmul.f32 %v675_v35, %v1516_v41  ;;  %v655_v58 = vsel %vm654_vm7, %v1859_v11, %v651_v9  ;;  %v718_v38 = vmul.f32 %v1906_v47, %v717_v32  ;;  %vm1959_vm11 = vmor %vm722_vm3, %vm723_vm8 }
 0x136   : > { %v677_v3 = vmul.f32 %v1925_v1, %v1865_v7  ;;  %1005 = vst.msk [vmem:[%s1734_s21 + $0x58] sm:$0xff] %vm216_vm0, %v973_v31  ;;  %v903_v42 = vmul.f32 %v655_v58, %v1500_v17  ;;  %v747_v25 = vmul.f32 %v1182_v27, %v1872_v44  ;;  %v1946_v20 = vadd.f32 1e-05, %v525_v13 }
 0x137   : > { %v698_v28 = vmul.f32 %v1913_v54, %v697_v26  ;;  %v938_v61 = vmul.f32 %v1688_v56, %v905_v39  ;;  %v719_v41 = vmul.f32 0.5, %v718_v38  ;;  %vm703_vm9 = vweird.f32 %v1913_v54 }
 0x138   : > { %v678_v11 = vmul.f32 %v1925_v1, %v677_v3  ;;  %v936_v60 = vmul.f32 %v1688_v56, %v903_v42  ;;  %v748_v37 = vmul.f32 %v1182_v27, %v747_v25  ;;  %1183 = vrsqrt.f32 %v1922_v49  ;;  %v1970_v32 = vpop.xlane.xlu0 %474  ;;  %vm1979_vm13 = vmor %vm702_vm4, %vm703_vm9 }
 0x139   : > { %v699_v53 = vmul.f32 0.5, %v698_v28  ;;  %v971_v17 = vadd.f32 %v1690_v55, %v938_v61  ;;  %v720_v10 = vsub.f32 1.5, %v719_v41  ;;  %vm753_vm10 = vweird.f32 %v1182_v27 }
 0x13a   : > { %v679_v57 = vmul.f32 0.5, %v678_v11  ;;  %v969_v62 = vadd.f32 %v1690_v55, %v936_v60  ;;  %v749_v13 = vmul.f32 0.5, %v748_v37  ;;  %1185 = vrsqrt.f32 %v1946_v20  ;;  %vm1993_vm15 = vmor %vm752_vm5, %vm753_vm10 }
 0x13b   : > { %v700_v48 = vsub.f32 1.5, %v699_v53  ;;  %1003 = vst.msk [vmem:[%s1734_s21 + $0x48] sm:$0xff] %vm216_vm0, %v971_v17  ;;  %v721_v16 = vmul.f32 %v1906_v47, %v720_v10  ;;  %vm683_vm12 = vweird.f32 %v1925_v1  ;;  %v1968_v9 = vadd.f32 1e-05, %v532_v19  ;;  %v481_v19 = vpop.xlane.xlu2 %480 }
 0x13c   : > { %v680_v40 = vsub.f32 1.5, %v679_v57  ;;  %1001 = vst.msk [vmem:[%s1734_s21 + $0x38] sm:$0xff] %vm216_vm0, %v969_v62  ;;  %vm682_vm14 = vweird.f32 %v1865_v7  ;;  %v750_v35 = vsub.f32 1.5, %v749_v13  ;;  %v1984_v26 = vadd.f32 1e-05, %v530_v23  ;;  %v487_v23 = vpop.xlane.xlu1 %486 }
 0x13d   : > { %v701_v50 = vmul.f32 %v1913_v54, %v700_v48  ;;  %v725_v39 = vsel %vm1959_vm11, %v1906_v47, %v721_v16  ;;  %1187 = vrsqrt.f32 %v1968_v9  ;;  %v1998_v7 = vadd.f32 1e-05, %v528_v43  ;;  %vm684_vm1 = vmor %vm682_vm14, %vm683_vm12 }
 0x13e   : > { %v681_v58 = vmul.f32 %v1925_v1, %v680_v40  ;;  %v2000_v38 = vpop.eup %1183  ;;  %v910_v3 = vmul.f32 %v725_v39, %v1534_v8  ;;  %v751_v44 = vmul.f32 %v1182_v27, %v750_v35  ;;  %1189 = vrsqrt.f32 %v1984_v26 }
 0x13f   : > { %v705_v47 = vsel %vm1979_vm13, %v1913_v54, %v701_v50  ;;  %v727_v28 = vmul.f32 %v2000_v38, %v1922_v49  ;;  %vm732_vm2 = vweird.f32 %v1922_v49  ;;  %vm712_vm3 = vweird.f32 %v1946_v20 }
 0x140   : > { %v908_v42 = vmul.f32 %v705_v47, %v1537_v63  ;;  %v685_v43 = vsel %vm684_vm1, %v1925_v1, %v681_v58  ;;  %v2013_v25 = vpop.eup %1185  ;;  %v943_v8 = vmul.f32 %v1688_v56, %v910_v3  ;;  %v755_v54 = vsel %vm1993_vm15, %v1182_v27, %v751_v44  ;;  %v2049_v40 = vpop.xlane.xlu0 %483 }
 0x141   : > { %v906_v61 = vmul.f32 %v685_v43, %v1521_v2  ;;  %v913_v63 = vmul.f32 %v755_v54, %v1555_v12  ;;  %v728_v1 = vmul.f32 %v2000_v38, %v727_v28  ;;  %v707_v11 = vmul.f32 %v2013_v25, %v1946_v20 }
 0x142   : > { %v941_v41 = vmul.f32 %v1688_v56, %v908_v42  ;;  %v976_v2 = vadd.f32 %v1690_v55, %v943_v8  ;;  %vm782_vm4 = vweird.f32 %v1968_v9  ;;  %1191 = vrsqrt.f32 %v1998_v7 }
 0x143   : > { %v939_v60 = vmul.f32 %v1688_v56, %v906_v61  ;;  %v2030_v27 = vpop.eup %1187  ;;  %v946_v53 = vmul.f32 %v1688_v56, %v913_v63  ;;  %v729_v37 = vmul.f32 0.5, %v728_v1  ;;  %v708_v17 = vmul.f32 %v2013_v25, %v707_v11  ;;  %v490_v39 = vpop.xlane.xlu2 %489 }
 0x144   : > { %v974_v12 = vadd.f32 %v1690_v55, %v941_v41  ;;  %v2035_v10 = vpop.eup %1189  ;;  %1008 = vst.msk [vmem:[%s1734_s21 + $0x70] sm:$0xff] %vm216_vm0, %v976_v2  ;;  %vm733_vm5 = vweird.f32 %v2000_v38  ;;  %v777_v62 = vmul.f32 %v2030_v27, %v1968_v9  ;;  %vm762_vm6 = vweird.f32 %v1984_v26  ;;  %v496_v47 = vpop.xlane.xlu1 %495 }
 0x145   : > { %v972_v57 = vadd.f32 %v1690_v55, %v939_v60  ;;  %v979_v51 = vadd.f32 %v1690_v55, %v946_v53  ;;  %v730_v48 = vsub.f32 1.5, %v729_v37  ;;  %v709_v13 = vmul.f32 0.5, %v708_v17  ;;  %vm734_vm9 = vmor %vm732_vm2, %vm733_vm5 }
 0x146   : > { %1006 = vst.msk [vmem:[%s1734_s21 + $0x60] sm:$0xff] %vm216_vm0, %v974_v12  ;;  %v757_v16 = vmul.f32 %v2035_v10, %v1984_v26  ;;  %vm713_vm7 = vweird.f32 %v2013_v25  ;;  %v778_v50 = vmul.f32 %v2030_v27, %v777_v62  ;;  %v535_v31 = vmul.f32 %v487_v23, %v1445_v15 }
 0x147   : > { %1004 = vst.msk [vmem:[%s1734_s21 + $0x50] sm:$0xff] %vm216_vm0, %v972_v57  ;;  %v533_v35 = vmul.f32 %v481_v19, %v1445_v15  ;;  %v731_v58 = vmul.f32 %v2000_v38, %v730_v48  ;;  %v710_v52 = vsub.f32 1.5, %v709_v13  ;;  %vm783_vm8 = vweird.f32 %v2030_v27  ;;  %vm714_vm10 = vmor %vm712_vm3, %vm713_vm7 }
 0x148   : > { %1011 = vst.msk [vmem:[%s1734_s21 + $0x88] sm:$0xff] %vm216_vm0, %v979_v51  ;;  %v758_v3 = vmul.f32 %v2035_v10, %v757_v16  ;;  %v1192_v44 = vpop.eup %1191  ;;  %v779_v23 = vmul.f32 0.5, %v778_v50  ;;  %v2066_v42 = vadd.f32 1e-05, %v535_v31  ;;  %v531_v43 = vmul.f32 %v1970_v32, %v1445_v15  ;;  %vm2087_vm11 = vmor %vm782_vm4, %vm783_vm8  ;;  %v2111_v51 = vpop.xlane.xlu0 %492 }
 0x149   : > { %v2068_v19 = vadd.f32 1e-05, %v533_v35  ;;  %v735_v28 = vsel %vm734_vm9, %v2000_v38, %v731_v58  ;;  %v711_v8 = vmul.f32 %v2013_v25, %v710_v52  ;;  %v737_v54 = vmul.f32 %v1192_v44, %v1998_v7 }
 0x14a   : > { %v759_v61 = vmul.f32 0.5, %v758_v3  ;;  %v911_v41 = vmul.f32 %v735_v28, %v1558_v33  ;;  %v780_v49 = vsub.f32 1.5, %v779_v23  ;;  %1193 = vrsqrt.f32 %v2066_v42 }
 0x14b   : > { %v538_v63 = vmul.f32 %v496_v47, %v1445_v15  ;;  %v715_v32 = vsel %vm714_vm10, %v2013_v25, %v711_v8  ;;  %vm763_vm12 = vweird.f32 %v2035_v10  ;;  %v738_v20 = vmul.f32 %v1192_v44, %v737_v54  ;;  %v499_v13 = vpop.xlane.xlu2 %498 }
 0x14c   : > { %v760_v33 = vsub.f32 1.5, %v759_v61  ;;  %v944_v1 = vmul.f32 %v1688_v56, %v911_v41  ;;  %v909_v11 = vmul.f32 %v715_v32, %v1542_v4  ;;  %v781_v2 = vmul.f32 %v2030_v27, %v780_v49  ;;  %vm764_vm14 = vmor %vm762_vm6, %vm763_vm12  ;;  %v505_v47 = vpop.xlane.xlu1 %504 }
 0x14d   : > { %1195 = vrsqrt.f32 %v2068_v19  ;;  %v739_v9 = vmul.f32 0.5, %v738_v20  ;;  %vm743_vm13 = vweird.f32 %v1192_v44  ;;  %v2097_v60 = vadd.f32 1e-05, %v531_v43 }
 0x14e   : > { %v761_v25 = vmul.f32 %v2035_v10, %v760_v33  ;;  %v977_v12 = vadd.f32 %v1690_v55, %v944_v1  ;;  %v942_v53 = vmul.f32 %v1688_v56, %v909_v11  ;;  %v785_v37 = vsel %vm2087_vm11, %v2030_v27, %v781_v2 }
 0x14f   : > { %v2106_v4 = vadd.f32 1e-05, %v538_v63  ;;  %v916_v17 = vmul.f32 %v785_v37, %v1576_v18  ;;  %v740_v62 = vsub.f32 1.5, %v739_v9  ;;  %1197 = vrsqrt.f32 %v2097_v60 }
 0x150   : > { %v765_v57 = vsel %vm764_vm14, %v2035_v10, %v761_v25  ;;  %v2113_v48 = vpop.eup %1193  ;;  %1009 = vst.msk [vmem:[%s1734_s21 + $0x78] sm:$0xff] %vm216_vm0, %v977_v12  ;;  %v975_v27 = vadd.f32 %v1690_v55, %v942_v53  ;;  %vm742_vm15 = vweird.f32 %v1998_v7  ;;  %vm812_vm2 = vweird.f32 %v2066_v42  ;;  %v2179_v25 = vpop.xlane.xlu0 %501 }
 0x151   : > { %v914_v26 = vmul.f32 %v765_v57, %v1579_v59  ;;  %1199 = vrsqrt.f32 %v2106_v4  ;;  %v949_v18 = vmul.f32 %v1688_v56, %v916_v17  ;;  %v741_v16 = vmul.f32 %v1192_v44, %v740_v62  ;;  %vm744_vm1 = vmor %vm742_vm15, %vm743_vm13 }
 0x152   : > { %v807_v10 = vmul.f32 %v2113_v48, %v2066_v42  ;;  %1007 = vst.msk [vmem:[%s1734_s21 + $0x68] sm:$0xff] %vm216_vm0, %v975_v27  ;;  %v536_v59 = vmul.f32 %v490_v39, %v1445_v15  ;;  %v534_v35 = vmul.f32 %v2049_v40, %v1445_v15  ;;  %vm792_vm3 = vweird.f32 %v2068_v19 }
 0x153   : > { %v2124_v50 = vpop.eup %1195  ;;  %v947_v31 = vmul.f32 %v1688_v56, %v914_v26  ;;  %v982_v7 = vadd.f32 %v1690_v55, %v949_v18  ;;  %v745_v58 = vsel %vm744_vm1, %v1192_v44, %v741_v16  ;;  %vm813_vm4 = vweird.f32 %v2113_v48  ;;  %v508_v53 = vpop.xlane.xlu2 %507 }
 0x154   : > { %v808_v52 = vmul.f32 %v2113_v48, %v807_v10  ;;  %v787_v3 = vmul.f32 %v2124_v50, %v2068_v19  ;;  %v912_v43 = vmul.f32 %v745_v58, %v1563_v34  ;;  %v2141_v39 = vadd.f32 1e-05, %v536_v59  ;;  %vm2169_vm7 = vmor %vm812_vm2, %vm813_vm4 }
 0x155   : > { %v980_v23 = vadd.f32 %v1690_v55, %v947_v31  ;;  %v2143_v28 = vpop.eup %1197  ;;  %1014 = vst.msk [vmem:[%s1734_s21 + $0xa0] sm:$0xff] %vm216_vm0, %v982_v7  ;;  %v2149_v8 = vadd.f32 1e-05, %v534_v35  ;;  %vm772_vm5 = vweird.f32 %v2097_v60  ;;  %v541_v41 = vmul.f32 %v505_v47, %v1445_v15 }
 0x156   : > { %v809_v40 = vmul.f32 0.5, %v808_v52  ;;  %v788_v44 = vmul.f32 %v2124_v50, %v787_v3  ;;  %v945_v34 = vmul.f32 %v1688_v56, %v912_v43  ;;  %v767_v54 = vmul.f32 %v2143_v28, %v2097_v60 }
 0x157   : > { %v2151_v61 = vpop.eup %1199  ;;  %1012 = vst.msk [vmem:[%s1734_s21 + $0x90] sm:$0xff] %vm216_vm0, %v980_v23  ;;  %1201 = vrsqrt.f32 %v2141_v39  ;;  %vm842_vm6 = vweird.f32 %v2106_v4  ;;  %vm793_vm8 = vweird.f32 %v2124_v50  ;;  %vm773_vm9 = vweird.f32 %v2143_v28 }
 0x158   : > { %v810_v49 = vsub.f32 1.5, %v809_v40  ;;  %v789_v63 = vmul.f32 0.5, %v788_v44  ;;  %v837_v32 = vmul.f32 %v2151_v61, %v2106_v4  ;;  %v978_v38 = vadd.f32 %v1690_v55, %v945_v34  ;;  %vm794_vm12 = vmor %vm792_vm3, %vm793_vm8 }
 0x159   : > { %v768_v20 = vmul.f32 %v2143_v28, %v767_v54  ;;  %1203 = vrsqrt.f32 %v2149_v8  ;;  %vm843_vm10 = vweird.f32 %v2151_v61  ;;  %v2184_v9 = vadd.f32 1e-05, %v541_v41  ;;  %vm774_vm14 = vmor %vm772_vm5, %vm773_vm9 }
 0x15a   : > { %v811_v1 = vmul.f32 %v2113_v48, %v810_v49  ;;  %v790_v11 = vsub.f32 1.5, %v789_v63  ;;  %v838_v2 = vmul.f32 %v2151_v61, %v837_v32  ;;  %1010 = vst.msk [vmem:[%s1734_s21 + $0x80] sm:$0xff] %vm216_vm0, %v978_v38  ;;  %v539_v12 = vmul.f32 %v499_v13, %v1445_v15  ;;  %vm2213_vm13 = vmor %vm842_vm6, %vm843_vm10 }
 0x15b   : > { %v769_v42 = vmul.f32 0.5, %v768_v20  ;;  %vm822_vm11 = vweird.f32 %v2141_v39  ;;  %1205 = vrsqrt.f32 %v2184_v9  ;;  %v542_v10 = vmul.f32 %v508_v53, %v1445_v15 }
 0x15c   : > { %v815_v37 = vsel %vm2169_vm7, %v2113_v48, %v811_v1  ;;  %v791_v17 = vmul.f32 %v2124_v50, %v790_v11  ;;  %v839_v57 = vmul.f32 0.5, %v838_v2  ;;  %v537_v48 = vmul.f32 %v2111_v51, %v1445_v15 }
 0x15d   : > { %v2192_v62 = vpop.eup %1201  ;;  %v919_v27 = vmul.f32 %v815_v37, %v1597_v24  ;;  %v770_v26 = vsub.f32 1.5, %v769_v42  ;;  %vm802_vm15 = vweird.f32 %v2149_v8  ;;  %vm872_vm1 = vweird.f32 %v2184_v9 }
 0x15e   : > { %v795_v13 = vsel %vm794_vm12, %v2124_v50, %v791_v17  ;;  %v840_v18 = vsub.f32 1.5, %v839_v57  ;;  %v817_v16 = vmul.f32 %v2192_v62, %v2141_v39  ;;  %v2217_v50 = vadd.f32 1e-05, %v539_v12 }
 0x15f   : > { %v1204_v24 = vpop.eup %1203  ;;  %v952_v31 = vmul.f32 %v1688_v56, %v919_v27  ;;  %v917_v19 = vmul.f32 %v795_v13, %v1600_v21  ;;  %v771_v59 = vmul.f32 %v2143_v28, %v770_v26  ;;  %vm823_vm2 = vweird.f32 %v2192_v62 }
 0x160   : > { %v841_v21 = vmul.f32 %v2151_v61, %v840_v18  ;;  %v818_v35 = vmul.f32 %v2192_v62, %v817_v16  ;;  %v797_v7 = vmul.f32 %v1204_v24, %v2149_v8  ;;  %1207 = vrsqrt.f32 %v2217_v50  ;;  %vm824_vm5 = vmor %vm822_vm11, %vm823_vm2 }
 0x161   : > { %v985_v4 = vadd.f32 %v1690_v55, %v952_v31  ;;  %v950_v58 = vmul.f32 %v1688_v56, %v917_v19  ;;  %v775_v52 = vsel %vm774_vm14, %v2143_v28, %v771_v59  ;;  %v1206_v43 = vpop.eup %1205  ;;  %v2241_v28 = vadd.f32 1e-05, %v537_v48 }
 0x162   : > { %v915_v60 = vmul.f32 %v775_v52, %v1584_v6  ;;  %v845_v3 = vsel %vm2213_vm13, %v2151_v61, %v841_v21  ;;  %v819_v47 = vmul.f32 0.5, %v818_v35  ;;  %v798_v23 = vmul.f32 %v1204_v24, %v797_v7  ;;  %v511_v61 = vpop.xlane.xlu0 %510 }
 0x163   : > { %1017 = vst.msk [vmem:[%s1734_s21 + $0xb8] sm:$0xff] %vm216_vm0, %v985_v4  ;;  %v983_v40 = vadd.f32 %v1690_v55, %v950_v58  ;;  %v922_v44 = vmul.f32 %v845_v3, %v1618_v30  ;;  %v867_v41 = vmul.f32 %v1206_v43, %v2184_v9  ;;  %vm803_vm3 = vweird.f32 %v1204_v24 }
 0x164   : > { %v948_v34 = vmul.f32 %v1688_v56, %v915_v60  ;;  %v820_v6 = vsub.f32 1.5, %v819_v47  ;;  %v799_v54 = vmul.f32 0.5, %v798_v23  ;;  %vm873_vm4 = vweird.f32 %v1206_v43  ;;  %vm804_vm6 = vmor %vm802_vm15, %vm803_vm3 }
 0x165   : > { %1015 = vst.msk [vmem:[%s1734_s21 + $0xa8] sm:$0xff] %vm216_vm0, %v983_v40  ;;  %v955_v49 = vmul.f32 %v1688_v56, %v922_v44  ;;  %1209 = vrsqrt.f32 %v2241_v28  ;;  %v868_v38 = vmul.f32 %v1206_v43, %v867_v41  ;;  %v2256_v1 = vadd.f32 1e-05, %v542_v10  ;;  %vm2279_vm7 = vmor %vm872_vm1, %vm873_vm4 }
 0x166   : > { %v981_v30 = vadd.f32 %v1690_v55, %v948_v34  ;;  %v821_v63 = vmul.f32 %v2192_v62, %v820_v6  ;;  %v800_v32 = vsub.f32 1.5, %v799_v54  ;;  %v1208_v33 = vpop.eup %1207  ;;  %v540_v11 = vmul.f32 %v2179_v25, %v1445_v15 }
 0x167   : > { %v988_v20 = vadd.f32 %v1690_v55, %v955_v49  ;;  %v543_v2 = vmul.f32 %v511_v61, %v1445_v15  ;;  %v869_v53 = vmul.f32 0.5, %v868_v38  ;;  %v847_v37 = vmul.f32 %v1208_v33, %v2217_v50 }
 0x168   : > { %1013 = vst.msk [vmem:[%s1734_s21 + $0x98] sm:$0xff] %vm216_vm0, %v981_v30  ;;  %v825_v42 = vsel %vm824_vm5, %v2192_v62, %v821_v63  ;;  %v801_v12 = vmul.f32 %v1204_v24, %v800_v32  ;;  %1211 = vrsqrt.f32 %v2256_v1  ;;  %v2272_v57 = vadd.f32 1e-05, %v540_v11 }
 0x169   : > { %1020 = vst.msk [vmem:[%s1734_s21 + $0xd0] sm:$0xff] %vm216_vm0, %v988_v20  ;;  %v920_v39 = vmul.f32 %v825_v42, %v1621_v45  ;;  %v870_v15 = vsub.f32 1.5, %v869_v53  ;;  %v848_v17 = vmul.f32 %v1208_v33, %v847_v37  ;;  %v2283_v8 = vadd.f32 1e-05, %v543_v2 }
 0x16a   : > { %v805_v25 = vsel %vm804_vm6, %v1204_v24, %v801_v12  ;;  %vm852_vm8 = vweird.f32 %v2217_v50  ;;  %vm853_vm9 = vweird.f32 %v1208_v33  ;;  %1213 = vrsqrt.f32 %v2272_v57 }
 0x16b   : > { %v1210_v62 = vpop.eup %1209  ;;  %v953_v27 = vmul.f32 %v1688_v56, %v920_v39  ;;  %v918_v26 = vmul.f32 %v805_v25, %v1605_v22  ;;  %v871_v48 = vmul.f32 %v1206_v43, %v870_v15  ;;  %v849_v13 = vmul.f32 0.5, %v848_v17  ;;  %vm854_vm10 = vmor %vm852_vm8, %vm853_vm9 }
 0x16c   : > { %v827_v18 = vmul.f32 %v1210_v62, %v2241_v28  ;;  %1215 = vrsqrt.f32 %v2283_v8  ;;  %vm833_vm11 = vweird.f32 %v1210_v62  ;;  %vm832_vm12 = vweird.f32 %v2241_v28 }
 0x16d   : > { %v986_v16 = vadd.f32 %v1690_v55, %v953_v27  ;;  %v951_v22 = vmul.f32 %v1688_v56, %v918_v26  ;;  %v875_v9 = vsel %vm2279_vm7, %v1206_v43, %v871_v48  ;;  %v850_v10 = vsub.f32 1.5, %v849_v13  ;;  %vm834_vm13 = vmor %vm832_vm12, %vm833_vm11 }
 0x16e   : > { %v828_v24 = vmul.f32 %v1210_v62, %v827_v18  ;;  %v1212_v31 = vpop.eup %1211  ;;  %v925_v59 = vmul.f32 %v875_v9, %v1639_v36  ;;  %vm882_vm14 = vweird.f32 %v2256_v1  ;;  %vm862_vm4 = vweird.f32 %v2272_v57 }
 0x16f   : > { %1018 = vst.msk [vmem:[%s1734_s21 + $0xc0] sm:$0xff] %vm216_vm0, %v986_v16  ;;  %v984_v19 = vadd.f32 %v1690_v55, %v951_v22  ;;  %v851_v51 = vmul.f32 %v1208_v33, %v850_v10  ;;  %v877_v35 = vmul.f32 %v1212_v31, %v2256_v1  ;;  %vm883_vm15 = vweird.f32 %v1212_v31 }
 0x170   : > { %v829_v21 = vmul.f32 0.5, %v828_v24  ;;  %v958_v7 = vmul.f32 %v1688_v56, %v925_v59  ;;  %v1214_v60 = vpop.eup %1213  ;;  %vm884_vm1 = vmor %vm882_vm14, %vm883_vm15  ;;  %vm892_vm6 = vweird.f32 %v2283_v8 }
 0x171   : > { %1016 = vst.msk [vmem:[%s1734_s21 + $0xb0] sm:$0xff] %vm216_vm0, %v984_v19  ;;  %v855_v4 = vsel %vm854_vm10, %v1208_v33, %v851_v51  ;;  %v878_v52 = vmul.f32 %v1212_v31, %v877_v35  ;;  %v857_v40 = vmul.f32 %v1214_v60, %v2272_v57  ;;  %vm863_vm2 = vweird.f32 %v1214_v60 }
 0x172   : > { %v830_v58 = vsub.f32 1.5, %v829_v21  ;;  %v991_v36 = vadd.f32 %v1690_v55, %v958_v7  ;;  %v923_v3 = vmul.f32 %v855_v4, %v1642_v0  ;;  %v1216_v47 = vpop.eup %1215  ;;  %vm864_vm5 = vmor %vm862_vm4, %vm863_vm2 }
 0x173   : > { %v879_v43 = vmul.f32 0.5, %v878_v52  ;;  %v887_v44 = vmul.f32 %v1216_v47, %v2283_v8  ;;  %v858_v0 = vmul.f32 %v1214_v60, %v857_v40  ;;  %vm893_vm3 = vweird.f32 %v1216_v47 }
 0x174   : > { %v831_v23 = vmul.f32 %v1210_v62, %v830_v58  ;;  %1023 = vst.msk [vmem:[%s1734_s21 + $0xe8] sm:$0xff] %vm216_vm0, %v991_v36  ;;  %v956_v50 = vmul.f32 %v1688_v56, %v923_v3  ;;  %vm894_vm7 = vmor %vm892_vm6, %vm893_vm3 }
 0x175   : > { %v880_v6 = vsub.f32 1.5, %v879_v43  ;;  %v888_v41 = vmul.f32 %v1216_v47, %v887_v44  ;;  %v859_v49 = vmul.f32 0.5, %v858_v0 }
 0x176   : > { %v835_v34 = vsel %vm834_vm13, %v1210_v62, %v831_v23  ;;  %v989_v54 = vadd.f32 %v1690_v55, %v956_v50 }
 0x177   : > { %v921_v28 = vmul.f32 %v835_v34, %v1626_v46  ;;  %v881_v61 = vmul.f32 %v1212_v31, %v880_v6  ;;  %v889_v63 = vmul.f32 0.5, %v888_v41  ;;  %v860_v38 = vsub.f32 1.5, %v859_v49 }
 0x178   : > { %1021 = vst.msk [vmem:[%s1734_s21 + $0xd8] sm:$0xff] %vm216_vm0, %v989_v54 }
 0x179   : > { %v954_v30 = vmul.f32 %v1688_v56, %v921_v28  ;;  %v885_v32 = vsel %vm884_vm1, %v1212_v31, %v881_v61  ;;  %v890_v1 = vsub.f32 1.5, %v889_v63  ;;  %v861_v46 = vmul.f32 %v1214_v60, %v860_v38 }
 0x17a   : > { %v926_v20 = vmul.f32 %v885_v32, %v1659_v29 }
 0x17b   : > { %v987_v33 = vadd.f32 %v1690_v55, %v954_v30  ;;  %v891_v2 = vmul.f32 %v1216_v47, %v890_v1  ;;  %v865_v42 = vsel %vm864_vm5, %v1214_v60, %v861_v46 }
 0x17c   : > { %v959_v11 = vmul.f32 %v1688_v56, %v926_v20  ;;  %v924_v12 = vmul.f32 %v865_v42, %v1647_v5 }
 0x17d   : > { %1019 = vst.msk [vmem:[%s1734_s21 + $0xc8] sm:$0xff] %vm216_vm0, %v987_v33  ;;  %v895_v53 = vsel %vm894_vm7, %v1216_v47, %v891_v2 }
 0x17e   : > { %v992_v29 = vadd.f32 %v1690_v55, %v959_v11  ;;  %v927_v37 = vmul.f32 %v895_v53, %v1662_v14  ;;  %v957_v39 = vmul.f32 %v1688_v56, %v924_v12 }
 0x180   : > { %1024 = vst.msk [vmem:[%s1734_s21 + $0xf0] sm:$0xff] %vm216_vm0, %v992_v29  ;;  %v960_v25 = vmul.f32 %v1688_v56, %v927_v37  ;;  %v990_v15 = vadd.f32 %v1690_v55, %v957_v39 }
 0x182   : > { %v993_v17 = vadd.f32 %v1690_v55, %v960_v25  ;;  %1022 = vst.msk [vmem:[%s1734_s21 + $0xe0] sm:$0xff] %vm216_vm0, %v990_v15 }
 0x184   : > { %1025 = vst.msk [vmem:[%s1734_s21 + $0xf8] sm:$0xff] %vm216_vm0, %v993_v17 }
 0x185 PF: > { %s12_s11 = sadd.s32 1, %s1239_s11   ;;  %s2370_s9 = smov %s1235_s10 }
 0x186   : > { %p9_p5 = scmp.ge.s32.totalorder %s12_s11, 4   ;;  %s2371_s10 = smov %s2373_s12 }
 0x188   :  { %11 = sbr.rel (!%p9_p5) target bundleno = 2 (0x2), region = 58 }

// kernel: block_forward.4
= control target key start
LH: loop header
LB: loop body
LE: loop exit
PB: predicated region body
PF: predicated region fallthrough
CT: control target
= control target key end

     0   :  { %s1105_s18 = smov 0   ;;  %s1107_s19 = smov 0   ;;  %s1292_s0 = inlined_call_operand.vmem [shape: bf16[2,144,64], index: 0, kind: input, shape index: {}]   ;;  %s1293_s1 = inlined_call_operand.vmem [shape: f32[2,2,64], index: 1, kind: input, shape index: {}]   ;;  %s1294_s2 = inlined_call_operand.vmem [shape: bf16[64,64], index: 2, kind: input, shape index: {}]   ;;  %s1295_s3 = inlined_call_operand.vmem [shape: bf16[64,64], index: 3, kind: input, shape index: {}]   ;;  %s1296_s4 = inlined_call_operand.vmem [shape: f32[1,64], index: 4, kind: input, shape index: {}]   ;;  %s1297_s5 = inlined_call_operand.vmem [shape: bf16[2,144,64], index: 5, kind: output, shape index: {}]  }
   0x1   :  { %s1109_s20 = smov 0  }
   0x2 LB: > { %s27_s21 = sadd.s32 1, %s1069_s19  ;;  %p890_p0 = scmp.ge.s32.totalorder %s1073_s20, 1  ;;  %s1073_s20 = sphi %s1109_s20, %s15_s20   ;;  %s1069_s19 = sphi %s1107_s19, %s1299_s19   ;;  %s1065_s18 = sphi %s1105_s18, %s1298_s18  }
   0x3   : > { %p29_p1 = scmp.ge.s32.totalorder %s27_s21, 2  ;;  %p217_p2 = scmp.lt.s32.totalorder %s1073_s20, 3 }
   0x5   : > { %s1301_s21 = smov (%p29_p1, %s27_s21), 0  ;;  %p218_p3 = pnand %p890_p0, %p217_p2 }
   0x6   : > { %p258_p4 = scmp.lt.s32.totalorder (!%p218_p3), %s1065_s18, 1 }
   0x7   : > { %221 = sbr.rel (%p218_p3) target bundleno = 377 (0x179), region = 40 }
   0xc   : > { %v1012_v0 = vld [vmem:[%s1294_s2 + $0x18] sm:$0xff]  ;;  %v1011_v1 = vld [vmem:[%s1294_s2 + $0x10] sm:$0xff]  ;;  %s1303_s18 = smov (!%p258_p4, %s1065_s18), 1  ;;  %v1010_v2 = vld [vmem:[%s1294_s2 + $0x8] sm:$0xff]  ;;  %vm378_vm0 = vcmask 523264   ;;  %vm768_vm3 = vcmask 519168  }
   0xd   : > { %410 = vmatpush.bf16.msra.mxu0 %v1012_v0  ;;  %1017 = vmatpush.bf16.msra.mxu2 %v1012_v0  ;;  %s1025_s28 = smul.u32 72, %s1303_s18  ;;  %v1009_v3 = vld [vmem:[%s1294_s2] sm:$0xff]  ;;  %v1016_v13 = vld [vmem:[%s1295_s3 + $0x18] sm:$0xff]  ;;  %v1015_v14 = vld [vmem:[%s1295_s3 + $0x10] sm:$0xff]  ;;  %s892_s17 = sshll.u32 %s1303_s18, 1 }
   0xe   : > { %592 = vmatpush.bf16.msra.mxu1 %v1016_v13  ;;  %1021 = vmatpush.bf16.msra.mxu3 %v1016_v13  ;;  %v1014_v15 = vld [vmem:[%s1295_s3 + $0x8] sm:$0xff]  ;;  %v1013_v16 = vld [vmem:[%s1295_s3] sm:$0xff]  ;;  %s270_s24 = scalar_lea.vmem %s1293_s1, %s892_s17 }
   0xf   : > { %s265_s8 = scalar_lea.vmem %s1292_s0, %s1025_s28  ;;  %v300_v17 = vld [vmem:[%s270_s24] sm:$0x3]  ;;  %s1228_s30 = scalar_lea.vmem %s1297_s5, %s1025_s28 }
  0x10   : > { %v1000_v4 = vld [vmem:[%s265_s8] sm:$0xff]  ;;  %v1005_v5 = vld [vmem:[%s265_s8 + $0x28] sm:$0xff]  ;;  %v1006_v7 = vld [vmem:[%s265_s8 + $0x30] sm:$0xff]  ;;  %v1168_v19 = vperm.slane %v300_v17, 0  ;;  %v1170_v20 = vperm.slane %v300_v17, 1 }
  0x11   : > { %411 = vmatpush.bf16.msra.mxu0 %v1011_v1  ;;  %1018 = vmatpush.bf16.msra.mxu2 %v1011_v1  ;;  %v1001_v6 = vld [vmem:[%s265_s8 + $0x8] sm:$0xff]  ;;  %v1002_v8 = vld [vmem:[%s265_s8 + $0x10] sm:$0xff]  ;;  %v1007_v9 = vld [vmem:[%s265_s8 + $0x38] sm:$0xff] }
  0x12   : > { %v1003_v10 = vld [vmem:[%s265_s8 + $0x18] sm:$0xff]  ;;  %v1008_v11 = vld [vmem:[%s265_s8 + $0x40] sm:$0xff]  ;;  %593 = vmatpush.bf16.msra.mxu1 %v1015_v14  ;;  %1022 = vmatpush.bf16.msra.mxu3 %v1015_v14 }
  0x13   : > { %v1004_v12 = vld [vmem:[%s265_s8 + $0x20] sm:$0xff] }
  0x15   : > { %412 = vmatpush.bf16.msra.mxu0 %v1010_v2  ;;  %1019 = vmatpush.bf16.msra.mxu2 %v1010_v2 }
  0x16   : > { %594 = vmatpush.bf16.msra.mxu1 %v1014_v15  ;;  %1023 = vmatpush.bf16.msra.mxu3 %v1014_v15 }
  0x19   : > { %413 = vmatpush.bf16.msra.mxu0 %v1009_v3  ;;  %1020 = vmatpush.bf16.msra.mxu2 %v1009_v3 }
  0x1a   : > { %595 = vmatpush.bf16.msra.mxu1 %v1013_v16  ;;  %1024 = vmatpush.bf16.msra.mxu3 %v1013_v16 }
  0x1c   : > { %946 = vmatmul.msk.bf16.vlgmr.msra.gmra.mxu0 %vm378_vm0, %v1000_v4  ;;  %951 = vmatmul.msk.bf16.vlgmr.msra.gmra.mxu2 %vm378_vm0, %v1005_v5 }
  0x2c   : > { %947 = vmatmul.msk.bf16.gmra.mxu0 %vm378_vm0, %v1001_v6  ;;  %952 = vmatmul.msk.bf16.gmra.mxu2 %vm378_vm0, %v1006_v7 }
  0x3c   : > { %948 = vmatmul.msk.bf16.gmra.mxu0 %vm378_vm0, %v1002_v8  ;;  %953 = vmatmul.msk.bf16.gmra.mxu2 %vm378_vm0, %v1007_v9 }
  0x4c   : > { %949 = vmatmul.msk.bf16.gmra.mxu0 %vm378_vm0, %v1003_v10  ;;  %954 = vmatmul.msk.bf16.gmra.mxu2 %vm378_vm0, %v1008_v11 }
  0x5c   : > { %950 = vmatmul.msk.bf16.gmra.mxu0 %vm378_vm0, %v1004_v12 }
  0x99   : > { %v415_v18 = vpop.f32.mrf.mxu0 }
  0x9a   : > { %v461_v21 = vmul.f32 %v1168_v19, %v415_v18 }
  0x9c   : > { %v480_v24 = vadd.f32 %v1170_v20, %v461_v21 }
  0x9e   : > { %v498_v28 = vmax.f32 %v480_v24, 0.0 }
  0x9f   : > { %v440_v22 = vpop.f32.mrf.mxu2 }
  0xa0   : > { %v471_v26 = vmul.f32 %v1168_v19, %v440_v22 }
  0xa1   : > { %v417_v23 = vpop.f32.mrf.mxu0 }
  0xa2   : > { %v462_v25 = vmul.f32 %v1168_v19, %v417_v23  ;;  %v490_v31 = vadd.f32 %v1170_v20, %v471_v26 }
  0xa4   : > { %v481_v27 = vadd.f32 %v1170_v20, %v462_v25  ;;  %v508_v36 = vmax.f32 %v490_v31, 0.0 }
  0xa6   : > { %v499_v29 = vmax.f32 %v481_v27, 0.0 }
  0xa7   : > { %v442_v30 = vpop.f32.mrf.mxu2 }
  0xa8   : > { %v472_v32 = vmul.f32 %v1168_v19, %v442_v30  ;;  %v516_v33 = vpack.c.bf16 %v499_v29, %v498_v28 }
  0xa9   : > { %v420_v34 = vpop.f32.mrf.mxu0 }
  0xaa   : > { %v491_v35 = vadd.f32 %v1170_v20, %v472_v32  ;;  %971 = vmatmul.msk.bf16.vlgmr.msra.gmra.mxu1 %vm378_vm0, %v516_v33  ;;  %v463_v38 = vmul.f32 %v1168_v19, %v420_v34 }
  0xac   : > { %v509_v37 = vmax.f32 %v491_v35, 0.0  ;;  %v482_v42 = vadd.f32 %v1170_v20, %v463_v38 }
  0xae   : > { %v521_v39 = vpack.c.bf16 %v509_v37, %v508_v36  ;;  %v500_v46 = vmax.f32 %v482_v42, 0.0 }
  0xaf   : > { %v445_v40 = vpop.f32.mrf.mxu2 }
  0xb0   : > { %976 = vmatmul.msk.bf16.vlgmr.msra.gmra.mxu3 %vm378_vm0, %v521_v39  ;;  %v473_v44 = vmul.f32 %v1168_v19, %v445_v40  ;;  %v1220_v39 = vld [vmem:[%s1296_s4] ss:$0 sm:$0xff] }
  0xb1   : > { %v422_v41 = vpop.f32.mrf.mxu0 }
  0xb2   : > { %v464_v43 = vmul.f32 %v1168_v19, %v422_v41  ;;  %v492_v49 = vadd.f32 %v1170_v20, %v473_v44 }
  0xb4   : > { %v483_v45 = vadd.f32 %v1170_v20, %v464_v43  ;;  %v510_v54 = vmax.f32 %v492_v49, 0.0 }
  0xb6   : > { %v501_v47 = vmax.f32 %v483_v45, 0.0 }
  0xb7   : > { %v447_v48 = vpop.f32.mrf.mxu2 }
  0xb8   : > { %v474_v50 = vmul.f32 %v1168_v19, %v447_v48  ;;  %v517_v51 = vpack.c.bf16 %v501_v47, %v500_v46 }
  0xb9   : > { %v425_v52 = vpop.f32.mrf.mxu0 }
  0xba   : > { %v493_v53 = vadd.f32 %v1170_v20, %v474_v50  ;;  %972 = vmatmul.msk.bf16.gmra.mxu1 %vm378_vm0, %v517_v51  ;;  %v465_v56 = vmul.f32 %v1168_v19, %v425_v52 }
  0xbc   : > { %v511_v55 = vmax.f32 %v493_v53, 0.0  ;;  %v484_v60 = vadd.f32 %v1170_v20, %v465_v56 }
  0xbe   : > { %v522_v57 = vpack.c.bf16 %v511_v55, %v510_v54  ;;  %v502_v0 = vmax.f32 %v484_v60, 0.0 }
  0xbf   : > { %v450_v58 = vpop.f32.mrf.mxu2 }
  0xc0   : > { %977 = vmatmul.msk.bf16.gmra.mxu3 %vm378_vm0, %v522_v57  ;;  %v475_v62 = vmul.f32 %v1168_v19, %v450_v58 }
  0xc1   : > { %v427_v59 = vpop.f32.mrf.mxu0 }
  0xc2   : > { %v466_v61 = vmul.f32 %v1168_v19, %v427_v59  ;;  %v494_v3 = vadd.f32 %v1170_v20, %v475_v62 }
  0xc4   : > { %v485_v63 = vadd.f32 %v1170_v20, %v466_v61  ;;  %v512_v8 = vmax.f32 %v494_v3, 0.0 }
  0xc6   : > { %v503_v1 = vmax.f32 %v485_v63, 0.0 }
  0xc7   : > { %v452_v2 = vpop.f32.mrf.mxu2 }
  0xc8   : > { %v476_v4 = vmul.f32 %v1168_v19, %v452_v2  ;;  %v518_v5 = vpack.c.bf16 %v503_v1, %v502_v0 }
  0xc9   : > { %v430_v6 = vpop.f32.mrf.mxu0 }
  0xca   : > { %v495_v7 = vadd.f32 %v1170_v20, %v476_v4  ;;  %973 = vmatmul.msk.bf16.gmra.mxu1 %vm378_vm0, %v518_v5  ;;  %v467_v10 = vmul.f32 %v1168_v19, %v430_v6 }
  0xcc   : > { %v513_v9 = vmax.f32 %v495_v7, 0.0  ;;  %v486_v14 = vadd.f32 %v1170_v20, %v467_v10 }
  0xce   : > { %v523_v11 = vpack.c.bf16 %v513_v9, %v512_v8  ;;  %v504_v18 = vmax.f32 %v486_v14, 0.0 }
  0xcf   : > { %v455_v12 = vpop.f32.mrf.mxu2 }
  0xd0   : > { %978 = vmatmul.msk.bf16.gmra.mxu3 %vm378_vm0, %v523_v11  ;;  %v477_v16 = vmul.f32 %v1168_v19, %v455_v12 }
  0xd1   : > { %v432_v13 = vpop.f32.mrf.mxu0 }
  0xd2   : > { %v468_v15 = vmul.f32 %v1168_v19, %v432_v13  ;;  %v496_v23 = vadd.f32 %v1170_v20, %v477_v16 }
  0xd4   : > { %v487_v17 = vadd.f32 %v1170_v20, %v468_v15  ;;  %v514_v29 = vmax.f32 %v496_v23, 0.0 }
  0xd6   : > { %v505_v21 = vmax.f32 %v487_v17, 0.0 }
  0xd7   : > { %v457_v22 = vpop.f32.mrf.mxu2 }
  0xd8   : > { %v478_v24 = vmul.f32 %v1168_v19, %v457_v22  ;;  %v519_v25 = vpack.c.bf16 %v505_v21, %v504_v18 }
  0xd9   : > { %v435_v26 = vpop.f32.mrf.mxu0 }
  0xda   : > { %v497_v27 = vadd.f32 %v1170_v20, %v478_v24  ;;  %v469_v28 = vmul.f32 %v1168_v19, %v435_v26  ;;  %974 = vmatmul.msk.bf16.gmra.mxu1 %vm378_vm0, %v519_v25 }
  0xdc   : > { %v515_v30 = vmax.f32 %v497_v27, 0.0  ;;  %v488_v31 = vadd.f32 %v1170_v20, %v469_v28 }
  0xde   : > { %v524_v32 = vpack.c.bf16 %v515_v30, %v514_v29  ;;  %v506_v36 = vmax.f32 %v488_v31, 0.0 }
  0xe0   : > { %979 = vmatmul.msk.bf16.gmra.mxu3 %vm378_vm0, %v524_v32 }
  0xe1   : > { %v437_v33 = vpop.f32.mrf.mxu0 }
  0xe2   : > { %v470_v34 = vmul.f32 %v1168_v19, %v437_v33 }
  0xe4   : > { %v489_v35 = vadd.f32 %v1170_v20, %v470_v34 }
  0xe6   : > { %v507_v37 = vmax.f32 %v489_v35, 0.0 }
  0xe8   : > { %v520_v38 = vpack.c.bf16 %v507_v37, %v506_v36 }
  0xea   : > { %975 = vmatmul.msk.bf16.gmra.mxu1 %vm378_vm0, %v520_v38 }
 0x127   : > { %v597_v40 = vpop.f32.mrf.mxu1 }
 0x128   : > { %v598_v41 = vadd.f32 %v1220_v39, %v597_v40 }
 0x12a   : > { %v980_v42 = vadd.f32 -0.01, %v598_v41  ;;  %vm678_vm1 = vcmp.lt.f32.partialorder %v598_v41, -0.01  ;;  %v696_v43 = vadd.f32 0.01, %v598_v41 }
 0x12b   : > { %vm642_vm2 = vcmp.gt.f32.partialorder %v598_v41, 0.01 }
 0x12c   : > { %v714_v19 = vsel %vm678_vm1, %v696_v43, 0.0 }
 0x12d   : > { %v732_v20 = vsel %vm642_vm2, %v980_v42, %v714_v19 }
 0x12e   : > { %v750_v44 = vpack.c.bf16 %v732_v20, %v732_v20 }
 0x12f   : > { %v599_v45 = vpop.f32.mrf.mxu1 }
 0x130   : > { %v600_v46 = vadd.f32 %v1220_v39, %v599_v45  ;;  %769 = vst.msk [vmem:[%s1228_s30] sm:$0xf] %vm768_vm3, %v750_v44 }
 0x132   : > { %v981_v47 = vadd.f32 -0.01, %v600_v46  ;;  %vm679_vm4 = vcmp.lt.f32.partialorder %v600_v46, -0.01  ;;  %v697_v48 = vadd.f32 0.01, %v600_v46 }
 0x133   : > { %v622_v49 = vpop.f32.mrf.mxu3  ;;  %vm643_vm5 = vcmp.gt.f32.partialorder %v600_v46, 0.01 }
 0x134   : > { %v623_v50 = vadd.f32 %v1220_v39, %v622_v49  ;;  %v715_v51 = vsel %vm679_vm4, %v697_v48, 0.0 }
 0x135   : > { %v733_v52 = vsel %vm643_vm5, %v981_v47, %v715_v51 }
 0x136   : > { %v990_v53 = vadd.f32 -0.01, %v623_v50  ;;  %vm688_vm6 = vcmp.lt.f32.partialorder %v623_v50, -0.01  ;;  %v751_v54 = vpack.c.bf16 %v733_v52, %v733_v52  ;;  %v706_v55 = vadd.f32 0.01, %v623_v50 }
 0x137   : > { %v602_v56 = vpop.f32.mrf.mxu1  ;;  %vm652_vm7 = vcmp.gt.f32.partialorder %v623_v50, 0.01 }
 0x138   : > { %v603_v57 = vadd.f32 %v1220_v39, %v602_v56  ;;  %770 = vst.msk [vmem:[%s1228_s30 + $0x4] sm:$0xf] %vm768_vm3, %v751_v54  ;;  %v724_v58 = vsel %vm688_vm6, %v706_v55, 0.0 }
 0x139   : > { %v742_v59 = vsel %vm652_vm7, %v990_v53, %v724_v58 }
 0x13a   : > { %v982_v60 = vadd.f32 -0.01, %v603_v57  ;;  %vm680_vm8 = vcmp.lt.f32.partialorder %v603_v57, -0.01  ;;  %v760_v61 = vpack.c.bf16 %v742_v59, %v742_v59  ;;  %v698_v62 = vadd.f32 0.01, %v603_v57 }
 0x13b   : > { %v624_v63 = vpop.f32.mrf.mxu3  ;;  %vm644_vm9 = vcmp.gt.f32.partialorder %v603_v57, 0.01 }
 0x13c   : > { %v625_v0 = vadd.f32 %v1220_v39, %v624_v63  ;;  %779 = vst.msk [vmem:[%s1228_s30 + $0x28] sm:$0xf] %vm768_vm3, %v760_v61  ;;  %v716_v1 = vsel %vm680_vm8, %v698_v62, 0.0 }
 0x13d   : > { %v734_v2 = vsel %vm644_vm9, %v982_v60, %v716_v1 }
 0x13e   : > { %v991_v3 = vadd.f32 -0.01, %v625_v0  ;;  %vm689_vm10 = vcmp.lt.f32.partialorder %v625_v0, -0.01  ;;  %v752_v4 = vpack.c.bf16 %v734_v2, %v734_v2  ;;  %v707_v5 = vadd.f32 0.01, %v625_v0 }
 0x13f   : > { %v604_v6 = vpop.f32.mrf.mxu1  ;;  %vm653_vm11 = vcmp.gt.f32.partialorder %v625_v0, 0.01 }
 0x140   : > { %v605_v7 = vadd.f32 %v1220_v39, %v604_v6  ;;  %771 = vst.msk [vmem:[%s1228_s30 + $0x8] sm:$0xf] %vm768_vm3, %v752_v4  ;;  %v725_v8 = vsel %vm689_vm10, %v707_v5, 0.0 }
 0x141   : > { %v743_v9 = vsel %vm653_vm11, %v991_v3, %v725_v8 }
 0x142   : > { %v983_v10 = vadd.f32 -0.01, %v605_v7  ;;  %vm681_vm12 = vcmp.lt.f32.partialorder %v605_v7, -0.01  ;;  %v761_v11 = vpack.c.bf16 %v743_v9, %v743_v9  ;;  %v699_v12 = vadd.f32 0.01, %v605_v7 }
 0x143   : > { %v627_v13 = vpop.f32.mrf.mxu3  ;;  %vm645_vm13 = vcmp.gt.f32.partialorder %v605_v7, 0.01 }
 0x144   : > { %v628_v14 = vadd.f32 %v1220_v39, %v627_v13  ;;  %780 = vst.msk [vmem:[%s1228_s30 + $0x2c] sm:$0xf] %vm768_vm3, %v761_v11  ;;  %v717_v15 = vsel %vm681_vm12, %v699_v12, 0.0 }
 0x145   : > { %v735_v16 = vsel %vm645_vm13, %v983_v10, %v717_v15 }
 0x146   : > { %v992_v17 = vadd.f32 -0.01, %v628_v14  ;;  %vm690_vm14 = vcmp.lt.f32.partialorder %v628_v14, -0.01  ;;  %v753_v18 = vpack.c.bf16 %v735_v16, %v735_v16  ;;  %v708_v21 = vadd.f32 0.01, %v628_v14 }
 0x147   : > { %v607_v22 = vpop.f32.mrf.mxu1  ;;  %vm654_vm15 = vcmp.gt.f32.partialorder %v628_v14, 0.01 }
 0x148   : > { %v608_v23 = vadd.f32 %v1220_v39, %v607_v22  ;;  %772 = vst.msk [vmem:[%s1228_s30 + $0xc] sm:$0xf] %vm768_vm3, %v753_v18  ;;  %v726_v24 = vsel %vm690_vm14, %v708_v21, 0.0 }
 0x149   : > { %v744_v25 = vsel %vm654_vm15, %v992_v17, %v726_v24 }
 0x14a   : > { %v984_v26 = vadd.f32 -0.01, %v608_v23  ;;  %vm682_vm0 = vcmp.lt.f32.partialorder %v608_v23, -0.01  ;;  %v762_v27 = vpack.c.bf16 %v744_v25, %v744_v25  ;;  %v700_v28 = vadd.f32 0.01, %v608_v23 }
 0x14b   : > { %v629_v29 = vpop.f32.mrf.mxu3  ;;  %vm646_vm1 = vcmp.gt.f32.partialorder %v608_v23, 0.01 }
 0x14c   : > { %v630_v30 = vadd.f32 %v1220_v39, %v629_v29  ;;  %781 = vst.msk [vmem:[%s1228_s30 + $0x30] sm:$0xf] %vm768_vm3, %v762_v27  ;;  %v718_v31 = vsel %vm682_vm0, %v700_v28, 0.0 }
 0x14d   : > { %v736_v32 = vsel %vm646_vm1, %v984_v26, %v718_v31 }
 0x14e   : > { %v993_v33 = vadd.f32 -0.01, %v630_v30  ;;  %vm691_vm2 = vcmp.lt.f32.partialorder %v630_v30, -0.01  ;;  %v754_v34 = vpack.c.bf16 %v736_v32, %v736_v32  ;;  %v709_v35 = vadd.f32 0.01, %v630_v30 }
 0x14f   : > { %v609_v36 = vpop.f32.mrf.mxu1  ;;  %vm655_vm4 = vcmp.gt.f32.partialorder %v630_v30, 0.01 }
 0x150   : > { %v610_v37 = vadd.f32 %v1220_v39, %v609_v36  ;;  %773 = vst.msk [vmem:[%s1228_s30 + $0x10] sm:$0xf] %vm768_vm3, %v754_v34  ;;  %v727_v38 = vsel %vm691_vm2, %v709_v35, 0.0 }
 0x151   : > { %v745_v40 = vsel %vm655_vm4, %v993_v33, %v727_v38 }
 0x152   : > { %v985_v41 = vadd.f32 -0.01, %v610_v37  ;;  %vm683_vm5 = vcmp.lt.f32.partialorder %v610_v37, -0.01  ;;  %v763_v42 = vpack.c.bf16 %v745_v40, %v745_v40  ;;  %v701_v43 = vadd.f32 0.01, %v610_v37 }
 0x153   : > { %v632_v19 = vpop.f32.mrf.mxu3  ;;  %vm647_vm6 = vcmp.gt.f32.partialorder %v610_v37, 0.01 }
 0x154   : > { %v633_v20 = vadd.f32 %v1220_v39, %v632_v19  ;;  %782 = vst.msk [vmem:[%s1228_s30 + $0x34] sm:$0xf] %vm768_vm3, %v763_v42  ;;  %v719_v44 = vsel %vm683_vm5, %v701_v43, 0.0 }
 0x155   : > { %v737_v45 = vsel %vm647_vm6, %v985_v41, %v719_v44 }
 0x156   : > { %v994_v46 = vadd.f32 -0.01, %v633_v20  ;;  %vm692_vm7 = vcmp.lt.f32.partialorder %v633_v20, -0.01  ;;  %v755_v47 = vpack.c.bf16 %v737_v45, %v737_v45  ;;  %v710_v48 = vadd.f32 0.01, %v633_v20 }
 0x157   : > { %v612_v49 = vpop.f32.mrf.mxu1  ;;  %vm656_vm8 = vcmp.gt.f32.partialorder %v633_v20, 0.01 }
 0x158   : > { %v613_v50 = vadd.f32 %v1220_v39, %v612_v49  ;;  %774 = vst.msk [vmem:[%s1228_s30 + $0x14] sm:$0xf] %vm768_vm3, %v755_v47  ;;  %v728_v51 = vsel %vm692_vm7, %v710_v48, 0.0 }
 0x159   : > { %v746_v52 = vsel %vm656_vm8, %v994_v46, %v728_v51 }
 0x15a   : > { %v986_v53 = vadd.f32 -0.01, %v613_v50  ;;  %vm684_vm9 = vcmp.lt.f32.partialorder %v613_v50, -0.01  ;;  %v764_v54 = vpack.c.bf16 %v746_v52, %v746_v52  ;;  %v702_v55 = vadd.f32 0.01, %v613_v50 }
 0x15b   : > { %v634_v56 = vpop.f32.mrf.mxu3  ;;  %vm648_vm10 = vcmp.gt.f32.partialorder %v613_v50, 0.01 }
 0x15c   : > { %v635_v57 = vadd.f32 %v1220_v39, %v634_v56  ;;  %783 = vst.msk [vmem:[%s1228_s30 + $0x38] sm:$0xf] %vm768_vm3, %v764_v54  ;;  %v720_v58 = vsel %vm684_vm9, %v702_v55, 0.0 }
 0x15d   : > { %v738_v59 = vsel %vm648_vm10, %v986_v53, %v720_v58 }
 0x15e   : > { %v995_v60 = vadd.f32 -0.01, %v635_v57  ;;  %vm693_vm11 = vcmp.lt.f32.partialorder %v635_v57, -0.01  ;;  %v756_v61 = vpack.c.bf16 %v738_v59, %v738_v59  ;;  %v711_v62 = vadd.f32 0.01, %v635_v57 }
 0x15f   : > { %v614_v63 = vpop.f32.mrf.mxu1  ;;  %vm657_vm12 = vcmp.gt.f32.partialorder %v635_v57, 0.01 }
 0x160   : > { %v615_v0 = vadd.f32 %v1220_v39, %v614_v63  ;;  %775 = vst.msk [vmem:[%s1228_s30 + $0x18] sm:$0xf] %vm768_vm3, %v756_v61  ;;  %v729_v1 = vsel %vm693_vm11, %v711_v62, 0.0 }
 0x161   : > { %v747_v2 = vsel %vm657_vm12, %v995_v60, %v729_v1 }
 0x162   : > { %v987_v3 = vadd.f32 -0.01, %v615_v0  ;;  %vm685_vm13 = vcmp.lt.f32.partialorder %v615_v0, -0.01  ;;  %v765_v4 = vpack.c.bf16 %v747_v2, %v747_v2  ;;  %v703_v5 = vadd.f32 0.01, %v615_v0 }
 0x163   : > { %v637_v6 = vpop.f32.mrf.mxu3  ;;  %vm649_vm14 = vcmp.gt.f32.partialorder %v615_v0, 0.01 }
 0x164   : > { %v638_v7 = vadd.f32 %v1220_v39, %v637_v6  ;;  %784 = vst.msk [vmem:[%s1228_s30 + $0x3c] sm:$0xf] %vm768_vm3, %v765_v4  ;;  %v721_v8 = vsel %vm685_vm13, %v703_v5, 0.0 }
 0x165   : > { %v739_v9 = vsel %vm649_vm14, %v987_v3, %v721_v8 }
 0x166   : > { %v996_v10 = vadd.f32 -0.01, %v638_v7  ;;  %vm694_vm15 = vcmp.lt.f32.partialorder %v638_v7, -0.01  ;;  %v757_v11 = vpack.c.bf16 %v739_v9, %v739_v9  ;;  %v712_v12 = vadd.f32 0.01, %v638_v7 }
 0x167   : > { %v617_v13 = vpop.f32.mrf.mxu1  ;;  %vm658_vm0 = vcmp.gt.f32.partialorder %v638_v7, 0.01 }
 0x168   : > { %v618_v14 = vadd.f32 %v1220_v39, %v617_v13  ;;  %776 = vst.msk [vmem:[%s1228_s30 + $0x1c] sm:$0xf] %vm768_vm3, %v757_v11  ;;  %v730_v15 = vsel %vm694_vm15, %v712_v12, 0.0 }
 0x169   : > { %v748_v16 = vsel %vm658_vm0, %v996_v10, %v730_v15 }
 0x16a   : > { %v988_v17 = vadd.f32 -0.01, %v618_v14  ;;  %vm686_vm1 = vcmp.lt.f32.partialorder %v618_v14, -0.01  ;;  %v766_v18 = vpack.c.bf16 %v748_v16, %v748_v16  ;;  %v704_v21 = vadd.f32 0.01, %v618_v14 }
 0x16b   : > { %v639_v22 = vpop.f32.mrf.mxu3  ;;  %vm650_vm2 = vcmp.gt.f32.partialorder %v618_v14, 0.01 }
 0x16c   : > { %v640_v23 = vadd.f32 %v1220_v39, %v639_v22  ;;  %785 = vst.msk [vmem:[%s1228_s30 + $0x40] sm:$0xf] %vm768_vm3, %v766_v18  ;;  %v722_v24 = vsel %vm686_vm1, %v704_v21, 0.0 }
 0x16d   : > { %v740_v25 = vsel %vm650_vm2, %v988_v17, %v722_v24 }
 0x16e   : > { %v997_v26 = vadd.f32 -0.01, %v640_v23  ;;  %vm695_vm4 = vcmp.lt.f32.partialorder %v640_v23, -0.01  ;;  %v758_v27 = vpack.c.bf16 %v740_v25, %v740_v25  ;;  %v713_v28 = vadd.f32 0.01, %v640_v23 }
 0x16f   : > { %v619_v29 = vpop.f32.mrf.mxu1  ;;  %vm659_vm5 = vcmp.gt.f32.partialorder %v640_v23, 0.01 }
 0x170   : > { %v620_v30 = vadd.f32 %v1220_v39, %v619_v29  ;;  %777 = vst.msk [vmem:[%s1228_s30 + $0x20] sm:$0xf] %vm768_vm3, %v758_v27  ;;  %v731_v31 = vsel %vm695_vm4, %v713_v28, 0.0 }
 0x171   : > { %v749_v32 = vsel %vm659_vm5, %v997_v26, %v731_v31 }
 0x172   : > { %v989_v33 = vadd.f32 -0.01, %v620_v30  ;;  %vm687_vm6 = vcmp.lt.f32.partialorder %v620_v30, -0.01  ;;  %v767_v34 = vpack.c.bf16 %v749_v32, %v749_v32  ;;  %v705_v35 = vadd.f32 0.01, %v620_v30 }
 0x173   : > { %vm651_vm7 = vcmp.gt.f32.partialorder %v620_v30, 0.01 }
 0x174   : > { %786 = vst.msk [vmem:[%s1228_s30 + $0x44] sm:$0xf] %vm768_vm3, %v767_v34  ;;  %v723_v36 = vsel %vm687_vm6, %v705_v35, 0.0 }
 0x175   : > { %v741_v37 = vsel %vm651_vm7, %v989_v33, %v723_v36 }
 0x176   : > { %v759_v38 = vpack.c.bf16 %v741_v37, %v741_v37 }
 0x178   : > { %778 = vst.msk [vmem:[%s1228_s30 + $0x24] sm:$0xf] %vm768_vm3, %v759_v38 }
 0x179 PF: > { %s15_s20 = sadd.s32 1, %s1073_s20   ;;  %s1298_s18 = smov %s1069_s19 }
 0x17a   : > { %p12_p5 = scmp.ge.s32.totalorder %s15_s20, 4   ;;  %s1299_s19 = smov %s1301_s21 }
 0x17c   :  { %14 = sbr.rel (!%p12_p5) target bundleno = 2 (0x2), region = 73 }

// kernel: reverse.1
= control target key start
LH: loop header
LB: loop body
LE: loop exit
PB: predicated region body
PF: predicated region fallthrough
CT: control target
= control target key end

     0   :  { %s344_s0 = inlined_call_operand.vmem [shape: f32[2,32,16,7], index: 0, kind: input, shape index: {}]   ;;  %s345_s1 = inlined_call_operand.vmem [shape: f32[2,32,16,7], index: 1, kind: output, shape index: {}]  }
   0x1   :  { %v112_v0 = vld [vmem:[%s344_s0 + $0x60] sm:$0xff]  ;;  %v113_v1 = vld [vmem:[%s344_s0 + $0xd0] sm:$0xff]  ;;  %v138_v14 = vld [vmem:[%s344_s0 + $0x68] sm:$0xff] }
   0x2   :  { %v115_v2 = vld [vmem:[%s344_s0 + $0x50] sm:$0xff]  ;;  %4 = vst [vmem:[%s345_s1] sm:$0xff] %v112_v0  ;;  %v117_v3 = vld [vmem:[%s344_s0 + $0xc0] sm:$0xff]  ;;  %v140_v15 = vld [vmem:[%s344_s0 + $0xd8] sm:$0xff] }
   0x3   :  { %114 = vst [vmem:[%s345_s1 + $0x70] sm:$0xff] %v113_v1  ;;  %v119_v4 = vld [vmem:[%s344_s0 + $0x40] sm:$0xff]  ;;  %v121_v5 = vld [vmem:[%s344_s0 + $0xb0] sm:$0xff]  ;;  %v142_v16 = vld [vmem:[%s344_s0 + $0x58] sm:$0xff] }
   0x4   :  { %116 = vst [vmem:[%s345_s1 + $0x10] sm:$0xff] %v115_v2  ;;  %v123_v6 = vld [vmem:[%s344_s0 + $0x30] sm:$0xff]  ;;  %v125_v7 = vld [vmem:[%s344_s0 + $0xa0] sm:$0xff]  ;;  %v144_v17 = vld [vmem:[%s344_s0 + $0xc8] sm:$0xff] }
   0x5   :  { %118 = vst [vmem:[%s345_s1 + $0x80] sm:$0xff] %v117_v3  ;;  %v127_v8 = vld [vmem:[%s344_s0 + $0x20] sm:$0xff]  ;;  %v129_v9 = vld [vmem:[%s344_s0 + $0x90] sm:$0xff]  ;;  %v146_v18 = vld [vmem:[%s344_s0 + $0x48] sm:$0xff] }
   0x6   :  { %120 = vst [vmem:[%s345_s1 + $0x20] sm:$0xff] %v119_v4  ;;  %v131_v10 = vld [vmem:[%s344_s0 + $0x10] sm:$0xff]  ;;  %v133_v11 = vld [vmem:[%s344_s0 + $0x80] sm:$0xff]  ;;  %v148_v19 = vld [vmem:[%s344_s0 + $0xb8] sm:$0xff] }
   0x7   :  { %122 = vst [vmem:[%s345_s1 + $0x90] sm:$0xff] %v121_v5  ;;  %v49_v12 = vld [vmem:[%s344_s0] sm:$0xff]  ;;  %v136_v13 = vld [vmem:[%s344_s0 + $0x70] sm:$0xff]  ;;  %v150_v20 = vld [vmem:[%s344_s0 + $0x38] sm:$0xff] }
   0x8   :  { %124 = vst [vmem:[%s345_s1 + $0x30] sm:$0xff] %v123_v6  ;;  %v152_v21 = vld [vmem:[%s344_s0 + $0xa8] sm:$0xff]  ;;  %v156_v23 = vld [vmem:[%s344_s0 + $0x98] sm:$0xff] }
   0x9   :  { %126 = vst [vmem:[%s345_s1 + $0xa0] sm:$0xff] %v125_v7  ;;  %v154_v22 = vld [vmem:[%s344_s0 + $0x28] sm:$0xff]  ;;  %v158_v24 = vld [vmem:[%s344_s0 + $0x18] sm:$0xff] }
   0xa   :  { %128 = vst [vmem:[%s345_s1 + $0x40] sm:$0xff] %v127_v8  ;;  %v160_v25 = vld [vmem:[%s344_s0 + $0x88] sm:$0xff]  ;;  %v164_v27 = vld [vmem:[%s344_s0 + $0x78] sm:$0xff] }
   0xb   :  { %130 = vst [vmem:[%s345_s1 + $0xb0] sm:$0xff] %v129_v9  ;;  %v162_v26 = vld [vmem:[%s344_s0 + $0x8] sm:$0xff] }
   0xc   :  { %132 = vst [vmem:[%s345_s1 + $0x50] sm:$0xff] %v131_v10 }
   0xd   :  { %134 = vst [vmem:[%s345_s1 + $0xc0] sm:$0xff] %v133_v11 }
   0xe   :  { %135 = vst [vmem:[%s345_s1 + $0x60] sm:$0xff] %v49_v12 }
   0xf   :  { %137 = vst [vmem:[%s345_s1 + $0xd0] sm:$0xff] %v136_v13 }
  0x10   :  { %139 = vst [vmem:[%s345_s1 + $0x8] sm:$0xff] %v138_v14 }
  0x11   :  { %141 = vst [vmem:[%s345_s1 + $0x78] sm:$0xff] %v140_v15 }
  0x12   :  { %143 = vst [vmem:[%s345_s1 + $0x18] sm:$0xff] %v142_v16 }
  0x13   :  { %145 = vst [vmem:[%s345_s1 + $0x88] sm:$0xff] %v144_v17 }
  0x14   :  { %147 = vst [vmem:[%s345_s1 + $0x28] sm:$0xff] %v146_v18 }
  0x15   :  { %149 = vst [vmem:[%s345_s1 + $0x98] sm:$0xff] %v148_v19 }
  0x16   :  { %151 = vst [vmem:[%s345_s1 + $0x38] sm:$0xff] %v150_v20 }
  0x17   :  { %153 = vst [vmem:[%s345_s1 + $0xa8] sm:$0xff] %v152_v21 }
  0x18   :  { %155 = vst [vmem:[%s345_s1 + $0x48] sm:$0xff] %v154_v22 }
  0x19   :  { %157 = vst [vmem:[%s345_s1 + $0xb8] sm:$0xff] %v156_v23 }
  0x1a   :  { %159 = vst [vmem:[%s345_s1 + $0x58] sm:$0xff] %v158_v24 }
  0x1b   :  { %161 = vst [vmem:[%s345_s1 + $0xc8] sm:$0xff] %v160_v25 }
  0x1c   :  { %163 = vst [vmem:[%s345_s1 + $0x68] sm:$0xff] %v162_v26 }
  0x1d   :  { %165 = vst [vmem:[%s345_s1 + $0xd8] sm:$0xff] %v164_v27 }

// kernel: block_forward.5
= control target key start
LH: loop header
LB: loop body
LE: loop exit
PB: predicated region body
PF: predicated region fallthrough
CT: control target
= control target key end

     0   :  { %11 = vsyncpa [#allocation3], 0  ;;  %s7816_s0 = inlined_call_operand.vmem [shape: f32[2,256,32], index: 0, kind: input, shape index: {}]   ;;  %s7817_s1 = inlined_call_operand.vmem [shape: bf16[2,256,32], index: 1, kind: input, shape index: {}]   ;;  %s7818_s2 = inlined_call_operand.vmem [shape: f32[5,32], index: 2, kind: input, shape index: {}]   ;;  %s7819_s3 = inlined_call_operand.vmem [shape: f32[2,2,128], index: 3, kind: input, shape index: {}]   ;;  %s7820_s4 = inlined_call_operand.vmem [shape: bf16[32,128], index: 4, kind: input, shape index: {}]   ;;  %s7821_s5 = inlined_call_operand.vmem [shape: bf16[128,32], index: 5, kind: input, shape index: {}]   ;;  %s7822_s6 = inlined_call_operand.hbm [shape: f32[2,256,32], index: 6, kind: output, shape index: {}]  }
   0x1   :  { %13 = vsyncpa [#allocation3 + $0x1], 0  ;;  %s4647_s21 = smov 0   ;;  %s4649_s22 = smov 0  }
   0x2   :  { %s4651_s23 = smov 0   ;;  %s4653_s24 = smov 0  }
   0x3   :  { %s4655_s25 = smov 0   ;;  %s4657_s26 = smov 0  }
   0x4 LB: > { %s4049_s27 = sadd.s32 4294967295, %s4607_s26   ;;  %s4050_s28 = sadd.s32 4294967294, %s4607_s26   ;;  %s4607_s26 = sphi %s4657_s26, %s19_s26   ;;  %s4603_s25 = sphi %s4655_s25, %s8035_s25   ;;  %s4599_s24 = sphi %s4653_s24, %s8034_s24   ;;  %s4595_s23 = sphi %s4651_s23, %s8033_s23   ;;  %s4591_s22 = sphi %s4649_s22, %s8032_s22   ;;  %s4587_s21 = sphi %s4647_s21, %s8031_s21  }
   0x5   : > { %s31_s29 = sadd.s32 1, %s4603_s25  ;;  %s185_s30 = sadd.s32 1, %s4595_s23 }
   0x6   : > { %p33_p0 = scmp.ge.s32.totalorder %s31_s29, 2  ;;  %p195_p1 = scmp.ne.s32.totalorder %s4595_s23, %s4591_s22 }
   0x7   : > { %p196_p2 = scmp.eq.s32.totalorder %s4049_s27, 1  ;;  %p201_p3 = scmp.ne.s32.totalorder %s4591_s22, %s4587_s21 }
   0x8   : > { %s8037_s29 = smov (%p33_p0, %s31_s29), 0  ;;  %p202_p5 = scmp.eq.s32.totalorder %s4050_s28, 1 }
   0x9   : > { %p4687_p4 = por %p196_p2, %p195_p1  ;;  %s180_s8 = ssub.s32 %s4603_s25, %s8037_s29 }
   0xa   : > { %p4053_p6 = scmp.ge.s32.totalorder %s4607_s26, 1  ;;  %p183_p7 = scmp.eq.s32.totalorder %s180_s8, 0 }
   0xb   : > { %p4694_p8 = por %p202_p5, %p201_p3  ;;  %p262_p9 = scmp.lt.s32.totalorder %s4607_s26, 3 }
   0xc   : > { %s4700_s10 = scalar_select %p183_p7, %s4595_s23, %s185_s30  }
   0xd   : > { %p263_p10 = pnand %p4053_p6, %p262_p9 }
   0xf   : > { %266 = sbr.rel (%p263_p10) target bundleno = 1421 (0x58d), region = 44 }
  0x14   : > { %p310_p11 = scmp.lt.s32.totalorder %s4599_s24, 1  ;;  %vm433_vm0 = vcmask 261120   ;;  %v4609_v24 = vmov 32.0   ;;  %s4165_s14 = sshll.u32 %s4599_s24, 8 }
  0x15   : > { %4313 = vrcp.f32 %v4609_v24  ;;  %s3936_s18 = scalar_lea.hbm %s7822_s6, %s4165_s14  ;;  %s4549_s8 = scalar_lea.hbm %s7822_s6, 512 }
  0x16   : > { %s4704_s11 = scalar_select %p310_p11, %s4599_s24, 1 }
  0x18   : > { %s4153_s12 = sshll.u32 %s4704_s11, 8  ;;  %s4154_s16 = sshll.u32 %s4704_s11, 7 }
  0x19   : > { %s4710_s15 = scalar_lea.vmem %s7816_s0, %s4153_s12  ;;  %s4934_s19 = scalar_lea.vmem %s7817_s1, %s4154_s16 }
  0x1a   : > { %v4713_v0 = vld [vmem:[%s4710_s15 + $0x10] sm:$0xff]  ;;  %v4716_v1 = vld [vmem:[%s4710_s15] sm:$0xff]  ;;  %v4728_v6 = vld [vmem:[%s4710_s15 + $0x18] sm:$0xff]  ;;  %s4059_s16 = sshll.u32 %s4704_s11, 1  ;;  %s3939_s11 = sshll.u32 %s3936_s18, 4  ;;  %s3940_s11 = int_to_ptr.hbm [resolvable:$true] %s3939_s11 }
  0x1b   : > { %v440_v2 = vsel %vm433_vm0, %v4713_v0, 0.0  ;;  %v434_v3 = vsel %vm433_vm0, %v4716_v1, 0.0  ;;  %v4723_v4 = vld [vmem:[%s4710_s15 + $0x20] sm:$0xff]  ;;  %v4731_v7 = vld [vmem:[%s4710_s15 + $0x8] sm:$0xff]  ;;  %v443_v9 = vsel %vm433_vm0, %v4728_v6, 0.0  ;;  %v4746_v13 = vld [vmem:[%s4710_s15 + $0x38] sm:$0xff]  ;;  %v4314_v25 = vpop.eup %4313  ;;  %s332_s20 = scalar_lea.vmem %s7819_s3, %s4059_s16 }
  0x1c   : > { %441 = vadd.xlane.f32.xlu1 %v440_v2  ;;  %435 = vadd.xlane.f32.xlu0 %v434_v3  ;;  %v446_v5 = vsel %vm433_vm0, %v4723_v4, 0.0  ;;  %v4734_v8 = vld [vmem:[%s4710_s15 + $0x28] sm:$0xff]  ;;  %v437_v10 = vsel %vm433_vm0, %v4731_v7, 0.0  ;;  %v4749_v14 = vld [vmem:[%s4710_s15 + $0x30] sm:$0xff]  ;;  %v455_v16 = vsel %vm433_vm0, %v4746_v13, 0.0  ;;  %v4758_v18 = vld [vmem:[%s4710_s15 + $0x40] sm:$0xff]  ;;  %vm535_vm1 = vweird.f32 %v4314_v25 }
  0x1d   : > { %447 = vadd.xlane.f32.xlu2 %v446_v5  ;;  %v449_v11 = vsel %vm433_vm0, %v4734_v8, 0.0  ;;  %v4743_v12 = vld [vmem:[%s4710_s15 + $0x48] sm:$0xff]  ;;  %v452_v17 = vsel %vm433_vm0, %v4749_v14, 0.0  ;;  %v4761_v19 = vld [vmem:[%s4710_s15 + $0x58] sm:$0xff]  ;;  %v458_v20 = vsel %vm433_vm0, %v4758_v18, 0.0  ;;  %v4768_v22 = vld [vmem:[%s4710_s15 + $0x60] sm:$0xff] }
  0x1e   : > { %v461_v15 = vsel %vm433_vm0, %v4743_v12, 0.0  ;;  %v467_v21 = vsel %vm433_vm0, %v4761_v19, 0.0  ;;  %v470_v23 = vsel %vm433_vm0, %v4768_v22, 0.0  ;;  %v531_v26 = vmul.f32 32.0, %v4314_v25  ;;  %v4784_v42 = vld [vmem:[%s4710_s15 + $0x68] sm:$0xff]  ;;  %v4802_v52 = vld [vmem:[%s4710_s15 + $0x98] sm:$0xff] }
  0x1f   : > { %v473_v46 = vsel %vm433_vm0, %v4784_v42, 0.0  ;;  %v4805_v53 = vld [vmem:[%s4710_s15 + $0x70] sm:$0xff]  ;;  %v491_v57 = vsel %vm433_vm0, %v4802_v52, 0.0  ;;  %v4827_v63 = vld [vmem:[%s4710_s15 + $0x80] sm:$0xff]  ;;  %s4543_s27 = sshra.s32 %s3940_s11, 4  ;;  %s4544_s27 = int_to_ptr.hbm [resolvable:$true] %s4543_s27 }
  0x20   : > { %v532_v27 = vsub.f32 1.0, %v531_v26  ;;  %v4808_v54 = vld [vmem:[%s4710_s15 + $0x50] sm:$0xff]  ;;  %v476_v58 = vsel %vm433_vm0, %v4805_v53, 0.0  ;;  %s4545_s28 = scalar_lea.hbm %s4544_s27, 256  ;;  %p4550_p1 = scmp.lt.s32.totalorder %s4544_s27, %s7822_s6 }
  0x21   : > { %v464_v59 = vsel %vm433_vm0, %v4808_v54, 0.0  ;;  %p4546_p12 = scmp.ne.s32.totalorder %s4544_s27, %s4545_s28  ;;  %p4551_p2 = scmp.lt.s32.totalorder %s4549_s8, %s4545_s28 }
  0x22   : > { %v533_v28 = vmul.f32 %v4314_v25, %v532_v27 }
  0x23   : > { %p4547_p13 = pnand %p4546_p12, %p4687_p4  ;;  %p4552_p3 = por %p4551_p2, %p4550_p1 }
  0x24   : > { %444 = vadd.xlane.f32.xlu1 %v443_v9  ;;  %438 = vadd.xlane.f32.xlu0 %v437_v10  ;;  %v534_v29 = vadd.f32 %v4314_v25, %v533_v28  ;;  %v482_v10 = vsel %vm433_vm0, %v4827_v63, 0.0 }
  0x25   : > { %450 = vadd.xlane.f32.xlu2 %v449_v11  ;;  %p4548_p0 = pneg %p4547_p13 }
  0x26   : > { %v4772_v30 = vsel %vm535_vm1, %v4314_v25, %v534_v29 }
  0x27   : > { %p4553_p5 = pnand %p4552_p3, %p4548_p0 }
  0x2c   : > { %462 = vadd.xlane.f32.xlu1 %v461_v15  ;;  %456 = vadd.xlane.f32.xlu0 %v455_v16 }
  0x2d   : > { %453 = vadd.xlane.f32.xlu2 %v452_v17 }
  0x34   : > { %459 = vadd.xlane.f32.xlu0 %v458_v20 }
  0x35   : > { %468 = vadd.xlane.f32.xlu2 %v467_v21  ;;  %v4843_v21 = vld [vmem:[%s4710_s15 + $0xa8] sm:$0xff] }
  0x36   : > { %v497_v26 = vsel %vm433_vm0, %v4843_v21, 0.0 }
  0x3d   : > { %471 = vadd.xlane.f32.xlu2 %v470_v23  ;;  %v4846_v23 = vld [vmem:[%s4710_s15 + $0x78] sm:$0xff] }
  0x3e   : > { %v479_v29 = vsel %vm433_vm0, %v4846_v23, 0.0 }
  0x8f   : > { %v442_v31 = vpop.xlane.xlu1 %441  ;;  %v436_v32 = vpop.xlane.xlu0 %435 }
  0x90   : > { %v537_v33 = vmul.f32 %v4772_v30, %v436_v32  ;;  %v448_v36 = vpop.xlane.xlu2 %447  ;;  %v539_v55 = vmul.f32 %v4772_v30, %v442_v31 }
  0x91   : > { %v541_v51 = vmul.f32 %v4772_v30, %v448_v36 }
  0x92   : > { %v4776_v34 = vsub.f32 %v4716_v1, %v537_v33  ;;  %v4821_v60 = vsub.f32 %v4713_v0, %v539_v55 }
  0x93   : > { %v4812_v56 = vsub.f32 %v4723_v4, %v541_v51 }
  0x94   : > { %v601_v35 = vmul.f32 %v4776_v34, %v4776_v34  ;;  %v603_v3 = vmul.f32 %v4821_v60, %v4821_v60 }
  0x95   : > { %v605_v62 = vmul.f32 %v4812_v56, %v4812_v56 }
  0x96   : > { %v633_v37 = vsel %vm433_vm0, %v601_v35, 0.0  ;;  %v639_v15 = vsel %vm433_vm0, %v603_v3, 0.0  ;;  %v4865_v35 = vld [vmem:[%s4710_s15 + $0x88] sm:$0xff] }
  0x97   : > { %v445_v38 = vpop.xlane.xlu1 %444  ;;  %634 = vadd.xlane.f32.xlu0 %v633_v37  ;;  %v439_v39 = vpop.xlane.xlu0 %438  ;;  %v645_v9 = vsel %vm433_vm0, %v605_v62, 0.0 }
  0x98   : > { %v540_v40 = vmul.f32 %v4772_v30, %v445_v38  ;;  %v538_v41 = vmul.f32 %v4772_v30, %v439_v39  ;;  %v451_v50 = vpop.xlane.xlu2 %450  ;;  %v485_v39 = vsel %vm433_vm0, %v4865_v35, 0.0 }
  0x99   : > { %v542_v61 = vmul.f32 %v4772_v30, %v451_v50 }
  0x9a   : > { %v4787_v43 = vsub.f32 %v4728_v6, %v540_v40  ;;  %v4790_v44 = vsub.f32 %v4731_v7, %v538_v41 }
  0x9b   : > { %v4832_v5 = vsub.f32 %v4734_v8, %v542_v61 }
  0x9c   : > { %v604_v45 = vmul.f32 %v4787_v43, %v4787_v43  ;;  %v602_v47 = vmul.f32 %v4790_v44, %v4790_v44 }
  0x9d   : > { %v606_v20 = vmul.f32 %v4832_v5, %v4832_v5 }
  0x9e   : > { %v642_v48 = vsel %vm433_vm0, %v604_v45, 0.0  ;;  %v636_v49 = vsel %vm433_vm0, %v602_v47, 0.0  ;;  %v4878_v47 = vld [vmem:[%s4710_s15 + $0xb0] sm:$0xff] }
  0x9f   : > { %643 = vadd.xlane.f32.xlu2 %v642_v48  ;;  %474 = vadd.xlane.f32.xlu0 %v473_v46  ;;  %v463_v11 = vpop.xlane.xlu1 %462  ;;  %v648_v28 = vsel %vm433_vm0, %v606_v20, 0.0  ;;  %v457_v41 = vpop.xlane.xlu0 %456  ;;  %v500_v55 = vsel %vm433_vm0, %v4878_v47, 0.0 }
  0xa0   : > { %637 = vadd.xlane.f32.xlu1 %v636_v49  ;;  %v454_v2 = vpop.xlane.xlu2 %453  ;;  %v546_v17 = vmul.f32 %v4772_v30, %v463_v11  ;;  %v544_v48 = vmul.f32 %v4772_v30, %v457_v41  ;;  %v4882_v49 = vld [vmem:[%s4710_s15 + $0x90] sm:$0xff] }
  0xa1   : > { %v543_v16 = vmul.f32 %v4772_v30, %v454_v2 }
  0xa2   : > { %v4854_v27 = vsub.f32 %v4743_v12, %v546_v17  ;;  %v4914_v17 = vld [vmem:[%s4710_s15 + $0xb8] sm:$0xff] }
  0xa3   : > { %v4849_v25 = vsub.f32 %v4749_v14, %v543_v16  ;;  %v503_v20 = vsel %vm433_vm0, %v4914_v17, 0.0 }
  0xa4   : > { %v610_v32 = vmul.f32 %v4854_v27, %v4854_v27 }
  0xa5   : > { %v607_v33 = vmul.f32 %v4849_v25, %v4849_v25 }
  0xa6   : > { %v660_v37 = vsel %vm433_vm0, %v610_v32, 0.0 }
  0xa7   : > { %492 = vadd.xlane.f32.xlu2 %v491_v57  ;;  %477 = vadd.xlane.f32.xlu0 %v476_v58  ;;  %v651_v38 = vsel %vm433_vm0, %v607_v33, 0.0  ;;  %v488_v57 = vsel %vm433_vm0, %v4882_v49, 0.0  ;;  %v4893_v58 = vsub.f32 %v4746_v13, %v544_v48  ;;  %v460_v2 = vpop.xlane.xlu0 %459 }
  0xa8   : > { %465 = vadd.xlane.f32.xlu1 %v464_v59  ;;  %v469_v24 = vpop.xlane.xlu2 %468  ;;  %v545_v3 = vmul.f32 %v4772_v30, %v460_v2 }
  0xa9   : > { %v548_v31 = vmul.f32 %v4772_v30, %v469_v24  ;;  %v608_v59 = vmul.f32 %v4893_v58, %v4893_v58 }
  0xaa   : > { %v4908_v11 = vsub.f32 %v4758_v18, %v545_v3 }
  0xab   : > { %v4868_v36 = vsub.f32 %v4761_v19, %v548_v31  ;;  %v654_v62 = vsel %vm433_vm0, %v608_v59, 0.0 }
  0xad   : > { %v612_v46 = vmul.f32 %v4868_v36, %v4868_v36 }
  0xaf   : > { %646 = vadd.xlane.f32.xlu2 %v645_v9  ;;  %483 = vadd.xlane.f32.xlu0 %v482_v10  ;;  %v666_v51 = vsel %vm433_vm0, %v612_v46, 0.0  ;;  %v4903_v9 = vld [vmem:[%s4710_s15 + $0xa0] sm:$0xff] }
  0xb0   : > { %640 = vadd.xlane.f32.xlu1 %v639_v15  ;;  %v472_v40 = vpop.xlane.xlu2 %471  ;;  %v494_v10 = vsel %vm433_vm0, %v4903_v9, 0.0  ;;  %v609_v15 = vmul.f32 %v4908_v11, %v4908_v11 }
  0xb1   : > { %v549_v45 = vmul.f32 %v4772_v30, %v472_v40 }
  0xb2   : > { %v657_v16 = vsel %vm433_vm0, %v609_v15, 0.0 }
  0xb3   : > { %v4885_v50 = vsub.f32 %v4768_v22, %v549_v45 }
  0xb5   : > { %v613_v22 = vmul.f32 %v4885_v50, %v4885_v50 }
  0xb7   : > { %498 = vadd.xlane.f32.xlu2 %v497_v26  ;;  %649 = vadd.xlane.f32.xlu0 %v648_v28  ;;  %v669_v61 = vsel %vm433_vm0, %v613_v22, 0.0 }
  0xb8   : > { %480 = vadd.xlane.f32.xlu1 %v479_v29 }
  0xbf   : > { %661 = vadd.xlane.f32.xlu2 %v660_v37  ;;  %652 = vadd.xlane.f32.xlu0 %v651_v38 }
  0xc0   : > { %486 = vadd.xlane.f32.xlu1 %v485_v39 }
  0xc7   : > { %667 = vadd.xlane.f32.xlu2 %v666_v51  ;;  %501 = vadd.xlane.f32.xlu0 %v500_v55 }
  0xc8   : > { %489 = vadd.xlane.f32.xlu1 %v488_v57 }
  0xcf   : > { %670 = vadd.xlane.f32.xlu0 %v669_v61  ;;  %v431_v61 = vld [vmem:[%s7818_s2] sm:$0x1f] }
  0xd0   : > { %655 = vadd.xlane.f32.xlu1 %v654_v62 }
  0xd8   : > { %495 = vadd.xlane.f32.xlu1 %v494_v10 }
  0xe0   : > { %658 = vadd.xlane.f32.xlu1 %v657_v16 }
  0xe8   : > { %504 = vadd.xlane.f32.xlu1 %v503_v20 }
 0x10a   : > { %v635_v24 = vpop.xlane.xlu0 %634 }
 0x10b   : > { %v729_v26 = vmul.f32 %v635_v24, %v4772_v30  ;;  %v4952_v24 = vld [vmem:[%s4934_s19] sm:$0xff]  }
 0x10d   : > { %v761_v28 = vadd.f32 1e-05, %v729_v26 }
 0x10f   : > { %4315 = vrsqrt.f32 %v761_v28  ;;  %vm799_vm3 = vweird.f32 %v761_v28 }
 0x112   : > { %v644_v29 = vpop.xlane.xlu2 %643  ;;  %v475_v31 = vpop.xlane.xlu0 %474 }
 0x113   : > { %v732_v32 = vmul.f32 %v644_v29, %v4772_v30  ;;  %v638_v33 = vpop.xlane.xlu1 %637  ;;  %v550_v16 = vmul.f32 %v4772_v30, %v475_v31  ;;  %v4962_v31 = vperm.slane %v431_v61, 1 }
 0x114   : > { %v730_v37 = vmul.f32 %v638_v33, %v4772_v30 }
 0x115   : > { %v4316_v38 = vpop.eup %4315  ;;  %v4921_v39 = vadd.f32 1e-05, %v732_v32 }
 0x116   : > { %v794_v40 = vmul.f32 %v4316_v38, %v761_v28  ;;  %v4923_v41 = vadd.f32 1e-05, %v730_v37  ;;  %vm800_vm2 = vweird.f32 %v4316_v38 }
 0x117   : > { %4317 = vrsqrt.f32 %v4921_v39  ;;  %vm801_vm4 = vmor %vm799_vm3, %vm800_vm2  ;;  %vm829_vm5 = vweird.f32 %v4921_v39 }
 0x118   : > { %v795_v45 = vmul.f32 %v4316_v38, %v794_v40  ;;  %4319 = vrsqrt.f32 %v4923_v41  ;;  %vm809_vm8 = vweird.f32 %v4923_v41 }
 0x11a   : > { %v796_v46 = vmul.f32 0.5, %v795_v45  ;;  %v4928_v48 = vpop.xlane.xlu2 %492  ;;  %v478_v51 = vpop.xlane.xlu0 %477 }
 0x11b   : > { %v466_v55 = vpop.xlane.xlu1 %465  ;;  %v551_v57 = vmul.f32 %v4772_v30, %v478_v51 }
 0x11c   : > { %v797_v22 = vsub.f32 1.5, %v796_v46  ;;  %v547_v59 = vmul.f32 %v4772_v30, %v466_v55  ;;  %v4168_v46 = vunpack.c.l.bf16 %v4952_v24  ;;  %v4969_v55 = vsub.f32 %v4784_v42, %v550_v16 }
 0x11d   : > { %v4940_v62 = vpop.eup %4317  ;;  %v4943_v2 = vsub.f32 %v4805_v53, %v551_v57  ;;  %v4957_v53 = vperm.slane %v431_v61, 0 }
 0x11e   : > { %v4320_v3 = vpop.eup %4319  ;;  %v798_v10 = vmul.f32 %v4316_v38, %v797_v22  ;;  %v824_v15 = vmul.f32 %v4940_v62, %v4921_v39  ;;  %v4949_v20 = vsub.f32 %v4808_v54, %v547_v59  ;;  %vm830_vm6 = vweird.f32 %v4940_v62 }
 0x11f   : > { %v804_v26 = vmul.f32 %v4320_v3, %v4923_v41  ;;  %v615_v28 = vmul.f32 %v4943_v2, %v4943_v2  ;;  %vm810_vm7 = vweird.f32 %v4320_v3  ;;  %vm4991_vm9 = vmor %vm829_vm5, %vm830_vm6 }
 0x120   : > { %v802_v29 = vsel %vm801_vm4, %v4316_v38, %v798_v10  ;;  %v825_v32 = vmul.f32 %v4940_v62, %v824_v15  ;;  %v611_v33 = vmul.f32 %v4949_v20, %v4949_v20  ;;  %vm811_vm10 = vmor %vm809_vm8, %vm810_vm7 }
 0x121   : > { %v1113_v37 = vmul.f32 %v802_v29, %v4776_v34  ;;  %v805_v40 = vmul.f32 %v4320_v3, %v804_v26  ;;  %v675_v45 = vsel %vm433_vm0, %v615_v28, 0.0 }
 0x122   : > { %v826_v51 = vmul.f32 0.5, %v825_v32  ;;  %v647_v38 = vpop.xlane.xlu2 %646  ;;  %v663_v57 = vsel %vm433_vm0, %v611_v33, 0.0  ;;  %676 = vadd.xlane.f32.xlu0 %v675_v45  ;;  %v484_v22 = vpop.xlane.xlu0 %483 }
 0x123   : > { %v806_v59 = vmul.f32 0.5, %v805_v40  ;;  %v733_v61 = vmul.f32 %v647_v38, %v4772_v30  ;;  %v641_v34 = vpop.xlane.xlu1 %640  ;;  %664 = vadd.xlane.f32.xlu1 %v663_v57  ;;  %v553_v10 = vmul.f32 %v4772_v30, %v484_v22  ;;  %v1146_v15 = vmul.f32 %v4957_v53, %v1113_v37 }
 0x124   : > { %v827_v26 = vsub.f32 1.5, %v826_v51  ;;  %v731_v42 = vmul.f32 %v641_v34, %v4772_v30  ;;  %v614_v37 = vmul.f32 %v4969_v55, %v4969_v55 }
 0x125   : > { %v807_v16 = vsub.f32 1.5, %v806_v59  ;;  %v4977_v28 = vadd.f32 1e-05, %v733_v61  ;;  %v4980_v29 = vsub.f32 %v4827_v63, %v553_v10  ;;  %v1179_v32 = vadd.f32 %v4962_v31, %v1146_v15 }
 0x126   : > { %v4984_v33 = vadd.f32 1e-05, %v731_v42  ;;  %v828_v40 = vmul.f32 %v4940_v62, %v827_v26  ;;  %v672_v59 = vsel %vm433_vm0, %v614_v37, 0.0 }
 0x127   : > { %v808_v51 = vmul.f32 %v4320_v3, %v807_v16  ;;  %4321 = vrsqrt.f32 %v4977_v28  ;;  %v617_v63 = vmul.f32 %v4980_v29, %v4980_v29  ;;  %v1211_v57 = vadd.f32 %v4168_v46, %v1179_v32 }
 0x128   : > { %4323 = vrsqrt.f32 %v4984_v33  ;;  %v832_v34 = vsel %vm4991_vm9, %v4940_v62, %v828_v40  ;;  %v4169_v46 = vunpack.c.h.bf16 %v4952_v24  ;;  %vm819_vm12 = vweird.f32 %v4984_v33 }
 0x129   : > { %v812_v41 = vsel %vm811_vm10, %v4320_v3, %v808_v51  ;;  %v681_v38 = vsel %vm433_vm0, %v617_v63, 0.0  ;;  %v5016_v16 = vadd.f32 %v1211_v57, %v4716_v1  ;;  %v1116_v62 = vmul.f32 %v832_v34, %v4787_v43 }
 0x12a   : > { %v1114_v22 = vmul.f32 %v812_v41, %v4790_v44  ;;  %v5001_v39 = vpop.xlane.xlu2 %498  ;;  %682 = vadd.xlane.f32.xlu2 %v681_v38  ;;  %v650_v61 = vpop.xlane.xlu0 %649  ;;  %vm839_vm1 = vweird.f32 %v4977_v28 }
 0x12b   : > { %v481_v10 = vpop.xlane.xlu1 %480  ;;  %673 = vadd.xlane.f32.xlu1 %v672_v59  ;;  %v734_v15 = vmul.f32 %v650_v61, %v4772_v30  ;;  %7873 = vst [vmem:[#allocation5_spill] sm:$0xff] %v5016_v16  ;;  %v1275_v43 = vsel %vm433_vm0, %v5016_v16, 0.0 }
 0x12c   : > { %v552_v3 = vmul.f32 %v4772_v30, %v481_v10  ;;  %v1147_v44 = vmul.f32 %v4957_v53, %v1114_v22  ;;  %v1149_v22 = vmul.f32 %v4957_v53, %v1116_v62 }
 0x12d   : > { %v5011_v26 = vpop.eup %4321  ;;  %v5013_v42 = vadd.f32 1e-05, %v734_v15 }
 0x12e   : > { %v4324_v32 = vpop.eup %4323  ;;  %v5020_v37 = vsub.f32 %v4846_v23, %v552_v3  ;;  %v1180_v40 = vadd.f32 %v4962_v31, %v1147_v44  ;;  %v834_v24 = vmul.f32 %v5011_v26, %v4977_v28  ;;  %v5040_v3 = vld [vmem:[%s4934_s19 + $0x8] sm:$0xff]   ;;  %vm840_vm2 = vweird.f32 %v5011_v26 }
 0x12f   : > { %v814_v45 = vmul.f32 %v4324_v32, %v4984_v33  ;;  %4325 = vrsqrt.f32 %v5013_v42  ;;  %vm820_vm11 = vweird.f32 %v4324_v32  ;;  %vm849_vm14 = vweird.f32 %v5013_v42  ;;  %vm5088_vm4 = vmor %vm839_vm1, %vm840_vm2 }
 0x130   : > { %v616_v51 = vmul.f32 %v5020_v37, %v5020_v37  ;;  %v1212_v1 = vadd.f32 %v4169_v46, %v1180_v40  ;;  %v835_v59 = vmul.f32 %v5011_v26, %v834_v24  ;;  %vm821_vm13 = vmor %vm819_vm12, %vm820_vm11 }
 0x131   : > { %v815_v63 = vmul.f32 %v4324_v32, %v814_v45  ;;  %v5050_v45 = vld [vmem:[%s4710_s15 + $0xc0] sm:$0xff] }
 0x132   : > { %v662_v23 = vpop.xlane.xlu2 %661  ;;  %v678_v41 = vsel %vm433_vm0, %v616_v51, 0.0  ;;  %1276 = vadd.xlane.f32.xlu2 %v1275_v43  ;;  %v653_v38 = vpop.xlane.xlu0 %652  ;;  %v5033_v57 = vadd.f32 %v1212_v1, %v4731_v7  ;;  %v836_v43 = vmul.f32 0.5, %v835_v59 }
 0x133   : > { %v816_v61 = vmul.f32 0.5, %v815_v63  ;;  %v738_v34 = vmul.f32 %v662_v23, %v4772_v30  ;;  %v487_v10 = vpop.xlane.xlu1 %486  ;;  %679 = vadd.xlane.f32.xlu1 %v678_v41  ;;  %v735_v15 = vmul.f32 %v653_v38, %v4772_v30  ;;  %v4173_v63 = vunpack.c.h.bf16 %v5040_v3 }
 0x134   : > { %7874 = vst [vmem:[#allocation6_spill] sm:$0xff] %v5033_v57  ;;  %v554_v46 = vmul.f32 %v4772_v30, %v487_v10  ;;  %v1278_v7 = vsel %vm433_vm0, %v5033_v57, 0.0  ;;  %v1182_v41 = vadd.f32 %v4962_v31, %v1149_v22  ;;  %v837_v59 = vsub.f32 1.5, %v836_v43 }
 0x135   : > { %v4326_v44 = vpop.eup %4325  ;;  %v817_v40 = vsub.f32 1.5, %v816_v61  ;;  %v5045_v62 = vadd.f32 1e-05, %v738_v34  ;;  %v5047_v24 = vadd.f32 1e-05, %v735_v15  ;;  %1279 = vadd.xlane.f32.xlu0 %v1278_v7  ;;  %v506_v61 = vsel %vm433_vm0, %v5050_v45, 0.0 }
 0x136   : > { %v844_v51 = vmul.f32 %v4326_v44, %v5013_v42  ;;  %v5055_v1 = vsub.f32 %v4865_v35, %v554_v46  ;;  %vm850_vm15 = vweird.f32 %v4326_v44  ;;  %v1214_v22 = vadd.f32 %v4173_v63, %v1182_v41 }
 0x137   : > { %v818_v23 = vmul.f32 %v4324_v32, %v817_v40  ;;  %4327 = vrsqrt.f32 %v5045_v62  ;;  %vm5074_vm3 = vmor %vm849_vm14, %vm850_vm15  ;;  %v4172_v41 = vunpack.c.l.bf16 %v5040_v3  ;;  %vm889_vm5 = vweird.f32 %v5045_v62 }
 0x138   : > { %7875 = vst [vmem:[#allocation7_spill] sm:$0xff] %v5055_v1  ;;  %v845_v38 = vmul.f32 %v4326_v44, %v844_v51  ;;  %4329 = vrsqrt.f32 %v5047_v24  ;;  %v618_v33 = vmul.f32 %v5055_v1, %v5055_v1  ;;  %vm859_vm7 = vweird.f32 %v5047_v24 }
 0x139   : > { %v822_v35 = vsel %vm821_vm13, %v4324_v32, %v818_v23  ;;  %v556_v32 = vmul.f32 %v4772_v30, %v4928_v48  ;;  %v838_v48 = vmul.f32 %v5011_v26, %v837_v59 }
 0x13a   : > { %v1115_v34 = vmul.f32 %v822_v35, %v4821_v60  ;;  %v846_v10 = vmul.f32 0.5, %v845_v38  ;;  %v684_v40 = vsel %vm433_vm0, %v618_v33, 0.0  ;;  %v5086_v38 = vadd.f32 %v1214_v22, %v4728_v6 }
 0x13b   : > { %v490_v15 = vpop.xlane.xlu1 %489  ;;  %507 = vadd.xlane.f32.xlu1 %v506_v61 }
 0x13c   : > { %v847_v46 = vsub.f32 1.5, %v846_v10  ;;  %v555_v7 = vmul.f32 %v4772_v30, %v490_v15  ;;  %v1148_v51 = vmul.f32 %v4957_v53, %v1115_v34  ;;  %7878 = vst [vmem:[#allocation8_spill] sm:$0xff] %v5086_v38  ;;  %v5098_v34 = vsub.f32 %v4802_v52, %v556_v32 }
 0x13d   : > { %v4328_v1 = vpop.eup %4327  ;;  %685 = vadd.xlane.f32.xlu0 %v684_v40  ;;  %v1284_v40 = vsel %vm433_vm0, %v5086_v38, 0.0 }
 0x13e   : > { %v4330_v42 = vpop.eup %4329  ;;  %v848_v63 = vmul.f32 %v4326_v44, %v847_v46  ;;  %v884_v43 = vmul.f32 %v4328_v1, %v5045_v62  ;;  %v5080_v23 = vsub.f32 %v4882_v49, %v555_v7  ;;  %v1181_v3 = vadd.f32 %v4962_v31, %v1148_v51 }
 0x13f   : > { %v854_v28 = vmul.f32 %v4330_v42, %v5047_v24  ;;  %vm890_vm6 = vweird.f32 %v4328_v1  ;;  %vm860_vm8 = vweird.f32 %v4330_v42 }
 0x140   : > { %v852_v61 = vsel %vm5074_vm3, %v4326_v44, %v848_v63  ;;  %v885_v35 = vmul.f32 %v4328_v1, %v884_v43  ;;  %v619_v49 = vmul.f32 %v5080_v23, %v5080_v23  ;;  %v1213_v22 = vadd.f32 %v4172_v41, %v1181_v3  ;;  %vm891_vm9 = vmor %vm889_vm5, %vm890_vm6 }
 0x141   : > { %v1118_v10 = vmul.f32 %v852_v61, %v4832_v5  ;;  %v855_v6 = vmul.f32 %v4330_v42, %v854_v28  ;;  %v842_v44 = vsel %vm5088_vm4, %v5011_v26, %v838_v48  ;;  %vm861_vm10 = vmor %vm859_vm7, %vm860_vm8  ;;  %v620_v41 = vmul.f32 %v5098_v34, %v5098_v34  ;;  %v4231_v48 = vld [vmem:[%s4934_s19 + $0x10] sm:$0xff]  }
 0x142   : > { %v886_v59 = vmul.f32 0.5, %v885_v35  ;;  %v687_v15 = vsel %vm433_vm0, %v619_v49, 0.0  ;;  %v1117_v26 = vmul.f32 %v842_v44, %v4812_v56  ;;  %v5115_v63 = vadd.f32 %v1213_v22, %v4713_v0  ;;  %v4232_v49 = vld [vmem:[%s4934_s19 + $0x18] sm:$0xff]  }
 0x143   : > { %v856_v46 = vmul.f32 0.5, %v855_v6  ;;  %v656_v52 = vpop.xlane.xlu1 %655  ;;  %688 = vadd.xlane.f32.xlu2 %v687_v15  ;;  %v1151_v51 = vmul.f32 %v4957_v53, %v1118_v10  ;;  %v4177_v62 = vunpack.c.h.bf16 %v4231_v48  ;;  %v5130_v15 = vld [vmem:[%s4710_s15 + $0xc8] sm:$0xff]  ;;  %v4176_v22 = vunpack.c.l.bf16 %v4231_v48 }
 0x144   : > { %v887_v5 = vsub.f32 1.5, %v886_v59  ;;  %v736_v7 = vmul.f32 %v656_v52, %v4772_v30  ;;  %7881 = vst [vmem:[#allocation9_spill] sm:$0xff] %v5115_v63  ;;  %v1281_v0 = vsel %vm433_vm0, %v5115_v63, 0.0  ;;  %v1150_v3 = vmul.f32 %v4957_v53, %v1117_v26 }
 0x145   : > { %v857_v32 = vsub.f32 1.5, %v856_v46  ;;  %1285 = vadd.xlane.f32.xlu0 %v1284_v40  ;;  %v1184_v33 = vadd.f32 %v4962_v31, %v1151_v51  ;;  %v4233_v46 = vld [vmem:[%s4934_s19 + $0x20] sm:$0xff]  }
 0x146   : > { %v888_v24 = vmul.f32 %v4328_v1, %v887_v5  ;;  %v768_v60 = vadd.f32 1e-05, %v736_v7  ;;  %v1183_v44 = vadd.f32 %v4962_v31, %v1150_v3  ;;  %v509_v7 = vsel %vm433_vm0, %v5130_v15, 0.0 }
 0x147   : > { %v858_v43 = vmul.f32 %v4330_v42, %v857_v32  ;;  %v1216_v6 = vadd.f32 %v4177_v62, %v1184_v33  ;;  %v4185_v26 = vunpack.c.h.bf16 %v4233_v46 }
 0x148   : > { %v892_v28 = vsel %vm891_vm9, %v4328_v1, %v888_v24  ;;  %4331 = vrsqrt.f32 %v768_v60  ;;  %v690_v1 = vsel %vm433_vm0, %v620_v41, 0.0  ;;  %vm869_vm11 = vweird.f32 %v768_v60 }
 0x149   : > { %v1122_v56 = vmul.f32 %v892_v28, %v4854_v27  ;;  %v862_v61 = vsel %vm861_vm10, %v4330_v42, %v858_v43  ;;  %v4180_v27 = vunpack.c.l.bf16 %v4232_v49  ;;  %v5139_v40 = vadd.f32 %v1216_v6, %v4734_v8 }
 0x14a   : > { %v1119_v35 = vmul.f32 %v862_v61, %v4849_v25  ;;  %v1215_v43 = vadd.f32 %v4176_v22, %v1183_v44 }
 0x14b   : > { %v496_v10 = vpop.xlane.xlu1 %495  ;;  %1282 = vadd.xlane.f32.xlu2 %v1281_v0  ;;  %v1155_v25 = vmul.f32 %v4957_v53, %v1122_v56  ;;  %7882 = vst [vmem:[#allocation10_spill] sm:$0xff] %v5139_v40  ;;  %v1290_v33 = vsel %vm433_vm0, %v5139_v40, 0.0 }
 0x14c   : > { %v1152_v59 = vmul.f32 %v4957_v53, %v1119_v35  ;;  %v5151_v0 = vadd.f32 %v1215_v43, %v4723_v4  ;;  %v557_v3 = vmul.f32 %v4772_v30, %v496_v10  ;;  %v4184_v43 = vunpack.c.l.bf16 %v4233_v46 }
 0x14d   : > { %691 = vadd.xlane.f32.xlu0 %v690_v1  ;;  %v1188_v24 = vadd.f32 %v4962_v31, %v1155_v25 }
 0x14e   : > { %v4332_v42 = vpop.eup %4331  ;;  %v1185_v5 = vadd.f32 %v4962_v31, %v1152_v59  ;;  %7884 = vst [vmem:[#allocation12_spill] sm:$0xff] %v5151_v0  ;;  %v1287_v59 = vsel %vm433_vm0, %v5151_v0, 0.0  ;;  %v5162_v4 = vsub.f32 %v4903_v9, %v557_v3 }
 0x14f   : > { %v864_v52 = vmul.f32 %v4332_v42, %v768_v60  ;;  %vm870_vm12 = vweird.f32 %v4332_v42  ;;  %v1220_v61 = vadd.f32 %v4185_v26, %v1188_v24 }
 0x150   : > { %v1217_v32 = vadd.f32 %v4180_v27, %v1185_v5  ;;  %vm871_vm13 = vmor %vm869_vm11, %vm870_vm12  ;;  %v4181_v27 = vunpack.c.h.bf16 %v4232_v49 }
 0x151   : > { %v865_v51 = vmul.f32 %v4332_v42, %v864_v52  ;;  %v5155_v1 = vadd.f32 %v1220_v61, %v4743_v12  ;;  %v621_v52 = vmul.f32 %v5162_v4, %v5162_v4 }
 0x152   : > { %v5143_v28 = vadd.f32 %v1217_v32, %v4749_v14 }
 0x153   : > { %v866_v41 = vmul.f32 0.5, %v865_v51  ;;  %v659_v48 = vpop.xlane.xlu1 %658  ;;  %510 = vadd.xlane.f32.xlu2 %v509_v7  ;;  %7885 = vst [vmem:[#allocation13_spill] sm:$0xff] %v5155_v1  ;;  %v693_v51 = vsel %vm433_vm0, %v621_v52, 0.0 }
 0x154   : > { %7883 = vst [vmem:[#allocation11_spill] sm:$0xff] %v5143_v28  ;;  %v737_v62 = vmul.f32 %v659_v48, %v4772_v30  ;;  %v1293_v56 = vsel %vm433_vm0, %v5143_v28, 0.0 }
 0x155   : > { %v867_v8 = vsub.f32 1.5, %v866_v41  ;;  %1291 = vadd.xlane.f32.xlu0 %v1290_v33  ;;  %1294 = vadd.xlane.f32.xlu1 %v1293_v56 }
 0x156   : > { %v769_v35 = vadd.f32 1e-05, %v737_v62 }
 0x157   : > { %v868_v14 = vmul.f32 %v4332_v42, %v867_v8  ;;  %v668_v8 = vpop.xlane.xlu2 %667 }
 0x158   : > { %4333 = vrsqrt.f32 %v769_v35  ;;  %vm879_vm14 = vweird.f32 %v769_v35  ;;  %v740_v56 = vmul.f32 %v668_v8, %v4772_v30 }
 0x159   : > { %v872_v60 = vsel %vm871_vm13, %v4332_v42, %v868_v14  ;;  %v1302_v42 = vsel %vm433_vm0, %v5155_v1, 0.0  ;;  %v5186_v14 = vpop.xlane.xlu0 %501 }
 0x15a   : > { %v1120_v6 = vmul.f32 %v872_v60, %v4893_v58  ;;  %v772_v61 = vadd.f32 1e-05, %v740_v56 }
 0x15b   : > { %1288 = vadd.xlane.f32.xlu2 %v1287_v59 }
 0x15c   : > { %v1153_v25 = vmul.f32 %v4957_v53, %v1120_v6  ;;  %4335 = vrsqrt.f32 %v772_v61  ;;  %vm909_vm2 = vweird.f32 %v772_v61 }
 0x15d   : > { %1303 = vadd.xlane.f32.xlu1 %v1302_v42 }
 0x15e   : > { %v4334_v22 = vpop.eup %4333  ;;  %v1186_v12 = vadd.f32 %v4962_v31, %v1153_v25 }
 0x15f   : > { %v874_v10 = vmul.f32 %v4334_v22, %v769_v35  ;;  %vm880_vm15 = vweird.f32 %v4334_v22 }
 0x160   : > { %v1218_v44 = vadd.f32 %v4181_v27, %v1186_v12  ;;  %vm881_vm1 = vmor %vm879_vm14, %vm880_vm15 }
 0x161   : > { %v875_v58 = vmul.f32 %v4334_v22, %v874_v10  ;;  %v671_v59 = vpop.xlane.xlu0 %670 }
 0x162   : > { %v5170_v49 = vadd.f32 %v1218_v44, %v4746_v13  ;;  %v4336_v35 = vpop.eup %4335  ;;  %v741_v44 = vmul.f32 %v671_v59, %v4772_v30 }
 0x163   : > { %v876_v5 = vmul.f32 0.5, %v875_v58  ;;  %v904_v46 = vmul.f32 %v4336_v35, %v772_v61  ;;  %vm910_vm3 = vweird.f32 %v4336_v35 }
 0x164   : > { %7886 = vst [vmem:[#allocation14_spill] sm:$0xff] %v5170_v49  ;;  %v1296_v9 = vsel %vm433_vm0, %v5170_v49, 0.0  ;;  %vm911_vm4 = vmor %vm909_vm2, %vm910_vm3 }
 0x165   : > { %v877_v7 = vsub.f32 1.5, %v876_v5  ;;  %1297 = vadd.xlane.f32.xlu2 %v1296_v9  ;;  %694 = vadd.xlane.f32.xlu1 %v693_v51  ;;  %v905_v60 = vmul.f32 %v4336_v35, %v904_v46 }
 0x167   : > { %v878_v32 = vmul.f32 %v4334_v22, %v877_v7  ;;  %v906_v3 = vmul.f32 0.5, %v905_v60 }
 0x169   : > { %v882_v26 = vsel %vm881_vm1, %v4334_v22, %v878_v32  ;;  %v907_v27 = vsub.f32 1.5, %v906_v3  ;;  %v5194_v32 = vadd.f32 1e-05, %v741_v44 }
 0x16a   : > { %v1121_v24 = vmul.f32 %v882_v26, %v4908_v11  ;;  %v5184_v11 = vpop.xlane.xlu1 %504 }
 0x16b   : > { %v908_v42 = vmul.f32 %v4336_v35, %v907_v27  ;;  %vm919_vm11 = vweird.f32 %v5194_v32 }
 0x16c   : > { %v1154_v13 = vmul.f32 %v4957_v53, %v1121_v24 }
 0x16d   : > { %v912_v5 = vsel %vm911_vm4, %v4336_v35, %v908_v42 }
 0x16e   : > { %v1187_v41 = vadd.f32 %v4962_v31, %v1154_v13  ;;  %v1124_v51 = vmul.f32 %v912_v5, %v4868_v36 }
 0x170   : > { %v1219_v48 = vadd.f32 %v4184_v43, %v1187_v41  ;;  %v1157_v8 = vmul.f32 %v4957_v53, %v1124_v51 }
 0x172   : > { %v5179_v62 = vadd.f32 %v1219_v48, %v4758_v18  ;;  %v1190_v59 = vadd.f32 %v4962_v31, %v1157_v8 }
 0x174   : > { %7887 = vst [vmem:[#allocation15_spill] sm:$0xff] %v5179_v62  ;;  %v1299_v33 = vsel %vm433_vm0, %v5179_v62, 0.0 }
 0x175   : > { %1300 = vadd.xlane.f32.xlu0 %v1299_v33  ;;  %v4234_v33 = vld [vmem:[%s4934_s19 + $0x28] sm:$0xff]  }
 0x176   : > { %v4189_v60 = vunpack.c.h.bf16 %v4234_v33  ;;  %v4188_v5 = vunpack.c.l.bf16 %v4234_v33 }
 0x195   : > { %v677_v58 = vpop.xlane.xlu0 %676 }
 0x196   : > { %v665_v6 = vpop.xlane.xlu1 %664 }
 0x197   : > { %v739_v18 = vmul.f32 %v665_v6, %v4772_v30 }
 0x199   : > { %v771_v25 = vadd.f32 1e-05, %v739_v18 }
 0x19b   : > { %4337 = vrsqrt.f32 %v771_v25  ;;  %vm899_vm6 = vweird.f32 %v771_v25 }
 0x19d   : > { %v5189_v22 = vpop.xlane.xlu2 %682 }
 0x19e   : > { %v674_v12 = vpop.xlane.xlu1 %673 }
 0x19f   : > { %v742_v10 = vmul.f32 %v674_v12, %v4772_v30 }
 0x1a1   : > { %v4338_v52 = vpop.eup %4337  ;;  %v774_v9 = vadd.f32 1e-05, %v742_v10 }
 0x1a2   : > { %v894_v7 = vmul.f32 %v4338_v52, %v771_v25  ;;  %vm900_vm5 = vweird.f32 %v4338_v52 }
 0x1a3   : > { %4339 = vrsqrt.f32 %v774_v9  ;;  %vm901_vm7 = vmor %vm899_vm6, %vm900_vm5  ;;  %vm929_vm9 = vweird.f32 %v774_v9 }
 0x1a4   : > { %v895_v26 = vmul.f32 %v4338_v52, %v894_v7  ;;  %4341 = vrsqrt.f32 %v5194_v32 }
 0x1a5   : > { %v1277_v24 = vpop.xlane.xlu2 %1276 }
 0x1a6   : > { %v896_v43 = vmul.f32 0.5, %v895_v26  ;;  %v1371_v13 = vmul.f32 %v1277_v24, %v4772_v30  ;;  %v680_v10 = vpop.xlane.xlu1 %679  ;;  %v1222_v24 = vadd.f32 %v4189_v60, %v1190_v59 }
 0x1a8   : > { %v897_v41 = vsub.f32 1.5, %v896_v43  ;;  %v1280_v48 = vpop.xlane.xlu0 %1279  ;;  %v5201_v61 = vsub.f32 %v5016_v16, %v1371_v13  ;;  %v744_v13 = vmul.f32 %v680_v10, %v4772_v30  ;;  %v5225_v33 = vadd.f32 %v1222_v24, %v4761_v19 }
 0x1a9   : > { %v4340_v56 = vpop.eup %4339  ;;  %v1372_v46 = vmul.f32 %v1280_v48, %v4772_v30 }
 0x1aa   : > { %v898_v36 = vmul.f32 %v4338_v52, %v897_v41  ;;  %v924_v35 = vmul.f32 %v4340_v56, %v774_v9  ;;  %v1435_v42 = vmul.f32 %v5201_v61, %v5201_v61  ;;  %v5211_v12 = vpop.eup %4341  ;;  %vm930_vm8 = vweird.f32 %v4340_v56  ;;  %7888 = vst [vmem:[#allocation16_spill] sm:$0xff] %v5225_v33 }
 0x1ab   : > { %v5205_v18 = vsub.f32 %v5033_v57, %v1372_v46  ;;  %v914_v43 = vmul.f32 %v5211_v12, %v5194_v32  ;;  %vm931_vm10 = vmor %vm929_vm9, %vm930_vm8  ;;  %v1308_v19 = vsel %vm433_vm0, %v5225_v33, 0.0  ;;  %v558_v9 = vmul.f32 %v4772_v30, %v5001_v39 }
 0x1ac   : > { %v902_v3 = vsel %vm901_vm7, %v4338_v52, %v898_v36  ;;  %v925_v6 = vmul.f32 %v4340_v56, %v924_v35  ;;  %v1467_v52 = vsel %vm433_vm0, %v1435_v42, 0.0  ;;  %v5228_v35 = vadd.f32 1e-05, %v744_v13 }
 0x1ad   : > { %v1123_v27 = vmul.f32 %v902_v3, %v4949_v20  ;;  %v1436_v44 = vmul.f32 %v5205_v18, %v5205_v18  ;;  %1468 = vadd.xlane.f32.xlu2 %v1467_v52  ;;  %v915_v36 = vmul.f32 %v5211_v12, %v914_v43  ;;  %vm920_vm12 = vweird.f32 %v5211_v12 }
 0x1ae   : > { %v926_v25 = vmul.f32 0.5, %v925_v6  ;;  %v743_v6 = vmul.f32 %v677_v58, %v4772_v30  ;;  %4343 = vrsqrt.f32 %v5228_v35  ;;  %v5249_v58 = vld [vmem:[%s4710_s15 + $0xd0] sm:$0xff]  ;;  %vm5274_vm13 = vmor %vm919_vm11, %vm920_vm12  ;;  %vm949_vm15 = vweird.f32 %v5228_v35 }
 0x1af   : > { %v1156_v7 = vmul.f32 %v4957_v53, %v1123_v27  ;;  %v1470_v26 = vsel %vm433_vm0, %v1436_v44, 0.0  ;;  %v916_v42 = vmul.f32 0.5, %v915_v36  ;;  %v745_v36 = vmul.f32 %v5189_v22, %v4772_v30 }
 0x1b0   : > { %v927_v51 = vsub.f32 1.5, %v926_v25  ;;  %v5218_v20 = vpop.xlane.xlu0 %685  ;;  %1471 = vadd.xlane.f32.xlu0 %v1470_v26 }
 0x1b1   : > { %v1189_v41 = vadd.f32 %v4962_v31, %v1156_v7  ;;  %v917_v44 = vsub.f32 1.5, %v916_v42 }
 0x1b2   : > { %v928_v8 = vmul.f32 %v4340_v56, %v927_v51 }
 0x1b3   : > { %v1221_v48 = vadd.f32 %v4188_v5, %v1189_v41  ;;  %v5256_v5 = vsub.f32 %v4843_v21, %v558_v9  ;;  %v918_v32 = vmul.f32 %v5211_v12, %v917_v44  ;;  %v5295_v9 = vpop.xlane.xlu1 %507 }
 0x1b4   : > { %v932_v59 = vsel %vm931_vm10, %v4340_v56, %v928_v8  ;;  %v5251_v56 = vadd.f32 1e-05, %v743_v6  ;;  %v5261_v39 = vpop.eup %4343  ;;  %v4235_v8 = vld [vmem:[%s4934_s19 + $0x30] sm:$0xff]  }
 0x1b5   : > { %v5231_v46 = vadd.f32 %v1221_v48, %v4808_v54  ;;  %v1126_v25 = vmul.f32 %v932_v59, %v4969_v55  ;;  %v512_v55 = vsel %vm433_vm0, %v5249_v58, 0.0  ;;  %v944_v41 = vmul.f32 %v5261_v39, %v5228_v35 }
 0x1b6   : > { %v5233_v60 = vpop.xlane.xlu2 %688  ;;  %4345 = vrsqrt.f32 %v5251_v56  ;;  %v622_v48 = vmul.f32 %v5256_v5, %v5256_v5  ;;  %v4193_v6 = vunpack.c.h.bf16 %v4235_v8  ;;  %vm950_vm14 = vweird.f32 %v5261_v39 }
 0x1b7   : > { %7889 = vst [vmem:[#allocation17_spill] sm:$0xff] %v5231_v46  ;;  %v1305_v3 = vsel %vm433_vm0, %v5231_v46, 0.0  ;;  %v1159_v24 = vmul.f32 %v4957_v53, %v1126_v25  ;;  %v5299_v25 = vadd.f32 1e-05, %v745_v36  ;;  %vm5352_vm1 = vmor %vm949_vm15, %vm950_vm14  ;;  %vm939_vm2 = vweird.f32 %v5251_v56 }
 0x1b8   : > { %1306 = vadd.xlane.f32.xlu2 %v1305_v3  ;;  %v1286_v27 = vpop.xlane.xlu0 %1285  ;;  %1309 = vadd.xlane.f32.xlu0 %v1308_v19  ;;  %v922_v19 = vsel %vm5274_vm13, %v5211_v12, %v918_v32  ;;  %v696_v44 = vsel %vm433_vm0, %v622_v48, 0.0 }
 0x1b9   : > { %v1374_v54 = vmul.f32 %v1286_v27, %v4772_v30  ;;  %v1192_v59 = vadd.f32 %v4962_v31, %v1159_v24  ;;  %4347 = vrsqrt.f32 %v5299_v25  ;;  %vm959_vm5 = vweird.f32 %v5299_v25 }
 0x1bb   : > { %v5246_v10 = vsub.f32 %v5086_v38, %v1374_v54  ;;  %v945_v54 = vmul.f32 %v5261_v39, %v944_v41  ;;  %v4507_v41 = vld [vmem:[%s4710_s15 + $0x68] sm:$0xff] }
 0x1bc   : > { %v5292_v42 = vpop.eup %4345 }
 0x1bd   : > { %v1438_v52 = vmul.f32 %v5246_v10, %v5246_v10  ;;  %v946_v32 = vmul.f32 0.5, %v945_v54  ;;  %v559_v54 = vmul.f32 %v4772_v30, %v5186_v14  ;;  %v5341_v14 = vld [vmem:[%s4710_s15 + $0xe0] sm:$0xff]  ;;  %vm940_vm3 = vweird.f32 %v5292_v42 }
 0x1be   : > { %v1283_v7 = vpop.xlane.xlu2 %1282  ;;  %vm941_vm4 = vmor %vm939_vm2, %vm940_vm3 }
 0x1bf   : > { %v1373_v51 = vmul.f32 %v1283_v7, %v4772_v30  ;;  %v1476_v26 = vsel %vm433_vm0, %v1438_v52, 0.0  ;;  %v1224_v52 = vadd.f32 %v4193_v6, %v1192_v59  ;;  %v1125_v7 = vmul.f32 %v922_v19, %v4885_v50 }
 0x1c0   : > { %1477 = vadd.xlane.f32.xlu2 %v1476_v26  ;;  %v5268_v21 = vpop.xlane.xlu0 %691  ;;  %513 = vadd.xlane.f32.xlu0 %v512_v55  ;;  %v5304_v55 = vld [vmem:[%s4710_s15 + $0xd8] sm:$0xff]  ;;  %v746_v26 = vmul.f32 %v5218_v20, %v4772_v30  ;;  %v947_v20 = vsub.f32 1.5, %v946_v32 }
 0x1c1   : > { %v5272_v43 = vsub.f32 %v5115_v63, %v1373_v51  ;;  %v934_v51 = vmul.f32 %v5292_v42, %v5251_v56  ;;  %v515_v13 = vsel %vm433_vm0, %v5304_v55, 0.0  ;;  %v5315_v50 = vadd.f32 %v4507_v41, %v1224_v52 }
 0x1c2   : > { %v1158_v48 = vmul.f32 %v4957_v53, %v1125_v7  ;;  %v4192_v52 = vunpack.c.l.bf16 %v4235_v8  ;;  %v948_v32 = vmul.f32 %v5261_v39, %v947_v20  ;;  %v5347_v41 = vsub.f32 %v4878_v47, %v559_v54 }
 0x1c3   : > { %v1437_v3 = vmul.f32 %v5272_v43, %v5272_v43  ;;  %7892 = vst [vmem:[#allocation18_spill] sm:$0xff] %v5315_v50  ;;  %v935_v36 = vmul.f32 %v5292_v42, %v934_v51  ;;  %v518_v47 = vsel %vm433_vm0, %v5341_v14, 0.0 }
 0x1c4   : > { %v1191_v7 = vadd.f32 %v4962_v31, %v1158_v48  ;;  %v952_v54 = vsel %vm5352_vm1, %v5261_v39, %v948_v32 }
 0x1c5   : > { %v1473_v27 = vsel %vm433_vm0, %v1437_v3, 0.0  ;;  %v5319_v3 = vadd.f32 1e-05, %v746_v26  ;;  %v936_v51 = vmul.f32 0.5, %v935_v36  ;;  %v1128_v32 = vmul.f32 %v952_v54, %v5020_v37 }
 0x1c6   : > { %v5297_v22 = vpop.xlane.xlu2 %510  ;;  %1474 = vadd.xlane.f32.xlu1 %v1473_v27  ;;  %v1314_v27 = vsel %vm433_vm0, %v5315_v50, 0.0  ;;  %v1223_v36 = vadd.f32 %v4192_v52, %v1191_v7  ;;  %v560_v52 = vmul.f32 %v4772_v30, %v5184_v11 }
 0x1c7   : > { %4349 = vrsqrt.f32 %v5319_v3  ;;  %v937_v20 = vsub.f32 1.5, %v936_v51  ;;  %v623_v51 = vmul.f32 %v5347_v41, %v5347_v41  ;;  %vm969_vm9 = vweird.f32 %v5319_v3 }
 0x1c8   : > { %697 = vadd.xlane.f32.xlu2 %v696_v44  ;;  %v1292_v12 = vpop.xlane.xlu0 %1291  ;;  %v1295_v44 = vpop.xlane.xlu1 %1294  ;;  %v5389_v56 = vsub.f32 %v4914_v17, %v560_v52 }
 0x1c9   : > { %v1376_v24 = vmul.f32 %v1292_v12, %v4772_v30  ;;  %v5330_v12 = vpop.eup %4347  ;;  %v1377_v8 = vmul.f32 %v1295_v44, %v4772_v30  ;;  %v938_v39 = vmul.f32 %v5292_v42, %v937_v20 }
 0x1ca   : > { %v954_v48 = vmul.f32 %v5330_v12, %v5299_v25  ;;  %vm960_vm6 = vweird.f32 %v5330_v12 }
 0x1cb   : > { %v5322_v6 = vsub.f32 %v5139_v40, %v1376_v24  ;;  %v5366_v44 = vsub.f32 %v5143_v28, %v1377_v8  ;;  %v561_v8 = vmul.f32 %v4772_v30, %v5295_v9  ;;  %v942_v37 = vsel %vm941_vm4, %v5292_v42, %v938_v39  ;;  %v5401_v42 = vld [vmem:[%s4710_s15 + $0xe8] sm:$0xff]  ;;  %vm961_vm7 = vmor %vm959_vm5, %vm960_vm6  ;;  %v4513_v28 = vld [vmem:[%s4710_s15 + $0x90] sm:$0xff] }
 0x1cc   : > { %v955_v7 = vmul.f32 %v5330_v12, %v954_v48  ;;  %v624_v39 = vmul.f32 %v5389_v56, %v5389_v56  ;;  %v4516_v40 = vld [vmem:[%s4710_s15 + $0xa0] sm:$0xff] }
 0x1cd   : > { %v1440_v24 = vmul.f32 %v5322_v6, %v5322_v6  ;;  %v5363_v35 = vpop.eup %4349  ;;  %v1441_v48 = vmul.f32 %v5366_v44, %v5366_v44 }
 0x1ce   : > { %v1289_v59 = vpop.xlane.xlu2 %1288  ;;  %516 = vadd.xlane.f32.xlu1 %v515_v13  ;;  %v964_v11 = vmul.f32 %v5363_v35, %v5319_v3  ;;  %vm970_vm8 = vweird.f32 %v5363_v35  ;;  %v4510_v3 = vld [vmem:[%s4710_s15 + $0x70] sm:$0xff] }
 0x1cf   : > { %v1375_v19 = vmul.f32 %v1289_v59, %v4772_v30  ;;  %v699_v59 = vsel %vm433_vm0, %v623_v51, 0.0  ;;  %v1485_v54 = vsel %vm433_vm0, %v1441_v48, 0.0  ;;  %v4236_v51 = vld [vmem:[%s4934_s19 + $0x38] sm:$0xff]   ;;  %vm971_vm10 = vmor %vm969_vm9, %vm970_vm8 }
 0x1d0   : > { %1315 = vadd.xlane.f32.xlu2 %v1314_v27  ;;  %v1482_v27 = vsel %vm433_vm0, %v1440_v24, 0.0  ;;  %v4508_v24 = vld [vmem:[%s4710_s15 + $0x60] sm:$0xff]  ;;  %v965_v9 = vmul.f32 %v5363_v35, %v964_v11  ;;  %v1304_v52 = vpop.xlane.xlu1 %1303 }
 0x1d1   : > { %v5334_v26 = vsub.f32 %v5151_v0, %v1375_v19 }
 0x1d3   : > { %v1439_v13 = vmul.f32 %v5334_v26, %v5334_v26 }
 0x1d5   : > { %v1479_v19 = vsel %vm433_vm0, %v1439_v13, 0.0  ;;  %v5374_v13 = vadd.f32 %v4508_v24, %v1223_v36  ;;  %v956_v36 = vmul.f32 0.5, %v955_v7  ;;  %v1127_v7 = vmul.f32 %v942_v37, %v4943_v2 }
 0x1d6   : > { %1480 = vadd.xlane.f32.xlu0 %v1479_v19  ;;  %1483 = vadd.xlane.f32.xlu1 %v1482_v27  ;;  %v1161_v19 = vmul.f32 %v4957_v53, %v1128_v32  ;;  %v4197_v32 = vunpack.c.h.bf16 %v4236_v51  ;;  %v521_v2 = vsel %vm433_vm0, %v5401_v42, 0.0 }
 0x1d7   : > { %7895 = vst [vmem:[#allocation19_spill] sm:$0xff] %v5374_v13  ;;  %v1311_v20 = vsel %vm433_vm0, %v5374_v13, 0.0  ;;  %v957_v17 = vsub.f32 1.5, %v956_v36 }
 0x1d8   : > { %519 = vadd.xlane.f32.xlu2 %v518_v47  ;;  %v1298_v27 = vpop.xlane.xlu2 %1297  ;;  %v5396_v47 = vsub.f32 %v5050_v45, %v561_v8  ;;  %v1194_v11 = vadd.f32 %v4962_v31, %v1161_v19  ;;  %v966_v45 = vmul.f32 0.5, %v965_v9  ;;  %v1380_v8 = vmul.f32 %v1304_v52, %v4772_v30 }
 0x1d9   : > { %v1378_v24 = vmul.f32 %v1298_v27, %v4772_v30  ;;  %v958_v36 = vmul.f32 %v5330_v12, %v957_v17  ;;  %v4196_v17 = vunpack.c.l.bf16 %v4236_v51 }
 0x1da   : > { %v625_v48 = vmul.f32 %v5396_v47, %v5396_v47  ;;  %v1226_v19 = vadd.f32 %v4197_v32, %v1194_v11  ;;  %v967_v9 = vsub.f32 1.5, %v966_v45  ;;  %v5422_v27 = vsub.f32 %v5155_v1, %v1380_v8  ;;  %v4509_v32 = vld [vmem:[%s4710_s15 + $0x78] sm:$0xff] }
 0x1db   : > { %v5418_v37 = vsub.f32 %v5170_v49, %v1378_v24 }
 0x1dc   : > { %v705_v25 = vsel %vm433_vm0, %v625_v48, 0.0  ;;  %v5431_v11 = vadd.f32 %v4509_v32, %v1226_v19  ;;  %v968_v45 = vmul.f32 %v5363_v35, %v967_v9  ;;  %v1444_v51 = vmul.f32 %v5422_v27, %v5422_v27  ;;  %v4237_v9 = vld [vmem:[%s4934_s19 + $0x40] sm:$0xff]  }
 0x1de   : > { %700 = vadd.xlane.f32.xlu0 %v699_v59  ;;  %1312 = vadd.xlane.f32.xlu1 %v1311_v20  ;;  %v1160_v20 = vmul.f32 %v4957_v53, %v1127_v7  ;;  %v702_v59 = vsel %vm433_vm0, %v624_v39, 0.0  ;;  %v1442_v39 = vmul.f32 %v5418_v37, %v5418_v37  ;;  %7896 = vst [vmem:[#allocation20_spill] sm:$0xff] %v5431_v11 }
 0x1e0   : > { %1486 = vadd.xlane.f32.xlu2 %v1485_v54  ;;  %v962_v54 = vsel %vm961_vm7, %v5330_v12, %v958_v36  ;;  %v1193_v52 = vadd.f32 %v4962_v31, %v1160_v20  ;;  %v1488_v48 = vsel %vm433_vm0, %v1442_v39, 0.0  ;;  %v1320_v36 = vsel %vm433_vm0, %v5431_v11, 0.0 }
 0x1e1   : > { %v1129_v12 = vmul.f32 %v962_v54, %v4980_v29  ;;  %v972_v20 = vsel %vm971_vm10, %v5363_v35, %v968_v45  ;;  %v1494_v29 = vsel %vm433_vm0, %v1444_v51, 0.0 }
 0x1e2   : > { %v1225_v8 = vadd.f32 %v4196_v17, %v1193_v52  ;;  %v5458_v17 = vld [vmem:[%s4710_s15 + $0xf8] sm:$0xff]  ;;  %v4200_v52 = vunpack.c.l.bf16 %v4237_v9 }
 0x1e4   : > { %v5449_v19 = vadd.f32 %v4510_v3, %v1225_v8  ;;  %v5471_v8 = vld [vmem:[%s4710_s15 + $0xf0] sm:$0xff]  ;;  %v747_v3 = vmul.f32 %v5233_v60, %v4772_v30  ;;  %v748_v60 = vmul.f32 %v5268_v21, %v4772_v30  ;;  %v4156_v21 = vld [vmem:[%s7820_s4 + $0x8] sm:$0xff] }
 0x1e5   : > { %2131 = vmatpush.bf16.msra.mxu0 %v4156_v21  ;;  %4245 = vmatpush.bf16.msra.mxu3 %v4156_v21 }
 0x1e6   : > { %522 = vadd.xlane.f32.xlu0 %v521_v2  ;;  %703 = vadd.xlane.f32.xlu1 %v702_v59  ;;  %v1162_v59 = vmul.f32 %v4957_v53, %v1129_v12  ;;  %7897 = vst [vmem:[#allocation21_spill] sm:$0xff] %v5449_v19  ;;  %v1317_v39 = vsel %vm433_vm0, %v5449_v19, 0.0 }
 0x1e8   : > { %706 = vadd.xlane.f32.xlu2 %v705_v25  ;;  %v1301_v7 = vpop.xlane.xlu0 %1300  ;;  %v7898_v25 = vld [vmem:[#allocation7_spill] sm:$0xff] }
 0x1e9   : > { %v1379_v24 = vmul.f32 %v1301_v7, %v4772_v30  ;;  %v1130_v54 = vmul.f32 %v972_v20, %v7898_v25  ;;  %v562_v7 = vmul.f32 %v4772_v30, %v5297_v22  ;;  %v527_v22 = vsel %vm433_vm0, %v5458_v17, 0.0 }
 0x1ea   : > { %v524_v20 = vsel %vm433_vm0, %v5471_v8, 0.0 }
 0x1eb   : > { %v5440_v2 = vsub.f32 %v5179_v62, %v1379_v24  ;;  %v1195_v24 = vadd.f32 %v4962_v31, %v1162_v59  ;;  %v5464_v32 = vsub.f32 %v5130_v15, %v562_v7  ;;  %v1163_v12 = vmul.f32 %v4957_v53, %v1130_v54 }
 0x1ed   : > { %v1443_v35 = vmul.f32 %v5440_v2, %v5440_v2  ;;  %v1227_v51 = vadd.f32 %v4200_v52, %v1195_v24  ;;  %v1196_v15 = vadd.f32 %v4962_v31, %v1163_v12  ;;  %v695_v12 = vpop.xlane.xlu1 %694 }
 0x1ee   : > { %1489 = vadd.xlane.f32.xlu0 %v1488_v48  ;;  %1321 = vadd.xlane.f32.xlu1 %v1320_v36  ;;  %v626_v48 = vmul.f32 %v5464_v32, %v5464_v32  ;;  %v4201_v36 = vunpack.c.h.bf16 %v4237_v9  ;;  %v779_v9 = vadd.f32 1e-05, %v747_v3 }
 0x1ef   : > { %v1491_v45 = vsel %vm433_vm0, %v1443_v35, 0.0  ;;  %v4512_v35 = vld [vmem:[%s4710_s15 + $0x88] sm:$0xff] }
 0x1f0   : > { %1495 = vadd.xlane.f32.xlu2 %v1494_v29  ;;  %v4511_v29 = vld [vmem:[%s4710_s15 + $0x80] sm:$0xff]  ;;  %v708_v25 = vsel %vm433_vm0, %v626_v48, 0.0  ;;  %v1228_v54 = vadd.f32 %v4201_v36, %v1196_v15  ;;  %4351 = vrsqrt.f32 %v779_v9  ;;  %v749_v48 = vmul.f32 %v695_v12, %v4772_v30 }
 0x1f1   : > { %v5479_v59 = vadd.f32 %v4511_v29, %v1227_v51  ;;  %vm979_vm12 = vweird.f32 %v779_v9 }
 0x1f2   : > { %v5487_v52 = vadd.f32 %v4512_v35, %v1228_v54 }
 0x1f3   : > { %7899 = vst [vmem:[#allocation7_spill] sm:$0xff] %v5479_v59  ;;  %v1323_v7 = vsel %vm433_vm0, %v5479_v59, 0.0 }
 0x1f4   : > { %7900 = vst [vmem:[#allocation22_spill] sm:$0xff] %v5487_v52  ;;  %v1326_v24 = vsel %vm433_vm0, %v5487_v52, 0.0 }
 0x1f6   : > { %1318 = vadd.xlane.f32.xlu0 %v1317_v39  ;;  %1492 = vadd.xlane.f32.xlu1 %v1491_v45  ;;  %v4352_v39 = vpop.eup %4351  ;;  %v780_v45 = vadd.f32 1e-05, %v748_v60 }
 0x1f7   : > { %vm980_vm11 = vweird.f32 %v4352_v39 }
 0x1f8   : > { %528 = vadd.xlane.f32.xlu2 %v527_v22  ;;  %v974_v22 = vmul.f32 %v4352_v39, %v779_v9  ;;  %4353 = vrsqrt.f32 %v780_v45  ;;  %vm981_vm13 = vmor %vm979_vm12, %vm980_vm11  ;;  %vm989_vm15 = vweird.f32 %v780_v45 }
 0x1fa   : > { %v975_v51 = vmul.f32 %v4352_v39, %v974_v22 }
 0x1fc   : > { %v976_v15 = vmul.f32 0.5, %v975_v51 }
 0x1fe   : > { %709 = vadd.xlane.f32.xlu0 %v708_v25  ;;  %525 = vadd.xlane.f32.xlu1 %v524_v20  ;;  %v4354_v36 = vpop.eup %4353  ;;  %v5494_v20 = vadd.f32 1e-05, %v749_v48  ;;  %v977_v3 = vsub.f32 1.5, %v976_v15 }
 0x1ff   : > { %v984_v29 = vmul.f32 %v4354_v36, %v780_v45  ;;  %vm990_vm14 = vweird.f32 %v4354_v36 }
 0x200   : > { %1324 = vadd.xlane.f32.xlu2 %v1323_v7  ;;  %4355 = vrsqrt.f32 %v5494_v20  ;;  %v978_v54 = vmul.f32 %v4352_v39, %v977_v3  ;;  %vm991_vm1 = vmor %vm989_vm15, %vm990_vm14  ;;  %vm999_vm3 = vweird.f32 %v5494_v20 }
 0x201   : > { %v985_v25 = vmul.f32 %v4354_v36, %v984_v29 }
 0x202   : > { %v982_v60 = vsel %vm981_vm13, %v4352_v39, %v978_v54 }
 0x203   : > { %v986_v7 = vmul.f32 0.5, %v985_v25  ;;  %v1131_v48 = vmul.f32 %v982_v60, %v5080_v23 }
 0x205   : > { %v987_v22 = vsub.f32 1.5, %v986_v7  ;;  %v1164_v54 = vmul.f32 %v4957_v53, %v1131_v48  ;;  %v5516_v7 = vld [vmem:[%s4934_s19 + $0x48] sm:$0xff]  }
 0x206   : > { %1327 = vadd.xlane.f32.xlu0 %v1326_v24  ;;  %v5500_v35 = vpop.eup %4355  ;;  %v4155_v24 = vld [vmem:[%s7820_s4] sm:$0xff] }
 0x207   : > { %2132 = vmatpush.bf16.msra.mxu0 %v4155_v24  ;;  %4246 = vmatpush.bf16.msra.mxu3 %v4155_v24  ;;  %v994_v12 = vmul.f32 %v5500_v35, %v5494_v20  ;;  %v988_v25 = vmul.f32 %v4354_v36, %v987_v22  ;;  %vm1000_vm2 = vweird.f32 %v5500_v35 }
 0x208   : > { %vm5548_vm5 = vmor %vm999_vm3, %vm1000_vm2 }
 0x209   : > { %v995_v39 = vmul.f32 %v5500_v35, %v994_v12  ;;  %v992_v23 = vsel %vm991_vm1, %v4354_v36, %v988_v25  ;;  %v1197_v12 = vadd.f32 %v4962_v31, %v1164_v54 }
 0x20a   : > { %v1132_v45 = vmul.f32 %v992_v23, %v5098_v34 }
 0x20b   : > { %v996_v24 = vmul.f32 0.5, %v995_v39 }
 0x20d   : > { %v997_v62 = vsub.f32 1.5, %v996_v24  ;;  %v1165_v24 = vmul.f32 %v4957_v53, %v1132_v45 }
 0x220   : > { %v1469_v51 = vpop.xlane.xlu2 %1468 }
 0x221   : > { %v1563_v9 = vmul.f32 %v1469_v51, %v4772_v30 }
 0x223   : > { %v1472_v15 = vpop.xlane.xlu0 %1471  ;;  %v1595_v3 = vadd.f32 1e-05, %v1563_v9  ;;  %v4204_v9 = vunpack.c.l.bf16 %v5516_v7 }
 0x224   : > { %v1564_v29 = vmul.f32 %v1472_v15, %v4772_v30 }
 0x225   : > { %4357 = vrsqrt.f32 %v1595_v3  ;;  %v1229_v54 = vadd.f32 %v4204_v9, %v1197_v12  ;;  %vm1633_vm7 = vweird.f32 %v1595_v3 }
 0x226   : > { %v5511_v21 = vadd.f32 1e-05, %v1564_v29 }
 0x228   : > { %4359 = vrsqrt.f32 %v5511_v21  ;;  %vm1643_vm9 = vweird.f32 %v5511_v21 }
 0x22b   : > { %v1307_v60 = vpop.xlane.xlu2 %1306  ;;  %v1310_v22 = vpop.xlane.xlu0 %1309 }
 0x22c   : > { %v1381_v51 = vmul.f32 %v1307_v60, %v4772_v30  ;;  %v1382_v15 = vmul.f32 %v1310_v22, %v4772_v30  ;;  %v4358_v29 = vpop.eup %4357 }
 0x22d   : > { %v1628_v36 = vmul.f32 %v4358_v29, %v1595_v3  ;;  %vm1634_vm4 = vweird.f32 %v4358_v29 }
 0x22e   : > { %v5524_v48 = vsub.f32 %v5231_v46, %v1381_v51  ;;  %v4360_v1 = vpop.eup %4359  ;;  %v5527_v25 = vsub.f32 %v5225_v33, %v1382_v15  ;;  %v998_v46 = vmul.f32 %v5500_v35, %v997_v62  ;;  %vm1635_vm8 = vmor %vm1633_vm7, %vm1634_vm4 }
 0x22f   : > { %v1638_v39 = vmul.f32 %v4360_v1, %v5511_v21  ;;  %v1629_v22 = vmul.f32 %v4358_v29, %v1628_v36  ;;  %vm1644_vm6 = vweird.f32 %v4360_v1 }
 0x230   : > { %v1445_v60 = vmul.f32 %v5524_v48, %v5524_v48  ;;  %v1446_v34 = vmul.f32 %v5527_v25, %v5527_v25  ;;  %v1002_v20 = vsel %vm5548_vm5, %v5500_v35, %v998_v46  ;;  %vm1645_vm10 = vmor %vm1643_vm9, %vm1644_vm6 }
 0x231   : > { %v1639_v23 = vmul.f32 %v4360_v1, %v1638_v39  ;;  %v1630_v15 = vmul.f32 0.5, %v1629_v22  ;;  %v5541_v39 = vadd.f32 %v4513_v28, %v1229_v54  ;;  %v1198_v28 = vadd.f32 %v4962_v31, %v1165_v24 }
 0x232   : > { %v1497_v51 = vsel %vm433_vm0, %v1445_v60, 0.0  ;;  %v1500_v49 = vsel %vm433_vm0, %v1446_v34, 0.0  ;;  %v4205_v60 = vunpack.c.h.bf16 %v5516_v7 }
 0x233   : > { %1498 = vadd.xlane.f32.xlu0 %v1497_v51  ;;  %v1478_v33 = vpop.xlane.xlu2 %1477  ;;  %v1640_v9 = vmul.f32 0.5, %v1639_v23  ;;  %1501 = vadd.xlane.f32.xlu1 %v1500_v49  ;;  %v514_v36 = vpop.xlane.xlu0 %513  ;;  %7901 = vst [vmem:[#allocation23_spill] sm:$0xff] %v5541_v39  ;;  %v1631_v62 = vsub.f32 1.5, %v1630_v15  ;;  %v4514_v23 = vld [vmem:[%s7818_s2] sm:$0x1f]  ;;  %v1329_v35 = vsel %vm433_vm0, %v5541_v39, 0.0 }
 0x234   : > { %v1566_v12 = vmul.f32 %v1478_v33, %v4772_v30  ;;  %v563_v45 = vmul.f32 %v4772_v30, %v514_v36  ;;  %v5566_v51 = vperm.slane %v4514_v23, 2 }
 0x235   : > { %v1641_v33 = vsub.f32 1.5, %v1640_v9  ;;  %v1632_v7 = vmul.f32 %v4358_v29, %v1631_v62  ;;  %v1230_v9 = vadd.f32 %v4205_v60, %v1198_v28 }
 0x236   : > { %v5552_v49 = vadd.f32 1e-05, %v1566_v12  ;;  %v5559_v54 = vsub.f32 %v5249_v58, %v563_v45  ;;  %v1133_v12 = vmul.f32 %v1002_v20, %v5162_v4  ;;  %v5577_v45 = vperm.slane %v4514_v23, 3 }
 0x237   : > { %v1642_v34 = vmul.f32 %v4360_v1, %v1641_v33  ;;  %v1636_v24 = vsel %vm1635_vm8, %v4358_v29, %v1632_v7 }
 0x238   : > { %4361 = vrsqrt.f32 %v5552_v49  ;;  %v627_v58 = vmul.f32 %v5559_v54, %v5559_v54  ;;  %v1947_v3 = vmul.f32 %v1636_v24, %v5201_v61  ;;  %v1166_v23 = vmul.f32 %v4957_v53, %v1133_v12  ;;  %v5596_v24 = vld [vmem:[%s4934_s19 + $0x50] sm:$0xff]  }
 0x239   : > { %v1475_v46 = vpop.xlane.xlu1 %1474  ;;  %v1646_v21 = vsel %vm1645_vm10, %v4360_v1, %v1642_v34  ;;  %vm1663_vm12 = vweird.f32 %v5552_v49 }
 0x23a   : > { %v1565_v15 = vmul.f32 %v1475_v46, %v4772_v30  ;;  %v1948_v36 = vmul.f32 %v1646_v21, %v5205_v18  ;;  %v711_v62 = vsel %vm433_vm0, %v627_v58, 0.0  ;;  %v1980_v1 = vmul.f32 %v5566_v51, %v1947_v3  ;;  %v4515_v18 = vld [vmem:[%s4710_s15 + $0x98] sm:$0xff] }
 0x23b   : > { %1330 = vadd.xlane.f32.xlu0 %v1329_v35  ;;  %v698_v29 = vpop.xlane.xlu2 %697  ;;  %712 = vadd.xlane.f32.xlu1 %v711_v62  ;;  %v5588_v28 = vadd.f32 %v4515_v18, %v1230_v9  ;;  %v1199_v12 = vadd.f32 %v4962_v31, %v1166_v23 }
 0x23c   : > { %v5579_v22 = vadd.f32 1e-05, %v1565_v15  ;;  %v750_v61 = vmul.f32 %v698_v29, %v4772_v30  ;;  %v1981_v60 = vmul.f32 %v5566_v51, %v1948_v36  ;;  %v2013_v7 = vadd.f32 %v5577_v45, %v1980_v1 }
 0x23d   : > { %7904 = vst [vmem:[#allocation24_spill] sm:$0xff] %v5588_v28  ;;  %v1332_v9 = vsel %vm433_vm0, %v5588_v28, 0.0  ;;  %v4208_v36 = vunpack.c.l.bf16 %v5596_v24 }
 0x23e   : > { %v4362_v33 = vpop.eup %4361  ;;  %4363 = vrsqrt.f32 %v5579_v22  ;;  %v5585_v4 = vadd.f32 1e-05, %v750_v61  ;;  %v2014_v34 = vadd.f32 %v5577_v45, %v1981_v60  ;;  %vm1653_vm15 = vweird.f32 %v5579_v22 }
 0x23f   : > { %v1658_v20 = vmul.f32 %v4362_v33, %v5552_v49  ;;  %vm1664_vm11 = vweird.f32 %v4362_v33 }
 0x240   : > { %4365 = vrsqrt.f32 %v5585_v4  ;;  %v2045_v58 = vpack.c.bf16 %v2014_v34, %v2013_v7  ;;  %vm5619_vm13 = vmor %vm1663_vm12, %vm1664_vm11  ;;  %vm1009_vm3 = vweird.f32 %v5585_v4 }
 0x241   : > { %v1659_v46 = vmul.f32 %v4362_v33, %v1658_v20  ;;  %v517_v35 = vpop.xlane.xlu1 %516 }
 0x242   : > { %v564_v3 = vmul.f32 %v4772_v30, %v517_v35  ;;  %4068 = vmatmul.msk.bf16.vlgmr.msra.gmra.mxu0 %vm433_vm0, %v2045_v58 }
 0x243   : > { %v1660_v21 = vmul.f32 0.5, %v1659_v46  ;;  %v1316_v15 = vpop.xlane.xlu2 %1315  ;;  %1333 = vadd.xlane.f32.xlu1 %v1332_v9 }
 0x244   : > { %v4364_v29 = vpop.eup %4363  ;;  %v5605_v62 = vsub.f32 %v5304_v55, %v564_v3  ;;  %v1384_v61 = vmul.f32 %v1316_v15, %v4772_v30  ;;  %v1231_v55 = vadd.f32 %v4208_v36, %v1199_v12 }
 0x245   : > { %v1661_v1 = vsub.f32 1.5, %v1660_v21  ;;  %v1648_v60 = vmul.f32 %v4364_v29, %v5579_v22  ;;  %vm1654_vm14 = vweird.f32 %v4364_v29 }
 0x246   : > { %v4366_v18 = vpop.eup %4365  ;;  %v5610_v20 = vsub.f32 %v5315_v50, %v1384_v61  ;;  %v628_v7 = vmul.f32 %v5605_v62, %v5605_v62  ;;  %vm1655_vm2 = vmor %vm1653_vm15, %vm1654_vm14 }
 0x247   : > { %v1662_v34 = vmul.f32 %v4362_v33, %v1661_v1  ;;  %v1649_v23 = vmul.f32 %v4364_v29, %v1648_v60  ;;  %v1004_v46 = vmul.f32 %v4366_v18, %v5585_v4  ;;  %vm1010_vm1 = vweird.f32 %v4366_v18 }
 0x248   : > { %v714_v35 = vsel %vm433_vm0, %v628_v7, 0.0  ;;  %v1448_v58 = vmul.f32 %v5610_v20, %v5610_v20  ;;  %vm1011_vm4 = vmor %vm1009_vm3, %vm1010_vm1 }
 0x249   : > { %v1650_v21 = vmul.f32 0.5, %v1649_v23  ;;  %v1005_v15 = vmul.f32 %v4366_v18, %v1004_v46  ;;  %715 = vadd.xlane.f32.xlu2 %v714_v35  ;;  %v1484_v9 = vpop.xlane.xlu1 %1483  ;;  %v1481_v61 = vpop.xlane.xlu0 %1480  ;;  %v1666_v36 = vsel %vm5619_vm13, %v4362_v33, %v1662_v34  ;;  %v5629_v23 = vadd.f32 %v4516_v40, %v1231_v55 }
 0x24a   : > { %v1568_v49 = vmul.f32 %v1484_v9, %v4772_v30  ;;  %v1567_v12 = vmul.f32 %v1481_v61, %v4772_v30  ;;  %v1506_v1 = vsel %vm433_vm0, %v1448_v58, 0.0  ;;  %v1950_v34 = vmul.f32 %v1666_v36, %v5246_v10 }
 0x24b   : > { %v1651_v60 = vsub.f32 1.5, %v1650_v21  ;;  %v1006_v7 = vmul.f32 0.5, %v1005_v15  ;;  %1507 = vadd.xlane.f32.xlu0 %v1506_v1  ;;  %v520_v50 = vpop.xlane.xlu2 %519  ;;  %7907 = vst [vmem:[#allocation25_spill] sm:$0xff] %v5629_v23  ;;  %v1335_v61 = vsel %vm433_vm0, %v5629_v23, 0.0 }
 0x24c   : > { %v5632_v46 = vadd.f32 1e-05, %v1568_v49  ;;  %v5634_v35 = vadd.f32 1e-05, %v1567_v12  ;;  %v565_v33 = vmul.f32 %v4772_v30, %v520_v50 }
 0x24d   : > { %v1652_v3 = vmul.f32 %v4364_v29, %v1651_v60  ;;  %v1007_v58 = vsub.f32 1.5, %v1006_v7 }
 0x24e   : > { %4367 = vrsqrt.f32 %v5632_v46  ;;  %v5640_v21 = vsub.f32 %v5341_v14, %v565_v33  ;;  %v1983_v14 = vmul.f32 %v5566_v51, %v1950_v34  ;;  %vm1683_vm7 = vweird.f32 %v5632_v46 }
 0x24f   : > { %v1656_v40 = vsel %vm1655_vm2, %v4364_v29, %v1652_v3  ;;  %v1008_v55 = vmul.f32 %v4366_v18, %v1007_v58  ;;  %4369 = vrsqrt.f32 %v5634_v35  ;;  %vm1673_vm9 = vweird.f32 %v5634_v35 }
 0x250   : > { %v1949_v22 = vmul.f32 %v1656_v40, %v5272_v43  ;;  %v629_v10 = vmul.f32 %v5640_v21, %v5640_v21  ;;  %v2016_v58 = vadd.f32 %v5577_v45, %v1983_v14 }
 0x251   : > { %v1012_v50 = vsel %vm1011_vm4, %v4366_v18, %v1008_v55  ;;  %v1313_v15 = vpop.xlane.xlu1 %1312  ;;  %v701_v9 = vpop.xlane.xlu0 %700  ;;  %v4209_v55 = vunpack.c.h.bf16 %v5596_v24 }
 0x252   : > { %v1134_v29 = vmul.f32 %v1012_v50, %v5256_v5  ;;  %v1383_v4 = vmul.f32 %v1313_v15, %v4772_v30  ;;  %v751_v36 = vmul.f32 %v701_v9, %v4772_v30  ;;  %v717_v43 = vsel %vm433_vm0, %v629_v10, 0.0 }
 0x253   : > { %1336 = vadd.xlane.f32.xlu0 %v1335_v61  ;;  %v1487_v49 = vpop.xlane.xlu2 %1486  ;;  %718 = vadd.xlane.f32.xlu1 %v717_v43  ;;  %v1982_v18 = vmul.f32 %v5566_v51, %v1949_v22 }
 0x254   : > { %v4368_v12 = vpop.eup %4367  ;;  %v5656_v1 = vsub.f32 %v5374_v13, %v1383_v4  ;;  %v5658_v60 = vadd.f32 1e-05, %v751_v36  ;;  %v1569_v7 = vmul.f32 %v1487_v49, %v4772_v30  ;;  %v1167_v5 = vmul.f32 %v4957_v53, %v1134_v29 }
 0x255   : > { %v4370_v33 = vpop.eup %4369  ;;  %v1678_v34 = vmul.f32 %v4368_v12, %v5632_v46  ;;  %v2015_v3 = vadd.f32 %v5577_v45, %v1982_v18  ;;  %vm1684_vm5 = vweird.f32 %v4368_v12 }
 0x256   : > { %v1668_v40 = vmul.f32 %v4370_v33, %v5634_v35  ;;  %4371 = vrsqrt.f32 %v5658_v60  ;;  %v5668_v10 = vadd.f32 1e-05, %v1569_v7  ;;  %v1447_v15 = vmul.f32 %v5656_v1, %v5656_v1  ;;  %vm1685_vm8 = vmor %vm1683_vm7, %vm1684_vm5 }
 0x257   : > { %v1679_v22 = vmul.f32 %v4368_v12, %v1678_v34  ;;  %v2046_v50 = vpack.c.bf16 %v2016_v58, %v2015_v3  ;;  %v1200_v61 = vadd.f32 %v4962_v31, %v1167_v5  ;;  %vm1674_vm6 = vweird.f32 %v4370_v33 }
 0x258   : > { %v1669_v9 = vmul.f32 %v4370_v33, %v1668_v40  ;;  %4373 = vrsqrt.f32 %v5668_v10  ;;  %v1503_v14 = vsel %vm433_vm0, %v1447_v15, 0.0  ;;  %vm1675_vm10 = vmor %vm1673_vm9, %vm1674_vm6  ;;  %vm1019_vm12 = vweird.f32 %v5658_v60 }
 0x259   : > { %v1680_v29 = vmul.f32 0.5, %v1679_v22  ;;  %4069 = vmatmul.msk.bf16.gmra.mxu0 %vm433_vm0, %v2046_v50  ;;  %v704_v4 = vpop.xlane.xlu1 %703  ;;  %v523_v36 = vpop.xlane.xlu0 %522  ;;  %1504 = vadd.xlane.f32.xlu2 %v1503_v14  ;;  %v1232_v18 = vadd.f32 %v4209_v55, %v1200_v61  ;;  %vm1693_vm15 = vweird.f32 %v5668_v10 }
 0x25a   : > { %v1670_v24 = vmul.f32 0.5, %v1669_v9  ;;  %v752_v43 = vmul.f32 %v704_v4, %v4772_v30  ;;  %v566_v49 = vmul.f32 %v4772_v30, %v523_v36  ;;  %v4517_v9 = vld [vmem:[%s4710_s15 + $0xa8] sm:$0xff] }
 0x25b   : > { %v1681_v7 = vsub.f32 1.5, %v1680_v29  ;;  %v707_v5 = vpop.xlane.xlu2 %706  ;;  %v5687_v55 = vadd.f32 %v4517_v9, %v1232_v18 }
 0x25c   : > { %v4372_v34 = vpop.eup %4371  ;;  %v1671_v3 = vsub.f32 1.5, %v1670_v24  ;;  %v5678_v58 = vadd.f32 1e-05, %v752_v43  ;;  %v5681_v40 = vsub.f32 %v5401_v42, %v566_v49  ;;  %v753_v22 = vmul.f32 %v707_v5, %v4772_v30 }
 0x25d   : > { %v1682_v50 = vmul.f32 %v4368_v12, %v1681_v7  ;;  %v1014_v15 = vmul.f32 %v4372_v34, %v5658_v60  ;;  %7908 = vst [vmem:[#allocation26_spill] sm:$0xff] %v5687_v55  ;;  %v1338_v46 = vsel %vm433_vm0, %v5687_v55, 0.0  ;;  %vm1020_vm11 = vweird.f32 %v4372_v34 }
 0x25e   : > { %v1672_v61 = vmul.f32 %v4370_v33, %v1671_v3  ;;  %4375 = vrsqrt.f32 %v5678_v58  ;;  %v5691_v29 = vadd.f32 1e-05, %v753_v22  ;;  %v5693_v42 = vpop.eup %4373  ;;  %v630_v36 = vmul.f32 %v5681_v40, %v5681_v40  ;;  %1339 = vadd.xlane.f32.xlu1 %v1338_v46  ;;  %vm1021_vm13 = vmor %vm1019_vm12, %vm1020_vm11 }
 0x25f   : > { %v1686_v14 = vsel %vm1685_vm8, %v4368_v12, %v1682_v50  ;;  %v1015_v4 = vmul.f32 %v4372_v34, %v1014_v15  ;;  %v1688_v35 = vmul.f32 %v5693_v42, %v5668_v10  ;;  %vm1694_vm14 = vweird.f32 %v5693_v42 }
 0x260   : > { %v1952_v24 = vmul.f32 %v1686_v14, %v5322_v6  ;;  %v1676_v43 = vsel %vm1675_vm10, %v4370_v33, %v1672_v61  ;;  %4377 = vrsqrt.f32 %v5691_v29  ;;  %v720_v22 = vsel %vm433_vm0, %v630_v36, 0.0  ;;  %vm5756_vm2 = vmor %vm1693_vm15, %vm1694_vm14 }
 0x261   : > { %v1951_v49 = vmul.f32 %v1676_v43, %v5334_v26  ;;  %v1016_v18 = vmul.f32 0.5, %v1015_v4  ;;  %v1322_v12 = vpop.xlane.xlu1 %1321  ;;  %v1490_v7 = vpop.xlane.xlu0 %1489  ;;  %v1689_v5 = vmul.f32 %v5693_v42, %v1688_v35  ;;  %721 = vadd.xlane.f32.xlu2 %v720_v22  ;;  %vm1029_vm1 = vweird.f32 %v5678_v58 }
 0x262   : > { %v1386_v3 = vmul.f32 %v1322_v12, %v4772_v30  ;;  %v1570_v6 = vmul.f32 %v1490_v7, %v4772_v30  ;;  %v1985_v15 = vmul.f32 %v5566_v51, %v1952_v24  ;;  %vm1039_vm6 = vweird.f32 %v5691_v29 }
 0x263   : > { %v1017_v33 = vsub.f32 1.5, %v1016_v18  ;;  %v1496_v50 = vpop.xlane.xlu2 %1495  ;;  %v1984_v26 = vmul.f32 %v5566_v51, %v1951_v49  ;;  %v1690_v61 = vmul.f32 0.5, %v1689_v5  ;;  %v5724_v49 = vld [vmem:[%s4934_s19 + $0x58] sm:$0xff]  }
 0x264   : > { %v5711_v9 = vpop.eup %4375  ;;  %v5714_v14 = vsub.f32 %v5431_v11, %v1386_v3  ;;  %v5716_v4 = vadd.f32 1e-05, %v1570_v6  ;;  %v1572_v46 = vmul.f32 %v1496_v50, %v4772_v30  ;;  %v2018_v60 = vadd.f32 %v5577_v45, %v1985_v15  ;;  %v4518_v11 = vld [vmem:[%s4710_s15 + $0xb0] sm:$0xff] }
 0x265   : > { %v1018_v36 = vmul.f32 %v4372_v34, %v1017_v33  ;;  %v1024_v43 = vmul.f32 %v5711_v9, %v5678_v58  ;;  %v2017_v35 = vadd.f32 %v5577_v45, %v1984_v26  ;;  %v1691_v24 = vsub.f32 1.5, %v1690_v61 }
 0x266   : > { %4379 = vrsqrt.f32 %v5716_v4  ;;  %v5728_v18 = vadd.f32 1e-05, %v1572_v46  ;;  %v5730_v12 = vpop.eup %4377  ;;  %v1450_v3 = vmul.f32 %v5714_v14, %v5714_v14  ;;  %v4212_v33 = vunpack.c.l.bf16 %v5724_v49 }
 0x267   : > { %v1022_v7 = vsel %vm1021_vm13, %v4372_v34, %v1018_v36  ;;  %v1025_v5 = vmul.f32 %v5711_v9, %v1024_v43  ;;  %v1034_v6 = vmul.f32 %v5730_v12, %v5691_v29  ;;  %v2047_v34 = vpack.c.bf16 %v2018_v60, %v2017_v35 }
 0x268   : > { %v1135_v22 = vmul.f32 %v1022_v7, %v5347_v41  ;;  %4381 = vrsqrt.f32 %v5728_v18  ;;  %v1692_v15 = vmul.f32 %v5693_v42, %v1691_v24  ;;  %v1512_v36 = vsel %vm433_vm0, %v1450_v3, 0.0 }
 0x269   : > { %v1026_v50 = vmul.f32 0.5, %v1025_v5  ;;  %v1493_v26 = vpop.xlane.xlu1 %1492  ;;  %v1319_v61 = vpop.xlane.xlu0 %1318  ;;  %v1035_v46 = vmul.f32 %v5730_v12, %v1034_v6  ;;  %4070 = vmatmul.msk.bf16.gmra.mxu0 %vm433_vm0, %v2047_v34  ;;  %1513 = vadd.xlane.f32.xlu0 %v1512_v36  ;;  %vm1030_vm3 = vweird.f32 %v5711_v9  ;;  %vm1040_vm4 = vweird.f32 %v5730_v12 }
 0x26a   : > { %v1571_v41 = vmul.f32 %v1493_v26, %v4772_v30  ;;  %v1385_v7 = vmul.f32 %v1319_v61, %v4772_v30  ;;  %v1168_v35 = vmul.f32 %v4957_v53, %v1135_v22  ;;  %v1696_v26 = vsel %vm5756_vm2, %v5693_v42, %v1692_v15  ;;  %vm5781_vm5 = vmor %vm1029_vm1, %vm1030_vm3 }
 0x26b   : > { %v1027_v43 = vsub.f32 1.5, %v1026_v50  ;;  %v529_v5 = vpop.xlane.xlu2 %528  ;;  %v1036_v24 = vmul.f32 0.5, %v1035_v46  ;;  %vm1703_vm7 = vweird.f32 %v5716_v4  ;;  %vm5793_vm8 = vmor %vm1039_vm6, %vm1040_vm4  ;;  %vm1723_vm15 = vweird.f32 %v5728_v18 }
 0x26c   : > { %v4380_v60 = vpop.eup %4379  ;;  %v5751_v6 = vadd.f32 1e-05, %v1571_v41  ;;  %v568_v3 = vmul.f32 %v4772_v30, %v529_v5  ;;  %v5764_v34 = vsub.f32 %v5449_v19, %v1385_v7  ;;  %v1201_v7 = vadd.f32 %v4962_v31, %v1168_v35 }
 0x26d   : > { %v1028_v50 = vmul.f32 %v5711_v9, %v1027_v43  ;;  %v1698_v22 = vmul.f32 %v4380_v60, %v5716_v4  ;;  %v1037_v61 = vsub.f32 1.5, %v1036_v24  ;;  %vm1704_vm9 = vweird.f32 %v4380_v60 }
 0x26e   : > { %4383 = vrsqrt.f32 %v5751_v6  ;;  %v5771_v46 = vpop.eup %4381  ;;  %v5774_v41 = vsub.f32 %v5458_v17, %v568_v3  ;;  %v1449_v43 = vmul.f32 %v5764_v34, %v5764_v34  ;;  %v1233_v29 = vadd.f32 %v4212_v33, %v1201_v7  ;;  %vm1705_vm10 = vmor %vm1703_vm7, %vm1704_vm9 }
 0x26f   : > { %v1699_v36 = vmul.f32 %v4380_v60, %v1698_v22  ;;  %v1038_v15 = vmul.f32 %v5730_v12, %v1037_v61  ;;  %v1718_v17 = vmul.f32 %v5771_v46, %v5728_v18  ;;  %v1032_v5 = vsel %vm5781_vm5, %v5711_v9, %v1028_v50 }
 0x270   : > { %v1509_v3 = vsel %vm433_vm0, %v1449_v43, 0.0  ;;  %v1953_v22 = vmul.f32 %v1696_v26, %v5366_v44  ;;  %v5807_v19 = vadd.f32 %v4518_v11, %v1233_v29  ;;  %v632_v33 = vmul.f32 %v5774_v41, %v5774_v41 }
 0x271   : > { %v1700_v35 = vmul.f32 0.5, %v1699_v36  ;;  %v526_v24 = vpop.xlane.xlu1 %525  ;;  %v5798_v10 = vpop.xlane.xlu0 %709  ;;  %v1042_v61 = vsel %vm5793_vm8, %v5730_v12, %v1038_v15  ;;  %v1719_v42 = vmul.f32 %v5771_v46, %v1718_v17  ;;  %1510 = vadd.xlane.f32.xlu2 %v1509_v3  ;;  %v1136_v44 = vmul.f32 %v1032_v5, %v5389_v56 }
 0x272   : > { %v567_v9 = vmul.f32 %v4772_v30, %v526_v24  ;;  %7915 = vst [vmem:[#allocation27_spill] sm:$0xff] %v5807_v19  ;;  %v1137_v12 = vmul.f32 %v1042_v61, %v5396_v47  ;;  %v1341_v11 = vsel %vm433_vm0, %v5807_v19, 0.0  ;;  %v4213_v56 = vunpack.c.h.bf16 %v5724_v49  ;;  %v5827_v24 = vld [vmem:[%s4934_s19 + $0x60] sm:$0xff]  }
 0x273   : > { %v1701_v50 = vsub.f32 1.5, %v1700_v35  ;;  %v1325_v36 = vpop.xlane.xlu2 %1324  ;;  %v1720_v26 = vmul.f32 0.5, %v1719_v42  ;;  %1342 = vadd.xlane.f32.xlu0 %v1341_v11  ;;  %v726_v35 = vsel %vm433_vm0, %v632_v33, 0.0  ;;  %v1986_v61 = vmul.f32 %v5566_v51, %v1953_v22 }
 0x274   : > { %v4384_v43 = vpop.eup %4383  ;;  %v5814_v7 = vsub.f32 %v5471_v8, %v567_v9  ;;  %v1387_v58 = vmul.f32 %v1325_v36, %v4772_v30  ;;  %v1169_v4 = vmul.f32 %v4957_v53, %v1136_v44  ;;  %vm1713_vm11 = vweird.f32 %v5751_v6 }
 0x275   : > { %v1702_v15 = vmul.f32 %v4380_v60, %v1701_v50  ;;  %v1708_v17 = vmul.f32 %v4384_v43, %v5751_v6  ;;  %v1721_v29 = vsub.f32 1.5, %v1720_v26  ;;  %v1170_v50 = vmul.f32 %v4957_v53, %v1137_v12 }
 0x276   : > { %v631_v8 = vmul.f32 %v5814_v7, %v5814_v7  ;;  %v5833_v9 = vsub.f32 %v5479_v59, %v1387_v58  ;;  %v4216_v22 = vunpack.c.l.bf16 %v5827_v24  ;;  %vm1724_vm12 = vweird.f32 %v5771_v46 }
 0x277   : > { %v1706_v5 = vsel %vm1705_vm10, %v4380_v60, %v1702_v15  ;;  %v1709_v47 = vmul.f32 %v4384_v43, %v1708_v17  ;;  %vm1714_vm13 = vweird.f32 %v4384_v43  ;;  %v1202_v44 = vadd.f32 %v4962_v31, %v1169_v4  ;;  %vm1725_vm1 = vmor %vm1723_vm15, %vm1724_vm12 }
 0x278   : > { %v1954_v3 = vmul.f32 %v1706_v5, %v5418_v37  ;;  %v723_v49 = vsel %vm433_vm0, %v631_v8, 0.0  ;;  %v2019_v12 = vadd.f32 %v5577_v45, %v1986_v61  ;;  %v1203_v17 = vadd.f32 %v4962_v31, %v1170_v50  ;;  %vm5854_vm14 = vmor %vm1713_vm11, %vm1714_vm13  ;;  %v4519_v61 = vld [vmem:[%s4710_s15 + $0xb8] sm:$0xff] }
 0x279   : > { %v1710_v42 = vmul.f32 0.5, %v1709_v47  ;;  %v1328_v60 = vpop.xlane.xlu0 %1327  ;;  %724 = vadd.xlane.f32.xlu1 %v723_v49  ;;  %727 = vadd.xlane.f32.xlu2 %v726_v35  ;;  %v1722_v58 = vmul.f32 %v5771_v46, %v1721_v29  ;;  %v1234_v5 = vadd.f32 %v4213_v56, %v1202_v44  ;;  %v1451_v47 = vmul.f32 %v5833_v9, %v5833_v9 }
 0x27a   : > { %v1388_v37 = vmul.f32 %v1328_v60, %v4772_v30  ;;  %v1987_v36 = vmul.f32 %v5566_v51, %v1954_v3  ;;  %v754_v6 = vmul.f32 %v5798_v10, %v4772_v30 }
 0x27b   : > { %v1711_v33 = vsub.f32 1.5, %v1710_v42  ;;  %v5864_v56 = vadd.f32 %v4519_v61, %v1234_v5  ;;  %v1235_v42 = vadd.f32 %v4216_v22, %v1203_v17  ;;  %v1726_v18 = vsel %vm1725_vm1, %v5771_v46, %v1722_v58 }
 0x27c   : > { %v5844_v26 = vsub.f32 %v5487_v52, %v1388_v37  ;;  %v2020_v15 = vadd.f32 %v5577_v45, %v1987_v36  ;;  %v1515_v49 = vsel %vm433_vm0, %v1451_v47, 0.0  ;;  %v1956_v50 = vmul.f32 %v1726_v18, %v5422_v27  ;;  %v4520_v37 = vld [vmem:[%s4710_s15 + $0xc0] sm:$0xff]  ;;  %v6066_v52 = vld [vmem:[%s4934_s19 + $0x70] sm:$0xff]  }
 0x27d   : > { %v1712_v11 = vmul.f32 %v4384_v43, %v1711_v33  ;;  %7918 = vst [vmem:[#allocation28_spill] sm:$0xff] %v5864_v56  ;;  %v786_v10 = vadd.f32 1e-05, %v754_v6  ;;  %v5879_v36 = vadd.f32 %v4520_v37, %v1235_v42 }
 0x27e   : > { %v2048_v35 = vpack.c.bf16 %v2020_v15, %v2019_v12  ;;  %v1452_v3 = vmul.f32 %v5844_v26, %v5844_v26  ;;  %v1989_v33 = vmul.f32 %v5566_v51, %v1956_v50  ;;  %v4217_v50 = vunpack.c.h.bf16 %v5827_v24 }
 0x27f   : > { %v1716_v29 = vsel %vm5854_vm14, %v4384_v43, %v1712_v11  ;;  %v1344_v43 = vsel %vm433_vm0, %v5864_v56, 0.0  ;;  %4385 = vrsqrt.f32 %v786_v10  ;;  %v1347_v46 = vsel %vm433_vm0, %v5879_v36, 0.0 }
 0x280   : > { %4071 = vmatmul.msk.bf16.gmra.mxu0 %vm433_vm0, %v2048_v35  ;;  %v1518_v4 = vsel %vm433_vm0, %v1452_v3, 0.0  ;;  %v1955_v60 = vmul.f32 %v1716_v29, %v5440_v2  ;;  %v2022_v2 = vadd.f32 %v5577_v45, %v1989_v33  ;;  %vm1049_vm3 = vweird.f32 %v786_v10 }
 0x281   : > { %1519 = vadd.xlane.f32.xlu0 %v1518_v4  ;;  %1345 = vadd.xlane.f32.xlu1 %v1344_v43 }
 0x282   : > { %1516 = vadd.xlane.f32.xlu2 %v1515_v49  ;;  %v1988_v22 = vmul.f32 %v5566_v51, %v1955_v60 }
 0x284   : > { %v2021_v44 = vadd.f32 %v5577_v45, %v1988_v22 }
 0x285   : > { %v4386_v12 = vpop.eup %4385 }
 0x286   : > { %v2049_v15 = vpack.c.bf16 %v2022_v2, %v2021_v44  ;;  %v1044_v27 = vmul.f32 %v4386_v12, %v786_v10  ;;  %vm1050_vm2 = vweird.f32 %v4386_v12 }
 0x287   : > { %vm1051_vm4 = vmor %vm1049_vm3, %vm1050_vm2 }
 0x288   : > { %v1045_v17 = vmul.f32 %v4386_v12, %v1044_v27 }
 0x289   : > { %1348 = vadd.xlane.f32.xlu0 %v1347_v46 }
 0x28a   : > { %v1046_v58 = vmul.f32 0.5, %v1045_v17 }
 0x28c   : > { %v1047_v11 = vsub.f32 1.5, %v1046_v58 }
 0x28e   : > { %v1048_v5 = vmul.f32 %v4386_v12, %v1047_v11 }
 0x290   : > { %4072 = vmatmul.msk.bf16.gmra.mxu0 %vm433_vm0, %v2049_v15  ;;  %v1052_v47 = vsel %vm1051_vm4, %v4386_v12, %v1048_v5 }
 0x291   : > { %v1138_v29 = vmul.f32 %v1052_v47, %v5464_v32 }
 0x293   : > { %v1171_v42 = vmul.f32 %v4957_v53, %v1138_v29 }
 0x295   : > { %v1204_v10 = vadd.f32 %v4962_v31, %v1171_v42 }
 0x297   : > { %v1236_v15 = vadd.f32 %v4217_v50, %v1204_v10 }
 0x2a6   : > { %v1499_v8 = vpop.xlane.xlu0 %1498  ;;  %v1502_v35 = vpop.xlane.xlu1 %1501 }
 0x2a7   : > { %v1573_v3 = vmul.f32 %v1499_v8, %v4772_v30  ;;  %v1574_v61 = vmul.f32 %v1502_v35, %v4772_v30  ;;  %v4521_v8 = vld [vmem:[%s4710_s15 + $0xc8] sm:$0xff] }
 0x2a8   : > { %v5908_v35 = vadd.f32 %v4521_v8, %v1236_v15 }
 0x2a9   : > { %v1605_v6 = vadd.f32 1e-05, %v1573_v3  ;;  %v1606_v4 = vadd.f32 1e-05, %v1574_v61  ;;  %v432_v3 = vld [vmem:[%s332_s20] sm:$0x3] }
 0x2aa   : > { %7920 = vst [vmem:[#allocation30_spill] sm:$0xff] %v5908_v35 }
 0x2ab   : > { %4387 = vrsqrt.f32 %v1605_v6  ;;  %vm1733_vm7 = vweird.f32 %v1605_v6  ;;  %vm1743_vm8 = vweird.f32 %v1606_v4 }
 0x2ac   : > { %4389 = vrsqrt.f32 %v1606_v4 }
 0x2ae   : > { %v1331_v18 = vpop.xlane.xlu0 %1330  ;;  %v713_v43 = vpop.xlane.xlu1 %712 }
 0x2af   : > { %v1389_v49 = vmul.f32 %v1331_v18, %v4772_v30  ;;  %v755_v60 = vmul.f32 %v713_v43, %v4772_v30 }
 0x2b1   : > { %v4388_v32 = vpop.eup %4387  ;;  %v5897_v37 = vsub.f32 %v5541_v39, %v1389_v49  ;;  %v787_v33 = vadd.f32 1e-05, %v755_v60  ;;  %v5913_v60 = vperm.slane %v432_v3, 0 }
 0x2b2   : > { %v4390_v22 = vpop.eup %4389  ;;  %v1728_v46 = vmul.f32 %v4388_v32, %v1605_v6  ;;  %vm1734_vm5 = vweird.f32 %v4388_v32 }
 0x2b3   : > { %7919 = vst [vmem:[#allocation29_spill] sm:$0xff] %v5897_v37  ;;  %v1738_v44 = vmul.f32 %v4390_v22, %v1606_v4  ;;  %v1453_v2 = vmul.f32 %v5897_v37, %v5897_v37  ;;  %4391 = vrsqrt.f32 %v787_v33  ;;  %vm1744_vm6 = vweird.f32 %v4390_v22  ;;  %vm1735_vm9 = vmor %vm1733_vm7, %vm1734_vm5 }
 0x2b4   : > { %v1729_v12 = vmul.f32 %v4388_v32, %v1728_v46  ;;  %vm1745_vm10 = vmor %vm1743_vm8, %vm1744_vm6  ;;  %vm1059_vm11 = vweird.f32 %v787_v33 }
 0x2b5   : > { %v1739_v27 = vmul.f32 %v4390_v22, %v1738_v44  ;;  %v1521_v24 = vsel %vm433_vm0, %v1453_v2, 0.0  ;;  %v1350_v44 = vsel %vm433_vm0, %v5908_v35, 0.0 }
 0x2b6   : > { %v1730_v17 = vmul.f32 0.5, %v1729_v12  ;;  %1522 = vadd.xlane.f32.xlu1 %v1521_v24  ;;  %v1334_v11 = vpop.xlane.xlu1 %1333 }
 0x2b7   : > { %v1740_v58 = vmul.f32 0.5, %v1739_v27  ;;  %v1390_v47 = vmul.f32 %v1334_v11, %v4772_v30  ;;  %v5925_v11 = vperm.slane %v432_v3, 1 }
 0x2b8   : > { %v1731_v5 = vsub.f32 1.5, %v1730_v17 }
 0x2b9   : > { %v1741_v29 = vsub.f32 1.5, %v1740_v58  ;;  %v4392_v61 = vpop.eup %4391  ;;  %v5911_v18 = vsub.f32 %v5588_v28, %v1390_v47 }
 0x2ba   : > { %v1732_v42 = vmul.f32 %v4388_v32, %v1731_v5  ;;  %v1054_v49 = vmul.f32 %v4392_v61, %v787_v33  ;;  %vm1060_vm12 = vweird.f32 %v4392_v61 }
 0x2bb   : > { %7921 = vst [vmem:[#allocation31_spill] sm:$0xff] %v5911_v18  ;;  %v1742_v43 = vmul.f32 %v4390_v22, %v1741_v29  ;;  %v1454_v46 = vmul.f32 %v5911_v18, %v5911_v18  ;;  %vm1061_vm13 = vmor %vm1059_vm11, %vm1060_vm12 }
 0x2bc   : > { %v1736_v50 = vsel %vm1735_vm9, %v4388_v32, %v1732_v42  ;;  %v716_v10 = vpop.xlane.xlu2 %715  ;;  %v1055_v12 = vmul.f32 %v4392_v61, %v1054_v49 }
 0x2bd   : > { %v1746_v2 = vsel %vm1745_vm10, %v4390_v22, %v1742_v43  ;;  %v1957_v6 = vmul.f32 %v1736_v50, %v5524_v48  ;;  %v756_v15 = vmul.f32 %v716_v10, %v4772_v30  ;;  %v1524_v27 = vsel %vm433_vm0, %v1454_v46, 0.0 }
 0x2be   : > { %v1958_v4 = vmul.f32 %v1746_v2, %v5527_v25  ;;  %1351 = vadd.xlane.f32.xlu1 %v1350_v44  ;;  %v1508_v32 = vpop.xlane.xlu0 %1507  ;;  %v1056_v24 = vmul.f32 0.5, %v1055_v12  ;;  %1525 = vadd.xlane.f32.xlu2 %v1524_v27 }
 0x2bf   : > { %v788_v17 = vadd.f32 1e-05, %v756_v15  ;;  %v1576_v58 = vmul.f32 %v1508_v32, %v4772_v30  ;;  %v1990_v22 = vmul.f32 %v5566_v51, %v1957_v6  ;;  %v2134_v48 = vpop.f32.mrf.mxu0  ;;  %v5947_v15 = vld [vmem:[%s4934_s19 + $0x68] sm:$0xff]  }
 0x2c0   : > { %v1991_v5 = vmul.f32 %v5566_v51, %v1958_v4  ;;  %v1057_v47 = vsub.f32 1.5, %v1056_v24  ;;  %v2215_v8 = vmul.f32 %v5913_v60, %v2134_v48 }
 0x2c1   : > { %4393 = vrsqrt.f32 %v788_v17  ;;  %v5928_v25 = vadd.f32 1e-05, %v1576_v58  ;;  %v2023_v29 = vadd.f32 %v5577_v45, %v1990_v22  ;;  %vm1069_vm15 = vweird.f32 %v788_v17 }
 0x2c2   : > { %v2024_v42 = vadd.f32 %v5577_v45, %v1991_v5  ;;  %v1058_v43 = vmul.f32 %v4392_v61, %v1057_v47  ;;  %v5937_v3 = vadd.f32 %v5925_v11, %v2215_v8  ;;  %v4220_v5 = vunpack.c.l.bf16 %v5947_v15 }
 0x2c3   : > { %4395 = vrsqrt.f32 %v5928_v25  ;;  %vm1763_vm6 = vweird.f32 %v5928_v25 }
 0x2c4   : > { %v2050_v49 = vpack.c.bf16 %v2024_v42, %v2023_v29  ;;  %v1062_v50 = vsel %vm1061_vm13, %v4392_v61, %v1058_v43  ;;  %v5941_v33 = vmul.f32 0.70710677, %v5937_v3  ;;  %v4164_v42 = vld [vmem:[%s7821_s5 + $0x38] sm:$0xff] }
 0x2c5   : > { %v1139_v10 = vmul.f32 %v1062_v50, %v5559_v54  ;;  %3769 = vmatpush.bf16.msra.mxu1 %v4164_v42  ;;  %4247 = vmatpush.bf16.msra.mxu2 %v4164_v42 }
 0x2c6   : > { %4073 = vmatmul.msk.bf16.gmra.mxu0 %vm433_vm0, %v2050_v49  ;;  %v719_v46 = vpop.xlane.xlu1 %718  ;;  %v1337_v44 = vpop.xlane.xlu0 %1336  ;;  %v2344_v48 = vmul.f32 %v5941_v33, %v5941_v33 }
 0x2c7   : > { %v4394_v2 = vpop.eup %4393  ;;  %v757_v6 = vmul.f32 %v719_v46, %v4772_v30  ;;  %v1391_v12 = vmul.f32 %v1337_v44, %v4772_v30  ;;  %v2136_v27 = vpop.f32.mrf.mxu0  ;;  %v1172_v61 = vmul.f32 %v4957_v53, %v1139_v10 }
 0x2c8   : > { %v1064_v4 = vmul.f32 %v4394_v2, %v788_v17  ;;  %v2216_v58 = vmul.f32 %v5913_v60, %v2136_v27  ;;  %vm1070_vm14 = vweird.f32 %v4394_v2  ;;  %v5974_v44 = vmin.f32 %v2344_v48, 16.0  ;;  %v4522_v48 = vld [vmem:[%s4710_s15 + $0xd0] sm:$0xff] }
 0x2c9   : > { %v5950_v32 = vpop.eup %4395  ;;  %v5952_v54 = vadd.f32 1e-05, %v757_v6  ;;  %v5955_v24 = vsub.f32 %v5629_v23, %v1391_v12  ;;  %v1205_v49 = vadd.f32 %v4962_v31, %v1172_v61  ;;  %v4163_v61 = vld [vmem:[%s7821_s5 + $0x30] sm:$0xff]  ;;  %vm1071_vm1 = vmor %vm1069_vm15, %vm1070_vm14 }
 0x2ca   : > { %v1065_v22 = vmul.f32 %v4394_v2, %v1064_v4  ;;  %v1758_v47 = vmul.f32 %v5950_v32, %v5928_v25  ;;  %v5965_v8 = vadd.f32 %v5925_v11, %v2216_v58  ;;  %3770 = vmatpush.bf16.msra.mxu1 %v4163_v61  ;;  %4248 = vmatpush.bf16.msra.mxu2 %v4163_v61  ;;  %vm1764_vm4 = vweird.f32 %v5950_v32 }
 0x2cb   : > { %7922 = vst [vmem:[#allocation32_spill] sm:$0xff] %v5955_v24  ;;  %4397 = vrsqrt.f32 %v5952_v54  ;;  %v1455_v29 = vmul.f32 %v5955_v24, %v5955_v24  ;;  %v1237_v27 = vadd.f32 %v4220_v5, %v1205_v49  ;;  %vm1079_vm2 = vweird.f32 %v5952_v54  ;;  %vm6045_vm7 = vmor %vm1763_vm6, %vm1764_vm4 }
 0x2cc   : > { %v1066_v43 = vmul.f32 0.5, %v1065_v22  ;;  %v1505_v50 = vpop.xlane.xlu2 %1504  ;;  %v5977_v6 = vmul.f32 0.70710677, %v5965_v8  ;;  %v1759_v4 = vmul.f32 %v5950_v32, %v1758_v47  ;;  %v2346_v47 = vmul.f32 2.1237322e-06, %v5974_v44 }
 0x2cd   : > { %v1527_v10 = vsel %vm433_vm0, %v1455_v29, 0.0  ;;  %v1575_v12 = vmul.f32 %v1505_v50, %v4772_v30  ;;  %v5988_v42 = vadd.f32 %v4522_v48, %v1237_v27 }
 0x2ce   : > { %v1067_v46 = vsub.f32 1.5, %v1066_v43  ;;  %1528 = vadd.xlane.f32.xlu2 %v1527_v10  ;;  %v2384_v49 = vmul.f32 %v5977_v6, %v5977_v6  ;;  %v1760_v50 = vmul.f32 0.5, %v1759_v4  ;;  %v2347_v61 = vadd.f32 0.00028619796, %v2346_v47  ;;  %v4161_v47 = vld [vmem:[%s7821_s5 + $0x20] sm:$0xff] }
 0x2cf   : > { %v5984_v22 = vadd.f32 1e-05, %v1575_v12  ;;  %7923 = vst [vmem:[#allocation33_spill] sm:$0xff] %v5988_v42  ;;  %v1353_v27 = vsel %vm433_vm0, %v5988_v42, 0.0  ;;  %v6194_v42 = vmul.f32 0.5, %v5937_v3 }
 0x2d0   : > { %v1068_v58 = vmul.f32 %v4394_v2, %v1067_v46  ;;  %v4162_v46 = vld [vmem:[%s7821_s5 + $0x28] sm:$0xff]  ;;  %v6002_v48 = vmin.f32 %v2384_v49, 16.0  ;;  %1354 = vadd.xlane.f32.xlu1 %v1353_v27  ;;  %v1761_v23 = vsub.f32 1.5, %v1760_v50  ;;  %v4221_v49 = vunpack.c.h.bf16 %v5947_v15 }
 0x2d1   : > { %v4398_v29 = vpop.eup %4397  ;;  %4399 = vrsqrt.f32 %v5984_v22  ;;  %v1340_v10 = vpop.xlane.xlu1 %1339  ;;  %3771 = vmatpush.bf16.msra.mxu1 %v4162_v46  ;;  %4249 = vmatpush.bf16.msra.mxu2 %v4162_v46  ;;  %vm1753_vm9 = vweird.f32 %v5984_v22 }
 0x2d2   : > { %v1072_v43 = vsel %vm1071_vm1, %v4394_v2, %v1068_v58  ;;  %v1074_v5 = vmul.f32 %v4398_v29, %v5952_v54  ;;  %v1392_v2 = vmul.f32 %v1340_v10, %v4772_v30  ;;  %vm1080_vm3 = vweird.f32 %v4398_v29 }
 0x2d3   : > { %v1140_v17 = vmul.f32 %v1072_v43, %v5605_v62  ;;  %vm1081_vm5 = vmor %vm1079_vm2, %vm1080_vm3 }
 0x2d4   : > { %v1075_v12 = vmul.f32 %v4398_v29, %v1074_v5  ;;  %v722_v62 = vpop.xlane.xlu2 %721  ;;  %v6006_v28 = vsub.f32 %v5687_v55, %v1392_v2 }
 0x2d5   : > { %v1173_v43 = vmul.f32 %v4957_v53, %v1140_v17  ;;  %v758_v5 = vmul.f32 %v722_v62, %v4772_v30  ;;  %3772 = vmatpush.bf16.msra.mxu1 %v4161_v47  ;;  %4250 = vmatpush.bf16.msra.mxu2 %v4161_v47  ;;  %v2386_v62 = vmul.f32 2.1237322e-06, %v6002_v48 }
 0x2d6   : > { %v1076_v58 = vmul.f32 0.5, %v1075_v12  ;;  %v2139_v4 = vpop.f32.mrf.mxu0  ;;  %7924 = vst [vmem:[#allocation34_spill] sm:$0xff] %v6006_v28  ;;  %v1456_v2 = vmul.f32 %v6006_v28, %v6006_v28 }
 0x2d7   : > { %v2217_v10 = vmul.f32 %v5913_v60, %v2139_v4  ;;  %v6015_v12 = vpop.eup %4399  ;;  %v6017_v17 = vadd.f32 1e-05, %v758_v5  ;;  %v1206_v27 = vadd.f32 %v4962_v31, %v1173_v43  ;;  %v1762_v4 = vmul.f32 %v5950_v32, %v1761_v23  ;;  %v4160_v43 = vld [vmem:[%s7821_s5 + $0x18] sm:$0xff] }
 0x2d8   : > { %v1077_v46 = vsub.f32 1.5, %v1076_v58  ;;  %v1748_v15 = vmul.f32 %v6015_v12, %v5984_v22  ;;  %v2348_v5 = vmul.f32 %v2347_v61, %v5974_v44  ;;  %v1530_v54 = vsel %vm433_vm0, %v1456_v2, 0.0 }
 0x2d9   : > { %v6020_v50 = vadd.f32 %v5925_v11, %v2217_v10  ;;  %4401 = vrsqrt.f32 %v6017_v17  ;;  %v1238_v61 = vadd.f32 %v4221_v49, %v1206_v27  ;;  %3773 = vmatpush.bf16.msra.mxu1 %v4160_v43  ;;  %4251 = vmatpush.bf16.msra.mxu2 %v4160_v43  ;;  %v4523_v27 = vld [vmem:[%s4710_s15 + $0xd8] sm:$0xff]  ;;  %vm1754_vm8 = vweird.f32 %v6015_v12 }
 0x2da   : > { %v1078_v58 = vmul.f32 %v4398_v29, %v1077_v46  ;;  %v1749_v47 = vmul.f32 %v6015_v12, %v1748_v15  ;;  %1531 = vadd.xlane.f32.xlu0 %v1530_v54  ;;  %v2349_v49 = vadd.f32 0.0036580483, %v2348_v5  ;;  %vm1755_vm10 = vmor %vm1753_vm9, %vm1754_vm8  ;;  %vm1089_vm12 = vweird.f32 %v6017_v17 }
 0x2db   : > { %v6040_v46 = vmul.f32 0.70710677, %v6020_v50  ;;  %v6056_v43 = vadd.f32 %v4523_v27, %v1238_v61 }
 0x2dc   : > { %v1082_v10 = vsel %vm1081_vm5, %v4398_v29, %v1078_v58  ;;  %v2387_v29 = vadd.f32 0.00028619796, %v2386_v62  ;;  %v1750_v58 = vmul.f32 0.5, %v1749_v47  ;;  %v1514_v25 = vpop.xlane.xlu0 %1513  ;;  %v4159_v62 = vld [vmem:[%s7821_s5 + $0x10] sm:$0xff]  ;;  %v2350_v22 = vmul.f32 %v2349_v49, %v5974_v44 }
 0x2dd   : > { %v1141_v23 = vmul.f32 %v1082_v10, %v5640_v21  ;;  %v2424_v15 = vmul.f32 %v6040_v46, %v6040_v46  ;;  %v1766_v21 = vsel %vm6045_vm7, %v5950_v32, %v1762_v4  ;;  %7927 = vst [vmem:[#allocation35_spill] sm:$0xff] %v6056_v43  ;;  %v1578_v54 = vmul.f32 %v1514_v25, %v4772_v30 }
 0x2de   : > { %v2141_v39 = vpop.f32.mrf.mxu0  ;;  %v1751_v10 = vsub.f32 1.5, %v1750_v58  ;;  %v1356_v32 = vsel %vm433_vm0, %v6056_v43, 0.0  ;;  %3774 = vmatpush.bf16.msra.mxu1 %v4159_v62  ;;  %4252 = vmatpush.bf16.msra.mxu2 %v4159_v62  ;;  %v2388_v5 = vmul.f32 %v2387_v29, %v6002_v48  ;;  %v4224_v25 = vunpack.c.l.bf16 %v6066_v52 }
 0x2df   : > { %v2218_v2 = vmul.f32 %v5913_v60, %v2141_v39  ;;  %v6062_v47 = vmin.f32 %v2424_v15, 16.0  ;;  %v6068_v55 = vpop.eup %4401  ;;  %v1174_v4 = vmul.f32 %v4957_v53, %v1141_v23  ;;  %1357 = vadd.xlane.f32.xlu2 %v1356_v32  ;;  %v1960_v27 = vmul.f32 %v1766_v21, %v5610_v20 }
 0x2e0   : > { %v1752_v61 = vmul.f32 %v6015_v12, %v1751_v10  ;;  %v1084_v58 = vmul.f32 %v6068_v55, %v6017_v17  ;;  %v2389_v59 = vadd.f32 0.0036580483, %v2388_v5  ;;  %vm1090_vm11 = vweird.f32 %v6068_v55 }
 0x2e1   : > { %v6072_v39 = vadd.f32 %v5925_v11, %v2218_v2  ;;  %v2426_v15 = vmul.f32 2.1237322e-06, %v6062_v47  ;;  %v6087_v2 = vadd.f32 1e-05, %v1578_v54  ;;  %v1207_v49 = vadd.f32 %v4962_v31, %v1174_v4  ;;  %vm6160_vm13 = vmor %vm1089_vm12, %vm1090_vm11 }
 0x2e2   : > { %v1756_v23 = vsel %vm1755_vm10, %v6015_v12, %v1752_v61  ;;  %v1085_v10 = vmul.f32 %v6068_v55, %v1084_v58  ;;  %v2351_v61 = vadd.f32 0.05243302, %v2350_v22 }
 0x2e3   : > { %v6090_v29 = vmul.f32 0.70710677, %v6072_v39  ;;  %v1959_v62 = vmul.f32 %v1756_v23, %v5656_v1  ;;  %v2427_v13 = vadd.f32 0.00028619796, %v2426_v15  ;;  %v1239_v0 = vadd.f32 %v4224_v25, %v1207_v49  ;;  %v4524_v25 = vld [vmem:[%s4710_s15 + $0xe0] sm:$0xff] }
 0x2e4   : > { %v1511_v32 = vpop.xlane.xlu2 %1510  ;;  %4403 = vrsqrt.f32 %v6087_v2  ;;  %v1086_v21 = vmul.f32 0.5, %v1085_v10  ;;  %v1993_v15 = vmul.f32 %v5566_v51, %v1960_v27  ;;  %v2390_v23 = vmul.f32 %v2389_v59, %v6002_v48 }
 0x2e5   : > { %v2464_v12 = vmul.f32 %v6090_v29, %v6090_v29  ;;  %v1577_v54 = vmul.f32 %v1511_v32, %v4772_v30  ;;  %v1992_v38 = vmul.f32 %v5566_v51, %v1959_v62  ;;  %v2428_v22 = vmul.f32 %v2427_v13, %v6062_v47 }
 0x2e6   : > { %v2144_v1 = vpop.f32.mrf.mxu0  ;;  %v1343_v5 = vpop.xlane.xlu0 %1342  ;;  %v6110_v32 = vadd.f32 %v4524_v25, %v1239_v0  ;;  %v2352_v62 = vmul.f32 %v2351_v61, %v5974_v44  ;;  %v2026_v13 = vadd.f32 %v5577_v45, %v1993_v15  ;;  %v4157_v15 = vld [vmem:[%s7821_s5] sm:$0xff]  ;;  %vm1783_vm14 = vweird.f32 %v6087_v2 }
 0x2e7   : > { %v6101_v20 = vmin.f32 %v2464_v12, 16.0  ;;  %v6103_v58 = vadd.f32 1e-05, %v1577_v54  ;;  %v2219_v4 = vmul.f32 %v5913_v60, %v2144_v1  ;;  %v2025_v10 = vadd.f32 %v5577_v45, %v1992_v38  ;;  %v4158_v12 = vld [vmem:[%s7821_s5 + $0x8] sm:$0xff] }
 0x2e8   : > { %7928 = vst [vmem:[#allocation36_spill] sm:$0xff] %v6110_v32  ;;  %v1393_v59 = vmul.f32 %v1343_v5, %v4772_v30  ;;  %v1087_v54 = vsub.f32 1.5, %v1086_v21  ;;  %3775 = vmatpush.bf16.msra.mxu1 %v4158_v12  ;;  %4253 = vmatpush.bf16.msra.mxu2 %v4158_v12  ;;  %v2429_v25 = vadd.f32 0.0036580483, %v2428_v22  ;;  %v1359_v63 = vsel %vm433_vm0, %v6110_v32, 0.0 }
 0x2e9   : > { %v6114_v49 = vadd.f32 %v5925_v11, %v2219_v4  ;;  %v2466_v27 = vmul.f32 2.1237322e-06, %v6101_v20  ;;  %4405 = vrsqrt.f32 %v6103_v58  ;;  %v2391_v4 = vadd.f32 0.05243302, %v2390_v23  ;;  %1360 = vadd.xlane.f32.xlu2 %v1359_v63 }
 0x2ea   : > { %v6127_v38 = vpop.eup %4403  ;;  %v2353_v5 = vadd.f32 0.18741608, %v2352_v62  ;;  %v2051_v57 = vpack.c.bf16 %v2026_v13, %v2025_v10  ;;  %v6139_v23 = vsub.f32 %v5807_v19, %v1393_v59  ;;  %v1088_v32 = vmul.f32 %v6068_v55, %v1087_v54 }
 0x2eb   : > { %7929 = vst [vmem:[#allocation37_spill] sm:$0xff] %v6114_v49  ;;  %v6124_v0 = vmul.f32 0.70710677, %v6114_v49  ;;  %v2467_v12 = vadd.f32 0.00028619796, %v2466_v27  ;;  %v1778_v63 = vmul.f32 %v6127_v38, %v6087_v2  ;;  %v2392_v27 = vmul.f32 %v2391_v4, %v6002_v48 }
 0x2ec   : > { %v725_v61 = vpop.xlane.xlu1 %724  ;;  %v728_v1 = vpop.xlane.xlu2 %727  ;;  %7930 = vst [vmem:[#allocation38_spill] sm:$0xff] %v6139_v23  ;;  %4074 = vmatmul.msk.bf16.gmra.mxu0 %vm433_vm0, %v2051_v57  ;;  %3776 = vmatpush.bf16.msra.mxu1 %v4157_v15  ;;  %v2430_v59 = vmul.f32 %v2429_v25, %v6062_v47  ;;  %v2354_v54 = vmul.f32 %v2353_v5, %v5974_v44  ;;  %vm1784_vm15 = vweird.f32 %v6127_v38  ;;  %vm1773_vm2 = vweird.f32 %v6103_v58 }
 0x2ed   : > { %v2504_v21 = vmul.f32 %v6124_v0, %v6124_v0  ;;  %v759_v16 = vmul.f32 %v725_v61, %v4772_v30  ;;  %v760_v22 = vmul.f32 %v728_v1, %v4772_v30  ;;  %v2357_v61 = vmul.f32 3.8918573e-05, %v5974_v44  ;;  %4254 = vmatpush.bf16.msra.mxu2 %v4157_v15  ;;  %vm6244_vm1 = vmor %vm1783_vm14, %vm1784_vm15 }
 0x2ee   : > { %v2146_v62 = vpop.f32.mrf.mxu0  ;;  %v2468_v57 = vmul.f32 %v2467_v12, %v6101_v20  ;;  %v1457_v25 = vmul.f32 %v6139_v23, %v6139_v23  ;;  %v1092_v17 = vsel %vm6160_vm13, %v6068_v55, %v1088_v32  ;;  %v1779_v5 = vmul.f32 %v6127_v38, %v1778_v63 }
 0x2ef   : > { %v6146_v10 = vadd.f32 1e-05, %v759_v16  ;;  %v2220_v13 = vmul.f32 %v5913_v60, %v2146_v62  ;;  %v6152_v1 = vpop.eup %4405  ;;  %v6156_v19 = vmin.f32 %v2504_v21, 16.0  ;;  %v6166_v4 = vadd.f32 1e-05, %v760_v22 }
 0x2f0   : > { %v2393_v62 = vadd.f32 0.18741608, %v2392_v27  ;;  %v2431_v28 = vadd.f32 0.05243302, %v2430_v59  ;;  %v1768_v12 = vmul.f32 %v6152_v1, %v6103_v58  ;;  %v2358_v43 = vadd.f32 0.001143296, %v2357_v61 }
 0x2f1   : > { %4407 = vrsqrt.f32 %v6146_v10  ;;  %v6175_v21 = vadd.f32 %v5925_v11, %v2220_v13  ;;  %v2355_v18 = vadd.f32 1.1283791, %v2354_v54  ;;  %v2506_v23 = vmul.f32 2.1237322e-06, %v6156_v19 }
 0x2f2   : > { %4409 = vrsqrt.f32 %v6166_v4  ;;  %v1142_v32 = vmul.f32 %v1092_v17, %v5681_v40  ;;  %v2469_v63 = vadd.f32 0.0036580483, %v2468_v57  ;;  %v1533_v13 = vsel %vm433_vm0, %v1457_v25, 0.0 }
 0x2f3   : > { %7933 = vst [vmem:[#allocation39_spill] sm:$0xff] %v6175_v21  ;;  %v6182_v55 = vmul.f32 0.70710677, %v6175_v21  ;;  %v1780_v59 = vmul.f32 0.5, %v1779_v5  ;;  %1534 = vadd.xlane.f32.xlu0 %v1533_v13  ;;  %v2394_v40 = vmul.f32 %v2393_v62, %v6002_v48  ;;  %v2432_v57 = vmul.f32 %v2431_v28, %v6062_v47 }
 0x2f4   : > { %v1346_v22 = vpop.xlane.xlu1 %1345  ;;  %v1520_v24 = vpop.xlane.xlu0 %1519  ;;  %v1769_v25 = vmul.f32 %v6152_v1, %v1768_v12  ;;  %v2507_v17 = vadd.f32 0.00028619796, %v2506_v23  ;;  %v2470_v3 = vmul.f32 %v2469_v63, %v6101_v20  ;;  %vm1774_vm3 = vweird.f32 %v6152_v1 }
 0x2f5   : > { %v1517_v15 = vpop.xlane.xlu2 %1516  ;;  %7934 = vst [vmem:[#allocation40_spill] sm:$0xff] %v6182_v55  ;;  %v2544_v16 = vmul.f32 %v6182_v55, %v6182_v55  ;;  %v1394_v61 = vmul.f32 %v1346_v22, %v4772_v30  ;;  %v1580_v54 = vmul.f32 %v1520_v24, %v4772_v30  ;;  %v2359_v22 = vmul.f32 %v2358_v43, %v5974_v44  ;;  %vm6282_vm5 = vmor %vm1773_vm2, %vm1774_vm3 }
 0x2f6   : > { %v1579_v27 = vmul.f32 %v1517_v15, %v4772_v30  ;;  %v6205_v24 = vmul.f32 %v2355_v18, %v5941_v33  ;;  %v1781_v28 = vsub.f32 1.5, %v1780_v59  ;;  %v1175_v43 = vmul.f32 %v4957_v53, %v1142_v32 }
 0x2f7   : > { %v6191_v37 = vpop.eup %4407  ;;  %v6199_v5 = vmin.f32 %v2544_v16, 16.0  ;;  %v6209_v13 = vadd.f32 1e-05, %v1580_v54  ;;  %v6216_v12 = vsub.f32 %v5864_v56, %v1394_v61  ;;  %v2433_v18 = vadd.f32 0.18741608, %v2432_v57 }
 0x2f8   : > { %v6201_v15 = vadd.f32 1e-05, %v1579_v27  ;;  %v6211_v62 = vpop.eup %4409  ;;  %v1094_v23 = vmul.f32 %v6191_v37, %v6146_v10  ;;  %v2395_v27 = vadd.f32 1.1283791, %v2394_v40  ;;  %v1770_v33 = vmul.f32 0.5, %v1769_v25 }
 0x2f9   : > { %7935 = vst [vmem:[#allocation41_spill] sm:$0xff] %v6216_v12  ;;  %v2508_v63 = vmul.f32 %v2507_v17, %v6156_v19  ;;  %v2546_v16 = vmul.f32 2.1237322e-06, %v6199_v5  ;;  %v4225_v54 = vunpack.c.h.bf16 %v6066_v52  ;;  %v2360_v21 = vadd.f32 0.014752088, %v2359_v22 }
 0x2fa   : > { %4411 = vrsqrt.f32 %v6201_v15  ;;  %v2471_v49 = vadd.f32 0.05243302, %v2470_v3  ;;  %v1104_v61 = vmul.f32 %v6211_v62, %v6166_v4  ;;  %v1782_v32 = vmul.f32 %v6127_v38, %v1781_v28 }
 0x2fb   : > { %4413 = vrsqrt.f32 %v6209_v13  ;;  %v1095_v40 = vmul.f32 %v6191_v37, %v1094_v23  ;;  %v1208_v57 = vadd.f32 %v4962_v31, %v1175_v43  ;;  %v1458_v25 = vmul.f32 %v6216_v12, %v6216_v12 }
 0x2fc   : > { %v6233_v52 = vmul.f32 %v2395_v27, %v5977_v6  ;;  %v2434_v17 = vmul.f32 %v2433_v18, %v6062_v47  ;;  %v1771_v22 = vsub.f32 1.5, %v1770_v33  ;;  %v2509_v56 = vadd.f32 0.0036580483, %v2508_v63 }
 0x2fd   : > { %v2149_v59 = vpop.f32.mrf.mxu0  ;;  %v2547_v35 = vadd.f32 0.00028619796, %v2546_v16  ;;  %v1240_v55 = vadd.f32 %v4225_v54, %v1208_v57  ;;  %v1536_v28 = vsel %vm433_vm0, %v1458_v25, 0.0  ;;  %v2472_v43 = vmul.f32 %v2471_v49, %v6101_v20 }
 0x2fe   : > { %v2221_v3 = vmul.f32 %v5913_v60, %v2149_v59  ;;  %v1105_v27 = vmul.f32 %v6211_v62, %v1104_v61  ;;  %1537 = vadd.xlane.f32.xlu1 %v1536_v28  ;;  %v2361_v18 = vmul.f32 %v2360_v21, %v5974_v44  ;;  %v1786_v33 = vsel %vm6244_vm1, %v6127_v38, %v1782_v32  ;;  %v4525_v59 = vld [vmem:[%s4710_s15 + $0xe8] sm:$0xff] }
 0x2ff   : > { %v1096_v2 = vmul.f32 0.5, %v1095_v40  ;;  %v6260_v49 = vadd.f32 1.1283791, %v2434_v17  ;;  %v1772_v54 = vmul.f32 %v6152_v1, %v1771_v22  ;;  %v6264_v61 = vadd.f32 %v4525_v59, %v1240_v55 }
 0x300   : > { %v6238_v23 = vpop.eup %4411  ;;  %v6267_v21 = vadd.f32 %v5925_v11, %v2221_v3  ;;  %v2510_v38 = vmul.f32 %v2509_v56, %v6156_v19  ;;  %v2548_v32 = vmul.f32 %v2547_v35, %v6199_v5  ;;  %v1962_v25 = vmul.f32 %v1786_v33, %v5714_v14 }
 0x301   : > { %v1788_v63 = vmul.f32 %v6238_v23, %v6201_v15  ;;  %v6258_v16 = vpop.eup %4413  ;;  %7938 = vst [vmem:[#allocation42_spill] sm:$0xff] %v6264_v61  ;;  %v2473_v17 = vadd.f32 0.18741608, %v2472_v43  ;;  %vm1099_vm4 = vweird.f32 %v6146_v10  ;;  %v1106_v22 = vmul.f32 0.5, %v1105_v27 }
 0x302   : > { %v1798_v57 = vmul.f32 %v6258_v16, %v6209_v13  ;;  %v1362_v55 = vsel %vm433_vm0, %v6264_v61, 0.0  ;;  %v1097_v35 = vsub.f32 1.5, %v1096_v2  ;;  %vm1100_vm6 = vweird.f32 %v6191_v37  ;;  %v1349_v61 = vpop.xlane.xlu0 %1348 }
 0x303   : > { %v1789_v40 = vmul.f32 %v6238_v23, %v1788_v63  ;;  %1363 = vadd.xlane.f32.xlu0 %v1362_v55  ;;  %v2362_v3 = vadd.f32 0.112945676, %v2361_v18  ;;  %v1776_v28 = vsel %vm6282_vm5, %v6152_v1, %v1772_v54  ;;  %vm1109_vm7 = vweird.f32 %v6166_v4  ;;  %vm6318_vm10 = vmor %vm1099_vm4, %vm1100_vm6 }
 0x304   : > { %v1799_v14 = vmul.f32 %v6258_v16, %v1798_v57  ;;  %v6293_v6 = vmul.f32 0.70710677, %v6267_v21  ;;  %v2397_v58 = vmul.f32 3.8918573e-05, %v6002_v48  ;;  %v2437_v43 = vmul.f32 3.8918573e-05, %v6062_v47 }
 0x305   : > { %v2511_v27 = vadd.f32 0.05243302, %v2510_v38  ;;  %v2549_v33 = vadd.f32 0.0036580483, %v2548_v32  ;;  %v1790_v2 = vmul.f32 0.5, %v1789_v40  ;;  %v2363_v63 = vmul.f32 %v2362_v3, %v5974_v44 }
 0x306   : > { %v6299_v18 = vmul.f32 %v2473_v17, %v6101_v20  ;;  %v1107_v59 = vsub.f32 1.5, %v1106_v22  ;;  %v2398_v57 = vadd.f32 0.001143296, %v2397_v58  ;;  %v2438_v1 = vadd.f32 0.001143296, %v2437_v43 }
 0x307   : > { %v1961_v54 = vmul.f32 %v1776_v28, %v5764_v34  ;;  %vm1110_vm8 = vweird.f32 %v6211_v62  ;;  %v1800_v55 = vmul.f32 0.5, %v1799_v14  ;;  %v2364_v56 = vadd.f32 0.4994258, %v2363_v63 }
 0x308   : > { %v1098_v12 = vmul.f32 %v6191_v37, %v1097_v35  ;;  %v2584_v38 = vmul.f32 %v6293_v6, %v6293_v6  ;;  %v2399_v32 = vmul.f32 %v2398_v57, %v6002_v48  ;;  %v2439_v40 = vmul.f32 %v2438_v1, %v6062_v47  ;;  %vm6336_vm12 = vmor %vm1109_vm7, %vm1110_vm8 }
 0x309   : > { %v2512_v17 = vmul.f32 %v2511_v27, %v6156_v19  ;;  %v2550_v22 = vmul.f32 %v2549_v33, %v6199_v5  ;;  %v1791_v3 = vsub.f32 1.5, %v1790_v2  ;;  %v2365_v34 = vmul.f32 %v2364_v56, %v5974_v44 }
 0x30a   : > { %v1108_v14 = vmul.f32 %v6211_v62, %v1107_v59  ;;  %vm1793_vm9 = vweird.f32 %v6201_v15  ;;  %v2400_v35 = vadd.f32 0.014752088, %v2399_v32  ;;  %v2477_v28 = vmul.f32 3.8918573e-05, %v6101_v20 }
 0x30b   : > { %v1801_v43 = vsub.f32 1.5, %v1800_v55  ;;  %v1395_v27 = vmul.f32 %v1349_v61, %v4772_v30  ;;  %v6323_v33 = vadd.f32 1.0, %v2365_v34  ;;  %v2440_v44 = vadd.f32 0.014752088, %v2439_v40 }
 0x30c   : > { %v1102_v2 = vsel %vm6318_vm10, %v6191_v37, %v1098_v12  ;;  %vm1803_vm11 = vweird.f32 %v6209_v13  ;;  %v6329_v63 = vmin.f32 %v2584_v38, 16.0  ;;  %v2401_v10 = vmul.f32 %v2400_v35, %v6002_v48  ;;  %v2151_v13 = vpop.f32.mrf.mxu0 }
 0x30d   : > { %v2551_v61 = vadd.f32 0.05243302, %v2550_v22  ;;  %v1792_v57 = vmul.f32 %v6238_v23, %v1791_v3  ;;  %vm1794_vm13 = vweird.f32 %v6238_v23  ;;  %4415 = vrcp.f32 %v6323_v33 }
 0x30e   : > { %v1112_v37 = vsel %vm6336_vm12, %v6211_v62, %v1108_v14  ;;  %v2402_v12 = vadd.f32 0.112945676, %v2401_v10  ;;  %v1995_v1 = vmul.f32 %v5566_v51, %v1962_v25  ;;  %v2478_v55 = vadd.f32 0.001143296, %v2477_v28  ;;  %vm6357_vm15 = vmor %vm1793_vm9, %vm1794_vm13 }
 0x30f   : > { %v1802_v4 = vmul.f32 %v6258_v16, %v1801_v43  ;;  %vm1804_vm14 = vweird.f32 %v6258_v16  ;;  %v6350_v56 = vsub.f32 %v5879_v36, %v1395_v27  ;;  %v2441_v38 = vmul.f32 %v2440_v44, %v6062_v47 }
 0x310   : > { %v6353_v32 = vadd.f32 0.18741608, %v2512_v17  ;;  %v2586_v62 = vmul.f32 2.1237322e-06, %v6329_v63  ;;  %v2403_v25 = vmul.f32 %v2402_v12, %v6002_v48  ;;  %v1994_v22 = vmul.f32 %v5566_v51, %v1961_v54  ;;  %vm6374_vm1 = vmor %vm1803_vm11, %vm1804_vm14  ;;  %v4244_v17 = vld [vmem:[%s4934_s19 + $0x78] sm:$0xff]  }
 0x311   : > { %v1143_v3 = vmul.f32 %v1102_v2, %v5814_v7  ;;  %v1144_v34 = vmul.f32 %v1112_v37, %v5774_v41  ;;  %v6367_v14 = vmul.f32 %v2551_v61, %v6199_v5  ;;  %v1796_v15 = vsel %vm6357_vm15, %v6238_v23, %v1792_v57 }
 0x312   : > { %v2404_v35 = vadd.f32 0.4994258, %v2403_v25  ;;  %v2027_v54 = vadd.f32 %v5577_v45, %v1994_v22  ;;  %v2028_v7 = vadd.f32 %v5577_v45, %v1995_v1  ;;  %v2479_v41 = vmul.f32 %v2478_v55, %v6101_v20 }
 0x313   : > { %v4416_v28 = vpop.eup %4415  ;;  %v1806_v58 = vsel %vm6374_vm1, %v6258_v16, %v1802_v4  ;;  %v1459_v23 = vmul.f32 %v6350_v56, %v6350_v56  ;;  %v2442_v43 = vadd.f32 0.112945676, %v2441_v38  ;;  %v2517_v27 = vmul.f32 3.8918573e-05, %v6156_v19 }
 0x314   : > { %v2587_v44 = vadd.f32 0.00028619796, %v2586_v62  ;;  %v2368_v2 = vmul.f32 %v4416_v28, %v6323_v33  ;;  %v2405_v10 = vmul.f32 %v2404_v35, %v6002_v48  ;;  %v2052_v59 = vpack.c.bf16 %v2028_v7, %v2027_v54 }
 0x315   : > { %v2376_v61 = vand.u32 2147483647, %v6323_v33  ;;  %v2378_v57 = vand.u32 2147483648, %v6323_v33  ;;  %v1539_v37 = vsel %vm433_vm0, %v1459_v23, 0.0  ;;  %v2222_v16 = vmul.f32 %v5913_v60, %v2151_v13 }
 0x316   : > { %v1963_v12 = vmul.f32 %v1796_v15, %v5833_v9  ;;  %v2369_v1 = vsub.f32 1.0, %v2368_v2  ;;  %v6394_v55 = vadd.f32 1.0, %v2405_v10  ;;  %4075 = vmatmul.msk.bf16.gmra.mxu0 %vm433_vm0, %v2052_v59  ;;  %1540 = vadd.xlane.f32.xlu1 %v1539_v37  ;;  %v2480_v4 = vadd.f32 0.014752088, %v2479_v41 }
 0x317   : > { %v1964_v48 = vmul.f32 %v1806_v58, %v5844_v26  ;;  %v6399_v38 = vadd.f32 %v5925_v11, %v2222_v16  ;;  %v2443_v40 = vmul.f32 %v2442_v43, %v6062_v47  ;;  %v2518_v62 = vadd.f32 0.001143296, %v2517_v27 }
 0x318   : > { %v2588_v25 = vmul.f32 %v2587_v44, %v6329_v63  ;;  %v2370_v22 = vmul.f32 %v4416_v28, %v2369_v1  ;;  %vm2373_vm2 = vweird.f32 %v4416_v28  ;;  %4417 = vrcp.f32 %v6394_v55 }
 0x319   : > { %vm2372_vm3 = vweird.f32 %v6323_v33  ;;  %vm6405_vm4 = vcmp.eq.f32.partialorder %v2376_v61, 8.507059e+37  ;;  %v2379_v15 = vor.u32 1.1754944e-38, %v2378_v57  ;;  %v6410_v26 = vmul.f32 0.70710677, %v6399_v38  ;;  %v2154_v33 = vpop.f32.mrf.mxu0 }
 0x31a   : > { %v2371_v35 = vadd.f32 %v4416_v28, %v2370_v22  ;;  %v4228_v54 = vunpack.c.l.bf16 %v4244_v17  ;;  %v1176_v7 = vmul.f32 %v4957_v53, %v1143_v3  ;;  %v2481_v41 = vmul.f32 %v2480_v4, %v6101_v20  ;;  %vm2374_vm5 = vmor %vm2372_vm3, %vm2373_vm2 }
 0x31b   : > { %v2624_v58 = vmul.f32 %v6410_v26, %v6410_v26  ;;  %v2444_v23 = vadd.f32 0.4994258, %v2443_v40  ;;  %v2519_v13 = vmul.f32 %v2518_v62, %v6156_v19  ;;  %v2557_v43 = vmul.f32 3.8918573e-05, %v6199_v5 }
 0x31c   : > { %v2375_v27 = vsel %vm2374_vm5, %v4416_v28, %v2371_v35  ;;  %v2223_v44 = vmul.f32 %v5913_v60, %v2154_v33  ;;  %v1209_v2 = vadd.f32 %v4962_v31, %v1176_v7  ;;  %v1177_v10 = vmul.f32 %v4957_v53, %v1144_v34  ;;  %v4527_v33 = vld [vmem:[%s4710_s15 + $0xf8] sm:$0xff] }
 0x31d   : > { %v2380_v3 = vsel %vm6405_vm4, %v2379_v15, %v2375_v27  ;;  %v6424_v59 = vmin.f32 %v2624_v58, 16.0  ;;  %v4229_v61 = vunpack.c.h.bf16 %v4244_v17  ;;  %v1996_v57 = vmul.f32 %v5566_v51, %v1963_v12  ;;  %v4526_v15 = vld [vmem:[%s4710_s15 + $0xf0] sm:$0xff]  ;;  %s306_s15 = sand.u32 1, %s4591_s22  }
 0x31e   : > { %v4418_v37 = vpop.eup %4417  ;;  %v6428_v16 = vadd.f32 %v5925_v11, %v2223_v44  ;;  %v1241_v28 = vadd.f32 %v4228_v54, %v1209_v2  ;;  %v1210_v1 = vadd.f32 %v4962_v31, %v1177_v10  ;;  %v2482_v4 = vadd.f32 0.112945676, %v2481_v41  ;;  %s4054_s12 = sshll.u32 %s306_s15, 8  ;;  %s3923_s24 = scalar_lea.sflag [#allocation3], %s306_s15 }
 0x31f   : > { %v2408_v40 = vmul.f32 %v4418_v37, %v6394_v55  ;;  %v2626_v53 = vmul.f32 2.1237322e-06, %v6424_v59  ;;  %v1997_v34 = vmul.f32 %v5566_v51, %v1964_v48  ;;  %v2445_v62 = vmul.f32 %v2444_v23, %v6062_v47  ;;  %s7025_s13 = scalar_lea.vmem [#allocation2], %s4054_s12 }
 0x320   : > { %v2381_v22 = vmul.f32 %v2380_v3, %v6205_v24  ;;  %v2416_v12 = vand.u32 2147483647, %v6394_v55  ;;  %v6438_v9 = vmul.f32 0.70710677, %v6428_v16  ;;  %v6441_v17 = vadd.f32 %v4526_v15, %v1241_v28  ;;  %s3937_s20 = sshll.u32 %s7025_s13, 4  ;;  %s3938_s20 = int_to_ptr.vmem [resolvable:$true] %s3937_s20 }
 0x321   : > { %v2409_v31 = vsub.f32 1.0, %v2408_v40  ;;  %v2627_v35 = vadd.f32 0.00028619796, %v2626_v53  ;;  %v1242_v54 = vadd.f32 %v4229_v61, %v1210_v1  ;;  %v2029_v7 = vadd.f32 %v5577_v45, %v1996_v57  ;;  %v2156_v3 = vpop.f32.mrf.mxu0 }
 0x322   : > { %7951 = vst [vmem:[#allocation43_spill] sm:$0xff] %v6441_v17  ;;  %v2418_v48 = vand.u32 2147483648, %v6394_v55  ;;  %v2664_v47 = vmul.f32 %v6438_v9, %v6438_v9  ;;  %v1365_v24 = vsel %vm433_vm0, %v6441_v17, 0.0  ;;  %v2030_v41 = vadd.f32 %v5577_v45, %v1997_v34 }
 0x323   : > { %v2410_v58 = vmul.f32 %v4418_v37, %v2409_v31  ;;  %vm2413_vm6 = vweird.f32 %v4418_v37  ;;  %1366 = vadd.xlane.f32.xlu0 %v1365_v24  ;;  %v6451_v23 = vadd.f32 %v4527_v33, %v1242_v54  ;;  %v6453_v27 = vadd.f32 1.0, %v2445_v62 }
 0x324   : > { %v2589_v44 = vadd.f32 0.0036580483, %v2588_v25  ;;  %v4084_v2 = vclamps-f32 %v2381_v22, 1.0  ;;  %vm2412_vm7 = vweird.f32 %v6394_v55  ;;  %v2053_v10 = vpack.c.bf16 %v2030_v41, %v2029_v7 }
 0x325   : > { %7952 = vst [vmem:[#allocation44_spill] sm:$0xff] %v6451_v23  ;;  %v2411_v61 = vadd.f32 %v4418_v37, %v2410_v58  ;;  %v2628_v57 = vmul.f32 %v2627_v35, %v6424_v59  ;;  %v1368_v28 = vsel %vm433_vm0, %v6451_v23, 0.0  ;;  %4419 = vrcp.f32 %v6453_v27  ;;  %vm2414_vm8 = vmor %vm2412_vm7, %vm2413_vm6 }
 0x326   : > { %v2419_v1 = vor.u32 1.1754944e-38, %v2418_v48  ;;  %v6460_v40 = vmin.f32 %v2664_v47, 16.0  ;;  %1369 = vadd.xlane.f32.xlu1 %v1368_v28  ;;  %4076 = vmatmul.msk.bf16.gmra.mxu0 %vm433_vm0, %v2053_v10  ;;  %v2520_v25 = vadd.f32 0.014752088, %v2519_v13  ;;  %v2558_v53 = vadd.f32 0.001143296, %v2557_v43 }
 0x327   : > { %v2415_v55 = vsel %vm2414_vm8, %v4418_v37, %v2411_v61  ;;  %vm2417_vm9 = vcmp.eq.f32.partialorder %v2416_v12, 8.507059e+37  ;;  %v2224_v34 = vmul.f32 %v5913_v60, %v2156_v3  ;;  %v2483_v62 = vmul.f32 %v2482_v4, %v6101_v20 }
 0x328   : > { %v2553_v22 = vadd.f32 0.18741608, %v6367_v14  ;;  %v2590_v15 = vmul.f32 %v2589_v44, %v6329_v63  ;;  %v2420_v31 = vsel %vm2417_vm9, %v2419_v1, %v2415_v55  ;;  %v3624_v35 = vadd.f32 1.0, %v4084_v2 }
 0x329   : > { %v2281_v54 = vmul.f32 0.5, %v5965_v8  ;;  %v2436_v7 = vmul.f32 %v6260_v49, %v6040_v46  ;;  %v2421_v13 = vmul.f32 %v2420_v31, %v6233_v52  ;;  %v2629_v43 = vadd.f32 0.0036580483, %v2628_v57 }
 0x32a   : > { %v2475_v37 = vadd.f32 1.1283791, %v6299_v18  ;;  %v2666_v12 = vmul.f32 2.1237322e-06, %v6460_v40  ;;  %v2484_v48 = vadd.f32 0.4994258, %v2483_v62  ;;  %v2521_v4 = vmul.f32 %v2520_v25, %v6156_v19 }
 0x32b   : > { %v4420_v14 = vpop.eup %4419  ;;  %v2514_v47 = vmul.f32 %v6353_v32, %v6156_v19  ;;  %v4085_v24 = vclamps-f32 %v2421_v13, 1.0  ;;  %v6477_v8 = vadd.f32 %v5925_v11, %v2224_v34  ;;  %v2559_v46 = vmul.f32 %v2558_v53, %v6199_v5 }
 0x32c   : > { %v2554_v52 = vmul.f32 %v2553_v22, %v6199_v5  ;;  %v2591_v49 = vadd.f32 0.05243302, %v2590_v15  ;;  %v3656_v18 = vmul.f32 %v3624_v35, %v6194_v42  ;;  %v2448_v41 = vmul.f32 %v4420_v14, %v6453_v27 }
 0x32d   : > { %v3625_v58 = vadd.f32 1.0, %v4085_v24  ;;  %v2630_v33 = vmul.f32 %v2629_v43, %v6424_v59  ;;  %v2485_v44 = vmul.f32 %v2484_v48, %v6101_v20  ;;  %v2522_v2 = vadd.f32 0.112945676, %v2521_v4 }
 0x32e   : > { %v2667_v32 = vadd.f32 0.00028619796, %v2666_v12  ;;  %v2449_v10 = vsub.f32 1.0, %v2448_v41  ;;  %v2458_v3 = vand.u32 2147483648, %v6453_v27  ;;  %v2560_v61 = vadd.f32 0.014752088, %v2559_v46 }
 0x32f   : > { %v3657_v57 = vmul.f32 %v3625_v58, %v2281_v54  ;;  %v6487_v28 = vmul.f32 0.70710677, %v6477_v8  ;;  %v6489_v1 = vadd.f32 1.0, %v2485_v44  ;;  %v2523_v42 = vmul.f32 %v2522_v2, %v6156_v19 }
 0x330   : > { %v2450_v25 = vmul.f32 %v4420_v14, %v2449_v10  ;;  %vm2453_vm10 = vweird.f32 %v4420_v14  ;;  %v2456_v53 = vand.u32 2147483647, %v6453_v27  ;;  %v2561_v20 = vmul.f32 %v2560_v61, %v6199_v5 }
 0x331   : > { %v2592_v55 = vmul.f32 %v2591_v49, %v6329_v63  ;;  %v3688_v34 = vpack.c.bf16 %v3657_v57, %v3656_v18  ;;  %vm2452_vm11 = vweird.f32 %v6453_v27  ;;  %4421 = vrcp.f32 %v6489_v1 }
 0x332   : > { %v2631_v62 = vadd.f32 0.05243302, %v2630_v33  ;;  %v2668_v22 = vmul.f32 %v2667_v32, %v6460_v40  ;;  %v2451_v15 = vadd.f32 %v4420_v14, %v2450_v25  ;;  %v2459_v31 = vor.u32 1.1754944e-38, %v2458_v3  ;;  %vm2454_vm12 = vmor %vm2452_vm11, %vm2453_vm10 }
 0x333   : > { %3777 = vmatmul.bf16.vlgmr.msra.gmra.mxu1 %v3688_v34  ;;  %v2704_v35 = vmul.f32 %v6487_v28, %v6487_v28  ;;  %v2524_v54 = vadd.f32 0.4994258, %v2523_v42  ;;  %v2562_v13 = vadd.f32 0.112945676, %v2561_v20  ;;  %v2597_v43 = vmul.f32 3.8918573e-05, %v6329_v63 }
 0x334   : > { %v2515_v12 = vadd.f32 1.1283791, %v2514_v47  ;;  %v2555_v48 = vadd.f32 1.1283791, %v2554_v52  ;;  %v2455_v4 = vsel %vm2454_vm12, %v4420_v14, %v2451_v15  ;;  %vm2457_vm13 = vcmp.eq.f32.partialorder %v2456_v53, 8.507059e+37 }
 0x335   : > { %v2593_v27 = vadd.f32 0.18741608, %v2592_v55  ;;  %v2460_v24 = vsel %vm2457_vm13, %v2459_v31, %v2455_v4  ;;  %v2525_v46 = vmul.f32 %v2524_v54, %v6156_v19  ;;  %v2563_v49 = vmul.f32 %v2562_v13, %v6199_v5 }
 0x336   : > { %v2282_v18 = vmul.f32 0.5, %v6020_v50  ;;  %v2632_v41 = vmul.f32 %v2631_v62, %v6424_v59  ;;  %v2669_v58 = vadd.f32 0.0036580483, %v2668_v22  ;;  %v2461_v33 = vmul.f32 %v2460_v24, %v2436_v7  ;;  %v7953_v7 = vld [vmem:[#allocation40_spill] sm:$0xff]  ;;  %v1523_v62 = vpop.xlane.xlu1 %1522  ;;  %v1526_v22 = vpop.xlane.xlu2 %1525 }
 0x337   : > { %v4422_v44 = vpop.eup %4421  ;;  %v6505_v2 = vmin.f32 %v2704_v35, 16.0  ;;  %v6507_v32 = vadd.f32 1.0, %v2525_v46  ;;  %v2564_v47 = vadd.f32 0.4994258, %v2563_v49  ;;  %v2598_v14 = vadd.f32 0.001143296, %v2597_v43 }
 0x338   : > { %v6510_v52 = vmul.f32 0.5, %v6072_v39  ;;  %v2476_v19 = vmul.f32 %v2475_v37, %v6090_v29  ;;  %v2488_v10 = vmul.f32 %v4422_v44, %v6489_v1  ;;  %v2637_v50 = vmul.f32 3.8918573e-05, %v6424_v59 }
 0x339   : > { %v6516_v3 = vmul.f32 %v2515_v12, %v6124_v0  ;;  %v6519_v61 = vmul.f32 %v2555_v48, %v7953_v7  ;;  %v6522_v57 = vmul.f32 %v2593_v27, %v6329_v63  ;;  %4423 = vrcp.f32 %v6507_v32 }
 0x33a   : > { %v6525_v42 = vadd.f32 0.18741608, %v2632_v41  ;;  %v4086_v39 = vclamps-f32 %v2461_v33, 1.0  ;;  %v2489_v25 = vsub.f32 1.0, %v2488_v10  ;;  %v2498_v29 = vand.u32 2147483648, %v6489_v1 }
 0x33b   : > { %v6529_v37 = vmul.f32 %v2669_v58, %v6460_v40  ;;  %v2706_v0 = vmul.f32 2.1237322e-06, %v6505_v2  ;;  %v2565_v53 = vmul.f32 %v2564_v47, %v6199_v5  ;;  %v2599_v20 = vmul.f32 %v2598_v14, %v6329_v63 }
 0x33c   : > { %v2490_v55 = vmul.f32 %v4422_v44, %v2489_v25  ;;  %vm2493_vm14 = vweird.f32 %v4422_v44  ;;  %v2496_v34 = vand.u32 2147483647, %v6489_v1  ;;  %v2638_v15 = vadd.f32 0.001143296, %v2637_v50 }
 0x33d   : > { %vm2492_vm15 = vweird.f32 %v6489_v1  ;;  %v2536_v31 = vand.u32 2147483647, %v6507_v32  ;;  %v6537_v35 = vadd.f32 1.0, %v2565_v53  ;;  %v1581_v54 = vmul.f32 %v1523_v62, %v4772_v30 }
 0x33e   : > { %v2491_v13 = vadd.f32 %v4422_v44, %v2490_v55  ;;  %v2499_v43 = vor.u32 1.1754944e-38, %v2498_v29  ;;  %v3626_v5 = vadd.f32 1.0, %v4086_v39  ;;  %v1582_v12 = vmul.f32 %v1526_v22, %v4772_v30  ;;  %vm2494_vm1 = vmor %vm2492_vm15, %vm2493_vm14 }
 0x33f   : > { %v4424_v48 = vpop.eup %4423  ;;  %v2538_v4 = vand.u32 2147483648, %v6507_v32  ;;  %4425 = vrcp.f32 %v6537_v35  ;;  %v2600_v27 = vadd.f32 0.014752088, %v2599_v20  ;;  %v2639_v1 = vmul.f32 %v2638_v15, %v6424_v59 }
 0x340   : > { %v2707_v24 = vadd.f32 0.00028619796, %v2706_v0  ;;  %v2495_v46 = vsel %vm2494_vm1, %v4422_v44, %v2491_v13  ;;  %vm2497_vm2 = vcmp.eq.f32.partialorder %v2496_v34, 8.507059e+37  ;;  %v2528_v49 = vmul.f32 %v4424_v48, %v6507_v32  ;;  %v1352_v0 = vpop.xlane.xlu1 %1351 }
 0x341   : > { %v2500_v41 = vsel %vm2497_vm2, %v2499_v43, %v2495_v46  ;;  %vm2532_vm3 = vweird.f32 %v6507_v32  ;;  %vm6546_vm4 = vcmp.eq.f32.partialorder %v2536_v31, 8.507059e+37  ;;  %v6550_v33 = vadd.f32 1e-05, %v1581_v54  ;;  %v7956_v31 = vld [vmem:[#allocation30_spill] sm:$0xff] }
 0x342   : > { %v2501_v47 = vmul.f32 %v2500_v41, %v2476_v19  ;;  %v3658_v14 = vmul.f32 %v3626_v5, %v2282_v18  ;;  %v2529_v10 = vsub.f32 1.0, %v2528_v49  ;;  %v6552_v50 = vadd.f32 1e-05, %v1582_v12 }
 0x343   : > { %v2539_v7 = vor.u32 1.1754944e-38, %v2538_v4  ;;  %4427 = vrsqrt.f32 %v6550_v33  ;;  %v2601_v44 = vmul.f32 %v2600_v27, %v6329_v63  ;;  %v2640_v39 = vadd.f32 0.014752088, %v2639_v1 }
 0x344   : > { %v4087_v25 = vclamps-f32 %v2501_v47, 1.0  ;;  %v2530_v29 = vmul.f32 %v4424_v48, %v2529_v10  ;;  %vm2533_vm5 = vweird.f32 %v4424_v48  ;;  %4429 = vrsqrt.f32 %v6552_v50 }
 0x345   : > { %v4426_v53 = vpop.eup %4425  ;;  %v2576_v20 = vand.u32 2147483647, %v6537_v35  ;;  %v1396_v18 = vmul.f32 %v1352_v0, %v4772_v30  ;;  %v2602_v19 = vadd.f32 0.112945676, %v2601_v44  ;;  %v2641_v55 = vmul.f32 %v2640_v39, %v6424_v59  ;;  %vm2534_vm6 = vmor %vm2532_vm3, %vm2533_vm5 }
 0x346   : > { %v3627_v34 = vadd.f32 1.0, %v4087_v25  ;;  %v2531_v62 = vadd.f32 %v4424_v48, %v2530_v29  ;;  %v2568_v22 = vmul.f32 %v4426_v53, %v6537_v35  ;;  %v2578_v15 = vand.u32 2147483648, %v6537_v35 }
 0x347   : > { %v6565_v54 = vsub.f32 %v7956_v31, %v1396_v18  ;;  %v2603_v13 = vmul.f32 %v2602_v19, %v6329_v63  ;;  %v2642_v43 = vadd.f32 0.112945676, %v2641_v55  ;;  %v2677_v5 = vmul.f32 3.8918573e-05, %v6460_v40 }
 0x348   : > { %v3659_v12 = vmul.f32 %v3627_v34, %v6510_v52  ;;  %v2535_v4 = vsel %vm2534_vm6, %v4424_v48, %v2531_v62  ;;  %v2569_v27 = vsub.f32 1.0, %v2568_v22  ;;  %vm2573_vm7 = vweird.f32 %v4426_v53 }
 0x349   : > { %v6570_v1 = vpop.eup %4427  ;;  %v2540_v46 = vsel %vm6546_vm4, %v2539_v7, %v2535_v4  ;;  %v1460_v32 = vmul.f32 %v6565_v54, %v6565_v54  ;;  %v2604_v49 = vadd.f32 0.4994258, %v2603_v13  ;;  %v2643_v41 = vmul.f32 %v2642_v43, %v6424_v59  ;;  %v1529_v13 = vpop.xlane.xlu2 %1528  ;;  %v7957_v43 = vld [vmem:[#allocation37_spill] sm:$0xff] }
 0x34a   : > { %v6577_v47 = vpop.eup %4429  ;;  %v3689_v10 = vpack.c.bf16 %v3659_v12, %v3658_v14  ;;  %v2541_v44 = vmul.f32 %v2540_v46, %v6516_v3  ;;  %v2570_v52 = vmul.f32 %v4426_v53, %v2569_v27  ;;  %v1808_v48 = vmul.f32 %v6570_v1, %v6550_v33 }
 0x34b   : > { %v2634_v39 = vmul.f32 %v6525_v42, %v6424_v59  ;;  %v2671_v58 = vadd.f32 0.05243302, %v6529_v37  ;;  %v2708_v7 = vmul.f32 %v2707_v24, %v6505_v2  ;;  %v1542_v25 = vsel %vm433_vm0, %v1460_v32, 0.0 }
 0x34c   : > { %3782 = vmatmul.bf16.gmra.mxu1 %v3689_v10  ;;  %v2571_v29 = vadd.f32 %v4426_v53, %v2570_v52  ;;  %vm2572_vm8 = vweird.f32 %v6537_v35  ;;  %v1818_v3 = vmul.f32 %v6577_v47, %v6552_v50  ;;  %1543 = vadd.xlane.f32.xlu2 %v1542_v25  ;;  %v2605_v14 = vmul.f32 %v2604_v49, %v6329_v63  ;;  %v2159_v63 = vpop.f32.mrf.mxu0  ;;  %v7958_v49 = vld [vmem:[#allocation39_spill] sm:$0xff] }
 0x34d   : > { %vm2574_vm9 = vmor %vm2572_vm8, %vm2573_vm7  ;;  %v2579_v0 = vor.u32 1.1754944e-38, %v2578_v15  ;;  %v1809_v42 = vmul.f32 %v6570_v1, %v1808_v48  ;;  %v2644_v37 = vadd.f32 0.4994258, %v2643_v41  ;;  %v2678_v18 = vadd.f32 0.001143296, %v2677_v5 }
 0x34e   : > { %v4088_v24 = vclamps-f32 %v2541_v44, 1.0  ;;  %v2575_v19 = vsel %vm2574_vm9, %v4426_v53, %v2571_v29  ;;  %vm2577_vm10 = vcmp.eq.f32.partialorder %v2576_v20, 8.507059e+37  ;;  %v6593_v55 = vadd.f32 1.0, %v2605_v14 }
 0x34f   : > { %v2595_v35 = vadd.f32 1.1283791, %v6522_v57  ;;  %v2635_v34 = vadd.f32 1.1283791, %v2634_v39  ;;  %v2580_v62 = vsel %vm2577_vm10, %v2579_v0, %v2575_v19  ;;  %v2645_v22 = vmul.f32 %v2644_v37, %v6424_v59 }
 0x350   : > { %v2284_v12 = vmul.f32 0.5, %v7957_v43  ;;  %v2581_v15 = vmul.f32 %v2580_v62, %v6519_v61  ;;  %v1819_v4 = vmul.f32 %v6577_v47, %v1818_v3  ;;  %4431 = vrcp.f32 %v6593_v55 }
 0x351   : > { %v2672_v53 = vmul.f32 %v2671_v58, %v6460_v40  ;;  %v2709_v20 = vadd.f32 0.0036580483, %v2708_v7  ;;  %v1810_v5 = vmul.f32 0.5, %v1809_v42  ;;  %v2679_v57 = vmul.f32 %v2678_v18, %v6460_v40  ;;  %v1355_v42 = vpop.xlane.xlu1 %1354 }
 0x352   : > { %v4089_v27 = vclamps-f32 %v2581_v15, 1.0  ;;  %v3628_v46 = vadd.f32 1.0, %v4088_v24  ;;  %v6603_v32 = vadd.f32 1.0, %v2645_v22  ;;  %v1583_v59 = vmul.f32 %v1529_v13, %v4772_v30  ;;  %v1532_v22 = vpop.xlane.xlu0 %1531 }
 0x353   : > { %v2285_v41 = vmul.f32 0.5, %v7958_v49  ;;  %v6608_v61 = vmul.f32 %v2595_v35, %v6293_v6  ;;  %v6611_v10 = vmul.f32 %v2635_v34, %v6410_v26  ;;  %v2717_v44 = vmul.f32 3.8918573e-05, %v6505_v2 }
 0x354   : > { %v3629_v52 = vadd.f32 1.0, %v4089_v27  ;;  %v6614_v48 = vmul.f32 0.5, %v1819_v4  ;;  %4433 = vrcp.f32 %v6603_v32  ;;  %v2225_v39 = vmul.f32 %v5913_v60, %v2159_v63  ;;  %v2161_v24 = vpop.f32.mrf.mxu0 }
 0x355   : > { %v6618_v58 = vadd.f32 0.18741608, %v2672_v53  ;;  %v6621_v7 = vmul.f32 %v2709_v20, %v6505_v2  ;;  %v1811_v25 = vsub.f32 1.5, %v1810_v5  ;;  %v2680_v6 = vadd.f32 0.014752088, %v2679_v57 }
 0x356   : > { %v4432_v29 = vpop.eup %4431  ;;  %v3660_v3 = vmul.f32 %v3628_v46, %v2284_v12  ;;  %v3661_v26 = vmul.f32 %v3629_v52, %v2285_v41  ;;  %v2616_v14 = vand.u32 2147483647, %v6593_v55  ;;  %v6624_v0 = vadd.f32 1e-05, %v1583_v59  ;;  %v7961_v59 = vld [vmem:[#allocation33_spill] sm:$0xff] }
 0x357   : > { %vm1814_vm11 = vweird.f32 %v6570_v1  ;;  %v2608_v37 = vmul.f32 %v4432_v29, %v6593_v55  ;;  %v2618_v18 = vand.u32 2147483648, %v6593_v55  ;;  %v2718_v19 = vadd.f32 0.001143296, %v2717_v44 }
 0x358   : > { %v3690_v35 = vpack.c.bf16 %v3661_v26, %v3660_v3  ;;  %vm1813_vm12 = vweird.f32 %v6550_v33  ;;  %v1821_v34 = vsub.f32 1.5, %v6614_v48  ;;  %4435 = vrsqrt.f32 %v6624_v0 }
 0x359   : > { %v6633_v62 = vadd.f32 %v5925_v11, %v2225_v39  ;;  %v6636_v13 = vmul.f32 %v6570_v1, %v1811_v25  ;;  %v2609_v63 = vsub.f32 1.0, %v2608_v37  ;;  %vm2612_vm13 = vweird.f32 %v6593_v55  ;;  %vm6682_vm5 = vmor %vm1813_vm12, %vm1814_vm11 }
 0x35a   : > { %v1397_v43 = vmul.f32 %v1355_v42, %v4772_v30  ;;  %v4434_v12 = vpop.eup %4433  ;;  %vm1824_vm14 = vweird.f32 %v6577_v47  ;;  %vm6641_vm15 = vcmp.eq.f32.partialorder %v2616_v14, 8.507059e+37  ;;  %v2226_v4 = vmul.f32 %v5913_v60, %v2161_v24 }
 0x35b   : > { %v1584_v53 = vmul.f32 %v1532_v22, %v4772_v30  ;;  %v2681_v20 = vmul.f32 %v2680_v6, %v6460_v40  ;;  %v2610_v5 = vmul.f32 %v4432_v29, %v2609_v63  ;;  %vm2613_vm1 = vweird.f32 %v4432_v29 }
 0x35c   : > { %v2619_v57 = vor.u32 1.1754944e-38, %v2618_v18  ;;  %v2648_v27 = vmul.f32 %v4434_v12, %v6603_v32  ;;  %3787 = vmatmul.bf16.gmra.mxu1 %v3690_v35  ;;  %vm1823_vm2 = vweird.f32 %v6552_v50  ;;  %v6651_v46 = vmul.f32 0.70710677, %v6633_v62  ;;  %vm2614_vm3 = vmor %vm2612_vm13, %vm2613_vm1  ;;  %v7966_v50 = vld [vmem:[#allocation29_spill] sm:$0xff] }
 0x35d   : > { %v6654_v49 = vsub.f32 %v7961_v59, %v1397_v43  ;;  %v6656_v41 = vadd.f32 1e-05, %v1584_v53  ;;  %v2719_v44 = vmul.f32 %v2718_v19, %v6505_v2  ;;  %v2611_v52 = vadd.f32 %v4432_v29, %v2610_v5  ;;  %vm6709_vm9 = vmor %vm1823_vm2, %vm1824_vm14 }
 0x35e   : > { %v2649_v48 = vsub.f32 1.0, %v2648_v27  ;;  %v2656_v39 = vand.u32 2147483647, %v6603_v32  ;;  %v2658_v25 = vand.u32 2147483648, %v6603_v32  ;;  %v6661_v6 = vpop.eup %4435  ;;  %v6666_v3 = vadd.f32 %v5925_v11, %v2226_v4 }
 0x35f   : > { %v1461_v26 = vmul.f32 %v6654_v49, %v6654_v49  ;;  %4437 = vrsqrt.f32 %v6656_v41  ;;  %v2682_v14 = vadd.f32 0.112945676, %v2681_v20  ;;  %v2615_v42 = vsel %vm2614_vm3, %v4432_v29, %v2611_v52 }
 0x360   : > { %v2650_v37 = vmul.f32 %v4434_v12, %v2649_v48  ;;  %vm2653_vm4 = vweird.f32 %v4434_v12  ;;  %v1828_v18 = vmul.f32 %v6661_v6, %v6624_v0  ;;  %v2620_v24 = vsel %vm6641_vm15, %v2619_v57, %v2615_v42 }
 0x361   : > { %v2744_v55 = vmul.f32 %v6651_v46, %v6651_v46  ;;  %v1545_v19 = vsel %vm433_vm0, %v1461_v26, 0.0  ;;  %v2720_v35 = vadd.f32 0.014752088, %v2719_v44  ;;  %v1822_v22 = vmul.f32 %v6577_v47, %v1821_v34 }
 0x362   : > { %v2621_v63 = vmul.f32 %v2620_v24, %v6608_v61  ;;  %v2651_v43 = vadd.f32 %v4434_v12, %v2650_v37  ;;  %vm2652_vm6 = vweird.f32 %v6603_v32  ;;  %1546 = vadd.xlane.f32.xlu2 %v1545_v19  ;;  %v2659_v15 = vor.u32 1.1754944e-38, %v2658_v25  ;;  %v7967_v19 = vld [vmem:[#allocation31_spill] sm:$0xff] }
 0x363   : > { %vm2654_vm7 = vmor %vm2652_vm6, %vm2653_vm4  ;;  %v1829_v4 = vmul.f32 %v6661_v6, %v1828_v18  ;;  %v6691_v53 = vmul.f32 0.70710677, %v6666_v3  ;;  %v2683_v33 = vmul.f32 %v2682_v14, %v6460_v40  ;;  %v1816_v34 = vsel %vm6682_vm5, %v6570_v1, %v6636_v13 }
 0x364   : > { %v4090_v20 = vclamps-f32 %v2621_v63, 1.0  ;;  %v2655_v61 = vsel %vm2654_vm7, %v4434_v12, %v2651_v43  ;;  %vm2657_vm8 = vcmp.eq.f32.partialorder %v2656_v39, 8.507059e+37  ;;  %v6700_v57 = vmin.f32 %v2744_v55, 16.0 }
 0x365   : > { %v6698_v5 = vpop.eup %4437  ;;  %v2660_v32 = vsel %vm2657_vm8, %v2659_v15, %v2655_v61  ;;  %v2684_v27 = vadd.f32 0.4994258, %v2683_v33  ;;  %v2721_v44 = vmul.f32 %v2720_v35, %v6505_v2  ;;  %v2286_v52 = vmul.f32 0.5, %v6267_v21 }
 0x366   : > { %v2711_v48 = vadd.f32 0.05243302, %v6621_v7  ;;  %v2661_v13 = vmul.f32 %v2660_v32, %v6611_v10  ;;  %v1838_v12 = vmul.f32 %v6698_v5, %v6656_v41  ;;  %v1826_v39 = vsel %vm6709_vm9, %v6577_v47, %v1822_v22 }
 0x367   : > { %v1830_v21 = vmul.f32 0.5, %v1829_v4  ;;  %v2784_v7 = vmul.f32 %v6691_v53, %v6691_v53  ;;  %v2685_v25 = vmul.f32 %v2684_v27, %v6460_v40  ;;  %v1965_v26 = vmul.f32 %v1816_v34, %v7966_v50  ;;  %v1535_v50 = vpop.xlane.xlu0 %1534 }
 0x368   : > { %v4091_v14 = vclamps-f32 %v2661_v13, 1.0  ;;  %v3630_v42 = vadd.f32 1.0, %v4090_v20  ;;  %v1839_v37 = vmul.f32 %v6698_v5, %v1838_v12  ;;  %v2674_v10 = vmul.f32 %v6618_v58, %v6460_v40 }
 0x369   : > { %v2746_v18 = vmul.f32 2.1237322e-06, %v6700_v57  ;;  %v6727_v24 = vadd.f32 1.0, %v2685_v25  ;;  %v2722_v47 = vadd.f32 0.112945676, %v2721_v44  ;;  %v2287_v55 = vmul.f32 0.5, %v6399_v38  ;;  %v1358_v25 = vpop.xlane.xlu2 %1357 }
 0x36a   : > { %v1966_v35 = vmul.f32 %v1826_v39, %v7967_v19  ;;  %v3631_v29 = vadd.f32 1.0, %v4091_v14  ;;  %v1840_v22 = vmul.f32 0.5, %v1839_v37  ;;  %v1831_v63 = vsub.f32 1.5, %v1830_v21  ;;  %v2164_v37 = vpop.f32.mrf.mxu0 }
 0x36b   : > { %v6731_v43 = vmin.f32 %v2784_v7, 16.0  ;;  %4439 = vrcp.f32 %v6727_v24  ;;  %v3662_v15 = vmul.f32 %v3630_v42, %v2286_v52  ;;  %v1998_v40 = vmul.f32 %v5566_v51, %v1965_v26 }
 0x36c   : > { %v3663_v4 = vmul.f32 %v3631_v29, %v2287_v55  ;;  %v1841_v33 = vsub.f32 1.5, %v1840_v22  ;;  %v2675_v58 = vadd.f32 1.1283791, %v2674_v10  ;;  %v2712_v34 = vmul.f32 %v2711_v48, %v6505_v2 }
 0x36d   : > { %v2747_v20 = vadd.f32 0.00028619796, %v2746_v18  ;;  %v2723_v38 = vmul.f32 %v2722_v47, %v6505_v2  ;;  %v1999_v32 = vmul.f32 %v5566_v51, %v1966_v35  ;;  %v1832_v27 = vmul.f32 %v6661_v6, %v1831_v63  ;;  %v7972_v63 = vld [vmem:[#allocation35_spill] sm:$0xff]  ;;  %v7977_v18 = vld [vmem:[#allocation36_spill] sm:$0xff] }
 0x36e   : > { %v3691_v61 = vpack.c.bf16 %v3663_v4, %v3662_v15  ;;  %vm1834_vm10 = vweird.f32 %v6661_v6  ;;  %v2786_v44 = vmul.f32 2.1237322e-06, %v6731_v43  ;;  %vm1844_vm11 = vweird.f32 %v6698_v5 }
 0x36f   : > { %v1842_v52 = vmul.f32 %v6698_v5, %v1841_v33  ;;  %v2724_v1 = vadd.f32 0.4994258, %v2723_v38  ;;  %v2031_v48 = vadd.f32 %v5577_v45, %v1998_v40  ;;  %v2032_v13 = vadd.f32 %v5577_v45, %v1999_v32  ;;  %v7973_v33 = vld [vmem:[#allocation32_spill] sm:$0xff] }
 0x370   : > { %3792 = vmatmul.bf16.gmra.mxu1 %v3691_v61  ;;  %v6748_v39 = vmul.f32 %v2675_v58, %v6438_v9  ;;  %v2713_v21 = vadd.f32 0.18741608, %v2712_v34  ;;  %vm1833_vm12 = vweird.f32 %v6624_v0  ;;  %v2748_v7 = vmul.f32 %v2747_v20, %v6700_v57  ;;  %v7974_v34 = vld [vmem:[#allocation34_spill] sm:$0xff] }
 0x371   : > { %v6745_v12 = vpop.eup %4439  ;;  %vm6754_vm13 = vmor %vm1833_vm12, %vm1834_vm10  ;;  %vm1843_vm14 = vweird.f32 %v6656_v41  ;;  %v2725_v9 = vmul.f32 %v2724_v1, %v6505_v2  ;;  %v2054_v42 = vpack.c.bf16 %v2032_v13, %v2031_v48  ;;  %v2787_v10 = vadd.f32 0.00028619796, %v2786_v44  ;;  %v1538_v44 = vpop.xlane.xlu1 %1537 }
 0x372   : > { %v2688_v14 = vmul.f32 %v6745_v12, %v6727_v24  ;;  %v1836_v0 = vsel %vm6754_vm13, %v6661_v6, %v1832_v27  ;;  %vm6767_vm15 = vmor %vm1843_vm14, %vm1844_vm11  ;;  %v1398_v41 = vmul.f32 %v1358_v25, %v4772_v30  ;;  %v1585_v47 = vmul.f32 %v1535_v50, %v4772_v30  ;;  %v1361_v13 = vpop.xlane.xlu2 %1360 }
 0x373   : > { %v1846_v55 = vsel %vm6767_vm15, %v6698_v5, %v1842_v52  ;;  %v6776_v35 = vadd.f32 1.0, %v2725_v9  ;;  %4077 = vmatmul.msk.bf16.vlgmr.msra.gmra.mxu3 %vm433_vm0, %v2054_v42  ;;  %v2227_v6 = vmul.f32 %v5913_v60, %v2164_v37  ;;  %v2714_v29 = vmul.f32 %v2713_v21, %v6505_v2 }
 0x374   : > { %v2689_v19 = vsub.f32 1.0, %v2688_v14  ;;  %v2749_v22 = vadd.f32 0.0036580483, %v2748_v7  ;;  %v6782_v15 = vsub.f32 %v7972_v63, %v1398_v41  ;;  %v6784_v4 = vadd.f32 1e-05, %v1585_v47 }
 0x375   : > { %v1967_v40 = vmul.f32 %v1836_v0, %v7973_v33  ;;  %vm2693_vm1 = vweird.f32 %v6745_v12  ;;  %4441 = vrcp.f32 %v6776_v35  ;;  %v2788_v5 = vmul.f32 %v2787_v10, %v6731_v43 }
 0x376   : > { %v2690_v58 = vmul.f32 %v6745_v12, %v2689_v19  ;;  %v1968_v20 = vmul.f32 %v1846_v55, %v7974_v34  ;;  %v2698_v2 = vand.u32 2147483648, %v6727_v24  ;;  %v1462_v38 = vmul.f32 %v6782_v15, %v6782_v15  ;;  %v1364_v21 = vpop.xlane.xlu0 %1363 }
 0x377   : > { %vm2692_vm2 = vweird.f32 %v6727_v24  ;;  %v2696_v32 = vand.u32 2147483647, %v6727_v24  ;;  %v6799_v27 = vadd.f32 %v5925_v11, %v2227_v6  ;;  %v2715_v52 = vadd.f32 1.1283791, %v2714_v29  ;;  %v2166_v6 = vpop.f32.mrf.mxu0 }
 0x378   : > { %v2691_v61 = vadd.f32 %v6745_v12, %v2690_v58  ;;  %vm6801_vm3 = vmor %vm2692_vm2, %vm2693_vm1  ;;  %v1548_v48 = vsel %vm433_vm0, %v1462_v38, 0.0  ;;  %4443 = vrsqrt.f32 %v6784_v4  ;;  %v2757_v7 = vmul.f32 3.8918573e-05, %v6700_v57 }
 0x379   : > { %1549 = vadd.xlane.f32.xlu0 %v1548_v48  ;;  %v1399_v25 = vmul.f32 %v1361_v13, %v4772_v30  ;;  %v6813_v50 = vmul.f32 0.70710677, %v6799_v27  ;;  %v2000_v26 = vmul.f32 %v5566_v51, %v1967_v40  ;;  %v2750_v14 = vmul.f32 %v2749_v22, %v6700_v57  ;;  %v7978_v40 = vld [vmem:[#allocation42_spill] sm:$0xff] }
 0x37a   : > { %v2695_v24 = vsel %vm6801_vm3, %v6745_v12, %v2691_v61  ;;  %v2699_v9 = vor.u32 1.1754944e-38, %v2698_v2  ;;  %v1400_v42 = vmul.f32 %v1364_v21, %v4772_v30  ;;  %v2001_v37 = vmul.f32 %v5566_v51, %v1968_v20 }
 0x37b   : > { %v4442_v0 = vpop.eup %4441  ;;  %v2789_v10 = vadd.f32 0.0036580483, %v2788_v5  ;;  %vm2697_vm4 = vcmp.eq.f32.partialorder %v2696_v32, 8.507059e+37  ;;  %v6820_v12 = vsub.f32 %v7977_v18, %v1399_v25  ;;  %v1586_v41 = vmul.f32 %v1538_v44, %v4772_v30 }
 0x37c   : > { %v2700_v47 = vsel %vm2697_vm4, %v2699_v9, %v2695_v24  ;;  %v2728_v55 = vmul.f32 %v4442_v0, %v6776_v35  ;;  %v2034_v19 = vadd.f32 %v5577_v45, %v2001_v37  ;;  %v2758_v29 = vadd.f32 0.001143296, %v2757_v7 }
 0x37d   : > { %v1463_v22 = vmul.f32 %v6820_v12, %v6820_v12  ;;  %v2824_v33 = vmul.f32 %v6813_v50, %v6813_v50  ;;  %v6830_v58 = vsub.f32 %v7978_v40, %v1400_v42  ;;  %v2033_v5 = vadd.f32 %v5577_v45, %v2000_v26 }
 0x37e   : > { %v6833_v34 = vpop.eup %4443  ;;  %v2716_v20 = vmul.f32 %v2715_v52, %v6487_v28  ;;  %v2729_v2 = vsub.f32 1.0, %v2728_v55  ;;  %v2736_v38 = vand.u32 2147483647, %v6776_v35  ;;  %v6837_v61 = vadd.f32 1e-05, %v1586_v41 }
 0x37f   : > { %v2738_v32 = vand.u32 2147483648, %v6776_v35  ;;  %v1551_v44 = vsel %vm433_vm0, %v1463_v22, 0.0  ;;  %v2055_v1 = vpack.c.bf16 %v2034_v19, %v2033_v5  ;;  %v2228_v48 = vmul.f32 %v5913_v60, %v2166_v6 }
 0x380   : > { %v2701_v13 = vmul.f32 %v2700_v47, %v6748_v39  ;;  %v2730_v21 = vmul.f32 %v4442_v0, %v2729_v2  ;;  %vm2733_vm5 = vweird.f32 %v4442_v0  ;;  %1552 = vadd.xlane.f32.xlu1 %v1551_v44  ;;  %4445 = vrsqrt.f32 %v6837_v61 }
 0x381   : > { %v2751_v28 = vadd.f32 0.05243302, %v2750_v14  ;;  %v1848_v52 = vmul.f32 %v6833_v34, %v6784_v4  ;;  %v6846_v7 = vmin.f32 %v2824_v33, 16.0  ;;  %v1464_v24 = vmul.f32 %v6830_v58, %v6830_v58 }
 0x382   : > { %v2790_v25 = vmul.f32 %v2789_v10, %v6731_v43  ;;  %v2731_v26 = vadd.f32 %v4442_v0, %v2730_v21  ;;  %vm2732_vm6 = vweird.f32 %v6776_v35  ;;  %v2759_v39 = vmul.f32 %v2758_v29, %v6700_v57 }
 0x383   : > { %vm2734_vm7 = vmor %vm2732_vm6, %vm2733_vm5  ;;  %vm2737_vm8 = vcmp.eq.f32.partialorder %v2736_v38, 8.507059e+37  ;;  %v2739_v9 = vor.u32 1.1754944e-38, %v2738_v32  ;;  %4078 = vmatmul.msk.bf16.gmra.mxu3 %vm433_vm0, %v2055_v1  ;;  %v6855_v14 = vadd.f32 %v5925_v11, %v2228_v48  ;;  %v1554_v42 = vsel %vm433_vm0, %v1464_v24, 0.0 }
 0x384   : > { %v4092_v37 = vclamps-f32 %v2701_v13, 1.0  ;;  %v2735_v41 = vsel %vm2734_vm7, %v4442_v0, %v2731_v26  ;;  %1555 = vadd.xlane.f32.xlu2 %v1554_v42  ;;  %v2760_v47 = vadd.f32 0.014752088, %v2759_v39  ;;  %v2797_v10 = vmul.f32 3.8918573e-05, %v6731_v43 }
 0x385   : > { %v2740_v55 = vsel %vm2737_vm8, %v2739_v9, %v2735_v41  ;;  %v1849_v35 = vmul.f32 %v6833_v34, %v1848_v52  ;;  %v2826_v19 = vmul.f32 2.1237322e-06, %v6846_v7  ;;  %v2752_v5 = vmul.f32 %v2751_v28, %v6700_v57 }
 0x386   : > { %v6861_v6 = vpop.eup %4445  ;;  %v2741_v29 = vmul.f32 %v2740_v55, %v2716_v20  ;;  %v2761_v22 = vmul.f32 %v2760_v47, %v6700_v57  ;;  %v2798_v33 = vadd.f32 0.001143296, %v2797_v10  ;;  %v6868_v2 = vmul.f32 0.70710677, %v6855_v14 }
 0x387   : > { %v1858_v0 = vmul.f32 %v6861_v6, %v6837_v61  ;;  %v2791_v38 = vadd.f32 0.05243302, %v2790_v25  ;;  %v3632_v44 = vadd.f32 1.0, %v4092_v37  ;;  %v2288_v48 = vmul.f32 0.5, %v6428_v16 }
 0x388   : > { %v4093_v32 = vclamps-f32 %v2741_v29, 1.0  ;;  %v2762_v1 = vadd.f32 0.112945676, %v2761_v22  ;;  %v1850_v13 = vmul.f32 0.5, %v1849_v35  ;;  %v2827_v21 = vadd.f32 0.00028619796, %v2826_v19 }
 0x389   : > { %v2799_v20 = vmul.f32 %v2798_v33, %v6731_v43  ;;  %v2289_v52 = vmul.f32 0.5, %v6477_v8  ;;  %v1859_v28 = vmul.f32 %v6861_v6, %v1858_v0  ;;  %v2753_v39 = vadd.f32 0.18741608, %v2752_v5 }
 0x38a   : > { %v3633_v24 = vadd.f32 1.0, %v4093_v32  ;;  %v2763_v26 = vmul.f32 %v2762_v1, %v6700_v57  ;;  %v2864_v25 = vmul.f32 %v6868_v2, %v6868_v2  ;;  %v2792_v42 = vmul.f32 %v2791_v38, %v6731_v43  ;;  %v1541_v32 = vpop.xlane.xlu1 %1540 }
 0x38b   : > { %v2800_v9 = vadd.f32 0.014752088, %v2799_v20  ;;  %v3664_v37 = vmul.f32 %v3632_v44, %v2288_v48  ;;  %v1851_v47 = vsub.f32 1.5, %v1850_v13  ;;  %v2828_v10 = vmul.f32 %v2827_v21, %v6846_v7 }
 0x38c   : > { %v3665_v16 = vmul.f32 %v3633_v24, %v2289_v52  ;;  %v2764_v41 = vadd.f32 0.4994258, %v2763_v26  ;;  %v1860_v35 = vmul.f32 0.5, %v1859_v28  ;;  %v6880_v19 = vmin.f32 %v2864_v25, 16.0 }
 0x38d   : > { %v2801_v8 = vmul.f32 %v2800_v9, %v6731_v43  ;;  %v2754_v33 = vmul.f32 %v2753_v39, %v6700_v57  ;;  %v2793_v5 = vadd.f32 0.18741608, %v2792_v42  ;;  %vm1854_vm9 = vweird.f32 %v6833_v34 }
 0x38e   : > { %v3692_v55 = vpack.c.bf16 %v3665_v16, %v3664_v37  ;;  %v2765_v29 = vmul.f32 %v2764_v41, %v6700_v57  ;;  %v1852_v0 = vmul.f32 %v6833_v34, %v1851_v47  ;;  %v2829_v38 = vadd.f32 0.0036580483, %v2828_v10 }
 0x38f   : > { %v2802_v22 = vadd.f32 0.112945676, %v2801_v8  ;;  %v1861_v48 = vsub.f32 1.5, %v1860_v35  ;;  %vm1853_vm10 = vweird.f32 %v6784_v4  ;;  %v2866_v13 = vmul.f32 2.1237322e-06, %v6880_v19 }
 0x390   : > { %3797 = vmatmul.bf16.gmra.mxu1 %v3692_v55  ;;  %v6886_v44 = vadd.f32 1.0, %v2765_v29  ;;  %v2755_v57 = vadd.f32 1.1283791, %v2754_v33  ;;  %vm6892_vm11 = vmor %vm1853_vm10, %vm1854_vm9  ;;  %v2794_v52 = vmul.f32 %v2793_v5, %v6731_v43  ;;  %v2830_v28 = vmul.f32 %v2829_v38, %v6846_v7  ;;  %v7981_v55 = vld [vmem:[#allocation38_spill] sm:$0xff] }
 0x391   : > { %v2803_v1 = vmul.f32 %v2802_v22, %v6731_v43  ;;  %v1856_v24 = vsel %vm6892_vm11, %v6833_v34, %v1852_v0  ;;  %v1862_v4 = vmul.f32 %v6861_v6, %v1861_v48  ;;  %vm1864_vm12 = vweird.f32 %v6861_v6 }
 0x392   : > { %4447 = vrcp.f32 %v6886_v44  ;;  %v6906_v42 = vmul.f32 0.5, %v6633_v62  ;;  %v2867_v37 = vadd.f32 0.00028619796, %v2866_v13  ;;  %v2756_v34 = vmul.f32 %v2755_v57, %v6651_v46  ;;  %v7982_v13 = vld [vmem:[#allocation41_spill] sm:$0xff] }
 0x393   : > { %v2804_v20 = vadd.f32 0.4994258, %v2803_v1  ;;  %v2169_v26 = vpop.f32.mrf.mxu0  ;;  %vm1863_vm13 = vweird.f32 %v6837_v61  ;;  %v6916_v8 = vadd.f32 1.1283791, %v2794_v52  ;;  %v6919_v35 = vadd.f32 0.05243302, %v2830_v28 }
 0x394   : > { %v2229_v39 = vmul.f32 %v5913_v60, %v2169_v26  ;;  %vm1865_vm14 = vmor %vm1863_vm13, %vm1864_vm12  ;;  %v1587_v62 = vmul.f32 %v1541_v32, %v4772_v30  ;;  %v2868_v5 = vmul.f32 %v2867_v37, %v6880_v19  ;;  %v2778_v38 = vand.u32 2147483648, %v6886_v44 }
 0x395   : > { %v2805_v9 = vmul.f32 %v2804_v20, %v6731_v43  ;;  %v1969_v43 = vmul.f32 %v1856_v24, %v7981_v55  ;;  %v1866_v61 = vsel %vm1865_vm14, %v6861_v6, %v1862_v4  ;;  %v2837_v48 = vmul.f32 3.8918573e-05, %v6846_v7 }
 0x396   : > { %v1367_v25 = vpop.xlane.xlu0 %1366  ;;  %v6912_v41 = vadd.f32 %v5925_v11, %v2229_v39  ;;  %v1970_v57 = vmul.f32 %v1866_v61, %v7982_v13  ;;  %v6943_v21 = vadd.f32 1e-05, %v1587_v62  ;;  %v2776_v20 = vand.u32 2147483647, %v6886_v44 }
 0x397   : > { %v1401_v16 = vmul.f32 %v1367_v25, %v4772_v30  ;;  %v6914_v47 = vadd.f32 1.0, %v2805_v9  ;;  %v2869_v39 = vadd.f32 0.0036580483, %v2868_v5  ;;  %vm2772_vm1 = vweird.f32 %v6886_v44 }
 0x398   : > { %v4448_v10 = vpop.eup %4447  ;;  %v6926_v29 = vmul.f32 0.70710677, %v6912_v41  ;;  %v2779_v25 = vor.u32 1.1754944e-38, %v2778_v38  ;;  %v2838_v62 = vadd.f32 0.001143296, %v2837_v48  ;;  %vm2777_vm3 = vcmp.eq.f32.partialorder %v2776_v20, 8.507059e+37 }
 0x399   : > { %v1370_v46 = vpop.xlane.xlu1 %1369  ;;  %v2768_v33 = vmul.f32 %v4448_v10, %v6886_v44  ;;  %v6932_v0 = vsub.f32 %v6441_v17, %v1401_v16  ;;  %4449 = vrcp.f32 %v6914_v47  ;;  %vm2773_vm15 = vweird.f32 %v4448_v10 }
 0x39a   : > { %v1402_v22 = vmul.f32 %v1370_v46, %v4772_v30  ;;  %v2904_v32 = vmul.f32 %v6926_v29, %v6926_v29  ;;  %vm2774_vm2 = vmor %vm2772_vm1, %vm2773_vm15  ;;  %v2002_v44 = vmul.f32 %v5566_v51, %v1969_v43  ;;  %4451 = vrsqrt.f32 %v6943_v21 }
 0x39b   : > { %v2769_v1 = vsub.f32 1.0, %v2768_v33  ;;  %v2171_v52 = vpop.f32.mrf.mxu0  ;;  %v1465_v9 = vmul.f32 %v6932_v0, %v6932_v0  ;;  %v2003_v33 = vmul.f32 %v5566_v51, %v1970_v57  ;;  %v2818_v48 = vand.u32 2147483648, %v6914_v47 }
 0x39c   : > { %v6939_v6 = vsub.f32 %v6451_v23, %v1402_v22  ;;  %v6946_v24 = vmin.f32 %v2904_v32, 16.0  ;;  %v2230_v26 = vmul.f32 %v5913_v60, %v2171_v52  ;;  %v2870_v32 = vmul.f32 %v2869_v39, %v6880_v19 }
 0x39d   : > { %v2770_v28 = vmul.f32 %v4448_v10, %v2769_v1  ;;  %v1557_v22 = vsel %vm433_vm0, %v1465_v9, 0.0  ;;  %v2035_v57 = vadd.f32 %v5577_v45, %v2002_v44  ;;  %vm2812_vm5 = vweird.f32 %v6914_v47 }
 0x39e   : > { %v1466_v4 = vmul.f32 %v6939_v6, %v6939_v6  ;;  %v2906_v37 = vmul.f32 2.1237322e-06, %v6946_v24  ;;  %v6956_v55 = vadd.f32 %v5925_v11, %v2230_v26  ;;  %1558 = vadd.xlane.f32.xlu0 %v1557_v22  ;;  %v2839_v26 = vmul.f32 %v2838_v62, %v6846_v7 }
 0x39f   : > { %v2771_v16 = vadd.f32 %v4448_v10, %v2770_v28  ;;  %v4450_v46 = vpop.eup %4449  ;;  %v2036_v28 = vadd.f32 %v5577_v45, %v2003_v33  ;;  %v2819_v62 = vor.u32 1.1754944e-38, %v2818_v48  ;;  %vm1873_vm9 = vweird.f32 %v6943_v21 }
 0x3a0   : > { %v1560_v61 = vsel %vm433_vm0, %v1466_v4, 0.0  ;;  %v2808_v38 = vmul.f32 %v4450_v46, %v6914_v47  ;;  %v6968_v13 = vmul.f32 0.70710677, %v6956_v55  ;;  %v2907_v52 = vadd.f32 0.00028619796, %v2906_v37  ;;  %v6977_v44 = vpop.eup %4451 }
 0x3a1   : > { %v2775_v5 = vsel %vm2774_vm2, %v4448_v10, %v2771_v16  ;;  %1561 = vadd.xlane.f32.xlu1 %v1560_v61  ;;  %v2877_v4 = vmul.f32 3.8918573e-05, %v6880_v19  ;;  %vm2813_vm4 = vweird.f32 %v4450_v46  ;;  %v2056_v9 = vpack.c.bf16 %v2036_v28, %v2035_v57 }
 0x3a2   : > { %v2780_v1 = vsel %vm2777_vm3, %v2779_v25, %v2775_v5  ;;  %v2809_v43 = vsub.f32 1.0, %v2808_v38  ;;  %v2944_v20 = vmul.f32 %v6968_v13, %v6968_v13  ;;  %v2816_v25 = vand.u32 2147483647, %v6914_v47  ;;  %vm2814_vm6 = vmor %vm2812_vm5, %vm2813_vm4 }
 0x3a3   : > { %v2781_v10 = vmul.f32 %v2780_v1, %v2756_v34  ;;  %v2174_v16 = vpop.f32.mrf.mxu0  ;;  %v2871_v37 = vadd.f32 0.05243302, %v2870_v32  ;;  %v2840_v61 = vadd.f32 0.014752088, %v2839_v26  ;;  %v2878_v22 = vadd.f32 0.001143296, %v2877_v4  ;;  %4079 = vmatmul.msk.bf16.gmra.mxu3 %vm433_vm0, %v2056_v9 }
 0x3a4   : > { %v2810_v39 = vmul.f32 %v4450_v46, %v2809_v43  ;;  %v2908_v34 = vmul.f32 %v2907_v52, %v6946_v24  ;;  %v6982_v38 = vmin.f32 %v2944_v20, 16.0  ;;  %v2796_v43 = vmul.f32 %v6916_v8, %v6691_v53  ;;  %v4528_v53 = vld [vmem:[%s7818_s2] sm:$0x1f] }
 0x3a5   : > { %v4094_v5 = vclamps-f32 %v2781_v10, 1.0  ;;  %v2841_v1 = vmul.f32 %v2840_v61, %v6846_v7  ;;  %v2879_v32 = vmul.f32 %v2878_v22, %v6880_v19  ;;  %vm2817_vm7 = vcmp.eq.f32.partialorder %v2816_v25, 8.507059e+37 }
 0x3a6   : > { %v2811_v33 = vadd.f32 %v4450_v46, %v2810_v39  ;;  %v2231_v52 = vmul.f32 %v5913_v60, %v2174_v16  ;;  %v2832_v47 = vmul.f32 %v6919_v35, %v6846_v7  ;;  %v2872_v48 = vmul.f32 %v2871_v37, %v6880_v19 }
 0x3a7   : > { %v1868_v28 = vmul.f32 %v6977_v44, %v6943_v21  ;;  %v2909_v20 = vadd.f32 0.0036580483, %v2908_v34  ;;  %v2842_v4 = vadd.f32 0.112945676, %v2841_v1  ;;  %v2880_v39 = vadd.f32 0.014752088, %v2879_v32 }
 0x3a8   : > { %v2815_v57 = vsel %vm2814_vm6, %v4450_v46, %v2811_v33  ;;  %v6998_v8 = vperm.slane %v4528_v53, 4  ;;  %v3634_v46 = vadd.f32 1.0, %v4094_v5  ;;  %v2946_v35 = vmul.f32 2.1237322e-06, %v6982_v38 }
 0x3a9   : > { %v2820_v10 = vsel %vm2817_vm7, %v2819_v62, %v2815_v57  ;;  %v2917_v25 = vmul.f32 3.8918573e-05, %v6946_v24  ;;  %v7003_v16 = vadd.f32 %v5925_v11, %v2231_v52  ;;  %v2843_v37 = vmul.f32 %v2842_v4, %v6846_v7 }
 0x3aa   : > { %v2821_v26 = vmul.f32 %v2820_v10, %v2796_v43  ;;  %v2881_v61 = vmul.f32 %v2880_v39, %v6880_v19  ;;  %v2291_v22 = vmul.f32 0.5, %v6666_v3  ;;  %v2833_v34 = vadd.f32 0.18741608, %v2832_v47 }
 0x3ab   : > { %v2873_v33 = vadd.f32 0.18741608, %v2872_v48  ;;  %v1869_v62 = vmul.f32 %v6977_v44, %v1868_v28  ;;  %v2910_v1 = vmul.f32 %v2909_v20, %v6946_v24  ;;  %v2176_v43 = vpop.f32.mrf.mxu0  ;;  %v2844_v57 = vadd.f32 0.4994258, %v2843_v37  ;;  %v7983_v20 = vld [vmem:[#allocation5_spill] sm:$0xff] }
 0x3ac   : > { %v4095_v9 = vclamps-f32 %v2821_v26, 1.0  ;;  %v2882_v52 = vadd.f32 0.112945676, %v2881_v61  ;;  %v3666_v26 = vmul.f32 %v3634_v46, %v6906_v42  ;;  %v2947_v4 = vadd.f32 0.00028619796, %v2946_v35 }
 0x3ad   : > { %v2918_v39 = vadd.f32 0.001143296, %v2917_v25  ;;  %v7015_v47 = vmul.f32 0.70710677, %v7003_v16  ;;  %v2845_v48 = vmul.f32 %v2844_v57, %v6846_v7  ;;  %v1870_v53 = vmul.f32 0.5, %v1869_v62 }
 0x3ae   : > { %v3635_v32 = vadd.f32 1.0, %v4095_v9  ;;  %v2883_v28 = vmul.f32 %v2882_v52, %v6880_v19  ;;  %v2232_v37 = vmul.f32 %v5913_v60, %v2176_v43  ;;  %v2834_v61 = vmul.f32 %v2833_v34, %v6846_v7 }
 0x3af   : > { %v7022_v23 = vadd.f32 1.0, %v2845_v48  ;;  %v2874_v42 = vmul.f32 %v2873_v33, %v6880_v19  ;;  %v2948_v46 = vmul.f32 %v2947_v4, %v6982_v38  ;;  %v2919_v25 = vmul.f32 %v2918_v39, %v6946_v24 }
 0x3b0   : > { %v3778_v5 = vpop.f32.mrf.mxu1  ;;  %v3667_v3 = vmul.f32 %v3635_v32, %v2291_v22  ;;  %v2884_v35 = vadd.f32 0.4994258, %v2883_v28  ;;  %v2911_v22 = vadd.f32 0.05243302, %v2910_v1  ;;  %v2984_v7 = vmul.f32 %v7015_v47, %v7015_v47  ;;  %v7984_v28 = vld [vmem:[#allocation6_spill] sm:$0xff] }
 0x3b1   : > { %v3779_v10 = vadd.f32 %v3778_v5, %v6998_v8  ;;  %4453 = vrcp.f32 %v7022_v23  ;;  %v1871_v34 = vsub.f32 1.5, %v1870_v53  ;;  %v7035_v33 = vadd.f32 %v5925_v11, %v2232_v37 }
 0x3b2   : > { %v3693_v5 = vpack.c.bf16 %v3667_v3, %v3666_v26  ;;  %v2885_v62 = vmul.f32 %v2884_v35, %v6880_v19  ;;  %v2835_v32 = vadd.f32 1.1283791, %v2834_v61  ;;  %v2920_v57 = vadd.f32 0.014752088, %v2919_v25 }
 0x3b3   : > { %v3858_v9 = vadd.f32 %v3779_v10, %v7983_v20  ;;  %v2957_v52 = vmul.f32 3.8918573e-05, %v6982_v38  ;;  %v2875_v10 = vadd.f32 1.1283791, %v2874_v42  ;;  %vm1874_vm8 = vweird.f32 %v6977_v44 }
 0x3b4   : > { %3802 = vmatmul.bf16.gmra.mxu1 %v3693_v5  ;;  %v2949_v26 = vadd.f32 0.0036580483, %v2948_v46  ;;  %v2912_v4 = vmul.f32 %v2911_v22, %v6946_v24  ;;  %v7042_v39 = vmin.f32 %v2984_v7, 16.0  ;;  %v7044_v3 = vadd.f32 1.0, %v2885_v62  ;;  %vm7066_vm10 = vmor %vm1873_vm9, %vm1874_vm8 }
 0x3b5   : > { %3890 = vst.msk [vmem:[%s7025_s13] sm:$0xff] %vm433_vm0, %v3858_v9  ;;  %v2921_v19 = vmul.f32 %v2920_v57, %v6946_v24  ;;  %v7048_v48 = vmul.f32 %v6977_v44, %v1871_v34  ;;  %v7052_v20 = vmul.f32 0.70710677, %v7035_v33  ;;  %v2958_v9 = vadd.f32 0.001143296, %v2957_v52 }
 0x3b6   : > { %4455 = vrcp.f32 %v7044_v3  ;;  %v2836_v61 = vmul.f32 %v2835_v32, %v6813_v50  ;;  %v2950_v5 = vmul.f32 %v2949_v26, %v6982_v38  ;;  %v7062_v46 = vmul.f32 %v2875_v10, %v6868_v2 }
 0x3b7   : > { %v4454_v37 = vpop.eup %4453  ;;  %v2913_v25 = vadd.f32 0.18741608, %v2912_v4  ;;  %v2986_v50 = vmul.f32 2.1237322e-06, %v7042_v39  ;;  %v2922_v22 = vadd.f32 0.112945676, %v2921_v19  ;;  %v3024_v7 = vmul.f32 %v7052_v20, %v7052_v20 }
 0x3b8   : > { %v3780_v43 = vpop.f32.mrf.mxu1  ;;  %v2848_v42 = vmul.f32 %v4454_v37, %v7022_v23  ;;  %v2959_v34 = vmul.f32 %v2958_v9, %v6982_v38  ;;  %v2856_v62 = vand.u32 2147483647, %v7022_v23  ;;  %v2858_v32 = vand.u32 2147483648, %v7022_v23 }
 0x3b9   : > { %v3781_v1 = vadd.f32 %v3780_v43, %v6998_v8  ;;  %v2923_v43 = vmul.f32 %v2922_v22, %v6946_v24  ;;  %v2997_v57 = vmul.f32 3.8918573e-05, %v7042_v39  ;;  %v2951_v52 = vadd.f32 0.05243302, %v2950_v5 }
 0x3ba   : > { %v2849_v2 = vsub.f32 1.0, %v2848_v42  ;;  %vm2853_vm11 = vweird.f32 %v4454_v37  ;;  %v2914_v4 = vmul.f32 %v2913_v25, %v6946_v24  ;;  %v2987_v19 = vadd.f32 0.00028619796, %v2986_v50 }
 0x3bb   : > { %v3859_v53 = vadd.f32 %v3781_v1, %v7984_v28  ;;  %v2960_v1 = vadd.f32 0.014752088, %v2959_v34  ;;  %v2924_v28 = vadd.f32 0.4994258, %v2923_v43  ;;  %v7083_v42 = vmin.f32 %v3024_v7, 16.0 }
 0x3bc   : > { %v2850_v10 = vmul.f32 %v4454_v37, %v2849_v2  ;;  %v4456_v26 = vpop.eup %4455  ;;  %vm2852_vm12 = vweird.f32 %v7022_v23  ;;  %vm2857_vm14 = vcmp.eq.f32.partialorder %v2856_v62, 8.507059e+37  ;;  %v2859_v22 = vor.u32 1.1754944e-38, %v2858_v32 }
 0x3bd   : > { %3891 = vst.msk [vmem:[%s7025_s13 + $0x8] sm:$0xff] %vm433_vm0, %v3859_v53  ;;  %v2998_v53 = vadd.f32 0.001143296, %v2997_v57  ;;  %v2888_v21 = vmul.f32 %v4456_v26, %v7044_v3  ;;  %vm2854_vm13 = vmor %vm2852_vm12, %vm2853_vm11  ;;  %v2925_v5 = vmul.f32 %v2924_v28, %v6946_v24  ;;  %v2961_v2 = vmul.f32 %v2960_v1, %v6982_v38 }
 0x3be   : > { %v2851_v9 = vadd.f32 %v4454_v37, %v2850_v10  ;;  %v2896_v25 = vand.u32 2147483647, %v7044_v3  ;;  %v2898_v43 = vand.u32 2147483648, %v7044_v3  ;;  %vm2893_vm15 = vweird.f32 %v4456_v26 }
 0x3bf   : > { %v2889_v17 = vsub.f32 1.0, %v2888_v21  ;;  %v2999_v50 = vmul.f32 %v2998_v53, %v7042_v39  ;;  %v1544_v57 = vpop.xlane.xlu2 %1543  ;;  %v7092_v23 = vadd.f32 1.0, %v2925_v5  ;;  %v2962_v10 = vadd.f32 0.112945676, %v2961_v2 }
 0x3c0   : > { %v2855_v34 = vsel %vm2854_vm13, %v4454_v37, %v2851_v9  ;;  %v1588_v24 = vmul.f32 %v1544_v57, %v4772_v30  ;;  %v2952_v32 = vmul.f32 %v2951_v52, %v6982_v38  ;;  %v2988_v37 = vmul.f32 %v2987_v19, %v7042_v39 }
 0x3c1   : > { %v2860_v7 = vsel %vm2857_vm14, %v2859_v22, %v2855_v34  ;;  %v2890_v62 = vmul.f32 %v4456_v26, %v2889_v17  ;;  %v3026_v21 = vmul.f32 2.1237322e-06, %v7083_v42  ;;  %4457 = vrcp.f32 %v7092_v23 }
 0x3c2   : > { %v2861_v40 = vmul.f32 %v2860_v7, %v2836_v61  ;;  %vm2892_vm1 = vweird.f32 %v7044_v3  ;;  %v7100_v53 = vadd.f32 1e-05, %v1588_v24  ;;  %v3000_v9 = vadd.f32 0.014752088, %v2999_v50  ;;  %v7987_v3 = vld [vmem:[#allocation9_spill] sm:$0xff] }
 0x3c3   : > { %v2891_v28 = vadd.f32 %v4456_v26, %v2890_v62  ;;  %vm2894_vm2 = vmor %vm2892_vm1, %vm2893_vm15  ;;  %v2899_v61 = vor.u32 1.1754944e-38, %v2898_v43  ;;  %v2963_v22 = vmul.f32 %v2962_v10, %v6982_v38  ;;  %v3037_v52 = vmul.f32 3.8918573e-05, %v7083_v42 }
 0x3c4   : > { %v4096_v19 = vclamps-f32 %v2861_v40, 1.0  ;;  %vm2897_vm3 = vcmp.eq.f32.partialorder %v2896_v25, 8.507059e+37  ;;  %4459 = vrsqrt.f32 %v7100_v53  ;;  %v2953_v2 = vadd.f32 0.18741608, %v2952_v32 }
 0x3c5   : > { %v2895_v5 = vsel %vm2894_vm2, %v4456_v26, %v2891_v28  ;;  %v2989_v34 = vadd.f32 0.0036580483, %v2988_v37  ;;  %v3027_v50 = vadd.f32 0.00028619796, %v3026_v21  ;;  %v2964_v24 = vadd.f32 0.4994258, %v2963_v22 }
 0x3c6   : > { %v2900_v57 = vsel %vm2897_vm3, %v2899_v61, %v2895_v5  ;;  %v3001_v43 = vmul.f32 %v3000_v9, %v7042_v39  ;;  %v2292_v40 = vmul.f32 0.5, %v6799_v27  ;;  %v2293_v26 = vmul.f32 0.5, %v6855_v14 }
 0x3c7   : > { %v2901_v62 = vmul.f32 %v2900_v57, %v7062_v46  ;;  %v7109_v10 = vpop.eup %4457  ;;  %v7988_v25 = vsel %vm7066_vm10, %v6977_v44, %v7048_v48  ;;  %v3038_v46 = vadd.f32 0.001143296, %v3037_v52  ;;  %v3636_v21 = vadd.f32 1.0, %v4096_v19 }
 0x3c8   : > { %v7119_v32 = vmul.f32 %v7988_v25, %v6350_v56  ;;  %v2965_v27 = vmul.f32 %v2964_v24, %v6982_v38  ;;  %v2915_v28 = vadd.f32 1.1283791, %v2914_v4  ;;  %v2954_v14 = vmul.f32 %v2953_v2, %v6982_v38 }
 0x3c9   : > { %v3783_v1 = vpop.f32.mrf.mxu1  ;;  %v4097_v37 = vclamps-f32 %v2901_v62, 1.0  ;;  %v2990_v35 = vmul.f32 %v2989_v34, %v7042_v39  ;;  %v3002_v9 = vadd.f32 0.112945676, %v3001_v43  ;;  %v3028_v56 = vmul.f32 %v3027_v50, %v7083_v42 }
 0x3ca   : > { %v3784_v17 = vadd.f32 %v3783_v1, %v6998_v8  ;;  %v2928_v1 = vmul.f32 %v7109_v10, %v7092_v23  ;;  %v7129_v22 = vadd.f32 1.0, %v2965_v27  ;;  %v3039_v38 = vmul.f32 %v3038_v46, %v7083_v42 }
 0x3cb   : > { %v3637_v48 = vadd.f32 1.0, %v4097_v37  ;;  %v3003_v5 = vmul.f32 %v3002_v9, %v7042_v39  ;;  %v3668_v4 = vmul.f32 %v3636_v21, %v2292_v40  ;;  %vm2933_vm4 = vweird.f32 %v7109_v10 }
 0x3cc   : > { %v3860_v7 = vadd.f32 %v3784_v17, %v7987_v3  ;;  %v4460_v17 = vpop.eup %4459  ;;  %v2929_v61 = vsub.f32 1.0, %v2928_v1  ;;  %4461 = vrcp.f32 %v7129_v22  ;;  %v7989_v3 = vld [vmem:[#allocation8_spill] sm:$0xff]  ;;  %v2936_v50 = vand.u32 2147483647, %v7092_v23 }
 0x3cd   : > { %v1878_v19 = vmul.f32 %v4460_v17, %v7100_v53  ;;  %v3669_v2 = vmul.f32 %v3637_v48, %v2293_v26  ;;  %v2938_v25 = vand.u32 2147483648, %v7092_v23  ;;  %v3004_v46 = vadd.f32 0.4994258, %v3003_v5 }
 0x3ce   : > { %3892 = vst.msk [vmem:[%s7025_s13 + $0x10] sm:$0xff] %vm433_vm0, %v3860_v7  ;;  %v2930_v34 = vmul.f32 %v7109_v10, %v2929_v61  ;;  %v2916_v40 = vmul.f32 %v2915_v28, %v6926_v29  ;;  %vm2932_vm5 = vweird.f32 %v7092_v23  ;;  %v3040_v37 = vadd.f32 0.014752088, %v3039_v38 }
 0x3cf   : > { %v1879_v57 = vmul.f32 %v4460_v17, %v1878_v19  ;;  %v3694_v62 = vpack.c.bf16 %v3669_v2, %v3668_v4  ;;  %v2955_v21 = vadd.f32 1.1283791, %v2954_v14  ;;  %v2991_v1 = vadd.f32 0.05243302, %v2990_v35  ;;  %vm7148_vm6 = vmor %vm2932_vm5, %vm2933_vm4  ;;  %v7992_v2 = vld [vmem:[#allocation12_spill] sm:$0xff] }
 0x3d0   : > { %v2931_v43 = vadd.f32 %v7109_v10, %v2930_v34  ;;  %v3029_v27 = vadd.f32 0.0036580483, %v3028_v56  ;;  %vm1884_vm7 = vweird.f32 %v4460_v17  ;;  %vm2937_vm8 = vcmp.eq.f32.partialorder %v2936_v50, 8.507059e+37 }
 0x3d1   : > { %v3785_v44 = vpop.f32.mrf.mxu1  ;;  %v1880_v26 = vmul.f32 0.5, %v1879_v57  ;;  %3807 = vmatmul.bf16.gmra.mxu1 %v3694_v62  ;;  %v2939_v35 = vor.u32 1.1754944e-38, %v2938_v25  ;;  %v3041_v61 = vmul.f32 %v3040_v37, %v7083_v42  ;;  %vm1883_vm9 = vweird.f32 %v7100_v53 }
 0x3d2   : > { %v3786_v52 = vadd.f32 %v3785_v44, %v6998_v8  ;;  %v3005_v44 = vmul.f32 %v3004_v46, %v7042_v39  ;;  %v2935_v23 = vsel %vm7148_vm6, %v7109_v10, %v2931_v43  ;;  %v4462_v28 = vpop.eup %4461  ;;  %v3030_v38 = vmul.f32 %v3029_v27, %v7083_v42  ;;  %vm1885_vm10 = vmor %vm1883_vm9, %vm1884_vm7 }
 0x3d3   : > { %v1881_v48 = vsub.f32 1.5, %v1880_v26  ;;  %v2968_v5 = vmul.f32 %v4462_v28, %v7129_v22  ;;  %v2940_v10 = vsel %vm2937_vm8, %v2939_v35, %v2935_v23  ;;  %v2004_v4 = vmul.f32 %v5566_v51, %v7119_v32 }
 0x3d4   : > { %v3861_v7 = vadd.f32 %v3786_v52, %v7989_v3  ;;  %v7157_v56 = vadd.f32 1.0, %v3005_v44  ;;  %v2976_v50 = vand.u32 2147483647, %v7129_v22  ;;  %v2978_v62 = vand.u32 2147483648, %v7129_v22 }
 0x3d5   : > { %v1547_v24 = vpop.xlane.xlu2 %1546  ;;  %v1882_v19 = vmul.f32 %v4460_v17, %v1881_v48  ;;  %v2969_v57 = vsub.f32 1.0, %v2968_v5  ;;  %v2956_v43 = vmul.f32 %v2955_v21, %v6968_v13  ;;  %v2941_v32 = vmul.f32 %v2940_v10, %v2916_v40 }
 0x3d6   : > { %3893 = vst.msk [vmem:[%s7025_s13 + $0x18] sm:$0xff] %vm433_vm0, %v3861_v7  ;;  %v1589_v29 = vmul.f32 %v1547_v24, %v4772_v30  ;;  %4463 = vrcp.f32 %v7157_v56  ;;  %v3042_v24 = vadd.f32 0.112945676, %v3041_v61  ;;  %vm2973_vm11 = vweird.f32 %v4462_v28 }
 0x3d7   : > { %v1886_v3 = vsel %vm1885_vm10, %v4460_v17, %v1882_v19  ;;  %v2970_v25 = vmul.f32 %v4462_v28, %v2969_v57  ;;  %v2992_v46 = vmul.f32 %v2991_v1, %v7042_v39  ;;  %v2037_v26 = vadd.f32 %v5577_v45, %v2004_v4  ;;  %v7993_v19 = vld [vmem:[#allocation10_spill] sm:$0xff] }
 0x3d8   : > { %v7168_v7 = vadd.f32 1e-05, %v1589_v29  ;;  %v1972_v53 = vmul.f32 %v1886_v3, %v6565_v54  ;;  %v3043_v54 = vmul.f32 %v3042_v24, %v7083_v42  ;;  %v3031_v37 = vadd.f32 0.05243302, %v3030_v38 }
 0x3d9   : > { %v3788_v14 = vpop.f32.mrf.mxu1  ;;  %v2971_v27 = vadd.f32 %v4462_v28, %v2970_v25  ;;  %vm2972_vm12 = vweird.f32 %v7129_v22  ;;  %vm2977_vm14 = vcmp.eq.f32.partialorder %v2976_v50, 8.507059e+37  ;;  %v2979_v40 = vor.u32 1.1754944e-38, %v2978_v62 }
 0x3da   : > { %v3789_v52 = vadd.f32 %v3788_v14, %v6998_v8  ;;  %v2005_v17 = vmul.f32 %v5566_v51, %v1972_v53  ;;  %4465 = vrsqrt.f32 %v7168_v7  ;;  %vm2974_vm13 = vmor %vm2972_vm12, %vm2973_vm11  ;;  %v3044_v1 = vadd.f32 0.4994258, %v3043_v54 }
 0x3db   : > { %v4098_v48 = vclamps-f32 %v2941_v32, 1.0  ;;  %v2975_v29 = vsel %vm2974_vm13, %v4462_v28, %v2971_v27  ;;  %v2993_v14 = vadd.f32 0.18741608, %v2992_v46  ;;  %v2294_v57 = vmul.f32 0.5, %v6912_v41 }
 0x3dc   : > { %v3862_v34 = vadd.f32 %v3789_v52, %v7992_v2  ;;  %v4464_v13 = vpop.eup %4463  ;;  %v2038_v9 = vadd.f32 %v5577_v45, %v2005_v17  ;;  %v2980_v35 = vsel %vm2977_vm14, %v2979_v40, %v2975_v29  ;;  %v3045_v22 = vmul.f32 %v3044_v1, %v7083_v42 }
 0x3dd   : > { %v3008_v23 = vmul.f32 %v4464_v13, %v7157_v56  ;;  %v3032_v52 = vmul.f32 %v3031_v37, %v7083_v42  ;;  %v2981_v38 = vmul.f32 %v2980_v35, %v2956_v43  ;;  %v2295_v53 = vmul.f32 0.5, %v6956_v55 }
 0x3de   : > { %3894 = vst.msk [vmem:[%s7025_s13 + $0x20] sm:$0xff] %vm433_vm0, %v3862_v34  ;;  %v2057_v61 = vpack.c.bf16 %v2038_v9, %v2037_v26  ;;  %v3046_v4 = vadd.f32 1.0, %v3045_v22  ;;  %v3638_v34 = vadd.f32 1.0, %v4098_v48  ;;  %v2994_v50 = vmul.f32 %v2993_v14, %v7042_v39  ;;  %v7996_v48 = vld [vmem:[#allocation11_spill] sm:$0xff] }
 0x3df   : > { %v3009_v10 = vsub.f32 1.0, %v3008_v23  ;;  %v4099_v28 = vclamps-f32 %v2981_v38, 1.0  ;;  %v3033_v62 = vadd.f32 0.18741608, %v3032_v52  ;;  %vm3013_vm15 = vweird.f32 %v4464_v13 }
 0x3e0   : > { %4080 = vmatmul.msk.bf16.gmra.mxu3 %vm433_vm0, %v2057_v61  ;;  %v7189_v2 = vpop.eup %4465  ;;  %4467 = vrcp.f32 %v3046_v4  ;;  %v3018_v25 = vand.u32 2147483648, %v7157_v56  ;;  %v3670_v46 = vmul.f32 %v3638_v34, %v2294_v57  ;;  %vm3012_vm1 = vweird.f32 %v7157_v56 }
 0x3e1   : > { %v3790_v21 = vpop.f32.mrf.mxu1  ;;  %v3010_v3 = vmul.f32 %v4464_v13, %v3009_v10  ;;  %v3639_v24 = vadd.f32 1.0, %v4099_v28  ;;  %v1888_v32 = vmul.f32 %v7189_v2, %v7168_v7  ;;  %v3016_v41 = vand.u32 2147483647, %v7157_v56  ;;  %vm7201_vm2 = vmor %vm3012_vm1, %vm3013_vm15 }
 0x3e2   : > { %v3791_v44 = vadd.f32 %v3790_v21, %v6998_v8  ;;  %v2995_v39 = vadd.f32 1.1283791, %v2994_v50  ;;  %v3034_v26 = vmul.f32 %v3033_v62, %v7083_v42  ;;  %v3019_v1 = vor.u32 1.1754944e-38, %v3018_v25 }
 0x3e3   : > { %v3011_v43 = vadd.f32 %v4464_v13, %v3010_v3  ;;  %v3671_v17 = vmul.f32 %v3639_v24, %v2295_v53  ;;  %v1889_v9 = vmul.f32 %v7189_v2, %v1888_v32  ;;  %vm3017_vm3 = vcmp.eq.f32.partialorder %v3016_v41, 8.507059e+37  ;;  %v7997_v24 = vld [vmem:[#allocation14_spill] sm:$0xff] }
 0x3e4   : > { %v3863_v5 = vadd.f32 %v3791_v44, %v7993_v19  ;;  %v2996_v14 = vmul.f32 %v2995_v39, %v7015_v47  ;;  %v3035_v35 = vadd.f32 1.1283791, %v3034_v26  ;;  %v3058_v52 = vand.u32 2147483648, %v3046_v4 }
 0x3e5   : > { %v3695_v37 = vpack.c.bf16 %v3671_v17, %v3670_v46  ;;  %v3015_v27 = vsel %vm7201_vm2, %v4464_v13, %v3011_v43  ;;  %v1890_v13 = vmul.f32 0.5, %v1889_v9  ;;  %v3056_v38 = vand.u32 2147483647, %v3046_v4 }
 0x3e6   : > { %3895 = vst.msk [vmem:[%s7025_s13 + $0x28] sm:$0xff] %vm433_vm0, %v3863_v5  ;;  %v4468_v21 = vpop.eup %4467  ;;  %v3020_v23 = vsel %vm3017_vm3, %v3019_v1, %v3015_v27  ;;  %vm3052_vm5 = vweird.f32 %v3046_v4  ;;  %v3059_v3 = vor.u32 1.1754944e-38, %v3058_v52  ;;  %v3036_v57 = vmul.f32 %v3035_v35, %v7052_v20 }
 0x3e7   : > { %3812 = vmatmul.bf16.gmra.mxu1 %v3695_v37  ;;  %v3048_v44 = vmul.f32 %v4468_v21, %v3046_v4  ;;  %v3021_v19 = vmul.f32 %v3020_v23, %v2996_v14  ;;  %vm3053_vm4 = vweird.f32 %v4468_v21  ;;  %v1891_v34 = vsub.f32 1.5, %v1890_v13 }
 0x3e8   : > { %vm3054_vm6 = vmor %vm3052_vm5, %vm3053_vm4  ;;  %vm3057_vm7 = vcmp.eq.f32.partialorder %v3056_v38, 8.507059e+37  ;;  %vm1894_vm8 = vweird.f32 %v7189_v2  ;;  %vm1893_vm9 = vweird.f32 %v7168_v7 }
 0x3e9   : > { %v3049_v61 = vsub.f32 1.0, %v3048_v44  ;;  %v4100_v53 = vclamps-f32 %v3021_v19, 1.0  ;;  %v1892_v41 = vmul.f32 %v7189_v2, %v1891_v34  ;;  %vm7239_vm10 = vmor %vm1893_vm9, %vm1894_vm8 }
 0x3eb   : > { %v3050_v5 = vmul.f32 %v4468_v21, %v3049_v61  ;;  %v1896_v44 = vsel %vm7239_vm10, %v7189_v2, %v1892_v41 }
 0x3ec   : > { %v1550_v56 = vpop.xlane.xlu0 %1549  ;;  %v1973_v52 = vmul.f32 %v1896_v44, %v6654_v49 }
 0x3ed   : > { %v3793_v54 = vpop.f32.mrf.mxu1  ;;  %v1590_v42 = vmul.f32 %v1550_v56, %v4772_v30  ;;  %v3051_v28 = vadd.f32 %v4468_v21, %v3050_v5 }
 0x3ee   : > { %v3794_v40 = vadd.f32 %v3793_v54, %v6998_v8  ;;  %v3640_v54 = vadd.f32 1.0, %v4100_v53 }
 0x3ef   : > { %v7215_v22 = vadd.f32 1e-05, %v1590_v42  ;;  %v3055_v50 = vsel %vm3054_vm6, %v4468_v21, %v3051_v28  ;;  %v2296_v21 = vmul.f32 0.5, %v7003_v16 }
 0x3f0   : > { %v3864_v29 = vadd.f32 %v3794_v40, %v7996_v48  ;;  %v3060_v32 = vsel %vm3057_vm7, %v3059_v3, %v3055_v50  ;;  %v2297_v40 = vmul.f32 0.5, %v7035_v33 }
 0x3f1   : > { %4469 = vrsqrt.f32 %v7215_v22  ;;  %v3061_v46 = vmul.f32 %v3060_v32, %v3036_v57  ;;  %v3672_v16 = vmul.f32 %v3640_v54, %v2296_v21  ;;  %vm1903_vm12 = vweird.f32 %v7215_v22 }
 0x3f2   : > { %3896 = vst.msk [vmem:[%s7025_s13 + $0x30] sm:$0xff] %vm433_vm0, %v3864_v29 }
 0x3f3   : > { %v1553_v17 = vpop.xlane.xlu1 %1552  ;;  %v4101_v26 = vclamps-f32 %v3061_v46, 1.0 }
 0x3f4   : > { %v1591_v55 = vmul.f32 %v1553_v17, %v4772_v30 }
 0x3f5   : > { %v3795_v10 = vpop.f32.mrf.mxu1  ;;  %v3641_v56 = vadd.f32 1.0, %v4101_v26 }
 0x3f6   : > { %v3796_v47 = vadd.f32 %v3795_v10, %v6998_v8  ;;  %v2179_v62 = vpop.f32.mrf.mxu3  ;;  %v7235_v27 = vadd.f32 1e-05, %v1591_v55 }
 0x3f7   : > { %v2233_v25 = vmul.f32 %v5913_v60, %v2179_v62  ;;  %v4470_v4 = vpop.eup %4469  ;;  %v1556_v48 = vpop.xlane.xlu2 %1555  ;;  %v3673_v42 = vmul.f32 %v3641_v56, %v2297_v40  ;;  %v2006_v62 = vmul.f32 %v5566_v51, %v1973_v52 }
 0x3f8   : > { %v3865_v43 = vadd.f32 %v3796_v47, %v7997_v24  ;;  %v1898_v39 = vmul.f32 %v4470_v4, %v7215_v22  ;;  %4471 = vrsqrt.f32 %v7235_v27  ;;  %v1592_v23 = vmul.f32 %v1556_v48, %v4772_v30 }
 0x3f9   : > { %v7227_v20 = vadd.f32 %v5925_v11, %v2233_v25  ;;  %vm1904_vm11 = vweird.f32 %v4470_v4  ;;  %v3696_v13 = vpack.c.bf16 %v3673_v42, %v3672_v16  ;;  %v2039_v54 = vadd.f32 %v5577_v45, %v2006_v62 }
 0x3fa   : > { %3897 = vst.msk [vmem:[%s7025_s13 + $0x38] sm:$0xff] %vm433_vm0, %v3865_v43  ;;  %v1899_v1 = vmul.f32 %v4470_v4, %v1898_v39  ;;  %v7253_v2 = vadd.f32 1e-05, %v1592_v23  ;;  %vm1905_vm13 = vmor %vm1903_vm12, %vm1904_vm11  ;;  %vm1913_vm15 = vweird.f32 %v7235_v27 }
 0x3fb   : > { %v7233_v37 = vmul.f32 0.70710677, %v7227_v20  ;;  %3817 = vmatmul.bf16.vlgmr.msra.gmra.mxu2 %v3696_v13 }
 0x3fc   : > { %v1900_v29 = vmul.f32 0.5, %v1899_v1  ;;  %4473 = vrsqrt.f32 %v7253_v2  ;;  %vm1923_vm3 = vweird.f32 %v7253_v2 }
 0x3fd   : > { %v3064_v7 = vmul.f32 %v7233_v37, %v7233_v37 }
 0x3fe   : > { %v2181_v33 = vpop.f32.mrf.mxu3  ;;  %v1901_v61 = vsub.f32 1.5, %v1900_v29  ;;  %v7263_v28 = vpop.eup %4471 }
 0x3ff   : > { %v7250_v14 = vmin.f32 %v3064_v7, 16.0  ;;  %v2234_v35 = vmul.f32 %v5913_v60, %v2181_v33  ;;  %v1908_v3 = vmul.f32 %v7263_v28, %v7235_v27  ;;  %vm1914_vm14 = vweird.f32 %v7263_v28 }
 0x400   : > { %v1902_v10 = vmul.f32 %v4470_v4, %v1901_v61  ;;  %vm7302_vm1 = vmor %vm1913_vm15, %vm1914_vm14 }
 0x401   : > { %v3066_v19 = vmul.f32 2.1237322e-06, %v7250_v14  ;;  %v7258_v5 = vadd.f32 %v5925_v11, %v2234_v35  ;;  %v3077_v38 = vmul.f32 3.8918573e-05, %v7250_v14  ;;  %v1909_v24 = vmul.f32 %v7263_v28, %v1908_v3  ;;  %v8002_v3 = vld [vmem:[#allocation15_spill] sm:$0xff] }
 0x402   : > { %v1906_v49 = vsel %vm1905_vm13, %v4470_v4, %v1902_v10  ;;  %v4474_v4 = vpop.eup %4473 }
 0x403   : > { %v3067_v34 = vadd.f32 0.00028619796, %v3066_v19  ;;  %v7266_v47 = vmul.f32 0.70710677, %v7258_v5  ;;  %v3078_v57 = vadd.f32 0.001143296, %v3077_v38  ;;  %v1974_v53 = vmul.f32 %v1906_v49, %v6782_v15 }
 0x404   : > { %v1910_v15 = vmul.f32 0.5, %v1909_v24  ;;  %v1918_v26 = vmul.f32 %v4474_v4, %v7253_v2  ;;  %vm1924_vm2 = vweird.f32 %v4474_v4 }
 0x405   : > { %v3068_v50 = vmul.f32 %v3067_v34, %v7250_v14  ;;  %v3104_v22 = vmul.f32 %v7266_v47, %v7266_v47  ;;  %v3079_v32 = vmul.f32 %v3078_v57, %v7250_v14  ;;  %v2007_v46 = vmul.f32 %v5566_v51, %v1974_v53  ;;  %vm1925_vm4 = vmor %vm1923_vm3, %vm1924_vm2 }
 0x406   : > { %v2184_v43 = vpop.f32.mrf.mxu3  ;;  %v1911_v21 = vsub.f32 1.5, %v1910_v15  ;;  %v1919_v44 = vmul.f32 %v4474_v4, %v1918_v26 }
 0x407   : > { %v7277_v25 = vmin.f32 %v3104_v22, 16.0  ;;  %v2235_v17 = vmul.f32 %v5913_v60, %v2184_v43  ;;  %v3080_v41 = vadd.f32 0.014752088, %v3079_v32  ;;  %v3069_v55 = vadd.f32 0.0036580483, %v3068_v50 }
 0x408   : > { %v2040_v40 = vadd.f32 %v5577_v45, %v2007_v46  ;;  %v1912_v48 = vmul.f32 %v7263_v28, %v1911_v21  ;;  %v1920_v35 = vmul.f32 0.5, %v1919_v44 }
 0x409   : > { %v3106_v39 = vmul.f32 2.1237322e-06, %v7277_v25  ;;  %v7286_v9 = vadd.f32 %v5925_v11, %v2235_v17  ;;  %v3081_v1 = vmul.f32 %v3080_v41, %v7250_v14  ;;  %v3117_v7 = vmul.f32 3.8918573e-05, %v7277_v25 }
 0x40a   : > { %v2058_v29 = vpack.c.bf16 %v2040_v40, %v2039_v54  ;;  %v3070_v33 = vmul.f32 %v3069_v55, %v7250_v14  ;;  %v1921_v49 = vsub.f32 1.5, %v1920_v35  ;;  %v1916_v27 = vsel %vm7302_vm1, %v7263_v28, %v1912_v48 }
 0x40b   : > { %v3107_v56 = vadd.f32 0.00028619796, %v3106_v39  ;;  %v7293_v16 = vmul.f32 0.70710677, %v7286_v9  ;;  %v3082_v61 = vadd.f32 0.112945676, %v3081_v1  ;;  %v1975_v17 = vmul.f32 %v1916_v27, %v6820_v12 }
 0x40c   : > { %4081 = vmatmul.msk.bf16.gmra.mxu3 %vm433_vm0, %v2058_v29  ;;  %v3118_v38 = vadd.f32 0.001143296, %v3117_v7  ;;  %v3071_v22 = vadd.f32 0.05243302, %v3070_v33  ;;  %v1922_v62 = vmul.f32 %v4474_v4, %v1921_v49 }
 0x40d   : > { %v3798_v42 = vpop.f32.mrf.mxu1  ;;  %v3108_v23 = vmul.f32 %v3107_v56, %v7277_v25  ;;  %v3144_v52 = vmul.f32 %v7293_v16, %v7293_v16  ;;  %v3083_v50 = vmul.f32 %v3082_v61, %v7250_v14  ;;  %v2008_v7 = vmul.f32 %v5566_v51, %v1975_v17 }
 0x40e   : > { %v3799_v13 = vadd.f32 %v3798_v42, %v6998_v8  ;;  %v2186_v19 = vpop.f32.mrf.mxu3  ;;  %v3119_v28 = vmul.f32 %v3118_v38, %v7277_v25  ;;  %v1926_v15 = vsel %vm1925_vm4, %v4474_v4, %v1922_v62  ;;  %v3072_v2 = vmul.f32 %v3071_v22, %v7250_v14 }
 0x40f   : > { %v3109_v34 = vadd.f32 0.0036580483, %v3108_v23  ;;  %v2236_v53 = vmul.f32 %v5913_v60, %v2186_v19  ;;  %v7313_v24 = vmin.f32 %v3144_v52, 16.0  ;;  %v3084_v46 = vadd.f32 0.4994258, %v3083_v50 }
 0x410   : > { %v3866_v57 = vadd.f32 %v3799_v13, %v8002_v3  ;;  %v1976_v39 = vmul.f32 %v1926_v15, %v6830_v58  ;;  %v3120_v21 = vadd.f32 0.014752088, %v3119_v28  ;;  %v8003_v58 = vld [vmem:[#allocation13_spill] sm:$0xff]  ;;  %v2041_v19 = vadd.f32 %v5577_v45, %v2008_v7 }
 0x411   : > { %v3110_v43 = vmul.f32 %v3109_v34, %v7277_v25  ;;  %v7319_v32 = vadd.f32 %v5925_v11, %v2236_v53  ;;  %v3085_v54 = vmul.f32 %v3084_v46, %v7250_v14  ;;  %v3146_v56 = vmul.f32 2.1237322e-06, %v7313_v24  ;;  %v1559_v4 = vpop.xlane.xlu0 %1558 }
 0x412   : > { %3898 = vst.msk [vmem:[%s7025_s13 + $0x40] sm:$0xff] %vm433_vm0, %v3866_v57  ;;  %v1593_v44 = vmul.f32 %v1559_v4, %v4772_v30  ;;  %v2009_v35 = vmul.f32 %v5566_v51, %v1976_v39  ;;  %v3121_v61 = vmul.f32 %v3120_v21, %v7277_v25  ;;  %v3157_v53 = vmul.f32 3.8918573e-05, %v7313_v24 }
 0x413   : > { %v7324_v41 = vmul.f32 0.70710677, %v7319_v32  ;;  %v3111_v1 = vadd.f32 0.05243302, %v3110_v43  ;;  %v7334_v48 = vadd.f32 1.0, %v3085_v54 }
 0x414   : > { %v1562_v26 = vpop.xlane.xlu1 %1561  ;;  %v7341_v23 = vadd.f32 1e-05, %v1593_v44  ;;  %v3147_v52 = vadd.f32 0.00028619796, %v3146_v56  ;;  %v2042_v38 = vadd.f32 %v5577_v45, %v2009_v35  ;;  %v3122_v49 = vadd.f32 0.112945676, %v3121_v61 }
 0x415   : > { %v3800_v55 = vpop.f32.mrf.mxu1  ;;  %v1594_v12 = vmul.f32 %v1562_v26, %v4772_v30  ;;  %v3184_v42 = vmul.f32 %v7324_v41, %v7324_v41  ;;  %4475 = vrcp.f32 %v7334_v48  ;;  %v3073_v30 = vadd.f32 0.18741608, %v3072_v2 }
 0x416   : > { %v3801_v40 = vadd.f32 %v3800_v55, %v6998_v8  ;;  %v3112_v13 = vmul.f32 %v3111_v1, %v7277_v25  ;;  %v2059_v34 = vpack.c.bf16 %v2042_v38, %v2041_v19  ;;  %v3148_v27 = vmul.f32 %v3147_v52, %v7313_v24 }
 0x417   : > { %v7339_v33 = vadd.f32 1e-05, %v1594_v12  ;;  %v7353_v10 = vmin.f32 %v3184_v42, 16.0  ;;  %v3074_v3 = vmul.f32 %v3073_v30, %v7250_v14  ;;  %v3123_v22 = vmul.f32 %v3122_v49, %v7277_v25 }
 0x418   : > { %v3867_v29 = vadd.f32 %v3801_v40, %v8003_v58  ;;  %v3113_v57 = vadd.f32 0.18741608, %v3112_v13  ;;  %v3158_v14 = vadd.f32 0.001143296, %v3157_v53  ;;  %v3149_v39 = vadd.f32 0.0036580483, %v3148_v27 }
 0x419   : > { %4477 = vrsqrt.f32 %v7339_v33  ;;  %v3186_v43 = vmul.f32 2.1237322e-06, %v7353_v10  ;;  %v3124_v15 = vadd.f32 0.4994258, %v3123_v22  ;;  %v3075_v2 = vadd.f32 1.1283791, %v3074_v3 }
 0x41a   : > { %3899 = vst.msk [vmem:[%s7025_s13 + $0x48] sm:$0xff] %vm433_vm0, %v3867_v29  ;;  %4479 = vrsqrt.f32 %v7341_v23  ;;  %v3114_v55 = vmul.f32 %v3113_v57, %v7277_v25  ;;  %v3159_v1 = vmul.f32 %v3158_v14, %v7313_v24  ;;  %vm1943_vm5 = vweird.f32 %v7339_v33  ;;  %v8010_v27 = vld [vmem:[#allocation17_spill] sm:$0xff] }
 0x41b   : > { %v4476_v50 = vpop.eup %4475  ;;  %v3125_v40 = vmul.f32 %v3124_v15, %v7277_v25  ;;  %v3187_v56 = vadd.f32 0.00028619796, %v3186_v43  ;;  %v3197_v4 = vmul.f32 3.8918573e-05, %v7353_v10  ;;  %v3098_v35 = vand.u32 2147483648, %v7334_v48 }
 0x41c   : > { %4082 = vmatmul.msk.bf16.gmra.mxu3 %vm433_vm0, %v2059_v34  ;;  %v3088_v46 = vmul.f32 %v4476_v50, %v7334_v48  ;;  %v3160_v29 = vadd.f32 0.014752088, %v3159_v1  ;;  %vm3093_vm6 = vweird.f32 %v4476_v50  ;;  %vm3092_vm9 = vweird.f32 %v7334_v48 }
 0x41d   : > { %v7369_v58 = vadd.f32 1.0, %v3125_v40  ;;  %v3198_v61 = vadd.f32 0.001143296, %v3197_v4  ;;  %v3096_v52 = vand.u32 2147483647, %v7334_v48  ;;  %v3188_v19 = vmul.f32 %v3187_v56, %v7353_v10  ;;  %vm7376_vm10 = vmor %vm3092_vm9, %vm3093_vm6 }
 0x41e   : > { %v3089_v21 = vsub.f32 1.0, %v3088_v46  ;;  %v3161_v49 = vmul.f32 %v3160_v29, %v7313_v24  ;;  %v3076_v57 = vmul.f32 %v3075_v2, %v7233_v37  ;;  %vm1933_vm12 = vweird.f32 %v7341_v23 }
 0x41f   : > { %v4478_v62 = vpop.eup %4477  ;;  %4481 = vrcp.f32 %v7369_v58  ;;  %v3199_v3 = vmul.f32 %v3198_v61, %v7353_v10  ;;  %v3150_v22 = vmul.f32 %v3149_v39, %v7313_v24  ;;  %v3099_v46 = vor.u32 1.1754944e-38, %v3098_v35 }
 0x420   : > { %v4480_v28 = vpop.eup %4479  ;;  %v1938_v17 = vmul.f32 %v4478_v62, %v7339_v33  ;;  %v3090_v7 = vmul.f32 %v4476_v50, %v3089_v21  ;;  %vm1944_vm7 = vweird.f32 %v4478_v62  ;;  %v3162_v33 = vadd.f32 0.112945676, %v3161_v49 }
 0x421   : > { %v1928_v26 = vmul.f32 %v4480_v28, %v7341_v23  ;;  %vm1934_vm8 = vweird.f32 %v4480_v28  ;;  %vm7385_vm11 = vmor %vm1943_vm5, %vm1944_vm7  ;;  %vm3097_vm14 = vcmp.eq.f32.partialorder %v3096_v52, 8.507059e+37  ;;  %v3189_v23 = vadd.f32 0.0036580483, %v3188_v19 }
 0x422   : > { %v1939_v54 = vmul.f32 %v4478_v62, %v1938_v17  ;;  %v3091_v25 = vadd.f32 %v4476_v50, %v3090_v7  ;;  %vm1935_vm13 = vmor %vm1933_vm12, %vm1934_vm8  ;;  %v3115_v17 = vadd.f32 1.1283791, %v3114_v55  ;;  %v3138_v55 = vand.u32 2147483648, %v7369_v58 }
 0x423   : > { %v1929_v12 = vmul.f32 %v4480_v28, %v1928_v26  ;;  %v3151_v4 = vadd.f32 0.05243302, %v3150_v22  ;;  %vm3132_vm1 = vweird.f32 %v7369_v58 }
 0x424   : > { %v1940_v44 = vmul.f32 0.5, %v1939_v54  ;;  %v3095_v53 = vsel %vm7376_vm10, %v4476_v50, %v3091_v25  ;;  %v3163_v50 = vmul.f32 %v3162_v33, %v7313_v24  ;;  %v3200_v54 = vadd.f32 0.014752088, %v3199_v3 }
 0x425   : > { %v1930_v42 = vmul.f32 0.5, %v1929_v12  ;;  %v4482_v2 = vpop.eup %4481  ;;  %v3100_v26 = vsel %vm3097_vm14, %v3099_v46, %v3095_v53  ;;  %v3116_v12 = vmul.f32 %v3115_v17, %v7266_v47 }
 0x426   : > { %v1941_v30 = vsub.f32 1.5, %v1940_v44  ;;  %v2189_v37 = vpop.f32.mrf.mxu3  ;;  %v3128_v40 = vmul.f32 %v4482_v2, %v7369_v58  ;;  %v3164_v1 = vadd.f32 0.4994258, %v3163_v50  ;;  %v3201_v56 = vmul.f32 %v3200_v54, %v7353_v10 }
 0x427   : > { %v1931_v13 = vsub.f32 1.5, %v1930_v42  ;;  %v2237_v14 = vmul.f32 %v5913_v60, %v2189_v37  ;;  %v3101_v7 = vmul.f32 %v3100_v26, %v3076_v57  ;;  %vm3133_vm15 = vweird.f32 %v4482_v2 }
 0x428   : > { %v1942_v38 = vmul.f32 %v4478_v62, %v1941_v30  ;;  %v3165_v29 = vmul.f32 %v3164_v1, %v7313_v24  ;;  %v3202_v42 = vadd.f32 0.112945676, %v3201_v56  ;;  %vm3134_vm3 = vmor %vm3132_vm1, %vm3133_vm15  ;;  %v3152_v37 = vmul.f32 %v3151_v4, %v7313_v24 }
 0x429   : > { %v1932_v48 = vmul.f32 %v4480_v28, %v1931_v13  ;;  %v7401_v21 = vadd.f32 %v5925_v11, %v2237_v14  ;;  %v3139_v13 = vor.u32 1.1754944e-38, %v3138_v55  ;;  %v4102_v53 = vclamps-f32 %v3101_v7, 1.0  ;;  %v8011_v7 = vld [vmem:[#allocation16_spill] sm:$0xff] }
 0x42a   : > { %v1946_v43 = vsel %vm7385_vm11, %v4478_v62, %v1942_v38  ;;  %v7420_v19 = vadd.f32 1.0, %v3165_v29  ;;  %v3203_v57 = vmul.f32 %v3202_v42, %v7353_v10 }
 0x42b   : > { %v1936_v15 = vsel %vm1935_vm13, %v4480_v28, %v1932_v48  ;;  %v1978_v39 = vmul.f32 %v1946_v43, %v6939_v6  ;;  %v3136_v28 = vand.u32 2147483647, %v7369_v58  ;;  %v7409_v44 = vmul.f32 0.70710677, %v7401_v21 }
 0x42c   : > { %v1977_v62 = vmul.f32 %v1936_v15, %v6932_v0  ;;  %v3129_v6 = vsub.f32 1.0, %v3128_v40  ;;  %v3190_v0 = vmul.f32 %v3189_v23, %v7353_v10  ;;  %4483 = vrcp.f32 %v7420_v19 }
 0x42d   : > { %v2011_v30 = vmul.f32 %v5566_v51, %v1978_v39  ;;  %vm7416_vm2 = vcmp.eq.f32.partialorder %v3136_v28, 8.507059e+37  ;;  %v3224_v34 = vmul.f32 %v7409_v44, %v7409_v44  ;;  %v3642_v26 = vadd.f32 1.0, %v4102_v53 }
 0x42e   : > { %v3130_v35 = vmul.f32 %v4482_v2, %v3129_v6  ;;  %v2010_v61 = vmul.f32 %v5566_v51, %v1977_v62  ;;  %v2191_v52 = vpop.f32.mrf.mxu3  ;;  %v3191_v17 = vadd.f32 0.05243302, %v3190_v0  ;;  %v2298_v39 = vmul.f32 0.5, %v7227_v20 }
 0x42f   : > { %v2238_v51 = vmul.f32 %v5913_v60, %v2191_v52  ;;  %v2044_v3 = vadd.f32 %v5577_v45, %v2011_v30  ;;  %v2299_v62 = vmul.f32 0.5, %v7258_v5  ;;  %v3153_v40 = vadd.f32 0.18741608, %v3152_v37 }
 0x430   : > { %v3131_v49 = vadd.f32 %v4482_v2, %v3130_v35  ;;  %v2043_v58 = vadd.f32 %v5577_v45, %v2010_v61  ;;  %v7439_v45 = vmin.f32 %v3224_v34, 16.0  ;;  %v3192_v1 = vmul.f32 %v3191_v17, %v7353_v10 }
 0x431   : > { %v3803_v25 = vpop.f32.mrf.mxu1  ;;  %v7432_v43 = vadd.f32 %v5925_v11, %v2238_v51  ;;  %v3674_v20 = vmul.f32 %v3642_v26, %v2298_v39  ;;  %v3154_v61 = vmul.f32 %v3153_v40, %v7313_v24  ;;  %v3178_v52 = vand.u32 2147483648, %v7420_v19 }
 0x432   : > { %v3804_v38 = vadd.f32 %v3803_v25, %v6998_v8  ;;  %v3135_v22 = vsel %vm3134_vm3, %v4482_v2, %v3131_v49  ;;  %v2060_v33 = vpack.c.bf16 %v2044_v3, %v2043_v58  ;;  %v3204_v2 = vadd.f32 0.4994258, %v3203_v57  ;;  %v4484_v54 = vpop.eup %4483 }
 0x433   : > { %v3140_v46 = vsel %vm7416_vm2, %v3139_v13, %v3135_v22  ;;  %v7442_v14 = vmul.f32 0.70710677, %v7432_v43  ;;  %v3168_v6 = vmul.f32 %v4484_v54, %v7420_v19  ;;  %v3193_v30 = vadd.f32 0.18741608, %v3192_v1 }
 0x434   : > { %v3868_v48 = vadd.f32 %v3804_v38, %v8010_v27  ;;  %v3141_v15 = vmul.f32 %v3140_v46, %v3116_v12  ;;  %4083 = vmatmul.msk.bf16.gmra.mxu3 %vm433_vm0, %v2060_v33  ;;  %v3205_v55 = vmul.f32 %v3204_v2, %v7353_v10  ;;  %v3226_v12 = vmul.f32 2.1237322e-06, %v7439_v45 }
 0x435   : > { %v3264_v50 = vmul.f32 %v7442_v14, %v7442_v14  ;;  %v3169_v35 = vsub.f32 1.0, %v3168_v6  ;;  %vm3173_vm4 = vweird.f32 %v4484_v54  ;;  %v3237_v38 = vmul.f32 3.8918573e-05, %v7439_v45 }
 0x436   : > { %3900 = vst.msk [vmem:[%s7025_s13 + $0x50] sm:$0xff] %vm433_vm0, %v3868_v48  ;;  %v4103_v23 = vclamps-f32 %v3141_v15, 1.0  ;;  %v3206_v0 = vadd.f32 1.0, %v3205_v55  ;;  %v3227_v25 = vadd.f32 0.00028619796, %v3226_v12  ;;  %vm3172_vm5 = vweird.f32 %v7420_v19 }
 0x437   : > { %v7455_v5 = vmin.f32 %v3264_v50, 16.0  ;;  %v3170_v13 = vmul.f32 %v4484_v54, %v3169_v35  ;;  %v3176_v49 = vand.u32 2147483647, %v7420_v19  ;;  %v3238_v24 = vadd.f32 0.001143296, %v3237_v38  ;;  %vm3174_vm6 = vmor %vm3172_vm5, %vm3173_vm4 }
 0x438   : > { %v3643_v4 = vadd.f32 1.0, %v4103_v23  ;;  %4485 = vrcp.f32 %v3206_v0  ;;  %v3155_v58 = vadd.f32 1.1283791, %v3154_v61  ;;  %v3194_v3 = vmul.f32 %v3193_v30, %v7353_v10 }
 0x439   : > { %v3805_v28 = vpop.f32.mrf.mxu1  ;;  %v3266_v34 = vmul.f32 2.1237322e-06, %v7455_v5  ;;  %v3171_v51 = vadd.f32 %v4484_v54, %v3170_v13  ;;  %v3228_v57 = vmul.f32 %v3227_v25, %v7439_v45  ;;  %v3179_v53 = vor.u32 1.1754944e-38, %v3178_v52 }
 0x43a   : > { %v3806_v56 = vadd.f32 %v3805_v28, %v6998_v8  ;;  %v3675_v42 = vmul.f32 %v3643_v4, %v2299_v62  ;;  %v3239_v22 = vmul.f32 %v3238_v24, %v7439_v45  ;;  %vm3177_vm7 = vcmp.eq.f32.partialorder %v3176_v49, 8.507059e+37 }
 0x43b   : > { %v3175_v48 = vsel %vm3174_vm6, %v4484_v54, %v3171_v51  ;;  %v3267_v37 = vadd.f32 0.00028619796, %v3266_v34  ;;  %v3277_v15 = vmul.f32 3.8918573e-05, %v7455_v5  ;;  %v3156_v19 = vmul.f32 %v3155_v58, %v7293_v16 }
 0x43c   : > { %v3869_v29 = vadd.f32 %v3806_v56, %v8011_v7  ;;  %v3697_v47 = vpack.c.bf16 %v3675_v42, %v3674_v20  ;;  %v3180_v33 = vsel %vm3177_vm7, %v3179_v53, %v3175_v48  ;;  %v3240_v17 = vadd.f32 0.014752088, %v3239_v22 }
 0x43d   : > { %v3195_v2 = vadd.f32 1.1283791, %v3194_v3  ;;  %v3229_v23 = vadd.f32 0.0036580483, %v3228_v57  ;;  %v3216_v26 = vand.u32 2147483647, %v3206_v0  ;;  %v3268_v62 = vmul.f32 %v3267_v37, %v7455_v5 }
 0x43e   : > { %3901 = vst.msk [vmem:[%s7025_s13 + $0x58] sm:$0xff] %vm433_vm0, %v3869_v29  ;;  %3822 = vmatmul.bf16.gmra.mxu2 %v3697_v47  ;;  %v4486_v27 = vpop.eup %4485  ;;  %v3218_v50 = vand.u32 2147483648, %v3206_v0  ;;  %v3241_v39 = vmul.f32 %v3240_v17, %v7439_v45  ;;  %v3278_v54 = vadd.f32 0.001143296, %v3277_v15  ;;  %v3181_v40 = vmul.f32 %v3180_v33, %v3156_v19 }
 0x43f   : > { %v3208_v46 = vmul.f32 %v4486_v27, %v3206_v0  ;;  %vm3213_vm8 = vweird.f32 %v4486_v27  ;;  %v3196_v56 = vmul.f32 %v3195_v2, %v7324_v41  ;;  %vm3212_vm9 = vweird.f32 %v3206_v0 }
 0x440   : > { %v3242_v55 = vadd.f32 0.112945676, %v3241_v39  ;;  %v3279_v1 = vmul.f32 %v3278_v54, %v7455_v5  ;;  %v3230_v16 = vmul.f32 %v3229_v23, %v7439_v45  ;;  %vm3214_vm10 = vmor %vm3212_vm9, %vm3213_vm8  ;;  %v3219_v4 = vor.u32 1.1754944e-38, %v3218_v50 }
 0x441   : > { %v3209_v10 = vsub.f32 1.0, %v3208_v46  ;;  %v3269_v29 = vadd.f32 0.0036580483, %v3268_v62  ;;  %v4104_v20 = vclamps-f32 %v3181_v40, 1.0  ;;  %vm3217_vm11 = vcmp.eq.f32.partialorder %v3216_v26, 8.507059e+37  ;;  %v8012_v46 = vld [vmem:[#allocation19_spill] sm:$0xff] }
 0x442   : > { %v3243_v6 = vmul.f32 %v3242_v55, %v7439_v45  ;;  %v3280_v7 = vadd.f32 0.014752088, %v3279_v1  ;;  %v3231_v47 = vadd.f32 0.05243302, %v3230_v16  ;;  %v2300_v51 = vmul.f32 0.5, %v7286_v9  ;;  %v8013_v62 = vld [vmem:[#allocation18_spill] sm:$0xff] }
 0x443   : > { %v3210_v28 = vmul.f32 %v4486_v27, %v3209_v10  ;;  %v3270_v13 = vmul.f32 %v3269_v29, %v7455_v5  ;;  %v3644_v38 = vadd.f32 1.0, %v4104_v20  ;;  %v2301_v24 = vmul.f32 0.5, %v7319_v32 }
 0x444   : > { %v3244_v61 = vadd.f32 0.4994258, %v3243_v6  ;;  %v3281_v30 = vmul.f32 %v3280_v7, %v7455_v5  ;;  %v3232_v57 = vmul.f32 %v3231_v47, %v7439_v45 }
 0x445   : > { %v3211_v12 = vadd.f32 %v4486_v27, %v3210_v28  ;;  %v3271_v48 = vadd.f32 0.05243302, %v3270_v13  ;;  %v3676_v53 = vmul.f32 %v3644_v38, %v2300_v51 }
 0x446   : > { %v3245_v41 = vmul.f32 %v3244_v61, %v7439_v45  ;;  %v3282_v0 = vadd.f32 0.112945676, %v3281_v30  ;;  %v3233_v19 = vadd.f32 0.18741608, %v3232_v57  ;;  %v8014_v57 = vld [vmem:[#allocation21_spill] sm:$0xff] }
 0x447   : > { %v3215_v42 = vsel %vm3214_vm10, %v4486_v27, %v3211_v12  ;;  %v3272_v9 = vmul.f32 %v3271_v48, %v7455_v5 }
 0x448   : > { %v3220_v35 = vsel %vm3217_vm11, %v3219_v4, %v3215_v42  ;;  %v3246_v34 = vadd.f32 1.0, %v3245_v41  ;;  %v3283_v49 = vmul.f32 %v3282_v0, %v7455_v5  ;;  %v3234_v26 = vmul.f32 %v3233_v19, %v7439_v45 }
 0x449   : > { %v3221_v25 = vmul.f32 %v3220_v35, %v3196_v56  ;;  %v3273_v39 = vadd.f32 0.18741608, %v3272_v9 }
 0x44a   : > { %4487 = vrcp.f32 %v3246_v34  ;;  %v3284_v37 = vadd.f32 0.4994258, %v3283_v49  ;;  %v3258_v28 = vand.u32 2147483648, %v3246_v34  ;;  %v3256_v1 = vand.u32 2147483647, %v3246_v34 }
 0x44b   : > { %v4105_v52 = vclamps-f32 %v3221_v25, 1.0  ;;  %v3235_v56 = vadd.f32 1.1283791, %v3234_v26  ;;  %v3274_v16 = vmul.f32 %v3273_v39, %v7455_v5  ;;  %vm3252_vm13 = vweird.f32 %v3246_v34 }
 0x44c   : > { %v3285_v15 = vmul.f32 %v3284_v37, %v7455_v5  ;;  %v3259_v45 = vor.u32 1.1754944e-38, %v3258_v28  ;;  %vm3257_vm15 = vcmp.eq.f32.partialorder %v3256_v1, 8.507059e+37  ;;  %v2303_v37 = vmul.f32 0.5, %v7432_v43  ;;  %v8015_v43 = vld [vmem:[#allocation20_spill] sm:$0xff] }
 0x44d   : > { %v3645_v3 = vadd.f32 1.0, %v4105_v52  ;;  %v3236_v29 = vmul.f32 %v3235_v56, %v7409_v44  ;;  %v3275_v35 = vadd.f32 1.1283791, %v3274_v16 }
 0x44e   : > { %v3808_v58 = vpop.f32.mrf.mxu1  ;;  %v3286_v32 = vadd.f32 1.0, %v3285_v15 }
 0x44f   : > { %v3809_v27 = vadd.f32 %v3808_v58, %v6998_v8  ;;  %v3677_v22 = vmul.f32 %v3645_v3, %v2301_v24  ;;  %v3276_v13 = vmul.f32 %v3275_v35, %v7442_v14 }
 0x450   : > { %v4488_v2 = vpop.eup %4487  ;;  %4489 = vrcp.f32 %v3286_v32  ;;  %v3298_v61 = vand.u32 2147483648, %v3286_v32  ;;  %v3296_v47 = vand.u32 2147483647, %v3286_v32  ;;  %vm3292_vm2 = vweird.f32 %v3286_v32 }
 0x451   : > { %v3870_v33 = vadd.f32 %v3809_v27, %v8012_v46  ;;  %v3698_v17 = vpack.c.bf16 %v3677_v22, %v3676_v53  ;;  %v3248_v10 = vmul.f32 %v4488_v2, %v3246_v34  ;;  %vm3253_vm12 = vweird.f32 %v4488_v2 }
 0x452   : > { %vm3254_vm14 = vmor %vm3252_vm13, %vm3253_vm12  ;;  %v3299_v52 = vor.u32 1.1754944e-38, %v3298_v61  ;;  %vm3297_vm4 = vcmp.eq.f32.partialorder %v3296_v47, 8.507059e+37  ;;  %v2302_v53 = vmul.f32 0.5, %v7401_v21 }
 0x453   : > { %3902 = vst.msk [vmem:[%s7025_s13 + $0x60] sm:$0xff] %vm433_vm0, %v3870_v33  ;;  %3827 = vmatmul.bf16.gmra.mxu2 %v3698_v17  ;;  %v3249_v54 = vsub.f32 1.0, %v3248_v10 }
 0x455   : > { %v3250_v55 = vmul.f32 %v4488_v2, %v3249_v54 }
 0x456   : > { %v3810_v23 = vpop.f32.mrf.mxu1  ;;  %v4490_v12 = vpop.eup %4489 }
 0x457   : > { %v3811_v50 = vadd.f32 %v3810_v23, %v6998_v8  ;;  %v3251_v4 = vadd.f32 %v4488_v2, %v3250_v55  ;;  %v3288_v6 = vmul.f32 %v4490_v12, %v3286_v32  ;;  %vm3293_vm1 = vweird.f32 %v4490_v12 }
 0x458   : > { %vm3294_vm3 = vmor %vm3292_vm2, %vm3293_vm1 }
 0x459   : > { %v3871_v40 = vadd.f32 %v3811_v50, %v8013_v62  ;;  %v3255_v7 = vsel %vm3254_vm14, %v4488_v2, %v3251_v4  ;;  %v3289_v42 = vsub.f32 1.0, %v3288_v6 }
 0x45a   : > { %v3260_v20 = vsel %vm3257_vm15, %v3259_v45, %v3255_v7 }
 0x45b   : > { %3903 = vst.msk [vmem:[%s7025_s13 + $0x68] sm:$0xff] %vm433_vm0, %v3871_v40  ;;  %v3261_v30 = vmul.f32 %v3260_v20, %v3236_v29  ;;  %v3290_v25 = vmul.f32 %v4490_v12, %v3289_v42 }
 0x45d   : > { %v3291_v0 = vadd.f32 %v4490_v12, %v3290_v25  ;;  %v4106_v34 = vclamps-f32 %v3261_v30, 1.0  ;;  %v8016_v30 = vld [vmem:[#allocation7_spill] sm:$0xff] }
 0x45f   : > { %v3295_v49 = vsel %vm3294_vm3, %v4490_v12, %v3291_v0  ;;  %v3646_v48 = vadd.f32 1.0, %v4106_v34 }
 0x460   : > { %v3300_v24 = vsel %vm3297_vm4, %v3299_v52, %v3295_v49 }
 0x461   : > { %v3301_v3 = vmul.f32 %v3300_v24, %v3276_v13  ;;  %v3678_v19 = vmul.f32 %v3646_v48, %v2302_v53 }
 0x463   : > { %v2194_v41 = vpop.f32.mrf.mxu3  ;;  %v4107_v14 = vclamps-f32 %v3301_v3, 1.0 }
 0x464   : > { %v2239_v5 = vmul.f32 %v5913_v60, %v2194_v41  ;;  %v3813_v38 = vpop.f32.mrf.mxu1 }
 0x465   : > { %v3814_v51 = vadd.f32 %v3813_v38, %v6998_v8  ;;  %v3647_v33 = vadd.f32 1.0, %v4107_v14 }
 0x466   : > { %v7499_v44 = vadd.f32 %v5925_v11, %v2239_v5 }
 0x467   : > { %v3872_v27 = vadd.f32 %v3814_v51, %v8014_v57  ;;  %v3679_v9 = vmul.f32 %v3647_v33, %v2303_v37 }
 0x468   : > { %v7503_v58 = vmul.f32 0.70710677, %v7499_v44 }
 0x469   : > { %3904 = vst.msk [vmem:[%s7025_s13 + $0x70] sm:$0xff] %vm433_vm0, %v3872_v27  ;;  %v3699_v23 = vpack.c.bf16 %v3679_v9, %v3678_v19  ;;  %v8017_v27 = vld [vmem:[#allocation22_spill] sm:$0xff] }
 0x46a   : > { %v3304_v46 = vmul.f32 %v7503_v58, %v7503_v58 }
 0x46b   : > { %v2196_v22 = vpop.f32.mrf.mxu3  ;;  %3832 = vmatmul.bf16.gmra.mxu2 %v3699_v23 }
 0x46c   : > { %v2240_v17 = vmul.f32 %v5913_v60, %v2196_v22  ;;  %v3815_v15 = vpop.f32.mrf.mxu1  ;;  %v3305_v2 = vmin.f32 %v3304_v46, 16.0 }
 0x46d   : > { %v3816_v21 = vadd.f32 %v3815_v15, %v6998_v8 }
 0x46e   : > { %v7514_v32 = vadd.f32 %v5925_v11, %v2240_v17  ;;  %v3306_v39 = vmul.f32 2.1237322e-06, %v3305_v2  ;;  %v3317_v62 = vmul.f32 3.8918573e-05, %v3305_v2 }
 0x46f   : > { %v3873_v26 = vadd.f32 %v3816_v21, %v8015_v43 }
 0x470   : > { %v7518_v10 = vmul.f32 0.70710677, %v7514_v32  ;;  %v3307_v40 = vadd.f32 0.00028619796, %v3306_v39  ;;  %v3318_v55 = vadd.f32 0.001143296, %v3317_v62 }
 0x471   : > { %3905 = vst.msk [vmem:[%s7025_s13 + $0x78] sm:$0xff] %vm433_vm0, %v3873_v26 }
 0x472   : > { %v3344_v50 = vmul.f32 %v7518_v10, %v7518_v10  ;;  %v3319_v1 = vmul.f32 %v3318_v55, %v3305_v2  ;;  %v3308_v56 = vmul.f32 %v3307_v40, %v3305_v2 }
 0x474   : > { %v7525_v54 = vmin.f32 %v3344_v50, 16.0  ;;  %v3320_v16 = vadd.f32 0.014752088, %v3319_v1  ;;  %v3309_v6 = vadd.f32 0.0036580483, %v3308_v56 }
 0x476   : > { %v3346_v28 = vmul.f32 2.1237322e-06, %v7525_v54  ;;  %v3321_v4 = vmul.f32 %v3320_v16, %v3305_v2  ;;  %v3357_v45 = vmul.f32 3.8918573e-05, %v7525_v54  ;;  %v3310_v41 = vmul.f32 %v3309_v6, %v3305_v2 }
 0x478   : > { %v3347_v12 = vadd.f32 0.00028619796, %v3346_v28  ;;  %v3322_v20 = vadd.f32 0.112945676, %v3321_v4  ;;  %v3358_v35 = vadd.f32 0.001143296, %v3357_v45 }
 0x479   : > { %v3311_v34 = vadd.f32 0.05243302, %v3310_v41 }
 0x47a   : > { %v3348_v29 = vmul.f32 %v3347_v12, %v7525_v54  ;;  %v3323_v61 = vmul.f32 %v3322_v20, %v3305_v2  ;;  %v3359_v47 = vmul.f32 %v3358_v35, %v7525_v54 }
 0x47b   : > { %v3312_v53 = vmul.f32 %v3311_v34, %v3305_v2 }
 0x47c   : > { %v3349_v5 = vadd.f32 0.0036580483, %v3348_v29  ;;  %v3324_v0 = vadd.f32 0.4994258, %v3323_v61  ;;  %v3360_v13 = vadd.f32 0.014752088, %v3359_v47 }
 0x47d   : > { %v3313_v9 = vadd.f32 0.18741608, %v3312_v53 }
 0x47e   : > { %v3818_v7 = vpop.f32.mrf.mxu2  ;;  %v3325_v52 = vmul.f32 %v3324_v0, %v3305_v2  ;;  %v3361_v38 = vmul.f32 %v3360_v13, %v7525_v54  ;;  %v3350_v49 = vmul.f32 %v3349_v5, %v7525_v54 }
 0x47f   : > { %v3819_v42 = vadd.f32 %v3818_v7, %v6998_v8  ;;  %v3314_v62 = vmul.f32 %v3313_v9, %v3305_v2 }
 0x480   : > { %v3326_v24 = vadd.f32 1.0, %v3325_v52  ;;  %v3362_v57 = vadd.f32 0.112945676, %v3361_v38  ;;  %v3351_v22 = vadd.f32 0.05243302, %v3350_v49 }
 0x481   : > { %v3874_v25 = vadd.f32 %v3819_v42, %v8016_v30  ;;  %v3315_v29 = vadd.f32 1.1283791, %v3314_v62 }
 0x482   : > { %4491 = vrcp.f32 %v3326_v24  ;;  %v3363_v48 = vmul.f32 %v3362_v57, %v7525_v54  ;;  %v3352_v21 = vmul.f32 %v3351_v22, %v7525_v54  ;;  %vm3332_vm6 = vweird.f32 %v3326_v24 }
 0x483   : > { %3906 = vst.msk [vmem:[%s7025_s13 + $0x80] sm:$0xff] %vm433_vm0, %v3874_v25  ;;  %v3336_v12 = vand.u32 2147483647, %v3326_v24  ;;  %v3338_v16 = vand.u32 2147483648, %v3326_v24  ;;  %v3316_v52 = vmul.f32 %v3315_v29, %v7503_v58 }
 0x484   : > { %v3364_v33 = vadd.f32 0.4994258, %v3363_v48  ;;  %v3353_v40 = vadd.f32 0.18741608, %v3352_v21 }
 0x485   : > { %v3339_v30 = vor.u32 1.1754944e-38, %v3338_v16  ;;  %vm3337_vm8 = vcmp.eq.f32.partialorder %v3336_v12, 8.507059e+37 }
 0x486   : > { %v3820_v51 = vpop.f32.mrf.mxu2  ;;  %v3365_v15 = vmul.f32 %v3364_v33, %v7525_v54  ;;  %v3354_v7 = vmul.f32 %v3353_v40, %v7525_v54 }
 0x487   : > { %v3821_v3 = vadd.f32 %v3820_v51, %v6998_v8 }
 0x488   : > { %v4492_v19 = vpop.eup %4491  ;;  %v3366_v26 = vadd.f32 1.0, %v3365_v15  ;;  %v3355_v0 = vadd.f32 1.1283791, %v3354_v7 }
 0x489   : > { %v3875_v14 = vadd.f32 %v3821_v3, %v8017_v27  ;;  %v3328_v43 = vmul.f32 %v4492_v19, %v3326_v24  ;;  %vm3333_vm5 = vweird.f32 %v4492_v19 }
 0x48a   : > { %4493 = vrcp.f32 %v3366_v26  ;;  %vm3334_vm7 = vmor %vm3332_vm6, %vm3333_vm5  ;;  %v3376_v51 = vand.u32 2147483647, %v3366_v26  ;;  %v3378_v57 = vand.u32 2147483648, %v3366_v26  ;;  %v3356_v22 = vmul.f32 %v3355_v0, %v7518_v10 }
 0x48b   : > { %3907 = vst.msk [vmem:[%s7025_s13 + $0x88] sm:$0xff] %vm433_vm0, %v3875_v14  ;;  %v3329_v39 = vsub.f32 1.0, %v3328_v43  ;;  %vm3372_vm10 = vweird.f32 %v3366_v26 }
 0x48c   : > { %vm3377_vm11 = vcmp.eq.f32.partialorder %v3376_v51, 8.507059e+37  ;;  %v3379_v21 = vor.u32 1.1754944e-38, %v3378_v57 }
 0x48d   : > { %v3330_v56 = vmul.f32 %v4492_v19, %v3329_v39 }
 0x48f   : > { %v2199_v37 = vpop.f32.mrf.mxu3  ;;  %v3331_v6 = vadd.f32 %v4492_v19, %v3330_v56 }
 0x490   : > { %v2241_v46 = vmul.f32 %v5913_v60, %v2199_v37  ;;  %v4494_v61 = vpop.eup %4493 }
 0x491   : > { %v3335_v35 = vsel %vm3334_vm7, %v4492_v19, %v3331_v6  ;;  %v3368_v5 = vmul.f32 %v4494_v61, %v3366_v26  ;;  %vm3373_vm9 = vweird.f32 %v4494_v61 }
 0x492   : > { %v7544_v17 = vadd.f32 %v5925_v11, %v2241_v46  ;;  %v3340_v13 = vsel %vm3337_vm8, %v3339_v30, %v3335_v35  ;;  %vm3374_vm12 = vmor %vm3372_vm10, %vm3373_vm9  ;;  %v2304_v35 = vmul.f32 0.5, %v7499_v44 }
 0x493   : > { %v3369_v49 = vsub.f32 1.0, %v3368_v5  ;;  %v3341_v48 = vmul.f32 %v3340_v13, %v3316_v52 }
 0x494   : > { %v7549_v23 = vmul.f32 0.70710677, %v7544_v17 }
 0x495   : > { %v3370_v53 = vmul.f32 %v4494_v61, %v3369_v49 }
 0x496   : > { %v3384_v50 = vmul.f32 %v7549_v23, %v7549_v23 }
 0x497   : > { %v2201_v28 = vpop.f32.mrf.mxu3  ;;  %v3371_v15 = vadd.f32 %v4494_v61, %v3370_v53 }
 0x498   : > { %v7553_v55 = vmin.f32 %v3384_v50, 16.0  ;;  %v2242_v1 = vmul.f32 %v5913_v60, %v2201_v28  ;;  %v4108_v50 = vclamps-f32 %v3341_v48, 1.0 }
 0x499   : > { %v3375_v39 = vsel %vm3374_vm12, %v4494_v61, %v3371_v15 }
 0x49a   : > { %v3386_v4 = vmul.f32 2.1237322e-06, %v7553_v55  ;;  %v7558_v45 = vadd.f32 %v5925_v11, %v2242_v1  ;;  %v3397_v2 = vmul.f32 3.8918573e-05, %v7553_v55  ;;  %v3380_v40 = vsel %vm3377_vm11, %v3379_v21, %v3375_v39 }
 0x49b   : > { %v3381_v56 = vmul.f32 %v3380_v40, %v3356_v22  ;;  %v3648_v29 = vadd.f32 1.0, %v4108_v50 }
 0x49c   : > { %v3387_v20 = vadd.f32 0.00028619796, %v3386_v4  ;;  %v7563_v42 = vmul.f32 0.70710677, %v7558_v45  ;;  %v3398_v25 = vadd.f32 0.001143296, %v3397_v2 }
 0x49d   : > { %v4109_v7 = vclamps-f32 %v3381_v56, 1.0  ;;  %v3680_v52 = vmul.f32 %v3648_v29, %v2304_v35 }
 0x49e   : > { %v3388_v47 = vmul.f32 %v3387_v20, %v7553_v55  ;;  %v3424_v41 = vmul.f32 %v7563_v42, %v7563_v42  ;;  %v3399_v54 = vmul.f32 %v3398_v25, %v7553_v55  ;;  %v2305_v25 = vmul.f32 0.5, %v7514_v32 }
 0x49f   : > { %v2204_v34 = vpop.f32.mrf.mxu3 }
 0x4a0   : > { %v7570_v38 = vmin.f32 %v3424_v41, 16.0  ;;  %v3389_v24 = vadd.f32 0.0036580483, %v3388_v47  ;;  %v2243_v3 = vmul.f32 %v5913_v60, %v2204_v34  ;;  %v3400_v27 = vadd.f32 0.014752088, %v3399_v54 }
 0x4a1   : > { %v3649_v41 = vadd.f32 1.0, %v4109_v7 }
 0x4a2   : > { %v3426_v14 = vmul.f32 2.1237322e-06, %v7570_v38  ;;  %v7576_v37 = vadd.f32 %v5925_v11, %v2243_v3  ;;  %v3401_v58 = vmul.f32 %v3400_v27, %v7553_v55  ;;  %v3437_v46 = vmul.f32 3.8918573e-05, %v7570_v38 }
 0x4a3   : > { %v3390_v19 = vmul.f32 %v3389_v24, %v7553_v55  ;;  %v3681_v34 = vmul.f32 %v3649_v41, %v2305_v25 }
 0x4a4   : > { %v3427_v33 = vadd.f32 0.00028619796, %v3426_v14  ;;  %v7582_v9 = vmul.f32 0.70710677, %v7576_v37  ;;  %v3402_v43 = vadd.f32 0.112945676, %v3401_v58 }
 0x4a5   : > { %v3438_v62 = vadd.f32 0.001143296, %v3437_v46  ;;  %v3391_v16 = vadd.f32 0.05243302, %v3390_v19  ;;  %v3700_v32 = vpack.c.bf16 %v3681_v34, %v3680_v52 }
 0x4a6   : > { %v3428_v10 = vmul.f32 %v3427_v33, %v7570_v38  ;;  %v3403_v28 = vmul.f32 %v3402_v43, %v7553_v55  ;;  %v3464_v26 = vmul.f32 %v7582_v9, %v7582_v9 }
 0x4a7   : > { %v2206_v1 = vpop.f32.mrf.mxu3  ;;  %v3439_v12 = vmul.f32 %v3438_v62, %v7570_v38  ;;  %v3392_v0 = vmul.f32 %v3391_v16, %v7553_v55  ;;  %3837 = vmatmul.bf16.gmra.mxu2 %v3700_v32 }
 0x4a8   : > { %v2244_v4 = vmul.f32 %v5913_v60, %v2206_v1  ;;  %v3404_v6 = vadd.f32 0.4994258, %v3403_v28  ;;  %v3429_v2 = vadd.f32 0.0036580483, %v3428_v10  ;;  %v7596_v47 = vmin.f32 %v3464_v26, 16.0 }
 0x4a9   : > { %v3440_v20 = vadd.f32 0.014752088, %v3439_v12  ;;  %v3393_v24 = vadd.f32 0.18741608, %v3392_v0 }
 0x4aa   : > { %v7592_v61 = vadd.f32 %v5925_v11, %v2244_v4  ;;  %v3405_v30 = vmul.f32 %v3404_v6, %v7553_v55  ;;  %v3430_v44 = vmul.f32 %v3429_v2, %v7570_v38  ;;  %v3466_v51 = vmul.f32 2.1237322e-06, %v7596_v47 }
 0x4ab   : > { %v3441_v5 = vmul.f32 %v3440_v20, %v7570_v38  ;;  %v3477_v27 = vmul.f32 3.8918573e-05, %v7596_v47  ;;  %v3394_v46 = vmul.f32 %v3393_v24, %v7553_v55 }
 0x4ac   : > { %v7601_v13 = vmul.f32 0.70710677, %v7592_v61  ;;  %v3406_v54 = vadd.f32 1.0, %v3405_v30  ;;  %v3431_v14 = vadd.f32 0.05243302, %v3430_v44 }
 0x4ad   : > { %v3442_v49 = vadd.f32 0.112945676, %v3441_v5  ;;  %v3478_v53 = vadd.f32 0.001143296, %v3477_v27  ;;  %v3467_v22 = vadd.f32 0.00028619796, %v3466_v51 }
 0x4ae   : > { %4495 = vrcp.f32 %v3406_v54  ;;  %v3504_v3 = vmul.f32 %v7601_v13, %v7601_v13  ;;  %v3432_v21 = vmul.f32 %v3431_v14, %v7570_v38  ;;  %v3395_v40 = vadd.f32 1.1283791, %v3394_v46 }
 0x4af   : > { %v3443_v57 = vmul.f32 %v3442_v49, %v7570_v38  ;;  %v3479_v19 = vmul.f32 %v3478_v53, %v7596_v47  ;;  %v3468_v39 = vmul.f32 %v3467_v22, %v7596_v47  ;;  %vm3412_vm14 = vweird.f32 %v3406_v54 }
 0x4b0   : > { %v7610_v33 = vmin.f32 %v3504_v3, 16.0  ;;  %v3433_v55 = vadd.f32 0.18741608, %v3432_v21  ;;  %v3418_v16 = vand.u32 2147483648, %v3406_v54  ;;  %v3416_v7 = vand.u32 2147483647, %v3406_v54 }
 0x4b1   : > { %v3444_v48 = vadd.f32 0.4994258, %v3443_v57  ;;  %v3480_v50 = vadd.f32 0.014752088, %v3479_v19  ;;  %v3469_v6 = vadd.f32 0.0036580483, %v3468_v39 }
 0x4b2   : > { %v3506_v28 = vmul.f32 2.1237322e-06, %v7610_v33  ;;  %v3517_v4 = vmul.f32 3.8918573e-05, %v7610_v33  ;;  %v3434_v41 = vmul.f32 %v3433_v55, %v7570_v38  ;;  %v3419_v34 = vor.u32 1.1754944e-38, %v3418_v16  ;;  %v8020_v55 = vld [vmem:[#allocation23_spill] sm:$0xff] }
 0x4b3   : > { %v3445_v15 = vmul.f32 %v3444_v48, %v7570_v38  ;;  %v3481_v56 = vmul.f32 %v3480_v50, %v7596_v47  ;;  %v3470_v49 = vmul.f32 %v3469_v6, %v7596_v47  ;;  %vm3417_vm1 = vcmp.eq.f32.partialorder %v3416_v7, 8.507059e+37 }
 0x4b4   : > { %v4496_v58 = vpop.eup %4495  ;;  %v3507_v20 = vadd.f32 0.00028619796, %v3506_v28  ;;  %v3518_v25 = vadd.f32 0.001143296, %v3517_v4  ;;  %v3435_v27 = vadd.f32 1.1283791, %v3434_v41 }
 0x4b5   : > { %v3408_v43 = vmul.f32 %v4496_v58, %v3406_v54  ;;  %v7615_v10 = vadd.f32 1.0, %v3445_v15  ;;  %vm3413_vm13 = vweird.f32 %v4496_v58  ;;  %v3482_v29 = vadd.f32 0.112945676, %v3481_v56 }
 0x4b6   : > { %vm7626_vm15 = vmor %vm3412_vm14, %vm3413_vm13  ;;  %v3396_v54 = vmul.f32 %v3395_v40, %v7549_v23  ;;  %v3508_v38 = vmul.f32 %v3507_v20, %v7610_v33  ;;  %v3519_v57 = vmul.f32 %v3518_v25, %v7610_v33  ;;  %v3471_v39 = vadd.f32 0.05243302, %v3470_v49 }
 0x4b7   : > { %v3409_v62 = vsub.f32 1.0, %v3408_v43  ;;  %4497 = vrcp.f32 %v7615_v10  ;;  %v2209_v26 = vpop.f32.mrf.mxu3  ;;  %v3483_v0 = vmul.f32 %v3482_v29, %v7596_v47  ;;  %v3456_v48 = vand.u32 2147483647, %v7615_v10 }
 0x4b8   : > { %v2245_v12 = vmul.f32 %v5913_v60, %v2209_v26  ;;  %v3458_v15 = vand.u32 2147483648, %v7615_v10  ;;  %v3520_v28 = vadd.f32 0.014752088, %v3519_v57  ;;  %vm3452_vm3 = vweird.f32 %v7615_v10 }
 0x4b9   : > { %v3410_v1 = vmul.f32 %v4496_v58, %v3409_v62  ;;  %v3484_v32 = vadd.f32 0.4994258, %v3483_v0  ;;  %v3509_v62 = vadd.f32 0.0036580483, %v3508_v38  ;;  %v3436_v16 = vmul.f32 %v3435_v27, %v7563_v42 }
 0x4ba   : > { %v7624_v35 = vadd.f32 %v5925_v11, %v2245_v12  ;;  %v3459_v12 = vor.u32 1.1754944e-38, %v3458_v15  ;;  %vm3457_vm5 = vcmp.eq.f32.partialorder %v3456_v48, 8.507059e+37  ;;  %v3521_v7 = vmul.f32 %v3520_v28, %v7610_v33 }
 0x4bb   : > { %v3411_v2 = vadd.f32 %v4496_v58, %v3410_v1  ;;  %v3485_v53 = vmul.f32 %v3484_v32, %v7596_v47  ;;  %v3510_v6 = vmul.f32 %v3509_v62, %v7610_v33  ;;  %v2306_v29 = vmul.f32 0.5, %v7544_v17 }
 0x4bc   : > { %v7636_v52 = vmul.f32 0.70710677, %v7624_v35  ;;  %v2307_v42 = vmul.f32 0.5, %v7558_v45  ;;  %v3522_v0 = vadd.f32 0.112945676, %v3521_v7  ;;  %v3472_v17 = vmul.f32 %v3471_v39, %v7596_v47 }
 0x4bd   : > { %v3415_v5 = vsel %vm7626_vm15, %v4496_v58, %v3411_v2  ;;  %v4498_v44 = vpop.eup %4497  ;;  %v7651_v50 = vadd.f32 1.0, %v3485_v53  ;;  %v3511_v32 = vadd.f32 0.05243302, %v3510_v6 }
 0x4be   : > { %v3448_v51 = vmul.f32 %v4498_v44, %v7615_v10  ;;  %v3544_v24 = vmul.f32 %v7636_v52, %v7636_v52  ;;  %v3420_v3 = vsel %vm3417_vm1, %v3419_v34, %v3415_v5  ;;  %vm3453_vm2 = vweird.f32 %v4498_v44 }
 0x4bf   : > { %v2211_v23 = vpop.f32.mrf.mxu3  ;;  %v3421_v21 = vmul.f32 %v3420_v3, %v3396_v54  ;;  %4499 = vrcp.f32 %v7651_v50  ;;  %vm3454_vm4 = vmor %vm3452_vm3, %vm3453_vm2  ;;  %v3523_v27 = vmul.f32 %v3522_v0, %v7610_v33  ;;  %v3512_v39 = vmul.f32 %v3511_v32, %v7610_v33 }
 0x4c0   : > { %v3449_v14 = vsub.f32 1.0, %v3448_v51  ;;  %v7646_v58 = vmin.f32 %v3544_v24, 16.0  ;;  %v2246_v46 = vmul.f32 %v5913_v60, %v2211_v23  ;;  %v8021_v24 = vld [vmem:[#allocation24_spill] sm:$0xff]  ;;  %vm3492_vm7 = vweird.f32 %v7651_v50 }
 0x4c1   : > { %v3823_v22 = vpop.f32.mrf.mxu2  ;;  %v3524_v15 = vadd.f32 0.4994258, %v3523_v27  ;;  %v8024_v27 = vld [vmem:[#allocation25_spill] sm:$0xff] }
 0x4c2   : > { %v3824_v19 = vadd.f32 %v3823_v22, %v6998_v8  ;;  %v3450_v43 = vmul.f32 %v4498_v44, %v3449_v14  ;;  %v7654_v40 = vadd.f32 %v5925_v11, %v2246_v46  ;;  %v3546_v60 = vmul.f32 2.1237322e-06, %v7646_v58 }
 0x4c3   : > { %v4110_v11 = vclamps-f32 %v3421_v21, 1.0  ;;  %v3557_v30 = vmul.f32 3.8918573e-05, %v7646_v58  ;;  %v3473_v21 = vadd.f32 0.18741608, %v3472_v17  ;;  %v3525_v28 = vmul.f32 %v3524_v15, %v7610_v33 }
 0x4c4   : > { %v3876_v26 = vadd.f32 %v3824_v19, %v8020_v55  ;;  %v3451_v1 = vadd.f32 %v4498_v44, %v3450_v43  ;;  %v7661_v56 = vmul.f32 0.70710677, %v7654_v40  ;;  %v3547_v25 = vadd.f32 0.00028619796, %v3546_v60 }
 0x4c5   : > { %v3650_v49 = vadd.f32 1.0, %v4110_v11  ;;  %v3558_v51 = vadd.f32 0.001143296, %v3557_v30  ;;  %v3474_v6 = vmul.f32 %v3473_v21, %v7596_v47 }
 0x4c6   : > { %3908 = vst.msk [vmem:[%s7025_s13 + $0x90] sm:$0xff] %vm433_vm0, %v3876_v26  ;;  %v3455_v4 = vsel %vm3454_vm4, %v4498_v44, %v3451_v1  ;;  %v3584_v10 = vmul.f32 %v7661_v56, %v7661_v56  ;;  %v7676_v44 = vpop.eup %4499  ;;  %v3548_v14 = vmul.f32 %v3547_v25, %v7646_v58  ;;  %v3496_v25 = vand.u32 2147483647, %v7651_v50 }
 0x4c7   : > { %v3460_v2 = vsel %vm3457_vm5, %v3459_v12, %v3455_v4  ;;  %v3488_v45 = vmul.f32 %v7676_v44, %v7651_v50  ;;  %v3559_v23 = vmul.f32 %v3558_v51, %v7646_v58  ;;  %v3682_v22 = vmul.f32 %v3650_v49, %v2306_v29 }
 0x4c8   : > { %v3461_v20 = vmul.f32 %v3460_v2, %v3436_v16  ;;  %v7674_v5 = vmin.f32 %v3584_v10, 16.0  ;;  %v3549_v26 = vadd.f32 0.0036580483, %v3548_v14  ;;  %v3526_v16 = vadd.f32 1.0, %v3525_v28 }
 0x4c9   : > { %v3825_v41 = vpop.f32.mrf.mxu2  ;;  %v3489_v53 = vsub.f32 1.0, %v3488_v45  ;;  %v3560_v19 = vadd.f32 0.014752088, %v3559_v23  ;;  %v3513_v10 = vadd.f32 0.18741608, %v3512_v39  ;;  %vm3493_vm6 = vweird.f32 %v7676_v44 }
 0x4ca   : > { %v3826_v54 = vadd.f32 %v3825_v41, %v6998_v8  ;;  %v4111_v34 = vclamps-f32 %v3461_v20, 1.0  ;;  %v3586_v38 = vmul.f32 2.1237322e-06, %v7674_v5  ;;  %v3597_v43 = vmul.f32 3.8918573e-05, %v7674_v5  ;;  %vm7704_vm8 = vmor %vm3492_vm7, %vm3493_vm6 }
 0x4cb   : > { %v3561_v55 = vmul.f32 %v3560_v19, %v7646_v58  ;;  %v3490_v1 = vmul.f32 %v7676_v44, %v3489_v53  ;;  %4501 = vrcp.f32 %v3526_v16  ;;  %v3550_v2 = vmul.f32 %v3549_v26, %v7646_v58 }
 0x4cc   : > { %v3877_v3 = vadd.f32 %v3826_v54, %v8021_v24  ;;  %v3651_v57 = vadd.f32 1.0, %v4111_v34  ;;  %v3587_v48 = vadd.f32 0.00028619796, %v3586_v38  ;;  %v3598_v60 = vadd.f32 0.001143296, %v3597_v43 }
 0x4cd   : > { %v3562_v11 = vadd.f32 0.112945676, %v3561_v55  ;;  %v3491_v7 = vadd.f32 %v7676_v44, %v3490_v1  ;;  %v3498_v29 = vand.u32 2147483648, %v7651_v50  ;;  %v3475_v41 = vadd.f32 1.1283791, %v3474_v6 }
 0x4ce   : > { %3909 = vst.msk [vmem:[%s7025_s13 + $0x98] sm:$0xff] %vm433_vm0, %v3877_v3  ;;  %v3683_v46 = vmul.f32 %v3651_v57, %v2307_v42  ;;  %v3588_v12 = vmul.f32 %v3587_v48, %v7674_v5  ;;  %v3599_v4 = vmul.f32 %v3598_v60, %v7674_v5  ;;  %v3514_v34 = vmul.f32 %v3513_v10, %v7610_v33 }
 0x4cf   : > { %v3563_v30 = vmul.f32 %v3562_v11, %v7646_v58  ;;  %v3551_v49 = vadd.f32 0.05243302, %v3550_v2  ;;  %v3495_v17 = vsel %vm7704_vm8, %v7676_v44, %v3491_v7  ;;  %v3499_v32 = vor.u32 1.1754944e-38, %v3498_v29  ;;  %v8025_v7 = vld [vmem:[#allocation26_spill] sm:$0xff] }
 0x4d0   : > { %v3701_v62 = vpack.c.bf16 %v3683_v46, %v3682_v22  ;;  %v3589_v20 = vadd.f32 0.0036580483, %v3588_v12  ;;  %v3600_v42 = vadd.f32 0.014752088, %v3599_v4  ;;  %vm3497_vm9 = vcmp.eq.f32.partialorder %v3496_v25, 8.507059e+37 }
 0x4d1   : > { %v3564_v0 = vadd.f32 0.4994258, %v3563_v30  ;;  %v4502_v38 = vpop.eup %4501  ;;  %v3500_v23 = vsel %vm3497_vm9, %v3499_v32, %v3495_v17  ;;  %v3476_v44 = vmul.f32 %v3475_v41, %v7582_v9  ;;  %v3515_v53 = vadd.f32 1.1283791, %v3514_v34 }
 0x4d2   : > { %3842 = vmatmul.bf16.gmra.mxu2 %v3701_v62  ;;  %v3601_v54 = vmul.f32 %v3600_v42, %v7674_v5  ;;  %v3590_v50 = vmul.f32 %v3589_v20, %v7674_v5  ;;  %v3528_v57 = vmul.f32 %v4502_v38, %v3526_v16  ;;  %v3552_v22 = vmul.f32 %v3551_v49, %v7646_v58 }
 0x4d3   : > { %v3565_v24 = vmul.f32 %v3564_v0, %v7646_v58  ;;  %v3536_v19 = vand.u32 2147483647, %v3526_v16  ;;  %v3538_v21 = vand.u32 2147483648, %v3526_v16  ;;  %v3501_v43 = vmul.f32 %v3500_v23, %v3476_v44 }
 0x4d4   : > { %v3602_v3 = vadd.f32 0.112945676, %v3601_v54  ;;  %v3529_v46 = vsub.f32 1.0, %v3528_v57  ;;  %v3591_v15 = vadd.f32 0.05243302, %v3590_v50  ;;  %vm3533_vm10 = vweird.f32 %v4502_v38 }
 0x4d5   : > { %v3566_v14 = vadd.f32 1.0, %v3565_v24  ;;  %v3516_v28 = vmul.f32 %v3515_v53, %v7601_v13  ;;  %vm3532_vm11 = vweird.f32 %v3526_v16  ;;  %v3553_v1 = vadd.f32 0.18741608, %v3552_v22 }
 0x4d6   : > { %v3828_v51 = vpop.f32.mrf.mxu2  ;;  %v3603_v48 = vmul.f32 %v3602_v3, %v7674_v5  ;;  %v3530_v39 = vmul.f32 %v4502_v38, %v3529_v46  ;;  %v3592_v60 = vmul.f32 %v3591_v15, %v7674_v5  ;;  %vm3534_vm12 = vmor %vm3532_vm11, %vm3533_vm10  ;;  %v3539_v11 = vor.u32 1.1754944e-38, %v3538_v21 }
 0x4d7   : > { %v3829_v45 = vadd.f32 %v3828_v51, %v6998_v8  ;;  %4503 = vrcp.f32 %v3566_v14  ;;  %v4112_v4 = vclamps-f32 %v3501_v43, 1.0  ;;  %vm3537_vm13 = vcmp.eq.f32.partialorder %v3536_v19, 8.507059e+37 }
 0x4d8   : > { %v3604_v62 = vadd.f32 0.4994258, %v3603_v48  ;;  %v3531_v26 = vadd.f32 %v4502_v38, %v3530_v39  ;;  %v3554_v30 = vmul.f32 %v3553_v1, %v7646_v58  ;;  %v3593_v42 = vadd.f32 0.18741608, %v3592_v60 }
 0x4d9   : > { %v3878_v33 = vadd.f32 %v3829_v45, %v8024_v27  ;;  %v3652_v41 = vadd.f32 1.0, %v4112_v4  ;;  %v2308_v0 = vmul.f32 0.5, %v7576_v37  ;;  %v2309_v54 = vmul.f32 0.5, %v7592_v61 }
 0x4da   : > { %v3605_v9 = vmul.f32 %v3604_v62, %v7674_v5  ;;  %v3535_v6 = vsel %vm3534_vm12, %v4502_v38, %v3531_v26  ;;  %v3578_v34 = vand.u32 2147483648, %v3566_v14  ;;  %v3576_v17 = vand.u32 2147483647, %v3566_v14  ;;  %v8026_v26 = vld [vmem:[#allocation27_spill] sm:$0xff] }
 0x4db   : > { %3910 = vst.msk [vmem:[%s7025_s13 + $0xa0] sm:$0xff] %vm433_vm0, %v3878_v33  ;;  %v3540_v29 = vsel %vm3537_vm13, %v3539_v11, %v3535_v6  ;;  %v3555_v32 = vadd.f32 1.1283791, %v3554_v30  ;;  %v3594_v38 = vmul.f32 %v3593_v42, %v7674_v5  ;;  %v3684_v58 = vmul.f32 %v3652_v41, %v2308_v0 }
 0x4dc   : > { %v3606_v10 = vadd.f32 1.0, %v3605_v9  ;;  %v3541_v20 = vmul.f32 %v3540_v29, %v3516_v28  ;;  %vm3572_vm15 = vweird.f32 %v3566_v14  ;;  %v3579_v3 = vor.u32 1.1754944e-38, %v3578_v34 }
 0x4dd   : > { %v4504_v2 = vpop.eup %4503  ;;  %vm3577_vm2 = vcmp.eq.f32.partialorder %v3576_v17, 8.507059e+37  ;;  %v3556_v61 = vmul.f32 %v3555_v32, %v7636_v52  ;;  %v3595_v48 = vadd.f32 1.1283791, %v3594_v38  ;;  %v2310_v1 = vmul.f32 0.5, %v7624_v35  ;;  %v8029_v32 = vld [vmem:[#allocation43_spill] sm:$0xff] }
 0x4de   : > { %v3830_v55 = vpop.f32.mrf.mxu2  ;;  %v3568_v16 = vmul.f32 %v4504_v2, %v3566_v14  ;;  %4505 = vrcp.f32 %v3606_v10  ;;  %v4113_v25 = vclamps-f32 %v3541_v20, 1.0  ;;  %vm3573_vm14 = vweird.f32 %v4504_v2 }
 0x4df   : > { %v3831_v12 = vadd.f32 %v3830_v55, %v6998_v8  ;;  %vm3574_vm1 = vmor %vm3572_vm15, %vm3573_vm14  ;;  %v3618_v44 = vand.u32 2147483648, %v3606_v10  ;;  %v3616_v22 = vand.u32 2147483647, %v3606_v10  ;;  %vm3612_vm4 = vweird.f32 %v3606_v10 }
 0x4e0   : > { %v3569_v47 = vsub.f32 1.0, %v3568_v16  ;;  %v3653_v49 = vadd.f32 1.0, %v4113_v25  ;;  %v3596_v15 = vmul.f32 %v3595_v48, %v7661_v56  ;;  %v2311_v60 = vmul.f32 0.5, %v7654_v40 }
 0x4e1   : > { %v3879_v13 = vadd.f32 %v3831_v12, %v8025_v7  ;;  %v3619_v14 = vor.u32 1.1754944e-38, %v3618_v44  ;;  %vm3617_vm6 = vcmp.eq.f32.partialorder %v3616_v22, 8.507059e+37 }
 0x4e2   : > { %v3570_v51 = vmul.f32 %v4504_v2, %v3569_v47  ;;  %v3685_v45 = vmul.f32 %v3653_v49, %v2309_v54  ;;  %v8028_v49 = vld [vmem:[#allocation42_spill] sm:$0xff] }
 0x4e3   : > { %3911 = vst.msk [vmem:[%s7025_s13 + $0xa8] sm:$0xff] %vm433_vm0, %v3879_v13 }
 0x4e4   : > { %v4506_v50 = vpop.eup %4505  ;;  %v3571_v24 = vadd.f32 %v4504_v2, %v3570_v51  ;;  %v3702_v27 = vpack.c.bf16 %v3685_v45, %v3684_v58  ;;  %v8030_v58 = vld [vmem:[#allocation44_spill] sm:$0xff] }
 0x4e5   : > { %v3608_v57 = vmul.f32 %v4506_v50, %v3606_v10  ;;  %vm3613_vm3 = vweird.f32 %v4506_v50 }
 0x4e6   : > { %v3575_v37 = vsel %vm3574_vm1, %v4504_v2, %v3571_v24  ;;  %3847 = vmatmul.bf16.gmra.mxu2 %v3702_v27  ;;  %vm3614_vm5 = vmor %vm3612_vm4, %vm3613_vm3  ;;  %v8027_v2 = vld [vmem:[#allocation28_spill] sm:$0xff] }
 0x4e7   : > { %v3580_v33 = vsel %vm3577_vm2, %v3579_v3, %v3575_v37  ;;  %v3609_v23 = vsub.f32 1.0, %v3608_v57 }
 0x4e8   : > { %v3581_v53 = vmul.f32 %v3580_v33, %v3556_v61 }
 0x4e9   : > { %v3610_v5 = vmul.f32 %v4506_v50, %v3609_v23 }
 0x4ea   : > { %v4114_v19 = vclamps-f32 %v3581_v53, 1.0 }
 0x4eb   : > { %v3611_v46 = vadd.f32 %v4506_v50, %v3610_v5 }
 0x4ec   : > { %v3654_v55 = vadd.f32 1.0, %v4114_v19 }
 0x4ed   : > { %v3615_v21 = vsel %vm3614_vm5, %v4506_v50, %v3611_v46 }
 0x4ee   : > { %v3620_v52 = vsel %vm3617_vm6, %v3619_v14, %v3615_v21  ;;  %v3833_v43 = vpop.f32.mrf.mxu2  ;;  %v3686_v56 = vmul.f32 %v3654_v55, %v2310_v1 }
 0x4ef   : > { %v3621_v39 = vmul.f32 %v3620_v52, %v3596_v15  ;;  %v3834_v62 = vadd.f32 %v3833_v43, %v6998_v8 }
 0x4f1   : > { %v4115_v28 = vclamps-f32 %v3621_v39, 1.0  ;;  %v3880_v9 = vadd.f32 %v3834_v62, %v8026_v26 }
 0x4f3   : > { %v3655_v12 = vadd.f32 1.0, %v4115_v28  ;;  %3912 = vst.msk [vmem:[%s7025_s13 + $0xb0] sm:$0xff] %vm433_vm0, %v3880_v9 }
 0x4f5   : > { %v3687_v11 = vmul.f32 %v3655_v12, %v2311_v60 }
 0x4f6   : > { %v3835_v4 = vpop.f32.mrf.mxu2 }
 0x4f7   : > { %v3703_v6 = vpack.c.bf16 %v3687_v11, %v3686_v56  ;;  %v3836_v10 = vadd.f32 %v3835_v4, %v6998_v8 }
 0x4f9   : > { %3852 = vmatmul.bf16.gmra.mxu2 %v3703_v6  ;;  %v3881_v7 = vadd.f32 %v3836_v10, %v8027_v2 }
 0x4fb   : > { %3913 = vst.msk [vmem:[%s7025_s13 + $0xb8] sm:$0xff] %vm433_vm0, %v3881_v7 }
 0x52a   : > { %v3838_v35 = vpop.f32.mrf.mxu2 }
 0x52b   : > { %v3839_v40 = vadd.f32 %v3838_v35, %v6998_v8 }
 0x52d   : > { %v3882_v13 = vadd.f32 %v3839_v40, %v5879_v36 }
 0x52f   : > { %3914 = vst.msk [vmem:[%s7025_s13 + $0xc0] sm:$0xff] %vm433_vm0, %v3882_v13 }
 0x532   : > { %v3840_v29 = vpop.f32.mrf.mxu2 }
 0x533   : > { %v3841_v20 = vadd.f32 %v3840_v29, %v6998_v8 }
 0x535   : > { %v3883_v16 = vadd.f32 %v3841_v20, %v7956_v31 }
 0x537   : > { %3915 = vst.msk [vmem:[%s7025_s13 + $0xc8] sm:$0xff] %vm433_vm0, %v3883_v16 }
 0x555   : > { %v3843_v30 = vpop.f32.mrf.mxu2 }
 0x556   : > { %v3844_v42 = vadd.f32 %v3843_v30, %v6998_v8 }
 0x558   : > { %v3884_v25 = vadd.f32 %v3844_v42, %v7961_v59 }
 0x55a   : > { %3916 = vst.msk [vmem:[%s7025_s13 + $0xd0] sm:$0xff] %vm433_vm0, %v3884_v25 }
 0x55d   : > { %v3845_v36 = vpop.f32.mrf.mxu2 }
 0x55e   : > { %v3846_v41 = vadd.f32 %v3845_v36, %v6998_v8 }
 0x560   : > { %v3885_v47 = vadd.f32 %v3846_v41, %v7972_v63 }
 0x562   : > { %3917 = vst.msk [vmem:[%s7025_s13 + $0xd8] sm:$0xff] %vm433_vm0, %v3885_v47 }
 0x569   : > { %v3848_v31 = vpop.f32.mrf.mxu2 }
 0x56a   : > { %v3849_v0 = vadd.f32 %v3848_v31, %v6998_v8 }
 0x56c   : > { %v3886_v54 = vadd.f32 %v3849_v0, %v7977_v18 }
 0x56e   : > { %3918 = vst.msk [vmem:[%s7025_s13 + $0xe0] sm:$0xff] %vm433_vm0, %v3886_v54 }
 0x571   : > { %v3850_v59 = vpop.f32.mrf.mxu2 }
 0x572   : > { %v3851_v34 = vadd.f32 %v3850_v59, %v6998_v8 }
 0x574   : > { %v3887_v51 = vadd.f32 %v3851_v34, %v8028_v49 }
 0x576   : > { %3919 = vst.msk [vmem:[%s7025_s13 + $0xe8] sm:$0xff] %vm433_vm0, %v3887_v51 }
 0x57c   : > { %v3853_v63 = vpop.f32.mrf.mxu2 }
 0x57d   : > { %v3854_v17 = vadd.f32 %v3853_v63, %v6998_v8 }
 0x57f   : > { %v3888_v38 = vadd.f32 %v3854_v17, %v8029_v32 }
 0x581   : > { %3920 = vst.msk [vmem:[%s7025_s13 + $0xf0] sm:$0xff] %vm433_vm0, %v3888_v38 }
 0x584   : > { %v3855_v18 = vpop.f32.mrf.mxu2 }
 0x585   : > { %v3856_v50 = vadd.f32 %v3855_v18, %v6998_v8 }
 0x587   : > { %v3889_v45 = vadd.f32 %v3856_v50, %v8030_v58 }
 0x589   : > { %3921 = vst.msk [vmem:[%s7025_s13 + $0xf8] sm:$0xff] %vm433_vm0, %v3889_v45 }
 0x58a   : > { %4556 = shalt.err (!%p4553_p5)
}
 0x58b   : > { %s4610_s15 = smov 128   ;;  %s4611_s13 = smov 8  }
 0x58c   : > { %4255 = dma.vmem_to_hbm [thread:$0]  (%p4687_p4), %s3938_s20, 4096, %s3940_s11, %s3923_s24, %s4610_s15, %s4610_s15, %s4611_s13  }
 0x58d PF: > { %p4261_p6 = scmp.ge.s32.totalorder %s4607_s26, 2  ;;  %s3954_s16 = sand.u32 1, %s4587_s21  }
 0x58e   : > { %s3955_s17 = scalar_lea.sflag [#allocation3], %s3954_s16 }
 0x58f   : > { %p4258_p7 = pnand %p4261_p6, %p4694_p8 }
 0x591   : > { %p4259_p9 = pneg %p4258_p7 }
 0x593   : > { %4582 = dma.done.wait (%p4259_p9), %s3955_s17, 4096  }
 0x594   : > { %4584 = vsyncadd (%p4259_p9), %s3955_s17, 4294963200  ;;  %s19_s26 = sadd.s32 1, %s4607_s26   ;;  %s8031_s21 = smov %s4591_s22 }
 0x595   : > { %p16_p10 = scmp.ge.s32.totalorder %s19_s26, 4   ;;  %s8032_s22 = smov %s4595_s23 }
 0x596   : > { %s8033_s23 = smov %s4700_s10  ;;  %s8034_s24 = smov %s4603_s25 }
 0x597   : > { %s8035_s25 = smov %s8037_s29  ;;  %18 = sbr.rel (!%p16_p10) target bundleno = 4 (0x4), region = 85 }
 0x59c   :  { %3961 = vsyncpa [#allocation3], 1 }
 0x59d   :  { %3963 = vsyncpa [#allocation3 + $0x1], 1 }

</bundles_post_ra>
